<compile_context>
chip_gen: v7x
topology: tpu7x:2x2x1
jax: 0.10.0
libtpu: 0.0.40
codegen_flags: <defaults>
</compile_context>

<pallas_src>
import jax
import jax.numpy as jnp
from jax.experimental import pallas as pl
from jax.experimental.pallas import tpu as pltpu

IN_FEATURES = 96 * 96 * 3        # 27648
H1, H2, H3, OUT = 512, 128, 32, 5


def _fused_mlp_kernel(x_ref, w1_ref, b1_ref, w2_ref, b2_ref, w3_ref, b3_ref,
                      w4_ref, b4_ref, out_ref, acc_ref):
    """acc += x_tile @ w1_tile over k; at last k run the whole ReLU/MLP/sigmoid tail."""
    k = pl.program_id(1)

    @pl.when(k == 0)
    def _():
        acc_ref[...] = jnp.zeros_like(acc_ref)

    # Cast the f32 activation tile to bf16 in-kernel; bf16 x bf16 on the MXU,
    # f32 accumulation in the resident scratch.
    acc_ref[...] += jnp.dot(x_ref[...].astype(jnp.bfloat16), w1_ref[...],
                            preferred_element_type=jnp.float32)

    @pl.when(k == pl.num_programs(1) - 1)
    def _():
        h1 = jnp.maximum(acc_ref[...] + b1_ref[...], 0.0)
        h2 = jnp.maximum(
            jnp.dot(h1, w2_ref[...], preferred_element_type=jnp.float32)
            + b2_ref[...], 0.0)
        h3 = jnp.maximum(
            jnp.dot(h2, w3_ref[...], preferred_element_type=jnp.float32)
            + b3_ref[...], 0.0)
        logits = (jnp.dot(h3, w4_ref[...], preferred_element_type=jnp.float32)
                  + b4_ref[...])
        out_ref[...] = jax.nn.sigmoid(logits).astype(out_ref.dtype)


def lnn_model_2_forward(x_nchw, params, *, tk=IN_FEATURES // 4, max_tb=256):
    """x_nchw: (B, 3, 96, 96) float32. Returns (B, 5) float32."""
    w1, b1, w2, b2, w3, b3, w4, b4 = params
    B = x_nchw.shape[0]

    # nn.Flatten on NCHW == row-major reshape; keep x as f32, cast in-kernel.
    x2d = x_nchw.reshape(B, IN_FEATURES)
    w1 = w1.astype(jnp.bfloat16)          # no-op if already prepared as bf16

    # Batch tiling: pad to a multiple of 16 (bf16 sublane packing), tiles <= max_tb.
    Bp = ((B + 15) // 16) * 16
    if Bp <= max_tb:
        tb = Bp
    else:
        tb = max_tb
        Bp = ((Bp + tb - 1) // tb) * tb
    if Bp != B:
        x2d = jnp.pad(x2d, ((0, Bp - B), (0, 0)))

    assert IN_FEATURES % tk == 0
    nb, nk = Bp // tb, IN_FEATURES // tk

    out = pl.pallas_call(
        _fused_mlp_kernel,
        out_shape=jax.ShapeDtypeStruct((Bp, OUT), jnp.float32),
        grid_spec=pltpu.PrefetchScalarGridSpec(
            num_scalar_prefetch=0,
            grid=(nb, nk),
            in_specs=[
                pl.BlockSpec((tb, tk), lambda b, k: (b, k)),     # x tile (f32)
                pl.BlockSpec((tk, H1), lambda b, k: (k, 0)),     # w1 tile (bf16)
                pl.BlockSpec((1, H1), lambda b, k: (0, 0)),      # b1 (resident)
                pl.BlockSpec((H1, H2), lambda b, k: (0, 0)),     # tail weights,
                pl.BlockSpec((1, H2), lambda b, k: (0, 0)),      # all resident:
                pl.BlockSpec((H2, H3), lambda b, k: (0, 0)),     # constant block
                pl.BlockSpec((1, H3), lambda b, k: (0, 0)),      # index => fetched
                pl.BlockSpec((H3, OUT), lambda b, k: (0, 0)),    # once.
                pl.BlockSpec((1, OUT), lambda b, k: (0, 0)),
            ],
            out_specs=pl.BlockSpec((tb, OUT), lambda b, k: (b, 0)),
            scratch_shapes=[pltpu.VMEM((tb, H1), jnp.float32)],
        ),
        compiler_params=pltpu.CompilerParams(
            dimension_semantics=("parallel", "arbitrary"),
            vmem_limit_bytes=48 << 20,
        ),
    )(x2d, w1, b1, w2, b2, w3, b3, w4, b4)

    return out[:B]


def init_params(key):
    """PyTorch-style uniform(-1/sqrt(fan_in), 1/sqrt(fan_in)) init; weights as (in, out)."""
    dims = [(IN_FEATURES, H1), (H1, H2), (H2, H3), (H3, OUT)]
    params = []
    for fan_in, fan_out in dims:
        key, kw, kb = jax.random.split(key, 3)
        bound = 1.0 / jnp.sqrt(fan_in)
        w = jax.random.uniform(kw, (fan_in, fan_out), jnp.float32, -bound, bound)
        b = jax.random.uniform(kb, (1, fan_out), jnp.float32, -bound, bound)
        params += [w, b]
    return tuple(params)


def prepare_params(params):
    """Store the big w1 as bf16 once, so the dominant HBM stream is halved."""
    w1, b1, w2, b2, w3, b3, w4, b4 = params
    return (w1.astype(jnp.bfloat16), b1, w2, b2, w3, b3, w4, b4)


def reference_forward(x_nchw, params):
    """Golden using the same bf16 quantization of x / w1 as the kernel, f32 elsewhere."""
    w1, b1, w2, b2, w3, b3, w4, b4 = params
    h = x_nchw.reshape(x_nchw.shape[0], -1).astype(jnp.bfloat16).astype(jnp.float32)
    w1f = w1.astype(jnp.bfloat16).astype(jnp.float32)
    h = jnp.maximum(h @ w1f + b1, 0.0)
    h = jnp.maximum(h @ w2 + b2, 0.0)
    h = jnp.maximum(h @ w3 + b3, 0.0)
    return jax.nn.sigmoid(h @ w4 + b4)


if __name__ == "__main__":
    key = jax.random.PRNGKey(0)
    kx, kp = jax.random.split(key)
    B = 4                                           # spatial/channels fixed by the module
    x = jax.random.normal(kx, (B, 3, 96, 96), jnp.float32)

    params_f32 = init_params(kp)
    params = prepare_params(params_f32)             # w1 kept in HBM as bf16

    fwd = jax.jit(lnn_model_2_forward)
    out = jax.block_until_ready(fwd(x, params))

    ref = reference_forward(x, params_f32)
    assert out.shape == (B, OUT)
    # bf16 x/w1 is an intentional bandwidth/parity tradeoff; the reference applies
    # the same quantization, so remaining diffs are f32 accumulation-order only.
    assert jnp.allclose(out, ref, atol=1e-3, rtol=1e-3), "mismatch vs reference"
    print("KERNEL_OK")
</pallas_src>

<mosaic_0001>
module attributes {stable_mosaic.version = 11 : i64} {
  func.func @_fused_mlp_kernel(%arg0: i32, %arg1: i32, %arg2: memref<16x6912xf32, #tpu.memory_space<vmem>>, %arg3: memref<6912x512xbf16, #tpu.memory_space<vmem>>, %arg4: memref<1x512xf32, #tpu.memory_space<vmem>>, %arg5: memref<512x128xf32, #tpu.memory_space<vmem>>, %arg6: memref<1x128xf32, #tpu.memory_space<vmem>>, %arg7: memref<128x32xf32, #tpu.memory_space<vmem>>, %arg8: memref<1x32xf32, #tpu.memory_space<vmem>>, %arg9: memref<32x5xf32, #tpu.memory_space<vmem>>, %arg10: memref<1x5xf32, #tpu.memory_space<vmem>>, %arg11: memref<16x5xf32, #tpu.memory_space<vmem>>, %arg12: memref<16x512xf32, #tpu.memory_space<vmem>>) attributes {dimension_semantics = [#tpu.dimension_semantics<parallel>, #tpu.dimension_semantics<arbitrary>], iteration_bounds = array<i64: 1, 4>, scalar_prefetch = 0 : i64, scratch_operands = 1 : i64, tpu.core_type = #tpu.core_type<tc>, window_params = [{transform_indices = @transform_0, window_bounds = array<i64: 16, 6912>}, {transform_indices = @transform_1, window_bounds = array<i64: 6912, 512>}, {pipeline_mode = #tpu.pipeline_mode<synchronous>, transform_indices = @transform_2, window_bounds = array<i64: 1, 512>}, {pipeline_mode = #tpu.pipeline_mode<synchronous>, transform_indices = @transform_3, window_bounds = array<i64: 512, 128>}, {pipeline_mode = #tpu.pipeline_mode<synchronous>, transform_indices = @transform_4, window_bounds = array<i64: 1, 128>}, {pipeline_mode = #tpu.pipeline_mode<synchronous>, transform_indices = @transform_5, window_bounds = array<i64: 128, 32>}, {pipeline_mode = #tpu.pipeline_mode<synchronous>, transform_indices = @transform_6, window_bounds = array<i64: 1, 32>}, {pipeline_mode = #tpu.pipeline_mode<synchronous>, transform_indices = @transform_7, window_bounds = array<i64: 32, 5>}, {pipeline_mode = #tpu.pipeline_mode<synchronous>, transform_indices = @transform_8, window_bounds = array<i64: 1, 5>}, {transform_indices = @transform_9, window_bounds = array<i64: 16, 5>}]} {
    %c0_i32 = arith.constant 0 : i32
    %0 = arith.cmpi eq, %arg1, %c0_i32 : i32
    %1 = arith.extui %0 : i1 to i32
    %c0_i32_0 = arith.constant 0 : i32
    %2 = arith.cmpi ne, %1, %c0_i32_0 : i32
    scf.if %2 {
      %cst_9 = arith.constant 0.000000e+00 : f32
      %13 = vector.broadcast %cst_9 : f32 to vector<16x512xf32>
      %c0_10 = arith.constant 0 : index
      %c0_11 = arith.constant 0 : index
      %14 = vector.load %arg12[%c0_10, %c0_11] : memref<16x512xf32, #tpu.memory_space<vmem>>, vector<16x512xf32>
      tpu.vector_store %arg12[%c0_10, %c0_11], %13 {strides = array<i32>} : memref<16x512xf32, #tpu.memory_space<vmem>>, vector<16x512xf32>,
    } else {
    }
    %c0 = arith.constant 0 : index
    %c0_1 = arith.constant 0 : index
    %3 = vector.load %arg12[%c0, %c0_1] : memref<16x512xf32, #tpu.memory_space<vmem>>, vector<16x512xf32>
    %c0_2 = arith.constant 0 : index
    %c0_3 = arith.constant 0 : index
    %4 = vector.load %arg2[%c0_2, %c0_3] : memref<16x6912xf32, #tpu.memory_space<vmem>>, vector<16x6912xf32>
    %5 = arith.truncf %4 : vector<16x6912xf32> to vector<16x6912xbf16>
    %c0_4 = arith.constant 0 : index
    %c0_5 = arith.constant 0 : index
    %6 = vector.load %arg3[%c0_4, %c0_5] : memref<6912x512xbf16, #tpu.memory_space<vmem>>, vector<6912x512xbf16>
    %cst = arith.constant dense<0.000000e+00> : vector<16x512xf32>
    %7 = tpu.matmul %5, %6, %cst {dimension_numbers = #tpu.dot_dimension_numbers<[1], [0], [0], [1], [0, 0, 1, 1], [], []>} : vector<16x6912xbf16>, vector<6912x512xbf16>, vector<16x512xf32> -> vector<16x512xf32>
    %8 = arith.addf %3, %7 : vector<16x512xf32>
    %c0_6 = arith.constant 0 : index
    %c0_7 = arith.constant 0 : index
    %9 = vector.load %arg12[%c0_6, %c0_7] : memref<16x512xf32, #tpu.memory_space<vmem>>, vector<16x512xf32>
    tpu.vector_store %arg12[%c0_6, %c0_7], %8 {strides = array<i32>} : memref<16x512xf32, #tpu.memory_space<vmem>>, vector<16x512xf32>,
    %c3_i32 = arith.constant 3 : i32
    %10 = arith.cmpi eq, %arg1, %c3_i32 : i32
    %11 = arith.extui %10 : i1 to i32
    %c0_i32_8 = arith.constant 0 : i32
    %12 = arith.cmpi ne, %11, %c0_i32_8 : i32
    scf.if %12 {
      %c0_9 = arith.constant 0 : index
      %c0_10 = arith.constant 0 : index
      %13 = vector.load %arg12[%c0_9, %c0_10] : memref<16x512xf32, #tpu.memory_space<vmem>>, vector<16x512xf32>
      %c0_11 = arith.constant 0 : index
      %c0_12 = arith.constant 0 : index
      %14 = vector.load %arg4[%c0_11, %c0_12] : memref<1x512xf32, #tpu.memory_space<vmem>>, vector<1x512xf32>
      %15 = vector.broadcast %14 : vector<1x512xf32> to vector<16x512xf32>
      %16 = arith.addf %13, %15 : vector<16x512xf32>
      %cst_13 = arith.constant 0.000000e+00 : f32
      %17 = vector.broadcast %cst_13 : f32 to vector<16x512xf32>
      %18 = arith.maximumf %16, %17 : vector<16x512xf32>
      %c0_14 = arith.constant 0 : index
      %c0_15 = arith.constant 0 : index
      %19 = vector.load %arg5[%c0_14, %c0_15] : memref<512x128xf32, #tpu.memory_space<vmem>>, vector<512x128xf32>
      %cst_16 = arith.constant dense<0.000000e+00> : vector<16x128xf32>
      %20 = tpu.matmul %18, %19, %cst_16 {dimension_numbers = #tpu.dot_dimension_numbers<[1], [0], [0], [1], [0, 0, 1, 1], [], []>} : vector<16x512xf32>, vector<512x128xf32>, vector<16x128xf32> -> vector<16x128xf32>
      %c0_17 = arith.constant 0 : index
      %c0_18 = arith.constant 0 : index
      %21 = vector.load %arg6[%c0_17, %c0_18] : memref<1x128xf32, #tpu.memory_space<vmem>>, vector<1x128xf32>
      %22 = vector.broadcast %21 : vector<1x128xf32> to vector<16x128xf32>
      %23 = arith.addf %20, %22 : vector<16x128xf32>
      %cst_19 = arith.constant 0.000000e+00 : f32
      %24 = vector.broadcast %cst_19 : f32 to vector<16x128xf32>
      %25 = arith.maximumf %23, %24 : vector<16x128xf32>
      %c0_20 = arith.constant 0 : index
      %c0_21 = arith.constant 0 : index
      %26 = vector.load %arg7[%c0_20, %c0_21] : memref<128x32xf32, #tpu.memory_space<vmem>>, vector<128x32xf32>
      %cst_22 = arith.constant dense<0.000000e+00> : vector<16x32xf32>
      %27 = tpu.matmul %25, %26, %cst_22 {dimension_numbers = #tpu.dot_dimension_numbers<[1], [0], [0], [1], [0, 0, 1, 1], [], []>} : vector<16x128xf32>, vector<128x32xf32>, vector<16x32xf32> -> vector<16x32xf32>
      %c0_23 = arith.constant 0 : index
      %c0_24 = arith.constant 0 : index
      %28 = vector.load %arg8[%c0_23, %c0_24] : memref<1x32xf32, #tpu.memory_space<vmem>>, vector<1x32xf32>
      %29 = vector.broadcast %28 : vector<1x32xf32> to vector<16x32xf32>
      %30 = arith.addf %27, %29 : vector<16x32xf32>
      %cst_25 = arith.constant 0.000000e+00 : f32
      %31 = vector.broadcast %cst_25 : f32 to vector<16x32xf32>
      %32 = arith.maximumf %30, %31 : vector<16x32xf32>
      %c0_26 = arith.constant 0 : index
      %c0_27 = arith.constant 0 : index
      %33 = vector.load %arg9[%c0_26, %c0_27] : memref<32x5xf32, #tpu.memory_space<vmem>>, vector<32x5xf32>
      %cst_28 = arith.constant dense<0.000000e+00> : vector<16x5xf32>
      %34 = tpu.matmul %32, %33, %cst_28 {dimension_numbers = #tpu.dot_dimension_numbers<[1], [0], [0], [1], [0, 0, 1, 1], [], []>} : vector<16x32xf32>, vector<32x5xf32>, vector<16x5xf32> -> vector<16x5xf32>
      %c0_29 = arith.constant 0 : index
      %c0_30 = arith.constant 0 : index
      %35 = vector.load %arg10[%c0_29, %c0_30] : memref<1x5xf32, #tpu.memory_space<vmem>>, vector<1x5xf32>
      %36 = vector.broadcast %35 : vector<1x5xf32> to vector<16x5xf32>
      %37 = arith.addf %34, %36 : vector<16x5xf32>
      %38 = arith.negf %37 : vector<16x5xf32>
      %39 = math.exp %38 : vector<16x5xf32>
      %cst_31 = arith.constant 1.000000e+00 : f32
      %40 = vector.broadcast %cst_31 : f32 to vector<16x5xf32>
      %41 = arith.addf %40, %39 : vector<16x5xf32>
      %42 = arith.divf %40, %41 : vector<16x5xf32>
      %c0_32 = arith.constant 0 : index
      %c0_33 = arith.constant 0 : index
      %43 = vector.load %arg11[%c0_32, %c0_33] : memref<16x5xf32, #tpu.memory_space<vmem>>, vector<16x5xf32>
      tpu.vector_store %arg11[%c0_32, %c0_33], %42 {strides = array<i32>} : memref<16x5xf32, #tpu.memory_space<vmem>>, vector<16x5xf32>,
    } else {
    }
    return
  }
  func.func @transform_0(%arg0: i32, %arg1: i32) -> (i32, i32) {
    %c0_i32 = arith.constant 0 : i32
    return %arg0, %arg1 : i32, i32
  }
  func.func @transform_1(%arg0: i32, %arg1: i32) -> (i32, i32) {
    %c0_i32 = arith.constant 0 : i32
    %c0_i32_0 = arith.constant 0 : i32
    return %arg1, %c0_i32 : i32, i32
  }
  func.func @transform_2(%arg0: i32, %arg1: i32) -> (i32, i32) {
    %c0_i32 = arith.constant 0 : i32
    %c0_i32_0 = arith.constant 0 : i32
    %c0_i32_1 = arith.constant 0 : i32
    return %c0_i32, %c0_i32_0 : i32, i32
  }
  func.func @transform_3(%arg0: i32, %arg1: i32) -> (i32, i32) {
    %c0_i32 = arith.constant 0 : i32
    %c0_i32_0 = arith.constant 0 : i32
    %c0_i32_1 = arith.constant 0 : i32
    return %c0_i32, %c0_i32_0 : i32, i32
  }
  func.func @transform_4(%arg0: i32, %arg1: i32) -> (i32, i32) {
    %c0_i32 = arith.constant 0 : i32
    %c0_i32_0 = arith.constant 0 : i32
    %c0_i32_1 = arith.constant 0 : i32
    return %c0_i32, %c0_i32_0 : i32, i32
  }
  func.func @transform_5(%arg0: i32, %arg1: i32) -> (i32, i32) {
    %c0_i32 = arith.constant 0 : i32
    %c0_i32_0 = arith.constant 0 : i32
    %c0_i32_1 = arith.constant 0 : i32
    return %c0_i32, %c0_i32_0 : i32, i32
  }
  func.func @transform_6(%arg0: i32, %arg1: i32) -> (i32, i32) {
    %c0_i32 = arith.constant 0 : i32
    %c0_i32_0 = arith.constant 0 : i32
    %c0_i32_1 = arith.constant 0 : i32
    return %c0_i32, %c0_i32_0 : i32, i32
  }
  func.func @transform_7(%arg0: i32, %arg1: i32) -> (i32, i32) {
    %c0_i32 = arith.constant 0 : i32
    %c0_i32_0 = arith.constant 0 : i32
    %c0_i32_1 = arith.constant 0 : i32
    return %c0_i32, %c0_i32_0 : i32, i32
  }
  func.func @transform_8(%arg0: i32, %arg1: i32) -> (i32, i32) {
    %c0_i32 = arith.constant 0 : i32
    %c0_i32_0 = arith.constant 0 : i32
    %c0_i32_1 = arith.constant 0 : i32
    return %c0_i32, %c0_i32_0 : i32, i32
  }
  func.func @transform_9(%arg0: i32, %arg1: i32) -> (i32, i32) {
    %c0_i32 = arith.constant 0 : i32
    %c0_i32_0 = arith.constant 0 : i32
    return %arg0, %c0_i32 : i32, i32
  }
}

</mosaic_0001>

<bundles_post_ra>
// kernel: lnn_model_2_forward.1
= control target key start
LH: loop header
LB: loop body
LE: loop exit
PB: predicated region body
PF: predicated region fallthrough
CT: control target
= control target key end

     0   :  { %s21819_s0 = inlined_call_operand.vmem [shape: f32[16,27648], index: 0, kind: input, shape index: {}]   ;;  %s21820_s1 = inlined_call_operand.hbm [shape: bf16[27648,512], index: 1, kind: input, shape index: {}]   ;;  %s21821_s2 = inlined_call_operand.hbm [shape: f32[1,512], index: 2, kind: input, shape index: {}]   ;;  %s21822_s3 = inlined_call_operand.hbm [shape: f32[512,128], index: 3, kind: input, shape index: {}]   ;;  %s21823_s4 = inlined_call_operand.hbm [shape: f32[1,128], index: 4, kind: input, shape index: {}]   ;;  %s21824_s5 = inlined_call_operand.vmem [shape: f32[128,32], index: 5, kind: input, shape index: {}]   ;;  %s21825_s6 = inlined_call_operand.hbm [shape: f32[1,32], index: 6, kind: input, shape index: {}]   ;;  %s21826_s7 = inlined_call_operand.vmem [shape: f32[32,5], index: 7, kind: input, shape index: {}]   ;;  %s21827_s8 = inlined_call_operand.hbm [shape: f32[1,5], index: 8, kind: input, shape index: {}]   ;;  %s21828_s9 = inlined_call_operand.vmem [shape: f32[16,5], index: 9, kind: output, shape index: {}]  }
   0x1   :  { %21837 = sst [smem:[#allocation20_spill]] %s21821_s2 }
   0x2   :  { %21838 = sst [smem:[#allocation21_spill]] %s21823_s4 }
   0x3   :  { %21839 = sst [smem:[#allocation22_spill]] %s21826_s7 }
   0x4   :  { %21840 = sst [smem:[#allocation23_spill]] %s21828_s9 }
   0x5   :  { %14 = vsyncpa [#allocation5], 0 }
   0x6   :  { %16 = vsyncpa [#allocation5 + $0x1], 0 }
   0x7   :  { %17 = vsyncpa [#allocation7], 0 }
   0x8   :  { %18 = vsyncpa [#allocation10], 0 }
   0x9   :  { %19 = vsyncpa [#allocation13], 0  ;;  %s19428_s30 = smov 0   ;;  %s19430_s10 = smov 0  }
   0xa   :  { %s19432_s11 = smov 0   ;;  %s19434_s12 = smov 0  }
   0xb   :  { %s19436_s13 = smov 0   ;;  %s19438_s14 = smov 0  }
   0xc LB: > { %s14205_s15 = sadd.s32 4294967295, %s19365_s14   ;;  %s34_s16 = sadd.s32 1, %s19361_s13  ;;  %s19365_s14 = sphi %s19438_s14, %s25_s14   ;;  %s19361_s13 = sphi %s19436_s13, %s21864_s13   ;;  %s19357_s12 = sphi %s19434_s12, %s21863_s12   ;;  %s19353_s11 = sphi %s19432_s11, %s21862_s11   ;;  %s19349_s10 = sphi %s19430_s10, %s21861_s10   ;;  %s19345_s30 = sphi %s19428_s30, %s21860_s30  }
   0xd   : > { %p35_p0 = scmp.ge.s32.totalorder %s34_s16, 4  ;;  %s46_s17 = sadd.s32 1, %s19353_s11 }
   0xe   : > { %p53_p1 = scmp.ne.s32.totalorder %s19353_s11, %s19349_s10  ;;  %p54_p2 = scmp.eq.s32.totalorder %s19365_s14, 0 }
   0xf   : > { %s21866_s16 = smov (%p35_p0, %s34_s16), 0  ;;  %p85_p4 = scmp.ne.s32.totalorder %s19349_s10, %s19345_s30 }
  0x10   : > { %21841 = sst [smem:[#allocation18_spill]] %s21866_s16  ;;  %p19464_p3 = por %p54_p2, %p53_p1 }
  0x11   : > { %s42_s19 = ssub.s32 %s19361_s13, %s21866_s16  ;;  %p19471_p5 = scmp.eq.s32.totalorder %s14205_s15, 0 }
  0x12   : > { %s21842_s18 = scalar_select %p19464_p3, 1, 0 }
  0x13   : > { %s21843_s20 = scalar_select %p19471_p5, 1, 0 }
  0x14   : > { %p44_p6 = scmp.eq.s32.totalorder %s42_s19, 0  ;;  %p14206_p7 = scmp.ge.s32.totalorder %s19365_s14, 1 }
  0x15   : > { %p19478_p8 = por %p19471_p5, %p85_p4  ;;  %p269_p9 = scmp.lt.s32.totalorder %s19365_s14, 5 }
  0x16   : > { %s19484_s22 = scalar_select %p44_p6, %s19353_s11, %s46_s17  }
  0x17   : > { %s21844_s21 = scalar_select %p19478_p8, 1, 0 }
  0x18   : > { %21845 = sst [smem:[#allocation19_spill]] %s19484_s22  ;;  %p19486_p10 = pnand %p14206_p7, %p269_p9 }
  0x19   : > { %s19367_s24 = smov [#allocation6]   ;;  %s19368_s26 = smov [#allocation9]  }
  0x1a   : > { %s21846_s23 = scalar_select %p19486_p10, 1, 0 }
  0x1b   : > { %p16451_p11 = pneg %p19486_p10  ;;  %s282_s25 = sshll.u32 %s19367_s24, 4  ;;  %s283_s25 = int_to_ptr.vmem [resolvable:$true] %s282_s25 }
  0x1c   : > { %s306_s27 = sshll.u32 %s19368_s26, 4  ;;  %s19369_s29 = smov [#allocation8]   ;;  %s19498_s27 = int_to_ptr.vmem [resolvable:$true] %s306_s27 }
  0x1d   : > { %p19494_p12 = pnand %p16451_p11, %p19471_p5  ;;  %s19500_s30 = sshll.u32 %s19369_s29, 4  ;;  %s293_s30 = int_to_ptr.vmem [resolvable:$true] %s19500_s30 }
  0x1e   : > { %s21848_s2 = sld [smem:[#allocation20_spill]] }
  0x1f   : > { %p19510_p0 = pneg %p19494_p12 }
  0x24   : > { %s19135_s19 = scalar_lea.hbm %s21848_s2, 64 }
  0x25   : > { %p19136_p13 = scmp.ne.s32.totalorder %s21848_s2, %s19135_s19  ;;  %p19142_p4 = scmp.lt.u32.totalorder %s19135_s19, %s21848_s2 }
  0x27   : > { %p19138_p1 = pnand %p19510_p0, %p19136_p13 }
  0x29   : > { %p19139_p2 = pneg %p19138_p1 }
  0x2b   : > { %p19144_p6 = pnand %p19142_p4, %p19139_p2 }
  0x2d   : > { %19147 = shalt.err (!%p19144_p6)
}
  0x2e   : > { %s19148_s15 = scalar_lea.vmem %s283_s25, 64  ;;  %p19156_p5 = scmp.lt.s32.totalorder %s283_s25, %s283_s25 }
  0x2f   : > { %p19149_p7 = scmp.ne.s32.totalorder %s283_s25, %s19148_s15  ;;  %p19157_p8 = scmp.lt.s32.totalorder %s19148_s15, %s19148_s15 }
  0x31   : > { %p19151_p9 = pnand %p19149_p7, %p19510_p0  ;;  %p19158_p10 = por %p19157_p8, %p19156_p5 }
  0x33   : > { %p19152_p11 = pneg %p19151_p9 }
  0x35   : > { %p19159_p3 = pnand %p19158_p10, %p19152_p11 }
  0x37   : > { %19162 = shalt.err (!%p19159_p3)
}
  0x38   : > { %16454 = dma.hbm_to_vmem [thread:$0]  (!%p19494_p12), %s21848_s2, 64, %s283_s25, [#allocation7]  }
  0x39   : > { %s21850_s4 = sld [smem:[#allocation21_spill]] }
  0x3f   : > { %s19163_s24 = scalar_lea.hbm %s21850_s4, 16 }
  0x40   : > { %p19164_p13 = scmp.ne.s32.totalorder %s21850_s4, %s19163_s24  ;;  %p19170_p3 = scmp.lt.u32.totalorder %s19163_s24, %s21850_s4 }
  0x42   : > { %p19166_p1 = pnand %p19164_p13, %p19510_p0 }
  0x44   : > { %p19167_p5 = pneg %p19166_p1 }
  0x46   : > { %p19172_p8 = pnand %p19170_p3, %p19167_p5 }
  0x48   : > { %19175 = shalt.err (!%p19172_p8)
}
  0x49   : > { %s19176_s25 = scalar_lea.vmem %s19498_s27, 16  ;;  %s19183_s9 = scalar_lea.vmem %s19498_s27, 32 }
  0x4a   : > { %p19177_p10 = scmp.ne.s32.totalorder %s19498_s27, %s19176_s25  ;;  %p19184_p6 = scmp.lt.s32.totalorder %s19498_s27, %s19498_s27 }
  0x4b   : > { %p19185_p7 = scmp.lt.s32.totalorder %s19183_s9, %s19176_s25 }
  0x4c   : > { %p19179_p2 = pnand %p19177_p10, %p19510_p0 }
  0x4d   : > { %p19186_p9 = por %p19185_p7, %p19184_p6 }
  0x4e   : > { %p19180_p4 = pneg %p19179_p2 }
  0x50   : > { %p19187_p11 = pnand %p19186_p9, %p19180_p4 }
  0x52   : > { %19190 = shalt.err (!%p19187_p11)
}
  0x53   : > { %16460 = dma.hbm_to_vmem [thread:$0]  (!%p19494_p12), %s21850_s4, 16, %s19498_s27, [#allocation10]  }
  0x54   : > { %s19191_s19 = scalar_lea.hbm %s21822_s3, 8192 }
  0x55   : > { %p19192_p13 = scmp.ne.s32.totalorder %s21822_s3, %s19191_s19  ;;  %p19198_p3 = scmp.lt.u32.totalorder %s19191_s19, %s21822_s3 }
  0x57   : > { %p19194_p1 = pnand %p19192_p13, %p19510_p0 }
  0x59   : > { %p19195_p5 = pneg %p19194_p1 }
  0x5b   : > { %p19200_p8 = pnand %p19198_p3, %p19195_p5 }
  0x5d   : > { %19203 = shalt.err (!%p19200_p8)
}
  0x5e   : > { %s19204_s9 = scalar_lea.vmem %s293_s30, 8192  ;;  %p19212_p6 = scmp.lt.s32.totalorder %s293_s30, %s293_s30 }
  0x5f   : > { %p19205_p10 = scmp.ne.s32.totalorder %s293_s30, %s19204_s9  ;;  %p19213_p7 = scmp.lt.s32.totalorder %s19204_s9, %s19204_s9 }
  0x61   : > { %p19207_p2 = pnand %p19205_p10, %p19510_p0  ;;  %p19214_p9 = por %p19213_p7, %p19212_p6 }
  0x63   : > { %p19208_p4 = pneg %p19207_p2 }
  0x65   : > { %p19215_p11 = pnand %p19214_p9, %p19208_p4 }
  0x67   : > { %19218 = shalt.err (!%p19215_p11)
}
  0x68   : > { %s19370_s27 = smov 128   ;;  %s19371_s7 = smov 8  }
  0x69   : > { %16457 = dma.hbm_to_vmem [thread:$0]  (!%p19494_p12), %s21822_s3, 8192, %s293_s30, [#allocation7], %s19370_s27, %s19370_s27, %s19371_s7  }
  0x6a   : > { %s19372_s22 = smov [#allocation11]   ;;  %s19373_s24 = smov [#allocation12]  }
  0x6b   : > { %s320_s19 = sshll.u32 %s19372_s22, 4  ;;  %s334_s29 = sshll.u32 %s19373_s24, 4  ;;  %s321_s19 = int_to_ptr.vmem [resolvable:$true] %s320_s19  ;;  %s19569_s29 = int_to_ptr.vmem [resolvable:$true] %s334_s29 }
  0x6c   : > { %s19219_s9 = scalar_lea.hbm %s21825_s6, 16 }
  0x6d   : > { %p19220_p13 = scmp.ne.s32.totalorder %s21825_s6, %s19219_s9  ;;  %p19226_p3 = scmp.lt.u32.totalorder %s19219_s9, %s21825_s6 }
  0x6f   : > { %p19222_p1 = pnand %p19220_p13, %p19510_p0 }
  0x71   : > { %p19223_p5 = pneg %p19222_p1 }
  0x73   : > { %p19228_p8 = pnand %p19226_p3, %p19223_p5 }
  0x75   : > { %19231 = shalt.err (!%p19228_p8)
}
  0x76   : > { %s19232_s27 = scalar_lea.vmem %s321_s19, 16  ;;  %s19239_s7 = scalar_lea.vmem %s321_s19, 32 }
  0x77   : > { %p19233_p10 = scmp.ne.s32.totalorder %s321_s19, %s19232_s27  ;;  %p19240_p6 = scmp.lt.s32.totalorder %s321_s19, %s321_s19 }
  0x78   : > { %p19241_p7 = scmp.lt.s32.totalorder %s19239_s7, %s19232_s27 }
  0x79   : > { %p19235_p2 = pnand %p19233_p10, %p19510_p0 }
  0x7a   : > { %p19242_p9 = por %p19241_p7, %p19240_p6 }
  0x7b   : > { %p19236_p4 = pneg %p19235_p2 }
  0x7d   : > { %p19243_p11 = pnand %p19242_p9, %p19236_p4 }
  0x7f   : > { %19246 = shalt.err (!%p19243_p11)
}
  0x80   : > { %16463 = dma.hbm_to_vmem [thread:$0]  (!%p19494_p12), %s21825_s6, 16, %s321_s19, [#allocation10]  }
  0x81   : > { %s19247_s24 = scalar_lea.hbm %s21827_s8, 16 }
  0x82   : > { %p19248_p13 = scmp.ne.s32.totalorder %s21827_s8, %s19247_s24  ;;  %p19254_p3 = scmp.lt.u32.totalorder %s19247_s24, %s21827_s8 }
  0x84   : > { %p19250_p1 = pnand %p19248_p13, %p19510_p0 }
  0x86   : > { %p19251_p5 = pneg %p19250_p1 }
  0x88   : > { %p19256_p8 = pnand %p19254_p3, %p19251_p5 }
  0x8a   : > { %19259 = shalt.err (!%p19256_p8)
}
  0x8b   : > { %s19260_s19 = scalar_lea.vmem %s19569_s29, 16  ;;  %s19267_s30 = scalar_lea.vmem %s19569_s29, 32 }
  0x8c   : > { %p19261_p10 = scmp.ne.s32.totalorder %s19569_s29, %s19260_s19  ;;  %p19268_p6 = scmp.lt.s32.totalorder %s19569_s29, %s19569_s29 }
  0x8d   : > { %p19269_p7 = scmp.lt.s32.totalorder %s19267_s30, %s19260_s19 }
  0x8e   : > { %p19263_p2 = pnand %p19261_p10, %p19510_p0 }
  0x8f   : > { %p19270_p9 = por %p19269_p7, %p19268_p6 }
  0x90   : > { %p19264_p4 = pneg %p19263_p2 }
  0x92   : > { %p19271_p11 = pnand %p19270_p9, %p19264_p4 }
  0x94   : > { %19274 = shalt.err (!%p19271_p11)
}
  0x95   : > { %16466 = dma.hbm_to_vmem [thread:$0]  (!%p19494_p12), %s21827_s8, 16, %s19569_s29, [#allocation13]  }
  0x96   : > { %p14212_p13 = scmp.ge.s32.totalorder %s19365_s14, 4 }
  0x97   : > { %p21851_p0 = scmp.ne.s32.totalorder (!%p14212_p13), %s21842_s18, 0 }
  0x98   : > { %341 = sbr.rel (%p14212_p13) target bundleno = 245 (0xf5), region = 44 }
  0x9f   : > { %344 = sbr.rel (!%p21851_p0) target bundleno = 218 (0xda), region = 48  ;;  %s346_s26 = sand.u32 (%p21851_p0), 1, %s19353_s11  }
  0xa0   : > { %s15963_s2 = smul.u32 (%p21851_p0), 432, %s19361_s13 }
  0xa1   : > { %s16425_s4 = smul.u32 (%p21851_p0), 864, %s346_s26 }
  0xa2   : > { %s19621_s28 = scalar_lea.vmem (%p21851_p0), %s21819_s0, %s15963_s2 }
  0xa3   : > { %v367_v0 = vld [vmem:[%s19621_s28] sm:$0xff] (%p21851_p0)  ;;  %v369_v1 = vld [vmem:[%s19621_s28 + $0x8] sm:$0xff] (%p21851_p0)  ;;  %v371_v2 = vld [vmem:[%s19621_s28 + $0x10] sm:$0xff] (%p21851_p0)  ;;  %s19626_s29 = scalar_lea.vmem (%p21851_p0), [#allocation3], %s16425_s4 }
  0xa4   : > { %368 = vst [vmem:[%s19626_s29] sm:$0xff] (%p21851_p0), %v367_v0  ;;  %370 = vst [vmem:[%s19626_s29 + $0x8] sm:$0xff] (%p21851_p0), %v369_v1  ;;  %v373_v3 = vld [vmem:[%s19621_s28 + $0x18] sm:$0xff] (%p21851_p0)  ;;  %v375_v4 = vld [vmem:[%s19621_s28 + $0x20] sm:$0xff] (%p21851_p0) }
  0xa5   : > { %372 = vst [vmem:[%s19626_s29 + $0x10] sm:$0xff] (%p21851_p0), %v371_v2  ;;  %v377_v5 = vld [vmem:[%s19621_s28 + $0x28] sm:$0xff] (%p21851_p0)  ;;  %374 = vst [vmem:[%s19626_s29 + $0x18] sm:$0xff] (%p21851_p0), %v373_v3  ;;  %v379_v6 = vld [vmem:[%s19621_s28 + $0x30] sm:$0xff] (%p21851_p0) }
  0xa6   : > { %376 = vst [vmem:[%s19626_s29 + $0x20] sm:$0xff] %v375_v4  ;;  %378 = vst [vmem:[%s19626_s29 + $0x28] sm:$0xff] %v377_v5  ;;  %v381_v7 = vld [vmem:[%s19621_s28 + $0x38] sm:$0xff]  ;;  %v383_v8 = vld [vmem:[%s19621_s28 + $0x40] sm:$0xff] }
  0xa7   : > { %380 = vst [vmem:[%s19626_s29 + $0x30] sm:$0xff] %v379_v6  ;;  %382 = vst [vmem:[%s19626_s29 + $0x38] sm:$0xff] %v381_v7  ;;  %v385_v9 = vld [vmem:[%s19621_s28 + $0x48] sm:$0xff]  ;;  %v387_v10 = vld [vmem:[%s19621_s28 + $0x50] sm:$0xff] }
  0xa8   : > { %384 = vst [vmem:[%s19626_s29 + $0x40] sm:$0xff] %v383_v8  ;;  %v389_v11 = vld [vmem:[%s19621_s28 + $0x58] sm:$0xff]  ;;  %386 = vst [vmem:[%s19626_s29 + $0x48] sm:$0xff] %v385_v9  ;;  %v391_v12 = vld [vmem:[%s19621_s28 + $0x60] sm:$0xff] }
  0xa9   : > { %388 = vst [vmem:[%s19626_s29 + $0x50] sm:$0xff] %v387_v10  ;;  %390 = vst [vmem:[%s19626_s29 + $0x58] sm:$0xff] %v389_v11  ;;  %v393_v13 = vld [vmem:[%s19621_s28 + $0x68] sm:$0xff]  ;;  %v395_v14 = vld [vmem:[%s19621_s28 + $0x70] sm:$0xff] }
  0xaa   : > { %392 = vst [vmem:[%s19626_s29 + $0x60] sm:$0xff] %v391_v12  ;;  %394 = vst [vmem:[%s19626_s29 + $0x68] sm:$0xff] %v393_v13  ;;  %v397_v15 = vld [vmem:[%s19621_s28 + $0x78] sm:$0xff]  ;;  %v399_v16 = vld [vmem:[%s19621_s28 + $0x80] sm:$0xff] }
  0xab   : > { %396 = vst [vmem:[%s19626_s29 + $0x70] sm:$0xff] %v395_v14  ;;  %v401_v17 = vld [vmem:[%s19621_s28 + $0x88] sm:$0xff]  ;;  %398 = vst [vmem:[%s19626_s29 + $0x78] sm:$0xff] %v397_v15  ;;  %v403_v18 = vld [vmem:[%s19621_s28 + $0x90] sm:$0xff] }
  0xac   : > { %400 = vst [vmem:[%s19626_s29 + $0x80] sm:$0xff] %v399_v16  ;;  %402 = vst [vmem:[%s19626_s29 + $0x88] sm:$0xff] %v401_v17  ;;  %v405_v19 = vld [vmem:[%s19621_s28 + $0x98] sm:$0xff]  ;;  %v407_v20 = vld [vmem:[%s19621_s28 + $0xa0] sm:$0xff] }
  0xad   : > { %404 = vst [vmem:[%s19626_s29 + $0x90] sm:$0xff] %v403_v18  ;;  %406 = vst [vmem:[%s19626_s29 + $0x98] sm:$0xff] %v405_v19  ;;  %v409_v21 = vld [vmem:[%s19621_s28 + $0xa8] sm:$0xff]  ;;  %v411_v22 = vld [vmem:[%s19621_s28 + $0xb0] sm:$0xff] }
  0xae   : > { %408 = vst [vmem:[%s19626_s29 + $0xa0] sm:$0xff] %v407_v20  ;;  %v413_v23 = vld [vmem:[%s19621_s28 + $0xb8] sm:$0xff]  ;;  %410 = vst [vmem:[%s19626_s29 + $0xa8] sm:$0xff] %v409_v21  ;;  %v415_v24 = vld [vmem:[%s19621_s28 + $0xc0] sm:$0xff] }
  0xaf   : > { %412 = vst [vmem:[%s19626_s29 + $0xb0] sm:$0xff] %v411_v22  ;;  %414 = vst [vmem:[%s19626_s29 + $0xb8] sm:$0xff] %v413_v23  ;;  %v417_v25 = vld [vmem:[%s19621_s28 + $0xc8] sm:$0xff]  ;;  %v419_v26 = vld [vmem:[%s19621_s28 + $0xd0] sm:$0xff] }
  0xb0   : > { %416 = vst [vmem:[%s19626_s29 + $0xc0] sm:$0xff] %v415_v24  ;;  %418 = vst [vmem:[%s19626_s29 + $0xc8] sm:$0xff] %v417_v25  ;;  %v421_v27 = vld [vmem:[%s19621_s28 + $0xd8] sm:$0xff]  ;;  %v423_v28 = vld [vmem:[%s19621_s28 + $0xe0] sm:$0xff] }
  0xb1   : > { %420 = vst [vmem:[%s19626_s29 + $0xd0] sm:$0xff] %v419_v26  ;;  %v425_v29 = vld [vmem:[%s19621_s28 + $0xe8] sm:$0xff]  ;;  %422 = vst [vmem:[%s19626_s29 + $0xd8] sm:$0xff] %v421_v27  ;;  %v427_v30 = vld [vmem:[%s19621_s28 + $0xf0] sm:$0xff] }
  0xb2   : > { %424 = vst [vmem:[%s19626_s29 + $0xe0] sm:$0xff] %v423_v28  ;;  %426 = vst [vmem:[%s19626_s29 + $0xe8] sm:$0xff] %v425_v29  ;;  %v429_v31 = vld [vmem:[%s19621_s28 + $0xf8] sm:$0xff]  ;;  %v431_v32 = vld [vmem:[%s19621_s28 + $0x100] sm:$0xff] }
  0xb3   : > { %428 = vst [vmem:[%s19626_s29 + $0xf0] sm:$0xff] %v427_v30  ;;  %430 = vst [vmem:[%s19626_s29 + $0xf8] sm:$0xff] %v429_v31  ;;  %v433_v33 = vld [vmem:[%s19621_s28 + $0x108] sm:$0xff]  ;;  %v435_v34 = vld [vmem:[%s19621_s28 + $0x110] sm:$0xff] }
  0xb4   : > { %432 = vst [vmem:[%s19626_s29 + $0x100] sm:$0xff] %v431_v32  ;;  %v437_v35 = vld [vmem:[%s19621_s28 + $0x118] sm:$0xff]  ;;  %434 = vst [vmem:[%s19626_s29 + $0x108] sm:$0xff] %v433_v33  ;;  %v439_v36 = vld [vmem:[%s19621_s28 + $0x120] sm:$0xff] }
  0xb5   : > { %436 = vst [vmem:[%s19626_s29 + $0x110] sm:$0xff] %v435_v34  ;;  %438 = vst [vmem:[%s19626_s29 + $0x118] sm:$0xff] %v437_v35  ;;  %v441_v37 = vld [vmem:[%s19621_s28 + $0x128] sm:$0xff]  ;;  %v443_v38 = vld [vmem:[%s19621_s28 + $0x130] sm:$0xff] }
  0xb6   : > { %440 = vst [vmem:[%s19626_s29 + $0x120] sm:$0xff] %v439_v36  ;;  %442 = vst [vmem:[%s19626_s29 + $0x128] sm:$0xff] %v441_v37  ;;  %v445_v39 = vld [vmem:[%s19621_s28 + $0x138] sm:$0xff]  ;;  %v447_v40 = vld [vmem:[%s19621_s28 + $0x140] sm:$0xff] }
  0xb7   : > { %444 = vst [vmem:[%s19626_s29 + $0x130] sm:$0xff] %v443_v38  ;;  %v449_v41 = vld [vmem:[%s19621_s28 + $0x148] sm:$0xff]  ;;  %446 = vst [vmem:[%s19626_s29 + $0x138] sm:$0xff] %v445_v39  ;;  %v451_v42 = vld [vmem:[%s19621_s28 + $0x150] sm:$0xff] }
  0xb8   : > { %448 = vst [vmem:[%s19626_s29 + $0x140] sm:$0xff] %v447_v40  ;;  %450 = vst [vmem:[%s19626_s29 + $0x148] sm:$0xff] %v449_v41  ;;  %v453_v43 = vld [vmem:[%s19621_s28 + $0x158] sm:$0xff]  ;;  %v455_v44 = vld [vmem:[%s19621_s28 + $0x160] sm:$0xff] }
  0xb9   : > { %452 = vst [vmem:[%s19626_s29 + $0x150] sm:$0xff] %v451_v42  ;;  %454 = vst [vmem:[%s19626_s29 + $0x158] sm:$0xff] %v453_v43  ;;  %v457_v45 = vld [vmem:[%s19621_s28 + $0x168] sm:$0xff]  ;;  %v459_v46 = vld [vmem:[%s19621_s28 + $0x170] sm:$0xff] }
  0xba   : > { %456 = vst [vmem:[%s19626_s29 + $0x160] sm:$0xff] %v455_v44  ;;  %v461_v47 = vld [vmem:[%s19621_s28 + $0x178] sm:$0xff]  ;;  %458 = vst [vmem:[%s19626_s29 + $0x168] sm:$0xff] %v457_v45  ;;  %v463_v48 = vld [vmem:[%s19621_s28 + $0x180] sm:$0xff] }
  0xbb   : > { %460 = vst [vmem:[%s19626_s29 + $0x170] sm:$0xff] %v459_v46  ;;  %462 = vst [vmem:[%s19626_s29 + $0x178] sm:$0xff] %v461_v47  ;;  %v465_v49 = vld [vmem:[%s19621_s28 + $0x188] sm:$0xff]  ;;  %v467_v50 = vld [vmem:[%s19621_s28 + $0x190] sm:$0xff] }
  0xbc   : > { %464 = vst [vmem:[%s19626_s29 + $0x180] sm:$0xff] %v463_v48  ;;  %466 = vst [vmem:[%s19626_s29 + $0x188] sm:$0xff] %v465_v49  ;;  %v469_v51 = vld [vmem:[%s19621_s28 + $0x198] sm:$0xff]  ;;  %v471_v52 = vld [vmem:[%s19621_s28 + $0x1a0] sm:$0xff] }
  0xbd   : > { %468 = vst [vmem:[%s19626_s29 + $0x190] sm:$0xff] %v467_v50  ;;  %v473_v53 = vld [vmem:[%s19621_s28 + $0x1a8] sm:$0xff]  ;;  %470 = vst [vmem:[%s19626_s29 + $0x198] sm:$0xff] %v469_v51  ;;  %v475_v54 = vld [vmem:[%s19621_s28 + $0x6c0] sm:$0xff] }
  0xbe   : > { %472 = vst [vmem:[%s19626_s29 + $0x1a0] sm:$0xff] %v471_v52  ;;  %474 = vst [vmem:[%s19626_s29 + $0x1a8] sm:$0xff] %v473_v53  ;;  %v477_v55 = vld [vmem:[%s19621_s28 + $0x6c8] sm:$0xff]  ;;  %v479_v56 = vld [vmem:[%s19621_s28 + $0x6d0] sm:$0xff] }
  0xbf   : > { %476 = vst [vmem:[%s19626_s29 + $0x1b0] sm:$0xff] %v475_v54  ;;  %478 = vst [vmem:[%s19626_s29 + $0x1b8] sm:$0xff] %v477_v55  ;;  %v481_v57 = vld [vmem:[%s19621_s28 + $0x6d8] sm:$0xff]  ;;  %v483_v58 = vld [vmem:[%s19621_s28 + $0x6e0] sm:$0xff] }
  0xc0   : > { %480 = vst [vmem:[%s19626_s29 + $0x1c0] sm:$0xff] %v479_v56  ;;  %v485_v59 = vld [vmem:[%s19621_s28 + $0x6e8] sm:$0xff]  ;;  %482 = vst [vmem:[%s19626_s29 + $0x1c8] sm:$0xff] %v481_v57  ;;  %v487_v60 = vld [vmem:[%s19621_s28 + $0x6f0] sm:$0xff] }
  0xc1   : > { %484 = vst [vmem:[%s19626_s29 + $0x1d0] sm:$0xff] %v483_v58  ;;  %486 = vst [vmem:[%s19626_s29 + $0x1d8] sm:$0xff] %v485_v59  ;;  %v489_v61 = vld [vmem:[%s19621_s28 + $0x6f8] sm:$0xff]  ;;  %v491_v62 = vld [vmem:[%s19621_s28 + $0x700] sm:$0xff] }
  0xc2   : > { %488 = vst [vmem:[%s19626_s29 + $0x1e0] sm:$0xff] %v487_v60  ;;  %490 = vst [vmem:[%s19626_s29 + $0x1e8] sm:$0xff] %v489_v61  ;;  %v493_v63 = vld [vmem:[%s19621_s28 + $0x708] sm:$0xff]  ;;  %v495_v0 = vld [vmem:[%s19621_s28 + $0x710] sm:$0xff] }
  0xc3   : > { %492 = vst [vmem:[%s19626_s29 + $0x1f0] sm:$0xff] %v491_v62  ;;  %v497_v1 = vld [vmem:[%s19621_s28 + $0x718] sm:$0xff]  ;;  %494 = vst [vmem:[%s19626_s29 + $0x1f8] sm:$0xff] %v493_v63  ;;  %v499_v2 = vld [vmem:[%s19621_s28 + $0x720] sm:$0xff] }
  0xc4   : > { %496 = vst [vmem:[%s19626_s29 + $0x200] sm:$0xff] %v495_v0  ;;  %498 = vst [vmem:[%s19626_s29 + $0x208] sm:$0xff] %v497_v1  ;;  %v501_v3 = vld [vmem:[%s19621_s28 + $0x728] sm:$0xff]  ;;  %v503_v4 = vld [vmem:[%s19621_s28 + $0x730] sm:$0xff] }
  0xc5   : > { %500 = vst [vmem:[%s19626_s29 + $0x210] sm:$0xff] %v499_v2  ;;  %502 = vst [vmem:[%s19626_s29 + $0x218] sm:$0xff] %v501_v3  ;;  %v505_v5 = vld [vmem:[%s19621_s28 + $0x738] sm:$0xff]  ;;  %v507_v6 = vld [vmem:[%s19621_s28 + $0x740] sm:$0xff] }
  0xc6   : > { %504 = vst [vmem:[%s19626_s29 + $0x220] sm:$0xff] %v503_v4  ;;  %v509_v7 = vld [vmem:[%s19621_s28 + $0x748] sm:$0xff]  ;;  %506 = vst [vmem:[%s19626_s29 + $0x228] sm:$0xff] %v505_v5  ;;  %v511_v8 = vld [vmem:[%s19621_s28 + $0x750] sm:$0xff] }
  0xc7   : > { %508 = vst [vmem:[%s19626_s29 + $0x230] sm:$0xff] %v507_v6  ;;  %510 = vst [vmem:[%s19626_s29 + $0x238] sm:$0xff] %v509_v7  ;;  %v513_v9 = vld [vmem:[%s19621_s28 + $0x758] sm:$0xff]  ;;  %v515_v10 = vld [vmem:[%s19621_s28 + $0x760] sm:$0xff] }
  0xc8   : > { %512 = vst [vmem:[%s19626_s29 + $0x240] sm:$0xff] %v511_v8  ;;  %514 = vst [vmem:[%s19626_s29 + $0x248] sm:$0xff] %v513_v9  ;;  %v517_v11 = vld [vmem:[%s19621_s28 + $0x768] sm:$0xff]  ;;  %v519_v12 = vld [vmem:[%s19621_s28 + $0x770] sm:$0xff] }
  0xc9   : > { %516 = vst [vmem:[%s19626_s29 + $0x250] sm:$0xff] %v515_v10  ;;  %v521_v13 = vld [vmem:[%s19621_s28 + $0x778] sm:$0xff]  ;;  %518 = vst [vmem:[%s19626_s29 + $0x258] sm:$0xff] %v517_v11  ;;  %v523_v14 = vld [vmem:[%s19621_s28 + $0x780] sm:$0xff] }
  0xca   : > { %520 = vst [vmem:[%s19626_s29 + $0x260] sm:$0xff] %v519_v12  ;;  %522 = vst [vmem:[%s19626_s29 + $0x268] sm:$0xff] %v521_v13  ;;  %v525_v15 = vld [vmem:[%s19621_s28 + $0x788] sm:$0xff]  ;;  %v527_v16 = vld [vmem:[%s19621_s28 + $0x790] sm:$0xff] }
  0xcb   : > { %524 = vst [vmem:[%s19626_s29 + $0x270] sm:$0xff] %v523_v14  ;;  %526 = vst [vmem:[%s19626_s29 + $0x278] sm:$0xff] %v525_v15  ;;  %v529_v17 = vld [vmem:[%s19621_s28 + $0x798] sm:$0xff]  ;;  %v531_v18 = vld [vmem:[%s19621_s28 + $0x7a0] sm:$0xff] }
  0xcc   : > { %528 = vst [vmem:[%s19626_s29 + $0x280] sm:$0xff] %v527_v16  ;;  %v533_v19 = vld [vmem:[%s19621_s28 + $0x7a8] sm:$0xff]  ;;  %530 = vst [vmem:[%s19626_s29 + $0x288] sm:$0xff] %v529_v17  ;;  %v535_v20 = vld [vmem:[%s19621_s28 + $0x7b0] sm:$0xff] }
  0xcd   : > { %532 = vst [vmem:[%s19626_s29 + $0x290] sm:$0xff] %v531_v18  ;;  %534 = vst [vmem:[%s19626_s29 + $0x298] sm:$0xff] %v533_v19  ;;  %v537_v21 = vld [vmem:[%s19621_s28 + $0x7b8] sm:$0xff]  ;;  %v539_v22 = vld [vmem:[%s19621_s28 + $0x7c0] sm:$0xff] }
  0xce   : > { %536 = vst [vmem:[%s19626_s29 + $0x2a0] sm:$0xff] %v535_v20  ;;  %538 = vst [vmem:[%s19626_s29 + $0x2a8] sm:$0xff] %v537_v21  ;;  %v541_v23 = vld [vmem:[%s19621_s28 + $0x7c8] sm:$0xff]  ;;  %v543_v24 = vld [vmem:[%s19621_s28 + $0x7d0] sm:$0xff] }
  0xcf   : > { %540 = vst [vmem:[%s19626_s29 + $0x2b0] sm:$0xff] %v539_v22  ;;  %v545_v25 = vld [vmem:[%s19621_s28 + $0x7d8] sm:$0xff]  ;;  %542 = vst [vmem:[%s19626_s29 + $0x2b8] sm:$0xff] %v541_v23  ;;  %v547_v26 = vld [vmem:[%s19621_s28 + $0x7e0] sm:$0xff] }
  0xd0   : > { %544 = vst [vmem:[%s19626_s29 + $0x2c0] sm:$0xff] %v543_v24  ;;  %546 = vst [vmem:[%s19626_s29 + $0x2c8] sm:$0xff] %v545_v25  ;;  %v549_v27 = vld [vmem:[%s19621_s28 + $0x7e8] sm:$0xff]  ;;  %v551_v28 = vld [vmem:[%s19621_s28 + $0x7f0] sm:$0xff] }
  0xd1   : > { %548 = vst [vmem:[%s19626_s29 + $0x2d0] sm:$0xff] %v547_v26  ;;  %550 = vst [vmem:[%s19626_s29 + $0x2d8] sm:$0xff] %v549_v27  ;;  %v553_v29 = vld [vmem:[%s19621_s28 + $0x7f8] sm:$0xff]  ;;  %v555_v30 = vld [vmem:[%s19621_s28 + $0x800] sm:$0xff] }
  0xd2   : > { %552 = vst [vmem:[%s19626_s29 + $0x2e0] sm:$0xff] %v551_v28  ;;  %v557_v31 = vld [vmem:[%s19621_s28 + $0x808] sm:$0xff]  ;;  %554 = vst [vmem:[%s19626_s29 + $0x2e8] sm:$0xff] %v553_v29  ;;  %v559_v32 = vld [vmem:[%s19621_s28 + $0x810] sm:$0xff] }
  0xd3   : > { %556 = vst [vmem:[%s19626_s29 + $0x2f0] sm:$0xff] %v555_v30  ;;  %558 = vst [vmem:[%s19626_s29 + $0x2f8] sm:$0xff] %v557_v31  ;;  %v561_v33 = vld [vmem:[%s19621_s28 + $0x818] sm:$0xff]  ;;  %v563_v34 = vld [vmem:[%s19621_s28 + $0x820] sm:$0xff] }
  0xd4   : > { %560 = vst [vmem:[%s19626_s29 + $0x300] sm:$0xff] %v559_v32  ;;  %562 = vst [vmem:[%s19626_s29 + $0x308] sm:$0xff] %v561_v33  ;;  %v565_v35 = vld [vmem:[%s19621_s28 + $0x828] sm:$0xff]  ;;  %v567_v36 = vld [vmem:[%s19621_s28 + $0x830] sm:$0xff] }
  0xd5   : > { %564 = vst [vmem:[%s19626_s29 + $0x310] sm:$0xff] %v563_v34  ;;  %v569_v37 = vld [vmem:[%s19621_s28 + $0x838] sm:$0xff]  ;;  %566 = vst [vmem:[%s19626_s29 + $0x318] sm:$0xff] %v565_v35  ;;  %v571_v38 = vld [vmem:[%s19621_s28 + $0x840] sm:$0xff] }
  0xd6   : > { %568 = vst [vmem:[%s19626_s29 + $0x320] sm:$0xff] %v567_v36  ;;  %570 = vst [vmem:[%s19626_s29 + $0x328] sm:$0xff] %v569_v37  ;;  %v573_v39 = vld [vmem:[%s19621_s28 + $0x848] sm:$0xff]  ;;  %v575_v40 = vld [vmem:[%s19621_s28 + $0x850] sm:$0xff] }
  0xd7   : > { %572 = vst [vmem:[%s19626_s29 + $0x330] sm:$0xff] %v571_v38  ;;  %574 = vst [vmem:[%s19626_s29 + $0x338] sm:$0xff] %v573_v39  ;;  %v577_v41 = vld [vmem:[%s19621_s28 + $0x858] sm:$0xff]  ;;  %v579_v42 = vld [vmem:[%s19621_s28 + $0x860] sm:$0xff] }
  0xd8   : > { %576 = vst [vmem:[%s19626_s29 + $0x340] sm:$0xff] %v575_v40  ;;  %v581_v43 = vld [vmem:[%s19621_s28 + $0x868] sm:$0xff]  ;;  %578 = vst [vmem:[%s19626_s29 + $0x348] sm:$0xff] %v577_v41 }
  0xd9   : > { %580 = vst [vmem:[%s19626_s29 + $0x350] sm:$0xff] %v579_v42  ;;  %582 = vst [vmem:[%s19626_s29 + $0x358] sm:$0xff] %v581_v43 }
  0xda PF: > { %s589_s24 = sand.u32 1, %s19353_s11   ;;  %s15966_s15 = smul.u32 221184, %s19361_s13 }
  0xdb   : > { %s16426_s25 = smul.u32 13824, %s589_s24  ;;  %s19850_s7 = scalar_lea.sflag [#allocation5], %s589_s24 }
  0xdc   : > { %s19846_s19 = scalar_lea.hbm %s21820_s1, %s15966_s15  ;;  %p21852_p1 = scmp.ne.s32.totalorder %s21842_s18, 0 }
  0xdd   : > { %s593_s30 = scalar_lea.vmem [#allocation4], %s16426_s25  ;;  %s19275_s26 = scalar_lea.hbm %s19846_s19, 221184 }
  0xde   : > { %s601_s27 = sshll.u32 %s593_s30, 4  ;;  %p19276_p12 = scmp.ne.s32.totalorder %s19846_s19, %s19275_s26  ;;  %s19848_s27 = int_to_ptr.vmem [resolvable:$true] %s601_s27 }
  0xdf   : > { %s19279_s17 = scalar_lea.hbm %s21820_s1, 884736  ;;  %p19280_p8 = scmp.lt.u32.totalorder %s19846_s19, %s21820_s1 }
  0xe0   : > { %p19277_p5 = pnand %p19276_p12, %p21852_p1  ;;  %p19281_p10 = scmp.lt.u32.totalorder %s19279_s17, %s19275_s26 }
  0xe1   : > { %p19283_p4 = scmp.lt.u32.totalorder %s19275_s26, %s19846_s19 }
  0xe2   : > { %p19278_p3 = pneg %p19277_p5  ;;  %p19282_p2 = por %p19281_p10, %p19280_p8 }
  0xe4   : > { %p19284_p6 = por %p19283_p4, %p19282_p2 }
  0xe6   : > { %p19285_p7 = pnand %p19284_p6, %p19278_p3 }
  0xe8   : > { %19288 = shalt.err (!%p19285_p7)
}
  0xe9   : > { %s19289_s29 = scalar_lea.vmem %s19848_s27, 221184  ;;  %s19374_s24 = smov [#allocation4]  }
  0xea   : > { %p19290_p9 = scmp.ne.s32.totalorder %s19848_s27, %s19289_s29  ;;  %s19293_s15 = sshll.u32 %s19374_s24, 4  ;;  %s19294_s15 = int_to_ptr.vmem [resolvable:$false] %s19293_s15 }
  0xeb   : > { %s19295_s25 = scalar_lea.vmem %s19294_s15, 442368  ;;  %p19296_p0 = scmp.lt.s32.totalorder %s19848_s27, %s19294_s15 }
  0xec   : > { %p19291_p11 = pnand %p19290_p9, %p21852_p1  ;;  %p19297_p12 = scmp.lt.s32.totalorder %s19295_s25, %s19289_s29 }
  0xee   : > { %p19292_p13 = pneg %p19291_p11  ;;  %p19298_p5 = por %p19297_p12, %p19296_p0 }
  0xf0   : > { %p19299_p8 = pnand %p19298_p5, %p19292_p13 }
  0xf2   : > { %19302 = shalt.err (!%p19299_p8)
}
  0xf3   : > { %s19375_s9 = smov 256   ;;  %s19376_s16 = smov 16  }
  0xf4   : > { %16439 = dma.hbm_to_vmem [thread:$0]  (%p21852_p1), %s19846_s19, 221184, %s19848_s27, %s19850_s7, %s19375_s9, %s19375_s9, %s19376_s16  }
  0xf5 PF: > { %p21853_p3 = scmp.ne.s32.totalorder %s21846_s23, 0 }
  0xf6   : > { %s616_s30 = sand.u32 (!%p21853_p3), 1, %s19349_s10   ;;  %p21854_p10 = scmp.ne.s32.totalorder (!%p21853_p3), %s21844_s21, 0 }
  0xf7   : > { %613 = sbr.rel (%p21853_p3) target bundleno = 2921 (0xb69), region = 75  ;;  %s623_s17 = scalar_lea.sflag (!%p21853_p3), [#allocation5], %s616_s30 }
  0xf8   : > { %s16427_s26 = smul.u32 (!%p21853_p3), 864, %s616_s30 }
  0xf9   : > { %s16428_s2 = smul.u32 (!%p21853_p3), 13824, %s616_s30 }
  0xfa   : > { %s19877_s4 = scalar_lea.vmem (!%p21853_p3), [#allocation3], %s16427_s26 }
  0xfb   : > { %s19879_s22 = scalar_lea.vmem (!%p21853_p3), [#allocation4], %s16428_s2 }
  0xfe   : > { %19328 = dma.done.wait (%p21854_p10), %s623_s17, 221184  }
  0xff   : > { %19330 = vsyncadd (%p21854_p10), %s623_s17, 4294746112  ;;  %p21855_p1 = scmp.ne.s32.totalorder %s21843_s20, 0 }
 0x101   : > { %19332 = dma.done.wait (%p21855_p1), [#allocation7], 8256  }
 0x102   : > { %19334 = vsyncadd (%p21855_p1), [#allocation7], 4294959040 }
 0x103   : > { %19336 = dma.done.wait (%p21855_p1), [#allocation10], 32  }
 0x104   : > { %19338 = vsyncadd (%p21855_p1), [#allocation10], 4294967264 }
 0x105   : > { %19340 = dma.done.wait (%p21855_p1), [#allocation13], 16  }
 0x106   : > { %19342 = vsyncadd (%p21855_p1), [#allocation13], 4294967280  ;;  %p14222_p2 = scmp.ne.s32.totalorder %s19357_s12, 0 }
 0x107   : > { %v19377_v44 = vmov (!%p14222_p2), 0.0  }
 0x108   : > { %697 = sbr.rel (%p14222_p2) target bundleno = 271 (0x10f), region = 107  ;;  %698 = vst [vmem:[#allocation2] sm:$0xff] (!%p14222_p2), %v19377_v44  ;;  %699 = vst [vmem:[#allocation2 + $0x8] sm:$0xff] (!%p14222_p2), %v19377_v44 }
 0x109   : > { %700 = vst [vmem:[#allocation2 + $0x10] sm:$0xff] (!%p14222_p2), %v19377_v44  ;;  %701 = vst [vmem:[#allocation2 + $0x18] sm:$0xff] (!%p14222_p2), %v19377_v44 }
 0x10a   : > { %702 = vst [vmem:[#allocation2 + $0x20] sm:$0xff] (!%p14222_p2), %v19377_v44  ;;  %703 = vst [vmem:[#allocation2 + $0x28] sm:$0xff] (!%p14222_p2), %v19377_v44 }
 0x10b   : > { %704 = vst [vmem:[#allocation2 + $0x30] sm:$0xff] (!%p14222_p2), %v19377_v44  ;;  %705 = vst [vmem:[#allocation2 + $0x38] sm:$0xff] (!%p14222_p2), %v19377_v44 }
 0x10f PF: > { %v16535_v45 = vld [vmem:[%s19879_s22 + $0x4] ss:$16 sps:$4 sm:$0xff]   ;;  %v16537_v46 = vld [vmem:[%s19879_s22 + $0xc] ss:$16 sps:$4 sm:$0xff]   ;;  %v16539_v47 = vld [vmem:[%s19879_s22] ss:$16 sps:$4 sm:$0xff]  }
 0x110   : > { %11244 = vmatprep.subr.bf16.mxu0 %v16535_v45  ;;  %v16540_v48 = vld [vmem:[%s19879_s22 + $0x8] ss:$16 sps:$4 sm:$0xff]   ;;  %12405 = vmatprep.subr.bf16.mxu1 %v16537_v46  ;;  %v16541_v49 = vld [vmem:[%s19879_s22 + $0x24] ss:$16 sps:$4 sm:$0xff]   ;;  %v16543_v50 = vld [vmem:[%s19879_s22 + $0x2c] ss:$16 sps:$4 sm:$0xff]  }
 0x111   : > { %11245 = vmatpush1.bf16.msra.mxu0 %v16539_v47  ;;  %12406 = vmatpush1.bf16.msra.mxu1 %v16540_v48  ;;  %v16545_v51 = vld [vmem:[%s19879_s22 + $0x20] ss:$16 sps:$4 sm:$0xff]   ;;  %v16546_v52 = vld [vmem:[%s19879_s22 + $0x28] ss:$16 sps:$4 sm:$0xff]   ;;  %v16547_v53 = vld [vmem:[%s19879_s22 + $0x44] ss:$16 sps:$4 sm:$0xff]  }
 0x112   : > { %11246 = vmatprep.subr.bf16.mxu0 %v16541_v49  ;;  %12407 = vmatprep.subr.bf16.mxu1 %v16543_v50  ;;  %v16549_v54 = vld [vmem:[%s19879_s22 + $0x4c] ss:$16 sps:$4 sm:$0xff]   ;;  %v16551_v55 = vld [vmem:[%s19879_s22 + $0x40] ss:$16 sps:$4 sm:$0xff]   ;;  %v16552_v56 = vld [vmem:[%s19879_s22 + $0x48] ss:$16 sps:$4 sm:$0xff]  }
 0x113   : > { %v16553_v57 = vld [vmem:[%s19879_s22 + $0x64] ss:$16 sps:$4 sm:$0xff]   ;;  %v16555_v58 = vld [vmem:[%s19879_s22 + $0x6c] ss:$16 sps:$4 sm:$0xff]   ;;  %v16557_v59 = vld [vmem:[%s19879_s22 + $0x60] ss:$16 sps:$4 sm:$0xff]  }
 0x114   : > { %v16558_v60 = vld [vmem:[%s19879_s22 + $0x68] ss:$16 sps:$4 sm:$0xff]   ;;  %v16559_v61 = vld [vmem:[%s19879_s22 + $0x84] ss:$16 sps:$4 sm:$0xff]   ;;  %v16561_v62 = vld [vmem:[%s19879_s22 + $0x8c] ss:$16 sps:$4 sm:$0xff]  }
 0x115   : > { %11247 = vmatpush1.bf16.msra.mxu0 %v16545_v51  ;;  %12408 = vmatpush1.bf16.msra.mxu1 %v16546_v52  ;;  %v16563_v63 = vld [vmem:[%s19879_s22 + $0x80] ss:$16 sps:$4 sm:$0xff]   ;;  %v16564_v0 = vld [vmem:[%s19879_s22 + $0x88] ss:$16 sps:$4 sm:$0xff]   ;;  %v16565_v1 = vld [vmem:[%s19879_s22 + $0xa4] ss:$16 sps:$4 sm:$0xff]  }
 0x116   : > { %11248 = vmatprep.subr.bf16.mxu0 %v16547_v53  ;;  %12409 = vmatprep.subr.bf16.mxu1 %v16549_v54  ;;  %v16567_v2 = vld [vmem:[%s19879_s22 + $0xac] ss:$16 sps:$4 sm:$0xff]   ;;  %v16569_v3 = vld [vmem:[%s19879_s22 + $0xa0] ss:$16 sps:$4 sm:$0xff]   ;;  %v16570_v4 = vld [vmem:[%s19879_s22 + $0xa8] ss:$16 sps:$4 sm:$0xff]  }
 0x117   : > { %v16571_v5 = vld [vmem:[%s19879_s22 + $0xc4] ss:$16 sps:$4 sm:$0xff]   ;;  %v16573_v6 = vld [vmem:[%s19879_s22 + $0xcc] ss:$16 sps:$4 sm:$0xff]   ;;  %v16575_v7 = vld [vmem:[%s19879_s22 + $0xc0] ss:$16 sps:$4 sm:$0xff]  }
 0x118   : > { %v16576_v8 = vld [vmem:[%s19879_s22 + $0xc8] ss:$16 sps:$4 sm:$0xff]   ;;  %v16577_v9 = vld [vmem:[%s19879_s22 + $0xe4] ss:$16 sps:$4 sm:$0xff]   ;;  %v16579_v10 = vld [vmem:[%s19879_s22 + $0xec] ss:$16 sps:$4 sm:$0xff]  }
 0x119   : > { %11249 = vmatpush1.bf16.msra.mxu0 %v16551_v55  ;;  %12410 = vmatpush1.bf16.msra.mxu1 %v16552_v56  ;;  %v16581_v11 = vld [vmem:[%s19879_s22 + $0xe0] ss:$16 sps:$4 sm:$0xff]   ;;  %v16582_v12 = vld [vmem:[%s19879_s22 + $0xe8] ss:$16 sps:$4 sm:$0xff]   ;;  %v16583_v13 = vld [vmem:[%s19879_s22 + $0x104] ss:$16 sps:$4 sm:$0xff]  }
 0x11a   : > { %11250 = vmatprep.subr.bf16.mxu0 %v16553_v57  ;;  %12411 = vmatprep.subr.bf16.mxu1 %v16555_v58  ;;  %v16585_v14 = vld [vmem:[%s19879_s22 + $0x10c] ss:$16 sps:$4 sm:$0xff]   ;;  %v16587_v15 = vld [vmem:[%s19879_s22 + $0x100] ss:$16 sps:$4 sm:$0xff]   ;;  %v16588_v16 = vld [vmem:[%s19879_s22 + $0x108] ss:$16 sps:$4 sm:$0xff]  }
 0x11b   : > { %v16589_v17 = vld [vmem:[%s19879_s22 + $0x124] ss:$16 sps:$4 sm:$0xff]   ;;  %v16591_v18 = vld [vmem:[%s19879_s22 + $0x12c] ss:$16 sps:$4 sm:$0xff]   ;;  %v16593_v19 = vld [vmem:[%s19879_s22 + $0x120] ss:$16 sps:$4 sm:$0xff]  }
 0x11c   : > { %v16594_v20 = vld [vmem:[%s19879_s22 + $0x128] ss:$16 sps:$4 sm:$0xff]   ;;  %v16595_v21 = vld [vmem:[%s19879_s22 + $0x144] ss:$16 sps:$4 sm:$0xff]   ;;  %v16597_v22 = vld [vmem:[%s19879_s22 + $0x14c] ss:$16 sps:$4 sm:$0xff]  }
 0x11d   : > { %11251 = vmatpush1.bf16.msra.mxu0 %v16557_v59  ;;  %12412 = vmatpush1.bf16.msra.mxu1 %v16558_v60  ;;  %v16599_v23 = vld [vmem:[%s19879_s22 + $0x140] ss:$16 sps:$4 sm:$0xff]   ;;  %v16600_v24 = vld [vmem:[%s19879_s22 + $0x148] ss:$16 sps:$4 sm:$0xff]   ;;  %v16601_v25 = vld [vmem:[%s19879_s22 + $0x164] ss:$16 sps:$4 sm:$0xff]  }
 0x11e   : > { %11252 = vmatprep.subr.bf16.mxu0 %v16559_v61  ;;  %12413 = vmatprep.subr.bf16.mxu1 %v16561_v62  ;;  %v16603_v26 = vld [vmem:[%s19879_s22 + $0x16c] ss:$16 sps:$4 sm:$0xff]   ;;  %v16605_v29 = vld [vmem:[%s19879_s22 + $0x160] ss:$16 sps:$4 sm:$0xff]   ;;  %v16606_v30 = vld [vmem:[%s19879_s22 + $0x168] ss:$16 sps:$4 sm:$0xff]  }
 0x11f   : > { %v715_v27 = vld [vmem:[%s19877_s4 + $0x8] sm:$0xff]  ;;  %v769_v28 = vld [vmem:[%s19877_s4 + $0x1b8] sm:$0xff]  ;;  %v16607_v32 = vld [vmem:[%s19879_s22 + $0x184] ss:$16 sps:$4 sm:$0xff]   ;;  %p15951_p4 = scmp.ne.s32.totalorder %s19357_s12, 3 }
 0x120   : > { %v823_v31 = vpack.c.bf16 %v769_v28, %v715_v27  ;;  %v16609_v33 = vld [vmem:[%s19879_s22 + $0x18c] ss:$16 sps:$4 sm:$0xff]   ;;  %v16611_v34 = vld [vmem:[%s19879_s22 + $0x180] ss:$16 sps:$4 sm:$0xff]   ;;  %v16612_v35 = vld [vmem:[%s19879_s22 + $0x188] ss:$16 sps:$4 sm:$0xff]  }
 0x121   : > { %11253 = vmatpush1.bf16.msra.mxu0 %v16563_v63  ;;  %12414 = vmatpush1.bf16.msra.mxu1 %v16564_v0  ;;  %v16613_v36 = vld [vmem:[%s19879_s22 + $0x1a4] ss:$16 sps:$4 sm:$0xff]   ;;  %v16615_v37 = vld [vmem:[%s19879_s22 + $0x1ac] ss:$16 sps:$4 sm:$0xff]   ;;  %v16617_v38 = vld [vmem:[%s19879_s22 + $0x1a0] ss:$16 sps:$4 sm:$0xff]  }
 0x122   : > { %11254 = vmatprep.subr.bf16.mxu0 %v16565_v1  ;;  %12415 = vmatprep.subr.bf16.mxu1 %v16567_v2  ;;  %v16618_v39 = vld [vmem:[%s19879_s22 + $0x1a8] ss:$16 sps:$4 sm:$0xff]   ;;  %v16619_v40 = vld [vmem:[%s19879_s22 + $0x1c4] ss:$16 sps:$4 sm:$0xff]   ;;  %v16621_v41 = vld [vmem:[%s19879_s22 + $0x1cc] ss:$16 sps:$4 sm:$0xff]  }
 0x123   : > { %11276 = vmatprep.mubr.bf16.mxu0 %v823_v31  ;;  %12437 = vmatprep.mubr.bf16.mxu1 %v823_v31  ;;  %v16623_v42 = vld [vmem:[%s19879_s22 + $0x1c0] ss:$16 sps:$4 sm:$0xff]   ;;  %v16624_v43 = vld [vmem:[%s19879_s22 + $0x1c8] ss:$16 sps:$4 sm:$0xff]   ;;  %v16625_v44 = vld [vmem:[%s19879_s22 + $0x1e4] ss:$16 sps:$4 sm:$0xff]  }
 0x124   : > { %v16627_v45 = vld [vmem:[%s19879_s22 + $0x1ec] ss:$16 sps:$4 sm:$0xff]   ;;  %v16629_v46 = vld [vmem:[%s19879_s22 + $0x1e0] ss:$16 sps:$4 sm:$0xff]   ;;  %v16630_v47 = vld [vmem:[%s19879_s22 + $0x1e8] ss:$16 sps:$4 sm:$0xff]  }
 0x125   : > { %11255 = vmatpush1.bf16.msra.mxu0 %v16569_v3  ;;  %12416 = vmatpush1.bf16.msra.mxu1 %v16570_v4  ;;  %v16633_v48 = vld [vmem:[%s19879_s22 + $0x204] ss:$16 sps:$4 sm:$0xff]   ;;  %v16636_v51 = vld [vmem:[%s19879_s22 + $0x20c] ss:$16 sps:$4 sm:$0xff]   ;;  %v16631_v52 = vld [vmem:[%s19879_s22 + $0x200] ss:$16 sps:$4 sm:$0xff]  }
 0x126   : > { %11256 = vmatprep.subr.bf16.mxu0 %v16571_v5  ;;  %12417 = vmatprep.subr.bf16.mxu1 %v16573_v6  ;;  %v714_v49 = vld [vmem:[%s19877_s4] sm:$0xff]  ;;  %v768_v50 = vld [vmem:[%s19877_s4 + $0x1b0] sm:$0xff]  ;;  %v16634_v53 = vld [vmem:[%s19879_s22 + $0x208] ss:$16 sps:$4 sm:$0xff]   ;;  %s21856_s9 = sld [smem:[#allocation22_spill]] (!%p15951_p4)  ;;  %vm13966_vm0 = vcmask (!%p15951_p4), 261120  }
 0x127   : > { %v822_v54 = vpack.c.bf16 %v768_v50, %v714_v49  ;;  %v16639_v55 = vld [vmem:[%s19879_s22 + $0x224] ss:$16 sps:$4 sm:$0xff]   ;;  %v16642_v56 = vld [vmem:[%s19879_s22 + $0x22c] ss:$16 sps:$4 sm:$0xff]   ;;  %v16637_v57 = vld [vmem:[%s19879_s22 + $0x220] ss:$16 sps:$4 sm:$0xff]  }
 0x128   : > { %v16640_v58 = vld [vmem:[%s19879_s22 + $0x228] ss:$16 sps:$4 sm:$0xff]   ;;  %v16645_v59 = vld [vmem:[%s19879_s22 + $0x244] ss:$16 sps:$4 sm:$0xff]   ;;  %v16648_v60 = vld [vmem:[%s19879_s22 + $0x24c] ss:$16 sps:$4 sm:$0xff]  }
 0x129   : > { %11257 = vmatpush1.bf16.msra.mxu0 %v16575_v7  ;;  %12418 = vmatpush1.bf16.msra.mxu1 %v16576_v8  ;;  %v16643_v61 = vld [vmem:[%s19879_s22 + $0x240] ss:$16 sps:$4 sm:$0xff]   ;;  %v16646_v62 = vld [vmem:[%s19879_s22 + $0x248] ss:$16 sps:$4 sm:$0xff]   ;;  %v16651_v63 = vld [vmem:[%s19879_s22 + $0x264] ss:$16 sps:$4 sm:$0xff]  }
 0x12a   : > { %11258 = vmatprep.subr.bf16.mxu0 %v16577_v9  ;;  %12419 = vmatprep.subr.bf16.mxu1 %v16579_v10  ;;  %v16654_v0 = vld [vmem:[%s19879_s22 + $0x26c] ss:$16 sps:$4 sm:$0xff]   ;;  %v16649_v1 = vld [vmem:[%s19879_s22 + $0x260] ss:$16 sps:$4 sm:$0xff]   ;;  %v16652_v2 = vld [vmem:[%s19879_s22 + $0x268] ss:$16 sps:$4 sm:$0xff]  }
 0x12b   : > { %v16657_v3 = vld [vmem:[%s19879_s22 + $0x284] ss:$16 sps:$4 sm:$0xff]   ;;  %v16660_v4 = vld [vmem:[%s19879_s22 + $0x28c] ss:$16 sps:$4 sm:$0xff]   ;;  %v16655_v5 = vld [vmem:[%s19879_s22 + $0x280] ss:$16 sps:$4 sm:$0xff]  }
 0x12c   : > { %v16658_v6 = vld [vmem:[%s19879_s22 + $0x288] ss:$16 sps:$4 sm:$0xff]   ;;  %v16663_v7 = vld [vmem:[%s19879_s22 + $0x2a4] ss:$16 sps:$4 sm:$0xff]   ;;  %v16666_v8 = vld [vmem:[%s19879_s22 + $0x2ac] ss:$16 sps:$4 sm:$0xff]  }
 0x12d   : > { %11259 = vmatpush1.bf16.msra.mxu0 %v16581_v11  ;;  %12420 = vmatpush1.bf16.msra.mxu1 %v16582_v12  ;;  %v16661_v9 = vld [vmem:[%s19879_s22 + $0x2a0] ss:$16 sps:$4 sm:$0xff]   ;;  %v16664_v10 = vld [vmem:[%s19879_s22 + $0x2a8] ss:$16 sps:$4 sm:$0xff]   ;;  %v16669_v11 = vld [vmem:[%s19879_s22 + $0x2c4] ss:$16 sps:$4 sm:$0xff]  }
 0x12e   : > { %11260 = vmatprep.subr.bf16.mxu0 %v16583_v13  ;;  %12421 = vmatprep.subr.bf16.mxu1 %v16585_v14  ;;  %v16672_v12 = vld [vmem:[%s19879_s22 + $0x2cc] ss:$16 sps:$4 sm:$0xff]   ;;  %v16685_v28 = vld [vmem:[%s19879_s22 + $0x320] ss:$16 sps:$4 sm:$0xff]   ;;  %v16718_v49 = vld [vmem:[%s19879_s22 + $0x3c8] ss:$16 sps:$4 sm:$0xff]  }
 0x12f   : > { %v717_v13 = vld [vmem:[%s19877_s4 + $0x18] sm:$0xff]  ;;  %v771_v14 = vld [vmem:[%s19877_s4 + $0x1c8] sm:$0xff]  ;;  %v16723_v50 = vld [vmem:[%s19879_s22 + $0x3e4] ss:$16 sps:$4 sm:$0xff]   ;;  %vm14060_vm1 = vcmask (!%p15951_p4), 39936   ;;  %s21857_s18 = sld [smem:[#allocation23_spill]] (!%p15951_p4) }
 0x130   : > { %v16690_v27 = vld [vmem:[%s19879_s22 + $0x32c] ss:$16 sps:$4 sm:$0xff]  }
 0x131   : > { %11261 = vmatpush1.bf16.msra.mxu0 %v16587_v15  ;;  %12422 = vmatpush1.bf16.msra.mxu1 %v16588_v16  ;;  %v16667_v15 = vld [vmem:[%s19879_s22 + $0x2c0] ss:$16 sps:$4 sm:$0xff]   ;;  %v16670_v16 = vld [vmem:[%s19879_s22 + $0x2c8] ss:$16 sps:$4 sm:$0xff]   ;;  %v16696_v31 = vld [vmem:[%s19879_s22 + $0x34c] ss:$16 sps:$4 sm:$0xff]  }
 0x132   : > { %11262 = vmatprep.subr.bf16.mxu0 %v16589_v17  ;;  %12423 = vmatprep.subr.bf16.mxu1 %v16591_v18  ;;  %v825_v17 = vpack.c.bf16 %v771_v14, %v717_v13  ;;  %v16675_v18 = vld [vmem:[%s19879_s22 + $0x2e4] ss:$16 sps:$4 sm:$0xff]   ;;  %v16756_v13 = vld [vmem:[%s19879_s22 + $0x48c] ss:$16 sps:$4 sm:$0xff]   ;;  %v16751_v14 = vld [vmem:[%s19879_s22 + $0x480] ss:$16 sps:$4 sm:$0xff]  }
 0x135   : > { %11263 = vmatpush1.bf16.msra.mxu0 %v16593_v19  ;;  %12424 = vmatpush1.bf16.msra.mxu1 %v16594_v20  ;;  %v16678_v19 = vld [vmem:[%s19879_s22 + $0x2ec] ss:$16 sps:$4 sm:$0xff]   ;;  %v16673_v20 = vld [vmem:[%s19879_s22 + $0x2e0] ss:$16 sps:$4 sm:$0xff]  }
 0x136   : > { %11264 = vmatprep.subr.bf16.mxu0 %v16595_v21  ;;  %12425 = vmatprep.subr.bf16.mxu1 %v16597_v22  ;;  %v16676_v21 = vld [vmem:[%s19879_s22 + $0x2e8] ss:$16 sps:$4 sm:$0xff]   ;;  %v16681_v22 = vld [vmem:[%s19879_s22 + $0x304] ss:$16 sps:$4 sm:$0xff]  }
 0x139   : > { %11265 = vmatpush1.bf16.msra.mxu0 %v16599_v23  ;;  %12426 = vmatpush1.bf16.msra.mxu1 %v16600_v24  ;;  %v16684_v23 = vld [vmem:[%s19879_s22 + $0x30c] ss:$16 sps:$4 sm:$0xff]   ;;  %v16679_v24 = vld [vmem:[%s19879_s22 + $0x300] ss:$16 sps:$4 sm:$0xff]  }
 0x13a   : > { %11266 = vmatprep.subr.bf16.mxu0 %v16601_v25  ;;  %12427 = vmatprep.subr.bf16.mxu1 %v16603_v26  ;;  %v16682_v25 = vld [vmem:[%s19879_s22 + $0x308] ss:$16 sps:$4 sm:$0xff]   ;;  %v16687_v26 = vld [vmem:[%s19879_s22 + $0x324] ss:$16 sps:$4 sm:$0xff]  }
 0x13d   : > { %11267 = vmatpush1.bf16.msra.mxu0 %v16605_v29  ;;  %12428 = vmatpush1.bf16.msra.mxu1 %v16606_v30  ;;  %v16688_v29 = vld [vmem:[%s19879_s22 + $0x328] ss:$16 sps:$4 sm:$0xff]   ;;  %v16693_v30 = vld [vmem:[%s19879_s22 + $0x344] ss:$16 sps:$4 sm:$0xff]  }
 0x13e   : > { %11268 = vmatprep.subr.bf16.mxu0 %v16607_v32  ;;  %12429 = vmatprep.subr.bf16.mxu1 %v16609_v33  ;;  %v16691_v32 = vld [vmem:[%s19879_s22 + $0x340] ss:$16 sps:$4 sm:$0xff]   ;;  %v16694_v33 = vld [vmem:[%s19879_s22 + $0x348] ss:$16 sps:$4 sm:$0xff]  }
 0x141   : > { %11269 = vmatpush1.bf16.msra.mxu0 %v16611_v34  ;;  %12430 = vmatpush1.bf16.msra.mxu1 %v16612_v35  ;;  %v16699_v34 = vld [vmem:[%s19879_s22 + $0x364] ss:$16 sps:$4 sm:$0xff]   ;;  %v16702_v35 = vld [vmem:[%s19879_s22 + $0x36c] ss:$16 sps:$4 sm:$0xff]  }
 0x142   : > { %11270 = vmatprep.subr.bf16.mxu0 %v16613_v36  ;;  %12431 = vmatprep.subr.bf16.mxu1 %v16615_v37  ;;  %v16697_v36 = vld [vmem:[%s19879_s22 + $0x360] ss:$16 sps:$4 sm:$0xff]   ;;  %v16700_v37 = vld [vmem:[%s19879_s22 + $0x368] ss:$16 sps:$4 sm:$0xff]  }
 0x145   : > { %11271 = vmatpush1.bf16.msra.mxu0 %v16617_v38  ;;  %12432 = vmatpush1.bf16.msra.mxu1 %v16618_v39  ;;  %v16705_v38 = vld [vmem:[%s19879_s22 + $0x384] ss:$16 sps:$4 sm:$0xff]   ;;  %v16708_v39 = vld [vmem:[%s19879_s22 + $0x38c] ss:$16 sps:$4 sm:$0xff]  }
 0x146   : > { %11272 = vmatprep.subr.bf16.mxu0 %v16619_v40  ;;  %12433 = vmatprep.subr.bf16.mxu1 %v16621_v41  ;;  %v16703_v40 = vld [vmem:[%s19879_s22 + $0x380] ss:$16 sps:$4 sm:$0xff]   ;;  %v16706_v41 = vld [vmem:[%s19879_s22 + $0x388] ss:$16 sps:$4 sm:$0xff]  }
 0x149   : > { %11273 = vmatpush1.bf16.msra.mxu0 %v16623_v42  ;;  %12434 = vmatpush1.bf16.msra.mxu1 %v16624_v43  ;;  %v16711_v42 = vld [vmem:[%s19879_s22 + $0x3a4] ss:$16 sps:$4 sm:$0xff]   ;;  %v16714_v43 = vld [vmem:[%s19879_s22 + $0x3ac] ss:$16 sps:$4 sm:$0xff]  }
 0x14a   : > { %11274 = vmatprep.subr.bf16.mxu0 %v16625_v44  ;;  %12435 = vmatprep.subr.bf16.mxu1 %v16627_v45  ;;  %v16709_v44 = vld [vmem:[%s19879_s22 + $0x3a0] ss:$16 sps:$4 sm:$0xff]   ;;  %v16712_v45 = vld [vmem:[%s19879_s22 + $0x3a8] ss:$16 sps:$4 sm:$0xff]  }
 0x14d   : > { %11275 = vmatpush1.bf16.msra.mxu0 %v16629_v46  ;;  %12436 = vmatpush1.bf16.msra.mxu1 %v16630_v47  ;;  %v16717_v46 = vld [vmem:[%s19879_s22 + $0x3c4] ss:$16 sps:$4 sm:$0xff]   ;;  %v16720_v47 = vld [vmem:[%s19879_s22 + $0x3cc] ss:$16 sps:$4 sm:$0xff]  }
 0x14e   : > { %11287 = vmatprep.subr.bf16.mxu0 %v16633_v48  ;;  %12448 = vmatprep.subr.bf16.mxu1 %v16636_v51  ;;  %v16715_v48 = vld [vmem:[%s19879_s22 + $0x3c0] ss:$16 sps:$4 sm:$0xff]   ;;  %v16726_v51 = vld [vmem:[%s19879_s22 + $0x3ec] ss:$16 sps:$4 sm:$0xff]  }
 0x150   : > { %11277 = vmatmul.mubr.bf16.vlgmr.msra.gmra.mrb[0].mxu0 %v822_v54  ;;  %12438 = vmatmul.mubr.bf16.vlgmr.msra.gmra.mrb[0].mxu1 %v822_v54  ;;  %v16729_v54 = vld [vmem:[%s19879_s22 + $0x404] ss:$16 sps:$4 sm:$0xff]  }
 0x151   : > { %11288 = vmatpush1.bf16.msra.mxu0 %v16631_v52  ;;  %12449 = vmatpush1.bf16.msra.mxu1 %v16634_v53  ;;  %v16721_v52 = vld [vmem:[%s19879_s22 + $0x3e0] ss:$16 sps:$4 sm:$0xff]   ;;  %v16724_v53 = vld [vmem:[%s19879_s22 + $0x3e8] ss:$16 sps:$4 sm:$0xff]  }
 0x152   : > { %11289 = vmatprep.subr.bf16.mxu0 %v16639_v55  ;;  %12450 = vmatprep.subr.bf16.mxu1 %v16642_v56  ;;  %v716_v55 = vld [vmem:[%s19877_s4 + $0x10] sm:$0xff]  ;;  %v770_v56 = vld [vmem:[%s19877_s4 + $0x1c0] sm:$0xff] }
 0x153   : > { %11319 = vmatprep.mubr.bf16.mxu0 %v825_v17  ;;  %12480 = vmatprep.mubr.bf16.mxu1 %v825_v17  ;;  %v16762_v17 = vld [vmem:[%s19879_s22 + $0x4ac] ss:$16 sps:$4 sm:$0xff]  }
 0x155   : > { %11290 = vmatpush1.bf16.msra.mxu0 %v16637_v57  ;;  %12451 = vmatpush1.bf16.msra.mxu1 %v16640_v58  ;;  %v16732_v57 = vld [vmem:[%s19879_s22 + $0x40c] ss:$16 sps:$4 sm:$0xff]   ;;  %v16727_v58 = vld [vmem:[%s19879_s22 + $0x400] ss:$16 sps:$4 sm:$0xff]  }
 0x156   : > { %11291 = vmatprep.subr.bf16.mxu0 %v16645_v59  ;;  %12452 = vmatprep.subr.bf16.mxu1 %v16648_v60  ;;  %v16730_v59 = vld [vmem:[%s19879_s22 + $0x408] ss:$16 sps:$4 sm:$0xff]   ;;  %v824_v60 = vpack.c.bf16 %v770_v56, %v716_v55  ;;  %v16819_v56 = vld [vmem:[%s19879_s22 + $0x5e4] ss:$16 sps:$4 sm:$0xff]  }
 0x157   : > { %v16814_v55 = vld [vmem:[%s19879_s22 + $0x5c8] ss:$16 sps:$4 sm:$0xff]  }
 0x159   : > { %11292 = vmatpush1.bf16.msra.mxu0 %v16643_v61  ;;  %12453 = vmatpush1.bf16.msra.mxu1 %v16646_v62  ;;  %v16735_v61 = vld [vmem:[%s19879_s22 + $0x424] ss:$16 sps:$4 sm:$0xff]   ;;  %v16738_v62 = vld [vmem:[%s19879_s22 + $0x42c] ss:$16 sps:$4 sm:$0xff]  }
 0x15a   : > { %11293 = vmatprep.subr.bf16.mxu0 %v16651_v63  ;;  %12454 = vmatprep.subr.bf16.mxu1 %v16654_v0  ;;  %v719_v63 = vld [vmem:[%s19877_s4 + $0x28] sm:$0xff]  ;;  %v773_v0 = vld [vmem:[%s19877_s4 + $0x1d8] sm:$0xff] }
 0x15d   : > { %11294 = vmatpush1.bf16.msra.mxu0 %v16649_v1  ;;  %12455 = vmatpush1.bf16.msra.mxu1 %v16652_v2  ;;  %v16733_v1 = vld [vmem:[%s19879_s22 + $0x420] ss:$16 sps:$4 sm:$0xff]   ;;  %v16736_v2 = vld [vmem:[%s19879_s22 + $0x428] ss:$16 sps:$4 sm:$0xff]  }
 0x15e   : > { %11295 = vmatprep.subr.bf16.mxu0 %v16657_v3  ;;  %12456 = vmatprep.subr.bf16.mxu1 %v16660_v4  ;;  %v827_v3 = vpack.c.bf16 %v773_v0, %v719_v63  ;;  %v16741_v4 = vld [vmem:[%s19879_s22 + $0x444] ss:$16 sps:$4 sm:$0xff]   ;;  %v16828_v63 = vld [vmem:[%s19879_s22 + $0x60c] ss:$16 sps:$4 sm:$0xff]   ;;  %v16823_v0 = vld [vmem:[%s19879_s22 + $0x600] ss:$16 sps:$4 sm:$0xff]  }
 0x161   : > { %11296 = vmatpush1.bf16.msra.mxu0 %v16655_v5  ;;  %12457 = vmatpush1.bf16.msra.mxu1 %v16658_v6  ;;  %v16744_v5 = vld [vmem:[%s19879_s22 + $0x44c] ss:$16 sps:$4 sm:$0xff]   ;;  %v16739_v6 = vld [vmem:[%s19879_s22 + $0x440] ss:$16 sps:$4 sm:$0xff]  }
 0x162   : > { %11297 = vmatprep.subr.bf16.mxu0 %v16663_v7  ;;  %12458 = vmatprep.subr.bf16.mxu1 %v16666_v8  ;;  %v16742_v7 = vld [vmem:[%s19879_s22 + $0x448] ss:$16 sps:$4 sm:$0xff]   ;;  %v16747_v8 = vld [vmem:[%s19879_s22 + $0x464] ss:$16 sps:$4 sm:$0xff]  }
 0x165   : > { %11298 = vmatpush1.bf16.msra.mxu0 %v16661_v9  ;;  %12459 = vmatpush1.bf16.msra.mxu1 %v16664_v10  ;;  %v16750_v9 = vld [vmem:[%s19879_s22 + $0x46c] ss:$16 sps:$4 sm:$0xff]   ;;  %v16745_v10 = vld [vmem:[%s19879_s22 + $0x460] ss:$16 sps:$4 sm:$0xff]  }
 0x166   : > { %11299 = vmatprep.subr.bf16.mxu0 %v16669_v11  ;;  %12460 = vmatprep.subr.bf16.mxu1 %v16672_v12  ;;  %v16748_v11 = vld [vmem:[%s19879_s22 + $0x468] ss:$16 sps:$4 sm:$0xff]   ;;  %v16753_v12 = vld [vmem:[%s19879_s22 + $0x484] ss:$16 sps:$4 sm:$0xff]  }
 0x169   : > { %11300 = vmatpush1.bf16.msra.mxu0 %v16667_v15  ;;  %12461 = vmatpush1.bf16.msra.mxu1 %v16670_v16  ;;  %v16754_v15 = vld [vmem:[%s19879_s22 + $0x488] ss:$16 sps:$4 sm:$0xff]   ;;  %v16759_v16 = vld [vmem:[%s19879_s22 + $0x4a4] ss:$16 sps:$4 sm:$0xff]  }
 0x16a   : > { %11301 = vmatprep.subr.bf16.mxu0 %v16675_v18  ;;  %12462 = vmatprep.subr.bf16.mxu1 %v16678_v19  ;;  %v16757_v18 = vld [vmem:[%s19879_s22 + $0x4a0] ss:$16 sps:$4 sm:$0xff]   ;;  %v16760_v19 = vld [vmem:[%s19879_s22 + $0x4a8] ss:$16 sps:$4 sm:$0xff]  }
 0x16d   : > { %11302 = vmatpush1.bf16.msra.mxu0 %v16673_v20  ;;  %12463 = vmatpush1.bf16.msra.mxu1 %v16676_v21  ;;  %v16765_v20 = vld [vmem:[%s19879_s22 + $0x4c4] ss:$16 sps:$4 sm:$0xff]   ;;  %v16768_v21 = vld [vmem:[%s19879_s22 + $0x4cc] ss:$16 sps:$4 sm:$0xff]  }
 0x16e   : > { %11303 = vmatprep.subr.bf16.mxu0 %v16681_v22  ;;  %12464 = vmatprep.subr.bf16.mxu1 %v16684_v23  ;;  %v16763_v22 = vld [vmem:[%s19879_s22 + $0x4c0] ss:$16 sps:$4 sm:$0xff]   ;;  %v16766_v23 = vld [vmem:[%s19879_s22 + $0x4c8] ss:$16 sps:$4 sm:$0xff]  }
 0x171   : > { %11304 = vmatpush1.bf16.msra.mxu0 %v16679_v24  ;;  %12465 = vmatpush1.bf16.msra.mxu1 %v16682_v25  ;;  %v16771_v24 = vld [vmem:[%s19879_s22 + $0x4e4] ss:$16 sps:$4 sm:$0xff]   ;;  %v16774_v25 = vld [vmem:[%s19879_s22 + $0x4ec] ss:$16 sps:$4 sm:$0xff]  }
 0x172   : > { %11305 = vmatprep.subr.bf16.mxu0 %v16687_v26  ;;  %12466 = vmatprep.subr.bf16.mxu1 %v16690_v27  ;;  %v16769_v26 = vld [vmem:[%s19879_s22 + $0x4e0] ss:$16 sps:$4 sm:$0xff]   ;;  %v16772_v27 = vld [vmem:[%s19879_s22 + $0x4e8] ss:$16 sps:$4 sm:$0xff]  }
 0x175   : > { %11306 = vmatpush1.bf16.msra.mxu0 %v16685_v28  ;;  %12467 = vmatpush1.bf16.msra.mxu1 %v16688_v29  ;;  %v16777_v28 = vld [vmem:[%s19879_s22 + $0x504] ss:$16 sps:$4 sm:$0xff]   ;;  %v16780_v29 = vld [vmem:[%s19879_s22 + $0x50c] ss:$16 sps:$4 sm:$0xff]  }
 0x176   : > { %11307 = vmatprep.subr.bf16.mxu0 %v16693_v30  ;;  %12468 = vmatprep.subr.bf16.mxu1 %v16696_v31  ;;  %v16775_v30 = vld [vmem:[%s19879_s22 + $0x500] ss:$16 sps:$4 sm:$0xff]   ;;  %v16778_v31 = vld [vmem:[%s19879_s22 + $0x508] ss:$16 sps:$4 sm:$0xff]  }
 0x179   : > { %11308 = vmatpush1.bf16.msra.mxu0 %v16691_v32  ;;  %12469 = vmatpush1.bf16.msra.mxu1 %v16694_v33  ;;  %v16783_v32 = vld [vmem:[%s19879_s22 + $0x524] ss:$16 sps:$4 sm:$0xff]   ;;  %v16786_v33 = vld [vmem:[%s19879_s22 + $0x52c] ss:$16 sps:$4 sm:$0xff]  }
 0x17a   : > { %11309 = vmatprep.subr.bf16.mxu0 %v16699_v34  ;;  %12470 = vmatprep.subr.bf16.mxu1 %v16702_v35  ;;  %v16781_v34 = vld [vmem:[%s19879_s22 + $0x520] ss:$16 sps:$4 sm:$0xff]   ;;  %v16784_v35 = vld [vmem:[%s19879_s22 + $0x528] ss:$16 sps:$4 sm:$0xff]  }
 0x17d   : > { %11310 = vmatpush1.bf16.msra.mxu0 %v16697_v36  ;;  %12471 = vmatpush1.bf16.msra.mxu1 %v16700_v37  ;;  %v16789_v36 = vld [vmem:[%s19879_s22 + $0x544] ss:$16 sps:$4 sm:$0xff]   ;;  %v16792_v37 = vld [vmem:[%s19879_s22 + $0x54c] ss:$16 sps:$4 sm:$0xff]  }
 0x17e   : > { %11311 = vmatprep.subr.bf16.mxu0 %v16705_v38  ;;  %12472 = vmatprep.subr.bf16.mxu1 %v16708_v39  ;;  %v16787_v38 = vld [vmem:[%s19879_s22 + $0x540] ss:$16 sps:$4 sm:$0xff]   ;;  %v16790_v39 = vld [vmem:[%s19879_s22 + $0x548] ss:$16 sps:$4 sm:$0xff]  }
 0x181   : > { %11312 = vmatpush1.bf16.msra.mxu0 %v16703_v40  ;;  %12473 = vmatpush1.bf16.msra.mxu1 %v16706_v41  ;;  %v16795_v40 = vld [vmem:[%s19879_s22 + $0x564] ss:$16 sps:$4 sm:$0xff]   ;;  %v16798_v41 = vld [vmem:[%s19879_s22 + $0x56c] ss:$16 sps:$4 sm:$0xff]  }
 0x182   : > { %11313 = vmatprep.subr.bf16.mxu0 %v16711_v42  ;;  %12474 = vmatprep.subr.bf16.mxu1 %v16714_v43  ;;  %v16793_v42 = vld [vmem:[%s19879_s22 + $0x560] ss:$16 sps:$4 sm:$0xff]   ;;  %v16796_v43 = vld [vmem:[%s19879_s22 + $0x568] ss:$16 sps:$4 sm:$0xff]  }
 0x185   : > { %11314 = vmatpush1.bf16.msra.mxu0 %v16709_v44  ;;  %12475 = vmatpush1.bf16.msra.mxu1 %v16712_v45  ;;  %v16801_v44 = vld [vmem:[%s19879_s22 + $0x584] ss:$16 sps:$4 sm:$0xff]   ;;  %v16804_v45 = vld [vmem:[%s19879_s22 + $0x58c] ss:$16 sps:$4 sm:$0xff]  }
 0x186   : > { %11315 = vmatprep.subr.bf16.mxu0 %v16717_v46  ;;  %12476 = vmatprep.subr.bf16.mxu1 %v16720_v47  ;;  %v16799_v46 = vld [vmem:[%s19879_s22 + $0x580] ss:$16 sps:$4 sm:$0xff]   ;;  %v16802_v47 = vld [vmem:[%s19879_s22 + $0x588] ss:$16 sps:$4 sm:$0xff]  }
 0x189   : > { %11316 = vmatpush1.bf16.msra.mxu0 %v16715_v48  ;;  %12477 = vmatpush1.bf16.msra.mxu1 %v16718_v49  ;;  %v16807_v48 = vld [vmem:[%s19879_s22 + $0x5a4] ss:$16 sps:$4 sm:$0xff]   ;;  %v16810_v49 = vld [vmem:[%s19879_s22 + $0x5ac] ss:$16 sps:$4 sm:$0xff]  }
 0x18a   : > { %11317 = vmatprep.subr.bf16.mxu0 %v16723_v50  ;;  %12478 = vmatprep.subr.bf16.mxu1 %v16726_v51  ;;  %v16805_v50 = vld [vmem:[%s19879_s22 + $0x5a0] ss:$16 sps:$4 sm:$0xff]   ;;  %v16808_v51 = vld [vmem:[%s19879_s22 + $0x5a8] ss:$16 sps:$4 sm:$0xff]  }
 0x18d   : > { %11318 = vmatpush1.bf16.msra.mxu0 %v16721_v52  ;;  %12479 = vmatpush1.bf16.msra.mxu1 %v16724_v53  ;;  %v16813_v52 = vld [vmem:[%s19879_s22 + $0x5c4] ss:$16 sps:$4 sm:$0xff]   ;;  %v16816_v53 = vld [vmem:[%s19879_s22 + $0x5cc] ss:$16 sps:$4 sm:$0xff]  }
 0x18e   : > { %11330 = vmatprep.subr.bf16.mxu0 %v16729_v54  ;;  %12491 = vmatprep.subr.bf16.mxu1 %v16732_v57  ;;  %v16811_v54 = vld [vmem:[%s19879_s22 + $0x5c0] ss:$16 sps:$4 sm:$0xff]   ;;  %v16822_v57 = vld [vmem:[%s19879_s22 + $0x5ec] ss:$16 sps:$4 sm:$0xff]  }
 0x190   : > { %11320 = vmatmul.mubr.bf16.vlgmr.msra.gmra.mrb[0].mxu0 %v824_v60  ;;  %12481 = vmatmul.mubr.bf16.vlgmr.msra.gmra.mrb[0].mxu1 %v824_v60  ;;  %v16825_v60 = vld [vmem:[%s19879_s22 + $0x604] ss:$16 sps:$4 sm:$0xff]  }
 0x191   : > { %11331 = vmatpush1.bf16.msra.mxu0 %v16727_v58  ;;  %12492 = vmatpush1.bf16.msra.mxu1 %v16730_v59  ;;  %v16817_v58 = vld [vmem:[%s19879_s22 + $0x5e0] ss:$16 sps:$4 sm:$0xff]   ;;  %v16820_v59 = vld [vmem:[%s19879_s22 + $0x5e8] ss:$16 sps:$4 sm:$0xff]  }
 0x192   : > { %11332 = vmatprep.subr.bf16.mxu0 %v16735_v61  ;;  %12493 = vmatprep.subr.bf16.mxu1 %v16738_v62  ;;  %v718_v61 = vld [vmem:[%s19877_s4 + $0x20] sm:$0xff]  ;;  %v772_v62 = vld [vmem:[%s19877_s4 + $0x1d0] sm:$0xff] }
 0x193   : > { %11362 = vmatprep.mubr.bf16.mxu0 %v827_v3  ;;  %12523 = vmatprep.mubr.bf16.mxu1 %v827_v3  ;;  %v721_v3 = vld [vmem:[%s19877_s4 + $0x38] sm:$0xff] }
 0x195   : > { %11333 = vmatpush1.bf16.msra.mxu0 %v16733_v1  ;;  %12494 = vmatpush1.bf16.msra.mxu1 %v16736_v2  ;;  %v16826_v1 = vld [vmem:[%s19879_s22 + $0x608] ss:$16 sps:$4 sm:$0xff]   ;;  %v826_v2 = vpack.c.bf16 %v772_v62, %v718_v61  ;;  %v16915_v62 = vld [vmem:[%s19879_s22 + $0x7e4] ss:$16 sps:$4 sm:$0xff]  }
 0x196   : > { %11334 = vmatprep.subr.bf16.mxu0 %v16741_v4  ;;  %12495 = vmatprep.subr.bf16.mxu1 %v16744_v5  ;;  %v775_v4 = vld [vmem:[%s19877_s4 + $0x1e8] sm:$0xff]  ;;  %v16831_v5 = vld [vmem:[%s19879_s22 + $0x624] ss:$16 sps:$4 sm:$0xff]  }
 0x197   : > { %v16910_v61 = vld [vmem:[%s19879_s22 + $0x7c8] ss:$16 sps:$4 sm:$0xff]  }
 0x199   : > { %11335 = vmatpush1.bf16.msra.mxu0 %v16739_v6  ;;  %12496 = vmatpush1.bf16.msra.mxu1 %v16742_v7  ;;  %v16834_v6 = vld [vmem:[%s19879_s22 + $0x62c] ss:$16 sps:$4 sm:$0xff]   ;;  %v829_v7 = vpack.c.bf16 %v775_v4, %v721_v3  ;;  %v720_v3 = vld [vmem:[%s19877_s4 + $0x30] sm:$0xff]  ;;  %v774_v4 = vld [vmem:[%s19877_s4 + $0x1e0] sm:$0xff] }
 0x19a   : > { %11336 = vmatprep.subr.bf16.mxu0 %v16747_v8  ;;  %12497 = vmatprep.subr.bf16.mxu1 %v16750_v9  ;;  %v16829_v8 = vld [vmem:[%s19879_s22 + $0x620] ss:$16 sps:$4 sm:$0xff]   ;;  %v16832_v9 = vld [vmem:[%s19879_s22 + $0x628] ss:$16 sps:$4 sm:$0xff]  }
 0x19d   : > { %11337 = vmatpush1.bf16.msra.mxu0 %v16745_v10  ;;  %12498 = vmatpush1.bf16.msra.mxu1 %v16748_v11  ;;  %v16837_v10 = vld [vmem:[%s19879_s22 + $0x644] ss:$16 sps:$4 sm:$0xff]   ;;  %v16840_v11 = vld [vmem:[%s19879_s22 + $0x64c] ss:$16 sps:$4 sm:$0xff]  }
 0x19e   : > { %11338 = vmatprep.subr.bf16.mxu0 %v16753_v12  ;;  %12499 = vmatprep.subr.bf16.mxu1 %v16756_v13  ;;  %v16835_v12 = vld [vmem:[%s19879_s22 + $0x640] ss:$16 sps:$4 sm:$0xff]   ;;  %v16838_v13 = vld [vmem:[%s19879_s22 + $0x648] ss:$16 sps:$4 sm:$0xff]  }
 0x1a1   : > { %11339 = vmatpush1.bf16.msra.mxu0 %v16751_v14  ;;  %12500 = vmatpush1.bf16.msra.mxu1 %v16754_v15  ;;  %v16843_v14 = vld [vmem:[%s19879_s22 + $0x664] ss:$16 sps:$4 sm:$0xff]   ;;  %v16846_v15 = vld [vmem:[%s19879_s22 + $0x66c] ss:$16 sps:$4 sm:$0xff]  }
 0x1a2   : > { %11340 = vmatprep.subr.bf16.mxu0 %v16759_v16  ;;  %12501 = vmatprep.subr.bf16.mxu1 %v16762_v17  ;;  %v16841_v16 = vld [vmem:[%s19879_s22 + $0x660] ss:$16 sps:$4 sm:$0xff]   ;;  %v16844_v17 = vld [vmem:[%s19879_s22 + $0x668] ss:$16 sps:$4 sm:$0xff]  }
 0x1a5   : > { %11341 = vmatpush1.bf16.msra.mxu0 %v16757_v18  ;;  %12502 = vmatpush1.bf16.msra.mxu1 %v16760_v19  ;;  %v16849_v18 = vld [vmem:[%s19879_s22 + $0x684] ss:$16 sps:$4 sm:$0xff]   ;;  %v16852_v19 = vld [vmem:[%s19879_s22 + $0x68c] ss:$16 sps:$4 sm:$0xff]  }
 0x1a6   : > { %11342 = vmatprep.subr.bf16.mxu0 %v16765_v20  ;;  %12503 = vmatprep.subr.bf16.mxu1 %v16768_v21  ;;  %v16847_v20 = vld [vmem:[%s19879_s22 + $0x680] ss:$16 sps:$4 sm:$0xff]   ;;  %v16850_v21 = vld [vmem:[%s19879_s22 + $0x688] ss:$16 sps:$4 sm:$0xff]  }
 0x1a9   : > { %11343 = vmatpush1.bf16.msra.mxu0 %v16763_v22  ;;  %12504 = vmatpush1.bf16.msra.mxu1 %v16766_v23  ;;  %v16855_v22 = vld [vmem:[%s19879_s22 + $0x6a4] ss:$16 sps:$4 sm:$0xff]   ;;  %v16858_v23 = vld [vmem:[%s19879_s22 + $0x6ac] ss:$16 sps:$4 sm:$0xff]  }
 0x1aa   : > { %11344 = vmatprep.subr.bf16.mxu0 %v16771_v24  ;;  %12505 = vmatprep.subr.bf16.mxu1 %v16774_v25  ;;  %v16853_v24 = vld [vmem:[%s19879_s22 + $0x6a0] ss:$16 sps:$4 sm:$0xff]   ;;  %v16856_v25 = vld [vmem:[%s19879_s22 + $0x6a8] ss:$16 sps:$4 sm:$0xff]  }
 0x1ad   : > { %11345 = vmatpush1.bf16.msra.mxu0 %v16769_v26  ;;  %12506 = vmatpush1.bf16.msra.mxu1 %v16772_v27  ;;  %v16861_v26 = vld [vmem:[%s19879_s22 + $0x6c4] ss:$16 sps:$4 sm:$0xff]   ;;  %v16864_v27 = vld [vmem:[%s19879_s22 + $0x6cc] ss:$16 sps:$4 sm:$0xff]  }
 0x1ae   : > { %11346 = vmatprep.subr.bf16.mxu0 %v16777_v28  ;;  %12507 = vmatprep.subr.bf16.mxu1 %v16780_v29  ;;  %v16859_v28 = vld [vmem:[%s19879_s22 + $0x6c0] ss:$16 sps:$4 sm:$0xff]   ;;  %v16862_v29 = vld [vmem:[%s19879_s22 + $0x6c8] ss:$16 sps:$4 sm:$0xff]  }
 0x1b1   : > { %11347 = vmatpush1.bf16.msra.mxu0 %v16775_v30  ;;  %12508 = vmatpush1.bf16.msra.mxu1 %v16778_v31  ;;  %v16867_v30 = vld [vmem:[%s19879_s22 + $0x6e4] ss:$16 sps:$4 sm:$0xff]   ;;  %v16870_v31 = vld [vmem:[%s19879_s22 + $0x6ec] ss:$16 sps:$4 sm:$0xff]  }
 0x1b2   : > { %11348 = vmatprep.subr.bf16.mxu0 %v16783_v32  ;;  %12509 = vmatprep.subr.bf16.mxu1 %v16786_v33  ;;  %v16865_v32 = vld [vmem:[%s19879_s22 + $0x6e0] ss:$16 sps:$4 sm:$0xff]   ;;  %v16868_v33 = vld [vmem:[%s19879_s22 + $0x6e8] ss:$16 sps:$4 sm:$0xff]  }
 0x1b5   : > { %11349 = vmatpush1.bf16.msra.mxu0 %v16781_v34  ;;  %12510 = vmatpush1.bf16.msra.mxu1 %v16784_v35  ;;  %v16873_v34 = vld [vmem:[%s19879_s22 + $0x704] ss:$16 sps:$4 sm:$0xff]   ;;  %v16876_v35 = vld [vmem:[%s19879_s22 + $0x70c] ss:$16 sps:$4 sm:$0xff]  }
 0x1b6   : > { %11350 = vmatprep.subr.bf16.mxu0 %v16789_v36  ;;  %12511 = vmatprep.subr.bf16.mxu1 %v16792_v37  ;;  %v16871_v36 = vld [vmem:[%s19879_s22 + $0x700] ss:$16 sps:$4 sm:$0xff]   ;;  %v16874_v37 = vld [vmem:[%s19879_s22 + $0x708] ss:$16 sps:$4 sm:$0xff]  }
 0x1b9   : > { %11351 = vmatpush1.bf16.msra.mxu0 %v16787_v38  ;;  %12512 = vmatpush1.bf16.msra.mxu1 %v16790_v39  ;;  %v16879_v38 = vld [vmem:[%s19879_s22 + $0x724] ss:$16 sps:$4 sm:$0xff]   ;;  %v16882_v39 = vld [vmem:[%s19879_s22 + $0x72c] ss:$16 sps:$4 sm:$0xff]  }
 0x1ba   : > { %11352 = vmatprep.subr.bf16.mxu0 %v16795_v40  ;;  %12513 = vmatprep.subr.bf16.mxu1 %v16798_v41  ;;  %v16877_v40 = vld [vmem:[%s19879_s22 + $0x720] ss:$16 sps:$4 sm:$0xff]   ;;  %v16880_v41 = vld [vmem:[%s19879_s22 + $0x728] ss:$16 sps:$4 sm:$0xff]  }
 0x1bd   : > { %11353 = vmatpush1.bf16.msra.mxu0 %v16793_v42  ;;  %12514 = vmatpush1.bf16.msra.mxu1 %v16796_v43  ;;  %v16885_v42 = vld [vmem:[%s19879_s22 + $0x744] ss:$16 sps:$4 sm:$0xff]   ;;  %v16888_v43 = vld [vmem:[%s19879_s22 + $0x74c] ss:$16 sps:$4 sm:$0xff]  }
 0x1be   : > { %11354 = vmatprep.subr.bf16.mxu0 %v16801_v44  ;;  %12515 = vmatprep.subr.bf16.mxu1 %v16804_v45  ;;  %v16883_v44 = vld [vmem:[%s19879_s22 + $0x740] ss:$16 sps:$4 sm:$0xff]   ;;  %v16886_v45 = vld [vmem:[%s19879_s22 + $0x748] ss:$16 sps:$4 sm:$0xff]  }
 0x1c1   : > { %11355 = vmatpush1.bf16.msra.mxu0 %v16799_v46  ;;  %12516 = vmatpush1.bf16.msra.mxu1 %v16802_v47  ;;  %v16891_v46 = vld [vmem:[%s19879_s22 + $0x764] ss:$16 sps:$4 sm:$0xff]   ;;  %v16894_v47 = vld [vmem:[%s19879_s22 + $0x76c] ss:$16 sps:$4 sm:$0xff]  }
 0x1c2   : > { %11356 = vmatprep.subr.bf16.mxu0 %v16807_v48  ;;  %12517 = vmatprep.subr.bf16.mxu1 %v16810_v49  ;;  %v16889_v48 = vld [vmem:[%s19879_s22 + $0x760] ss:$16 sps:$4 sm:$0xff]   ;;  %v16892_v49 = vld [vmem:[%s19879_s22 + $0x768] ss:$16 sps:$4 sm:$0xff]  }
 0x1c5   : > { %11357 = vmatpush1.bf16.msra.mxu0 %v16805_v50  ;;  %12518 = vmatpush1.bf16.msra.mxu1 %v16808_v51  ;;  %v16897_v50 = vld [vmem:[%s19879_s22 + $0x784] ss:$16 sps:$4 sm:$0xff]   ;;  %v16900_v51 = vld [vmem:[%s19879_s22 + $0x78c] ss:$16 sps:$4 sm:$0xff]  }
 0x1c6   : > { %11358 = vmatprep.subr.bf16.mxu0 %v16813_v52  ;;  %12519 = vmatprep.subr.bf16.mxu1 %v16816_v53  ;;  %v16895_v52 = vld [vmem:[%s19879_s22 + $0x780] ss:$16 sps:$4 sm:$0xff]   ;;  %v16898_v53 = vld [vmem:[%s19879_s22 + $0x788] ss:$16 sps:$4 sm:$0xff]  }
 0x1c9   : > { %11359 = vmatpush1.bf16.msra.mxu0 %v16811_v54  ;;  %12520 = vmatpush1.bf16.msra.mxu1 %v16814_v55  ;;  %v16903_v54 = vld [vmem:[%s19879_s22 + $0x7a4] ss:$16 sps:$4 sm:$0xff]   ;;  %v16906_v55 = vld [vmem:[%s19879_s22 + $0x7ac] ss:$16 sps:$4 sm:$0xff]  }
 0x1ca   : > { %11360 = vmatprep.subr.bf16.mxu0 %v16819_v56  ;;  %12521 = vmatprep.subr.bf16.mxu1 %v16822_v57  ;;  %v16901_v56 = vld [vmem:[%s19879_s22 + $0x7a0] ss:$16 sps:$4 sm:$0xff]   ;;  %v16904_v57 = vld [vmem:[%s19879_s22 + $0x7a8] ss:$16 sps:$4 sm:$0xff]  }
 0x1cd   : > { %11361 = vmatpush1.bf16.msra.mxu0 %v16817_v58  ;;  %12522 = vmatpush1.bf16.msra.mxu1 %v16820_v59  ;;  %v16909_v58 = vld [vmem:[%s19879_s22 + $0x7c4] ss:$16 sps:$4 sm:$0xff]   ;;  %v16912_v59 = vld [vmem:[%s19879_s22 + $0x7cc] ss:$16 sps:$4 sm:$0xff]  }
 0x1ce   : > { %11373 = vmatprep.subr.bf16.mxu0 %v16825_v60  ;;  %12534 = vmatprep.subr.bf16.mxu1 %v16828_v63  ;;  %v16907_v60 = vld [vmem:[%s19879_s22 + $0x7c0] ss:$16 sps:$4 sm:$0xff]   ;;  %v16918_v63 = vld [vmem:[%s19879_s22 + $0x7ec] ss:$16 sps:$4 sm:$0xff]  }
 0x1d0   : > { %11363 = vmatmul.mubr.bf16.vlgmr.msra.gmra.mrb[0].mxu0 %v826_v2  ;;  %12524 = vmatmul.mubr.bf16.vlgmr.msra.gmra.mrb[0].mxu1 %v826_v2  ;;  %v16921_v2 = vld [vmem:[%s19879_s22 + $0x804] ss:$16 sps:$4 sm:$0xff]  }
 0x1d1   : > { %11374 = vmatpush1.bf16.msra.mxu0 %v16823_v0  ;;  %12535 = vmatpush1.bf16.msra.mxu1 %v16826_v1  ;;  %v16913_v0 = vld [vmem:[%s19879_s22 + $0x7e0] ss:$16 sps:$4 sm:$0xff]   ;;  %v16916_v1 = vld [vmem:[%s19879_s22 + $0x7e8] ss:$16 sps:$4 sm:$0xff]  }
 0x1d2   : > { %11375 = vmatprep.subr.bf16.mxu0 %v16831_v5  ;;  %12536 = vmatprep.subr.bf16.mxu1 %v16834_v6  ;;  %v16924_v5 = vld [vmem:[%s19879_s22 + $0x80c] ss:$16 sps:$4 sm:$0xff]   ;;  %v16919_v6 = vld [vmem:[%s19879_s22 + $0x800] ss:$16 sps:$4 sm:$0xff]  }
 0x1d3   : > { %11405 = vmatprep.mubr.bf16.mxu0 %v829_v7  ;;  %12566 = vmatprep.mubr.bf16.mxu1 %v829_v7  ;;  %v16922_v7 = vld [vmem:[%s19879_s22 + $0x808] ss:$16 sps:$4 sm:$0xff]  }
 0x1d5   : > { %11376 = vmatpush1.bf16.msra.mxu0 %v16829_v8  ;;  %12537 = vmatpush1.bf16.msra.mxu1 %v16832_v9  ;;  %v828_v8 = vpack.c.bf16 %v774_v4, %v720_v3  ;;  %v723_v9 = vld [vmem:[%s19877_s4 + $0x48] sm:$0xff]  ;;  %v17011_v4 = vld [vmem:[%s19879_s22 + $0x9e4] ss:$16 sps:$4 sm:$0xff]  }
 0x1d6   : > { %11377 = vmatprep.subr.bf16.mxu0 %v16837_v10  ;;  %12538 = vmatprep.subr.bf16.mxu1 %v16840_v11  ;;  %v777_v10 = vld [vmem:[%s19877_s4 + $0x1f8] sm:$0xff]  ;;  %v16927_v11 = vld [vmem:[%s19879_s22 + $0x824] ss:$16 sps:$4 sm:$0xff]  }
 0x1d7   : > { %v17006_v3 = vld [vmem:[%s19879_s22 + $0x9c8] ss:$16 sps:$4 sm:$0xff]  }
 0x1d9   : > { %11378 = vmatpush1.bf16.msra.mxu0 %v16835_v12  ;;  %12539 = vmatpush1.bf16.msra.mxu1 %v16838_v13  ;;  %v16930_v12 = vld [vmem:[%s19879_s22 + $0x82c] ss:$16 sps:$4 sm:$0xff]   ;;  %v831_v13 = vpack.c.bf16 %v777_v10, %v723_v9  ;;  %v722_v10 = vld [vmem:[%s19877_s4 + $0x40] sm:$0xff] }
 0x1da   : > { %11379 = vmatprep.subr.bf16.mxu0 %v16843_v14  ;;  %12540 = vmatprep.subr.bf16.mxu1 %v16846_v15  ;;  %v16925_v14 = vld [vmem:[%s19879_s22 + $0x820] ss:$16 sps:$4 sm:$0xff]   ;;  %v16928_v15 = vld [vmem:[%s19879_s22 + $0x828] ss:$16 sps:$4 sm:$0xff]   ;;  %v17020_v9 = vld [vmem:[%s19879_s22 + $0xa0c] ss:$16 sps:$4 sm:$0xff]  }
 0x1dd   : > { %11380 = vmatpush1.bf16.msra.mxu0 %v16841_v16  ;;  %12541 = vmatpush1.bf16.msra.mxu1 %v16844_v17  ;;  %v16933_v16 = vld [vmem:[%s19879_s22 + $0x844] ss:$16 sps:$4 sm:$0xff]   ;;  %v16936_v17 = vld [vmem:[%s19879_s22 + $0x84c] ss:$16 sps:$4 sm:$0xff]  }
 0x1de   : > { %11381 = vmatprep.subr.bf16.mxu0 %v16849_v18  ;;  %12542 = vmatprep.subr.bf16.mxu1 %v16852_v19  ;;  %v16931_v18 = vld [vmem:[%s19879_s22 + $0x840] ss:$16 sps:$4 sm:$0xff]   ;;  %v16934_v19 = vld [vmem:[%s19879_s22 + $0x848] ss:$16 sps:$4 sm:$0xff]  }
 0x1e1   : > { %11382 = vmatpush1.bf16.msra.mxu0 %v16847_v20  ;;  %12543 = vmatpush1.bf16.msra.mxu1 %v16850_v21  ;;  %v16939_v20 = vld [vmem:[%s19879_s22 + $0x864] ss:$16 sps:$4 sm:$0xff]   ;;  %v16942_v21 = vld [vmem:[%s19879_s22 + $0x86c] ss:$16 sps:$4 sm:$0xff]  }
 0x1e2   : > { %11383 = vmatprep.subr.bf16.mxu0 %v16855_v22  ;;  %12544 = vmatprep.subr.bf16.mxu1 %v16858_v23  ;;  %v16937_v22 = vld [vmem:[%s19879_s22 + $0x860] ss:$16 sps:$4 sm:$0xff]   ;;  %v16940_v23 = vld [vmem:[%s19879_s22 + $0x868] ss:$16 sps:$4 sm:$0xff]  }
 0x1e5   : > { %11384 = vmatpush1.bf16.msra.mxu0 %v16853_v24  ;;  %12545 = vmatpush1.bf16.msra.mxu1 %v16856_v25  ;;  %v16945_v24 = vld [vmem:[%s19879_s22 + $0x884] ss:$16 sps:$4 sm:$0xff]   ;;  %v16948_v25 = vld [vmem:[%s19879_s22 + $0x88c] ss:$16 sps:$4 sm:$0xff]  }
 0x1e6   : > { %11385 = vmatprep.subr.bf16.mxu0 %v16861_v26  ;;  %12546 = vmatprep.subr.bf16.mxu1 %v16864_v27  ;;  %v16943_v26 = vld [vmem:[%s19879_s22 + $0x880] ss:$16 sps:$4 sm:$0xff]   ;;  %v16946_v27 = vld [vmem:[%s19879_s22 + $0x888] ss:$16 sps:$4 sm:$0xff]  }
 0x1e9   : > { %11386 = vmatpush1.bf16.msra.mxu0 %v16859_v28  ;;  %12547 = vmatpush1.bf16.msra.mxu1 %v16862_v29  ;;  %v16951_v28 = vld [vmem:[%s19879_s22 + $0x8a4] ss:$16 sps:$4 sm:$0xff]   ;;  %v16954_v29 = vld [vmem:[%s19879_s22 + $0x8ac] ss:$16 sps:$4 sm:$0xff]  }
 0x1ea   : > { %11387 = vmatprep.subr.bf16.mxu0 %v16867_v30  ;;  %12548 = vmatprep.subr.bf16.mxu1 %v16870_v31  ;;  %v16949_v30 = vld [vmem:[%s19879_s22 + $0x8a0] ss:$16 sps:$4 sm:$0xff]   ;;  %v16952_v31 = vld [vmem:[%s19879_s22 + $0x8a8] ss:$16 sps:$4 sm:$0xff]  }
 0x1ed   : > { %11388 = vmatpush1.bf16.msra.mxu0 %v16865_v32  ;;  %12549 = vmatpush1.bf16.msra.mxu1 %v16868_v33  ;;  %v16957_v32 = vld [vmem:[%s19879_s22 + $0x8c4] ss:$16 sps:$4 sm:$0xff]   ;;  %v16960_v33 = vld [vmem:[%s19879_s22 + $0x8cc] ss:$16 sps:$4 sm:$0xff]  }
 0x1ee   : > { %11389 = vmatprep.subr.bf16.mxu0 %v16873_v34  ;;  %12550 = vmatprep.subr.bf16.mxu1 %v16876_v35  ;;  %v16955_v34 = vld [vmem:[%s19879_s22 + $0x8c0] ss:$16 sps:$4 sm:$0xff]   ;;  %v16958_v35 = vld [vmem:[%s19879_s22 + $0x8c8] ss:$16 sps:$4 sm:$0xff]  }
 0x1f1   : > { %11390 = vmatpush1.bf16.msra.mxu0 %v16871_v36  ;;  %12551 = vmatpush1.bf16.msra.mxu1 %v16874_v37  ;;  %v16963_v36 = vld [vmem:[%s19879_s22 + $0x8e4] ss:$16 sps:$4 sm:$0xff]   ;;  %v16966_v37 = vld [vmem:[%s19879_s22 + $0x8ec] ss:$16 sps:$4 sm:$0xff]  }
 0x1f2   : > { %11391 = vmatprep.subr.bf16.mxu0 %v16879_v38  ;;  %12552 = vmatprep.subr.bf16.mxu1 %v16882_v39  ;;  %v16961_v38 = vld [vmem:[%s19879_s22 + $0x8e0] ss:$16 sps:$4 sm:$0xff]   ;;  %v16964_v39 = vld [vmem:[%s19879_s22 + $0x8e8] ss:$16 sps:$4 sm:$0xff]  }
 0x1f5   : > { %11392 = vmatpush1.bf16.msra.mxu0 %v16877_v40  ;;  %12553 = vmatpush1.bf16.msra.mxu1 %v16880_v41  ;;  %v16969_v40 = vld [vmem:[%s19879_s22 + $0x904] ss:$16 sps:$4 sm:$0xff]   ;;  %v16972_v41 = vld [vmem:[%s19879_s22 + $0x90c] ss:$16 sps:$4 sm:$0xff]  }
 0x1f6   : > { %11393 = vmatprep.subr.bf16.mxu0 %v16885_v42  ;;  %12554 = vmatprep.subr.bf16.mxu1 %v16888_v43  ;;  %v16967_v42 = vld [vmem:[%s19879_s22 + $0x900] ss:$16 sps:$4 sm:$0xff]   ;;  %v16970_v43 = vld [vmem:[%s19879_s22 + $0x908] ss:$16 sps:$4 sm:$0xff]  }
 0x1f9   : > { %11394 = vmatpush1.bf16.msra.mxu0 %v16883_v44  ;;  %12555 = vmatpush1.bf16.msra.mxu1 %v16886_v45  ;;  %v16975_v44 = vld [vmem:[%s19879_s22 + $0x924] ss:$16 sps:$4 sm:$0xff]   ;;  %v16978_v45 = vld [vmem:[%s19879_s22 + $0x92c] ss:$16 sps:$4 sm:$0xff]  }
 0x1fa   : > { %11395 = vmatprep.subr.bf16.mxu0 %v16891_v46  ;;  %12556 = vmatprep.subr.bf16.mxu1 %v16894_v47  ;;  %v16973_v46 = vld [vmem:[%s19879_s22 + $0x920] ss:$16 sps:$4 sm:$0xff]   ;;  %v16976_v47 = vld [vmem:[%s19879_s22 + $0x928] ss:$16 sps:$4 sm:$0xff]  }
 0x1fd   : > { %11396 = vmatpush1.bf16.msra.mxu0 %v16889_v48  ;;  %12557 = vmatpush1.bf16.msra.mxu1 %v16892_v49  ;;  %v16981_v48 = vld [vmem:[%s19879_s22 + $0x944] ss:$16 sps:$4 sm:$0xff]   ;;  %v16984_v49 = vld [vmem:[%s19879_s22 + $0x94c] ss:$16 sps:$4 sm:$0xff]  }
 0x1fe   : > { %11397 = vmatprep.subr.bf16.mxu0 %v16897_v50  ;;  %12558 = vmatprep.subr.bf16.mxu1 %v16900_v51  ;;  %v16979_v50 = vld [vmem:[%s19879_s22 + $0x940] ss:$16 sps:$4 sm:$0xff]   ;;  %v16982_v51 = vld [vmem:[%s19879_s22 + $0x948] ss:$16 sps:$4 sm:$0xff]  }
 0x201   : > { %11398 = vmatpush1.bf16.msra.mxu0 %v16895_v52  ;;  %12559 = vmatpush1.bf16.msra.mxu1 %v16898_v53  ;;  %v16987_v52 = vld [vmem:[%s19879_s22 + $0x964] ss:$16 sps:$4 sm:$0xff]   ;;  %v16990_v53 = vld [vmem:[%s19879_s22 + $0x96c] ss:$16 sps:$4 sm:$0xff]  }
 0x202   : > { %11399 = vmatprep.subr.bf16.mxu0 %v16903_v54  ;;  %12560 = vmatprep.subr.bf16.mxu1 %v16906_v55  ;;  %v16985_v54 = vld [vmem:[%s19879_s22 + $0x960] ss:$16 sps:$4 sm:$0xff]   ;;  %v16988_v55 = vld [vmem:[%s19879_s22 + $0x968] ss:$16 sps:$4 sm:$0xff]  }
 0x205   : > { %11400 = vmatpush1.bf16.msra.mxu0 %v16901_v56  ;;  %12561 = vmatpush1.bf16.msra.mxu1 %v16904_v57  ;;  %v16993_v56 = vld [vmem:[%s19879_s22 + $0x984] ss:$16 sps:$4 sm:$0xff]   ;;  %v16996_v57 = vld [vmem:[%s19879_s22 + $0x98c] ss:$16 sps:$4 sm:$0xff]  }
 0x206   : > { %11401 = vmatprep.subr.bf16.mxu0 %v16909_v58  ;;  %12562 = vmatprep.subr.bf16.mxu1 %v16912_v59  ;;  %v16991_v58 = vld [vmem:[%s19879_s22 + $0x980] ss:$16 sps:$4 sm:$0xff]   ;;  %v16994_v59 = vld [vmem:[%s19879_s22 + $0x988] ss:$16 sps:$4 sm:$0xff]  }
 0x209   : > { %11402 = vmatpush1.bf16.msra.mxu0 %v16907_v60  ;;  %12563 = vmatpush1.bf16.msra.mxu1 %v16910_v61  ;;  %v16999_v60 = vld [vmem:[%s19879_s22 + $0x9a4] ss:$16 sps:$4 sm:$0xff]   ;;  %v17002_v61 = vld [vmem:[%s19879_s22 + $0x9ac] ss:$16 sps:$4 sm:$0xff]  }
 0x20a   : > { %11403 = vmatprep.subr.bf16.mxu0 %v16915_v62  ;;  %12564 = vmatprep.subr.bf16.mxu1 %v16918_v63  ;;  %v16997_v62 = vld [vmem:[%s19879_s22 + $0x9a0] ss:$16 sps:$4 sm:$0xff]   ;;  %v17000_v63 = vld [vmem:[%s19879_s22 + $0x9a8] ss:$16 sps:$4 sm:$0xff]  }
 0x20d   : > { %11404 = vmatpush1.bf16.msra.mxu0 %v16913_v0  ;;  %12565 = vmatpush1.bf16.msra.mxu1 %v16916_v1  ;;  %v17005_v0 = vld [vmem:[%s19879_s22 + $0x9c4] ss:$16 sps:$4 sm:$0xff]   ;;  %v17008_v1 = vld [vmem:[%s19879_s22 + $0x9cc] ss:$16 sps:$4 sm:$0xff]  }
 0x20e   : > { %11416 = vmatprep.subr.bf16.mxu0 %v16921_v2  ;;  %12577 = vmatprep.subr.bf16.mxu1 %v16924_v5  ;;  %v17003_v2 = vld [vmem:[%s19879_s22 + $0x9c0] ss:$16 sps:$4 sm:$0xff]   ;;  %v17014_v5 = vld [vmem:[%s19879_s22 + $0x9ec] ss:$16 sps:$4 sm:$0xff]  }
 0x210   : > { %11406 = vmatmul.mubr.bf16.vlgmr.msra.gmra.mrb[0].mxu0 %v828_v8  ;;  %12567 = vmatmul.mubr.bf16.vlgmr.msra.gmra.mrb[0].mxu1 %v828_v8  ;;  %v17017_v8 = vld [vmem:[%s19879_s22 + $0xa04] ss:$16 sps:$4 sm:$0xff]  }
 0x211   : > { %11417 = vmatpush1.bf16.msra.mxu0 %v16919_v6  ;;  %12578 = vmatpush1.bf16.msra.mxu1 %v16922_v7  ;;  %v17009_v6 = vld [vmem:[%s19879_s22 + $0x9e0] ss:$16 sps:$4 sm:$0xff]   ;;  %v17012_v7 = vld [vmem:[%s19879_s22 + $0x9e8] ss:$16 sps:$4 sm:$0xff]  }
 0x212   : > { %11418 = vmatprep.subr.bf16.mxu0 %v16927_v11  ;;  %12579 = vmatprep.subr.bf16.mxu1 %v16930_v12  ;;  %v776_v11 = vld [vmem:[%s19877_s4 + $0x1f0] sm:$0xff]  ;;  %v725_v12 = vld [vmem:[%s19877_s4 + $0x58] sm:$0xff] }
 0x213   : > { %11448 = vmatprep.mubr.bf16.mxu0 %v831_v13  ;;  %12609 = vmatprep.mubr.bf16.mxu1 %v831_v13  ;;  %v779_v13 = vld [vmem:[%s19877_s4 + $0x208] sm:$0xff] }
 0x215   : > { %11419 = vmatpush1.bf16.msra.mxu0 %v16925_v14  ;;  %12580 = vmatpush1.bf16.msra.mxu1 %v16928_v15  ;;  %v830_v14 = vpack.c.bf16 %v776_v11, %v722_v10  ;;  %v17015_v15 = vld [vmem:[%s19879_s22 + $0xa00] ss:$16 sps:$4 sm:$0xff]   ;;  %v17107_v10 = vld [vmem:[%s19879_s22 + $0xbe4] ss:$16 sps:$4 sm:$0xff]   ;;  %v17110_v11 = vld [vmem:[%s19879_s22 + $0xbec] ss:$16 sps:$4 sm:$0xff]  }
 0x216   : > { %11420 = vmatprep.subr.bf16.mxu0 %v16933_v16  ;;  %12581 = vmatprep.subr.bf16.mxu1 %v16936_v17  ;;  %v17018_v16 = vld [vmem:[%s19879_s22 + $0xa08] ss:$16 sps:$4 sm:$0xff]   ;;  %v17023_v17 = vld [vmem:[%s19879_s22 + $0xa24] ss:$16 sps:$4 sm:$0xff]  }
 0x219   : > { %11421 = vmatpush1.bf16.msra.mxu0 %v16931_v18  ;;  %12582 = vmatpush1.bf16.msra.mxu1 %v16934_v19  ;;  %v17026_v18 = vld [vmem:[%s19879_s22 + $0xa2c] ss:$16 sps:$4 sm:$0xff]   ;;  %v833_v19 = vpack.c.bf16 %v779_v13, %v725_v12  ;;  %v17105_v12 = vld [vmem:[%s19879_s22 + $0xbe0] ss:$16 sps:$4 sm:$0xff]   ;;  %v17108_v13 = vld [vmem:[%s19879_s22 + $0xbe8] ss:$16 sps:$4 sm:$0xff]  }
 0x21a   : > { %11422 = vmatprep.subr.bf16.mxu0 %v16939_v20  ;;  %12583 = vmatprep.subr.bf16.mxu1 %v16942_v21  ;;  %v17021_v20 = vld [vmem:[%s19879_s22 + $0xa20] ss:$16 sps:$4 sm:$0xff]   ;;  %v17024_v21 = vld [vmem:[%s19879_s22 + $0xa28] ss:$16 sps:$4 sm:$0xff]  }
 0x21d   : > { %11423 = vmatpush1.bf16.msra.mxu0 %v16937_v22  ;;  %12584 = vmatpush1.bf16.msra.mxu1 %v16940_v23  ;;  %v17029_v22 = vld [vmem:[%s19879_s22 + $0xa44] ss:$16 sps:$4 sm:$0xff]   ;;  %v17032_v23 = vld [vmem:[%s19879_s22 + $0xa4c] ss:$16 sps:$4 sm:$0xff]  }
 0x21e   : > { %11424 = vmatprep.subr.bf16.mxu0 %v16945_v24  ;;  %12585 = vmatprep.subr.bf16.mxu1 %v16948_v25  ;;  %v17027_v24 = vld [vmem:[%s19879_s22 + $0xa40] ss:$16 sps:$4 sm:$0xff]   ;;  %v17030_v25 = vld [vmem:[%s19879_s22 + $0xa48] ss:$16 sps:$4 sm:$0xff]  }
 0x221   : > { %11425 = vmatpush1.bf16.msra.mxu0 %v16943_v26  ;;  %12586 = vmatpush1.bf16.msra.mxu1 %v16946_v27  ;;  %v17035_v26 = vld [vmem:[%s19879_s22 + $0xa64] ss:$16 sps:$4 sm:$0xff]   ;;  %v17038_v27 = vld [vmem:[%s19879_s22 + $0xa6c] ss:$16 sps:$4 sm:$0xff]  }
 0x222   : > { %11426 = vmatprep.subr.bf16.mxu0 %v16951_v28  ;;  %12587 = vmatprep.subr.bf16.mxu1 %v16954_v29  ;;  %v17033_v28 = vld [vmem:[%s19879_s22 + $0xa60] ss:$16 sps:$4 sm:$0xff]   ;;  %v17036_v29 = vld [vmem:[%s19879_s22 + $0xa68] ss:$16 sps:$4 sm:$0xff]  }
 0x225   : > { %11427 = vmatpush1.bf16.msra.mxu0 %v16949_v30  ;;  %12588 = vmatpush1.bf16.msra.mxu1 %v16952_v31  ;;  %v17041_v30 = vld [vmem:[%s19879_s22 + $0xa84] ss:$16 sps:$4 sm:$0xff]   ;;  %v17044_v31 = vld [vmem:[%s19879_s22 + $0xa8c] ss:$16 sps:$4 sm:$0xff]  }
 0x226   : > { %11428 = vmatprep.subr.bf16.mxu0 %v16957_v32  ;;  %12589 = vmatprep.subr.bf16.mxu1 %v16960_v33  ;;  %v17039_v32 = vld [vmem:[%s19879_s22 + $0xa80] ss:$16 sps:$4 sm:$0xff]   ;;  %v17042_v33 = vld [vmem:[%s19879_s22 + $0xa88] ss:$16 sps:$4 sm:$0xff]  }
 0x229   : > { %11429 = vmatpush1.bf16.msra.mxu0 %v16955_v34  ;;  %12590 = vmatpush1.bf16.msra.mxu1 %v16958_v35  ;;  %v17047_v34 = vld [vmem:[%s19879_s22 + $0xaa4] ss:$16 sps:$4 sm:$0xff]   ;;  %v17050_v35 = vld [vmem:[%s19879_s22 + $0xaac] ss:$16 sps:$4 sm:$0xff]  }
 0x22a   : > { %11430 = vmatprep.subr.bf16.mxu0 %v16963_v36  ;;  %12591 = vmatprep.subr.bf16.mxu1 %v16966_v37  ;;  %v17045_v36 = vld [vmem:[%s19879_s22 + $0xaa0] ss:$16 sps:$4 sm:$0xff]   ;;  %v17048_v37 = vld [vmem:[%s19879_s22 + $0xaa8] ss:$16 sps:$4 sm:$0xff]  }
 0x22d   : > { %11431 = vmatpush1.bf16.msra.mxu0 %v16961_v38  ;;  %12592 = vmatpush1.bf16.msra.mxu1 %v16964_v39  ;;  %v17053_v38 = vld [vmem:[%s19879_s22 + $0xac4] ss:$16 sps:$4 sm:$0xff]   ;;  %v17056_v39 = vld [vmem:[%s19879_s22 + $0xacc] ss:$16 sps:$4 sm:$0xff]  }
 0x22e   : > { %11432 = vmatprep.subr.bf16.mxu0 %v16969_v40  ;;  %12593 = vmatprep.subr.bf16.mxu1 %v16972_v41  ;;  %v17051_v40 = vld [vmem:[%s19879_s22 + $0xac0] ss:$16 sps:$4 sm:$0xff]   ;;  %v17054_v41 = vld [vmem:[%s19879_s22 + $0xac8] ss:$16 sps:$4 sm:$0xff]  }
 0x231   : > { %11433 = vmatpush1.bf16.msra.mxu0 %v16967_v42  ;;  %12594 = vmatpush1.bf16.msra.mxu1 %v16970_v43  ;;  %v17059_v42 = vld [vmem:[%s19879_s22 + $0xae4] ss:$16 sps:$4 sm:$0xff]   ;;  %v17062_v43 = vld [vmem:[%s19879_s22 + $0xaec] ss:$16 sps:$4 sm:$0xff]  }
 0x232   : > { %11434 = vmatprep.subr.bf16.mxu0 %v16975_v44  ;;  %12595 = vmatprep.subr.bf16.mxu1 %v16978_v45  ;;  %v17057_v44 = vld [vmem:[%s19879_s22 + $0xae0] ss:$16 sps:$4 sm:$0xff]   ;;  %v17060_v45 = vld [vmem:[%s19879_s22 + $0xae8] ss:$16 sps:$4 sm:$0xff]  }
 0x235   : > { %11435 = vmatpush1.bf16.msra.mxu0 %v16973_v46  ;;  %12596 = vmatpush1.bf16.msra.mxu1 %v16976_v47  ;;  %v17065_v46 = vld [vmem:[%s19879_s22 + $0xb04] ss:$16 sps:$4 sm:$0xff]   ;;  %v17068_v47 = vld [vmem:[%s19879_s22 + $0xb0c] ss:$16 sps:$4 sm:$0xff]  }
 0x236   : > { %11436 = vmatprep.subr.bf16.mxu0 %v16981_v48  ;;  %12597 = vmatprep.subr.bf16.mxu1 %v16984_v49  ;;  %v17063_v48 = vld [vmem:[%s19879_s22 + $0xb00] ss:$16 sps:$4 sm:$0xff]   ;;  %v17066_v49 = vld [vmem:[%s19879_s22 + $0xb08] ss:$16 sps:$4 sm:$0xff]  }
 0x239   : > { %11437 = vmatpush1.bf16.msra.mxu0 %v16979_v50  ;;  %12598 = vmatpush1.bf16.msra.mxu1 %v16982_v51  ;;  %v17071_v50 = vld [vmem:[%s19879_s22 + $0xb24] ss:$16 sps:$4 sm:$0xff]   ;;  %v17074_v51 = vld [vmem:[%s19879_s22 + $0xb2c] ss:$16 sps:$4 sm:$0xff]  }
 0x23a   : > { %11438 = vmatprep.subr.bf16.mxu0 %v16987_v52  ;;  %12599 = vmatprep.subr.bf16.mxu1 %v16990_v53  ;;  %v17069_v52 = vld [vmem:[%s19879_s22 + $0xb20] ss:$16 sps:$4 sm:$0xff]   ;;  %v17072_v53 = vld [vmem:[%s19879_s22 + $0xb28] ss:$16 sps:$4 sm:$0xff]  }
 0x23d   : > { %11439 = vmatpush1.bf16.msra.mxu0 %v16985_v54  ;;  %12600 = vmatpush1.bf16.msra.mxu1 %v16988_v55  ;;  %v17077_v54 = vld [vmem:[%s19879_s22 + $0xb44] ss:$16 sps:$4 sm:$0xff]   ;;  %v17080_v55 = vld [vmem:[%s19879_s22 + $0xb4c] ss:$16 sps:$4 sm:$0xff]  }
 0x23e   : > { %11440 = vmatprep.subr.bf16.mxu0 %v16993_v56  ;;  %12601 = vmatprep.subr.bf16.mxu1 %v16996_v57  ;;  %v17075_v56 = vld [vmem:[%s19879_s22 + $0xb40] ss:$16 sps:$4 sm:$0xff]   ;;  %v17078_v57 = vld [vmem:[%s19879_s22 + $0xb48] ss:$16 sps:$4 sm:$0xff]  }
 0x241   : > { %11441 = vmatpush1.bf16.msra.mxu0 %v16991_v58  ;;  %12602 = vmatpush1.bf16.msra.mxu1 %v16994_v59  ;;  %v17083_v58 = vld [vmem:[%s19879_s22 + $0xb64] ss:$16 sps:$4 sm:$0xff]   ;;  %v17086_v59 = vld [vmem:[%s19879_s22 + $0xb6c] ss:$16 sps:$4 sm:$0xff]  }
 0x242   : > { %11442 = vmatprep.subr.bf16.mxu0 %v16999_v60  ;;  %12603 = vmatprep.subr.bf16.mxu1 %v17002_v61  ;;  %v17081_v60 = vld [vmem:[%s19879_s22 + $0xb60] ss:$16 sps:$4 sm:$0xff]   ;;  %v17084_v61 = vld [vmem:[%s19879_s22 + $0xb68] ss:$16 sps:$4 sm:$0xff]  }
 0x245   : > { %11443 = vmatpush1.bf16.msra.mxu0 %v16997_v62  ;;  %12604 = vmatpush1.bf16.msra.mxu1 %v17000_v63  ;;  %v17089_v62 = vld [vmem:[%s19879_s22 + $0xb84] ss:$16 sps:$4 sm:$0xff]   ;;  %v17092_v63 = vld [vmem:[%s19879_s22 + $0xb8c] ss:$16 sps:$4 sm:$0xff]  }
 0x246   : > { %11444 = vmatprep.subr.bf16.mxu0 %v17005_v0  ;;  %12605 = vmatprep.subr.bf16.mxu1 %v17008_v1  ;;  %v17087_v0 = vld [vmem:[%s19879_s22 + $0xb80] ss:$16 sps:$4 sm:$0xff]   ;;  %v17090_v1 = vld [vmem:[%s19879_s22 + $0xb88] ss:$16 sps:$4 sm:$0xff]  }
 0x249   : > { %11445 = vmatpush1.bf16.msra.mxu0 %v17003_v2  ;;  %12606 = vmatpush1.bf16.msra.mxu1 %v17006_v3  ;;  %v17095_v2 = vld [vmem:[%s19879_s22 + $0xba4] ss:$16 sps:$4 sm:$0xff]   ;;  %v17098_v3 = vld [vmem:[%s19879_s22 + $0xbac] ss:$16 sps:$4 sm:$0xff]  }
 0x24a   : > { %11446 = vmatprep.subr.bf16.mxu0 %v17011_v4  ;;  %12607 = vmatprep.subr.bf16.mxu1 %v17014_v5  ;;  %v17093_v4 = vld [vmem:[%s19879_s22 + $0xba0] ss:$16 sps:$4 sm:$0xff]   ;;  %v17096_v5 = vld [vmem:[%s19879_s22 + $0xba8] ss:$16 sps:$4 sm:$0xff]  }
 0x24d   : > { %11447 = vmatpush1.bf16.msra.mxu0 %v17009_v6  ;;  %12608 = vmatpush1.bf16.msra.mxu1 %v17012_v7  ;;  %v17101_v6 = vld [vmem:[%s19879_s22 + $0xbc4] ss:$16 sps:$4 sm:$0xff]   ;;  %v17104_v7 = vld [vmem:[%s19879_s22 + $0xbcc] ss:$16 sps:$4 sm:$0xff]  }
 0x24e   : > { %11459 = vmatprep.subr.bf16.mxu0 %v17017_v8  ;;  %12620 = vmatprep.subr.bf16.mxu1 %v17020_v9  ;;  %v17099_v8 = vld [vmem:[%s19879_s22 + $0xbc0] ss:$16 sps:$4 sm:$0xff]   ;;  %v17102_v9 = vld [vmem:[%s19879_s22 + $0xbc8] ss:$16 sps:$4 sm:$0xff]  }
 0x250   : > { %11449 = vmatmul.mubr.bf16.vlgmr.msra.gmra.mrb[0].mxu0 %v830_v14  ;;  %12610 = vmatmul.mubr.bf16.vlgmr.msra.gmra.mrb[0].mxu1 %v830_v14  ;;  %v17113_v14 = vld [vmem:[%s19879_s22 + $0xc04] ss:$16 sps:$4 sm:$0xff]  }
 0x251   : > { %11460 = vmatpush1.bf16.msra.mxu0 %v17015_v15  ;;  %12621 = vmatpush1.bf16.msra.mxu1 %v17018_v16  ;;  %v17116_v15 = vld [vmem:[%s19879_s22 + $0xc0c] ss:$16 sps:$4 sm:$0xff]   ;;  %v724_v16 = vld [vmem:[%s19877_s4 + $0x50] sm:$0xff] }
 0x252   : > { %11461 = vmatprep.subr.bf16.mxu0 %v17023_v17  ;;  %12622 = vmatprep.subr.bf16.mxu1 %v17026_v18  ;;  %v778_v17 = vld [vmem:[%s19877_s4 + $0x200] sm:$0xff]  ;;  %v727_v18 = vld [vmem:[%s19877_s4 + $0x68] sm:$0xff] }
 0x253   : > { %11491 = vmatprep.mubr.bf16.mxu0 %v833_v19  ;;  %12652 = vmatprep.mubr.bf16.mxu1 %v833_v19  ;;  %v781_v19 = vld [vmem:[%s19877_s4 + $0x218] sm:$0xff] }
 0x255   : > { %11462 = vmatpush1.bf16.msra.mxu0 %v17021_v20  ;;  %12623 = vmatpush1.bf16.msra.mxu1 %v17024_v21  ;;  %v832_v20 = vpack.c.bf16 %v778_v17, %v724_v16  ;;  %v17111_v21 = vld [vmem:[%s19879_s22 + $0xc00] ss:$16 sps:$4 sm:$0xff]   ;;  %v17203_v16 = vld [vmem:[%s19879_s22 + $0xde4] ss:$16 sps:$4 sm:$0xff]   ;;  %v17206_v17 = vld [vmem:[%s19879_s22 + $0xdec] ss:$16 sps:$4 sm:$0xff]  }
 0x256   : > { %11463 = vmatprep.subr.bf16.mxu0 %v17029_v22  ;;  %12624 = vmatprep.subr.bf16.mxu1 %v17032_v23  ;;  %v17114_v22 = vld [vmem:[%s19879_s22 + $0xc08] ss:$16 sps:$4 sm:$0xff]   ;;  %v17119_v23 = vld [vmem:[%s19879_s22 + $0xc24] ss:$16 sps:$4 sm:$0xff]  }
 0x259   : > { %11464 = vmatpush1.bf16.msra.mxu0 %v17027_v24  ;;  %12625 = vmatpush1.bf16.msra.mxu1 %v17030_v25  ;;  %v17122_v24 = vld [vmem:[%s19879_s22 + $0xc2c] ss:$16 sps:$4 sm:$0xff]   ;;  %v835_v25 = vpack.c.bf16 %v781_v19, %v727_v18  ;;  %v17201_v18 = vld [vmem:[%s19879_s22 + $0xde0] ss:$16 sps:$4 sm:$0xff]   ;;  %v17204_v19 = vld [vmem:[%s19879_s22 + $0xde8] ss:$16 sps:$4 sm:$0xff]  }
 0x25a   : > { %11465 = vmatprep.subr.bf16.mxu0 %v17035_v26  ;;  %12626 = vmatprep.subr.bf16.mxu1 %v17038_v27  ;;  %v17117_v26 = vld [vmem:[%s19879_s22 + $0xc20] ss:$16 sps:$4 sm:$0xff]   ;;  %v17120_v27 = vld [vmem:[%s19879_s22 + $0xc28] ss:$16 sps:$4 sm:$0xff]  }
 0x25d   : > { %11466 = vmatpush1.bf16.msra.mxu0 %v17033_v28  ;;  %12627 = vmatpush1.bf16.msra.mxu1 %v17036_v29  ;;  %v17125_v28 = vld [vmem:[%s19879_s22 + $0xc44] ss:$16 sps:$4 sm:$0xff]   ;;  %v17128_v29 = vld [vmem:[%s19879_s22 + $0xc4c] ss:$16 sps:$4 sm:$0xff]  }
 0x25e   : > { %11467 = vmatprep.subr.bf16.mxu0 %v17041_v30  ;;  %12628 = vmatprep.subr.bf16.mxu1 %v17044_v31  ;;  %v17123_v30 = vld [vmem:[%s19879_s22 + $0xc40] ss:$16 sps:$4 sm:$0xff]   ;;  %v17126_v31 = vld [vmem:[%s19879_s22 + $0xc48] ss:$16 sps:$4 sm:$0xff]  }
 0x261   : > { %11468 = vmatpush1.bf16.msra.mxu0 %v17039_v32  ;;  %12629 = vmatpush1.bf16.msra.mxu1 %v17042_v33  ;;  %v17131_v32 = vld [vmem:[%s19879_s22 + $0xc64] ss:$16 sps:$4 sm:$0xff]   ;;  %v17134_v33 = vld [vmem:[%s19879_s22 + $0xc6c] ss:$16 sps:$4 sm:$0xff]  }
 0x262   : > { %11469 = vmatprep.subr.bf16.mxu0 %v17047_v34  ;;  %12630 = vmatprep.subr.bf16.mxu1 %v17050_v35  ;;  %v17129_v34 = vld [vmem:[%s19879_s22 + $0xc60] ss:$16 sps:$4 sm:$0xff]   ;;  %v17132_v35 = vld [vmem:[%s19879_s22 + $0xc68] ss:$16 sps:$4 sm:$0xff]  }
 0x265   : > { %11470 = vmatpush1.bf16.msra.mxu0 %v17045_v36  ;;  %12631 = vmatpush1.bf16.msra.mxu1 %v17048_v37  ;;  %v17137_v36 = vld [vmem:[%s19879_s22 + $0xc84] ss:$16 sps:$4 sm:$0xff]   ;;  %v17140_v37 = vld [vmem:[%s19879_s22 + $0xc8c] ss:$16 sps:$4 sm:$0xff]  }
 0x266   : > { %11471 = vmatprep.subr.bf16.mxu0 %v17053_v38  ;;  %12632 = vmatprep.subr.bf16.mxu1 %v17056_v39  ;;  %v17135_v38 = vld [vmem:[%s19879_s22 + $0xc80] ss:$16 sps:$4 sm:$0xff]   ;;  %v17138_v39 = vld [vmem:[%s19879_s22 + $0xc88] ss:$16 sps:$4 sm:$0xff]  }
 0x269   : > { %11472 = vmatpush1.bf16.msra.mxu0 %v17051_v40  ;;  %12633 = vmatpush1.bf16.msra.mxu1 %v17054_v41  ;;  %v17143_v40 = vld [vmem:[%s19879_s22 + $0xca4] ss:$16 sps:$4 sm:$0xff]   ;;  %v17146_v41 = vld [vmem:[%s19879_s22 + $0xcac] ss:$16 sps:$4 sm:$0xff]  }
 0x26a   : > { %11473 = vmatprep.subr.bf16.mxu0 %v17059_v42  ;;  %12634 = vmatprep.subr.bf16.mxu1 %v17062_v43  ;;  %v17141_v42 = vld [vmem:[%s19879_s22 + $0xca0] ss:$16 sps:$4 sm:$0xff]   ;;  %v17144_v43 = vld [vmem:[%s19879_s22 + $0xca8] ss:$16 sps:$4 sm:$0xff]  }
 0x26d   : > { %11474 = vmatpush1.bf16.msra.mxu0 %v17057_v44  ;;  %12635 = vmatpush1.bf16.msra.mxu1 %v17060_v45  ;;  %v17149_v44 = vld [vmem:[%s19879_s22 + $0xcc4] ss:$16 sps:$4 sm:$0xff]   ;;  %v17152_v45 = vld [vmem:[%s19879_s22 + $0xccc] ss:$16 sps:$4 sm:$0xff]  }
 0x26e   : > { %11475 = vmatprep.subr.bf16.mxu0 %v17065_v46  ;;  %12636 = vmatprep.subr.bf16.mxu1 %v17068_v47  ;;  %v17147_v46 = vld [vmem:[%s19879_s22 + $0xcc0] ss:$16 sps:$4 sm:$0xff]   ;;  %v17150_v47 = vld [vmem:[%s19879_s22 + $0xcc8] ss:$16 sps:$4 sm:$0xff]  }
 0x271   : > { %11476 = vmatpush1.bf16.msra.mxu0 %v17063_v48  ;;  %12637 = vmatpush1.bf16.msra.mxu1 %v17066_v49  ;;  %v17155_v48 = vld [vmem:[%s19879_s22 + $0xce4] ss:$16 sps:$4 sm:$0xff]   ;;  %v17158_v49 = vld [vmem:[%s19879_s22 + $0xcec] ss:$16 sps:$4 sm:$0xff]  }
 0x272   : > { %11477 = vmatprep.subr.bf16.mxu0 %v17071_v50  ;;  %12638 = vmatprep.subr.bf16.mxu1 %v17074_v51  ;;  %v17153_v50 = vld [vmem:[%s19879_s22 + $0xce0] ss:$16 sps:$4 sm:$0xff]   ;;  %v17156_v51 = vld [vmem:[%s19879_s22 + $0xce8] ss:$16 sps:$4 sm:$0xff]  }
 0x275   : > { %11478 = vmatpush1.bf16.msra.mxu0 %v17069_v52  ;;  %12639 = vmatpush1.bf16.msra.mxu1 %v17072_v53  ;;  %v17161_v52 = vld [vmem:[%s19879_s22 + $0xd04] ss:$16 sps:$4 sm:$0xff]   ;;  %v17164_v53 = vld [vmem:[%s19879_s22 + $0xd0c] ss:$16 sps:$4 sm:$0xff]  }
 0x276   : > { %11479 = vmatprep.subr.bf16.mxu0 %v17077_v54  ;;  %12640 = vmatprep.subr.bf16.mxu1 %v17080_v55  ;;  %v17159_v54 = vld [vmem:[%s19879_s22 + $0xd00] ss:$16 sps:$4 sm:$0xff]   ;;  %v17162_v55 = vld [vmem:[%s19879_s22 + $0xd08] ss:$16 sps:$4 sm:$0xff]  }
 0x279   : > { %11480 = vmatpush1.bf16.msra.mxu0 %v17075_v56  ;;  %12641 = vmatpush1.bf16.msra.mxu1 %v17078_v57  ;;  %v17167_v56 = vld [vmem:[%s19879_s22 + $0xd24] ss:$16 sps:$4 sm:$0xff]   ;;  %v17170_v57 = vld [vmem:[%s19879_s22 + $0xd2c] ss:$16 sps:$4 sm:$0xff]  }
 0x27a   : > { %11481 = vmatprep.subr.bf16.mxu0 %v17083_v58  ;;  %12642 = vmatprep.subr.bf16.mxu1 %v17086_v59  ;;  %v17165_v58 = vld [vmem:[%s19879_s22 + $0xd20] ss:$16 sps:$4 sm:$0xff]   ;;  %v17168_v59 = vld [vmem:[%s19879_s22 + $0xd28] ss:$16 sps:$4 sm:$0xff]  }
 0x27d   : > { %11482 = vmatpush1.bf16.msra.mxu0 %v17081_v60  ;;  %12643 = vmatpush1.bf16.msra.mxu1 %v17084_v61  ;;  %v17173_v60 = vld [vmem:[%s19879_s22 + $0xd44] ss:$16 sps:$4 sm:$0xff]   ;;  %v17176_v61 = vld [vmem:[%s19879_s22 + $0xd4c] ss:$16 sps:$4 sm:$0xff]  }
 0x27e   : > { %11483 = vmatprep.subr.bf16.mxu0 %v17089_v62  ;;  %12644 = vmatprep.subr.bf16.mxu1 %v17092_v63  ;;  %v17171_v62 = vld [vmem:[%s19879_s22 + $0xd40] ss:$16 sps:$4 sm:$0xff]   ;;  %v17174_v63 = vld [vmem:[%s19879_s22 + $0xd48] ss:$16 sps:$4 sm:$0xff]  }
 0x281   : > { %11484 = vmatpush1.bf16.msra.mxu0 %v17087_v0  ;;  %12645 = vmatpush1.bf16.msra.mxu1 %v17090_v1  ;;  %v17179_v0 = vld [vmem:[%s19879_s22 + $0xd64] ss:$16 sps:$4 sm:$0xff]   ;;  %v17182_v1 = vld [vmem:[%s19879_s22 + $0xd6c] ss:$16 sps:$4 sm:$0xff]  }
 0x282   : > { %11485 = vmatprep.subr.bf16.mxu0 %v17095_v2  ;;  %12646 = vmatprep.subr.bf16.mxu1 %v17098_v3  ;;  %v17177_v2 = vld [vmem:[%s19879_s22 + $0xd60] ss:$16 sps:$4 sm:$0xff]   ;;  %v17180_v3 = vld [vmem:[%s19879_s22 + $0xd68] ss:$16 sps:$4 sm:$0xff]  }
 0x285   : > { %11486 = vmatpush1.bf16.msra.mxu0 %v17093_v4  ;;  %12647 = vmatpush1.bf16.msra.mxu1 %v17096_v5  ;;  %v17185_v4 = vld [vmem:[%s19879_s22 + $0xd84] ss:$16 sps:$4 sm:$0xff]   ;;  %v17188_v5 = vld [vmem:[%s19879_s22 + $0xd8c] ss:$16 sps:$4 sm:$0xff]  }
 0x286   : > { %11487 = vmatprep.subr.bf16.mxu0 %v17101_v6  ;;  %12648 = vmatprep.subr.bf16.mxu1 %v17104_v7  ;;  %v17183_v6 = vld [vmem:[%s19879_s22 + $0xd80] ss:$16 sps:$4 sm:$0xff]   ;;  %v17186_v7 = vld [vmem:[%s19879_s22 + $0xd88] ss:$16 sps:$4 sm:$0xff]  }
 0x289   : > { %11488 = vmatpush1.bf16.msra.mxu0 %v17099_v8  ;;  %12649 = vmatpush1.bf16.msra.mxu1 %v17102_v9  ;;  %v17191_v8 = vld [vmem:[%s19879_s22 + $0xda4] ss:$16 sps:$4 sm:$0xff]   ;;  %v17194_v9 = vld [vmem:[%s19879_s22 + $0xdac] ss:$16 sps:$4 sm:$0xff]  }
 0x28a   : > { %11489 = vmatprep.subr.bf16.mxu0 %v17107_v10  ;;  %12650 = vmatprep.subr.bf16.mxu1 %v17110_v11  ;;  %v17189_v10 = vld [vmem:[%s19879_s22 + $0xda0] ss:$16 sps:$4 sm:$0xff]   ;;  %v17192_v11 = vld [vmem:[%s19879_s22 + $0xda8] ss:$16 sps:$4 sm:$0xff]  }
 0x28d   : > { %11490 = vmatpush1.bf16.msra.mxu0 %v17105_v12  ;;  %12651 = vmatpush1.bf16.msra.mxu1 %v17108_v13  ;;  %v17197_v12 = vld [vmem:[%s19879_s22 + $0xdc4] ss:$16 sps:$4 sm:$0xff]   ;;  %v17200_v13 = vld [vmem:[%s19879_s22 + $0xdcc] ss:$16 sps:$4 sm:$0xff]  }
 0x28e   : > { %11502 = vmatprep.subr.bf16.mxu0 %v17113_v14  ;;  %12663 = vmatprep.subr.bf16.mxu1 %v17116_v15  ;;  %v17195_v14 = vld [vmem:[%s19879_s22 + $0xdc0] ss:$16 sps:$4 sm:$0xff]   ;;  %v17198_v15 = vld [vmem:[%s19879_s22 + $0xdc8] ss:$16 sps:$4 sm:$0xff]  }
 0x290   : > { %11492 = vmatmul.mubr.bf16.vlgmr.msra.gmra.mrb[0].mxu0 %v832_v20  ;;  %12653 = vmatmul.mubr.bf16.vlgmr.msra.gmra.mrb[0].mxu1 %v832_v20  ;;  %v17209_v20 = vld [vmem:[%s19879_s22 + $0xe04] ss:$16 sps:$4 sm:$0xff]  }
 0x291   : > { %11503 = vmatpush1.bf16.msra.mxu0 %v17111_v21  ;;  %12664 = vmatpush1.bf16.msra.mxu1 %v17114_v22  ;;  %v17212_v21 = vld [vmem:[%s19879_s22 + $0xe0c] ss:$16 sps:$4 sm:$0xff]   ;;  %v726_v22 = vld [vmem:[%s19877_s4 + $0x60] sm:$0xff] }
 0x292   : > { %11504 = vmatprep.subr.bf16.mxu0 %v17119_v23  ;;  %12665 = vmatprep.subr.bf16.mxu1 %v17122_v24  ;;  %v780_v23 = vld [vmem:[%s19877_s4 + $0x210] sm:$0xff]  ;;  %v729_v24 = vld [vmem:[%s19877_s4 + $0x78] sm:$0xff] }
 0x293   : > { %11534 = vmatprep.mubr.bf16.mxu0 %v835_v25  ;;  %12695 = vmatprep.mubr.bf16.mxu1 %v835_v25  ;;  %v783_v25 = vld [vmem:[%s19877_s4 + $0x228] sm:$0xff] }
 0x295   : > { %11505 = vmatpush1.bf16.msra.mxu0 %v17117_v26  ;;  %12666 = vmatpush1.bf16.msra.mxu1 %v17120_v27  ;;  %v834_v26 = vpack.c.bf16 %v780_v23, %v726_v22  ;;  %v17207_v27 = vld [vmem:[%s19879_s22 + $0xe00] ss:$16 sps:$4 sm:$0xff]   ;;  %v17299_v22 = vld [vmem:[%s19879_s22 + $0xfe4] ss:$16 sps:$4 sm:$0xff]   ;;  %v17302_v23 = vld [vmem:[%s19879_s22 + $0xfec] ss:$16 sps:$4 sm:$0xff]  }
 0x296   : > { %11506 = vmatprep.subr.bf16.mxu0 %v17125_v28  ;;  %12667 = vmatprep.subr.bf16.mxu1 %v17128_v29  ;;  %v17210_v28 = vld [vmem:[%s19879_s22 + $0xe08] ss:$16 sps:$4 sm:$0xff]   ;;  %v17215_v29 = vld [vmem:[%s19879_s22 + $0xe24] ss:$16 sps:$4 sm:$0xff]  }
 0x299   : > { %11507 = vmatpush1.bf16.msra.mxu0 %v17123_v30  ;;  %12668 = vmatpush1.bf16.msra.mxu1 %v17126_v31  ;;  %v17218_v30 = vld [vmem:[%s19879_s22 + $0xe2c] ss:$16 sps:$4 sm:$0xff]   ;;  %v837_v31 = vpack.c.bf16 %v783_v25, %v729_v24  ;;  %v17297_v24 = vld [vmem:[%s19879_s22 + $0xfe0] ss:$16 sps:$4 sm:$0xff]   ;;  %v17300_v25 = vld [vmem:[%s19879_s22 + $0xfe8] ss:$16 sps:$4 sm:$0xff]  }
 0x29a   : > { %11508 = vmatprep.subr.bf16.mxu0 %v17131_v32  ;;  %12669 = vmatprep.subr.bf16.mxu1 %v17134_v33  ;;  %v17213_v32 = vld [vmem:[%s19879_s22 + $0xe20] ss:$16 sps:$4 sm:$0xff]   ;;  %v17216_v33 = vld [vmem:[%s19879_s22 + $0xe28] ss:$16 sps:$4 sm:$0xff]  }
 0x29d   : > { %11509 = vmatpush1.bf16.msra.mxu0 %v17129_v34  ;;  %12670 = vmatpush1.bf16.msra.mxu1 %v17132_v35  ;;  %v17221_v34 = vld [vmem:[%s19879_s22 + $0xe44] ss:$16 sps:$4 sm:$0xff]   ;;  %v17224_v35 = vld [vmem:[%s19879_s22 + $0xe4c] ss:$16 sps:$4 sm:$0xff]  }
 0x29e   : > { %11510 = vmatprep.subr.bf16.mxu0 %v17137_v36  ;;  %12671 = vmatprep.subr.bf16.mxu1 %v17140_v37  ;;  %v17219_v36 = vld [vmem:[%s19879_s22 + $0xe40] ss:$16 sps:$4 sm:$0xff]   ;;  %v17222_v37 = vld [vmem:[%s19879_s22 + $0xe48] ss:$16 sps:$4 sm:$0xff]  }
 0x2a1   : > { %11511 = vmatpush1.bf16.msra.mxu0 %v17135_v38  ;;  %12672 = vmatpush1.bf16.msra.mxu1 %v17138_v39  ;;  %v17227_v38 = vld [vmem:[%s19879_s22 + $0xe64] ss:$16 sps:$4 sm:$0xff]   ;;  %v17230_v39 = vld [vmem:[%s19879_s22 + $0xe6c] ss:$16 sps:$4 sm:$0xff]  }
 0x2a2   : > { %11512 = vmatprep.subr.bf16.mxu0 %v17143_v40  ;;  %12673 = vmatprep.subr.bf16.mxu1 %v17146_v41  ;;  %v17225_v40 = vld [vmem:[%s19879_s22 + $0xe60] ss:$16 sps:$4 sm:$0xff]   ;;  %v17228_v41 = vld [vmem:[%s19879_s22 + $0xe68] ss:$16 sps:$4 sm:$0xff]  }
 0x2a5   : > { %11513 = vmatpush1.bf16.msra.mxu0 %v17141_v42  ;;  %12674 = vmatpush1.bf16.msra.mxu1 %v17144_v43  ;;  %v17233_v42 = vld [vmem:[%s19879_s22 + $0xe84] ss:$16 sps:$4 sm:$0xff]   ;;  %v17236_v43 = vld [vmem:[%s19879_s22 + $0xe8c] ss:$16 sps:$4 sm:$0xff]  }
 0x2a6   : > { %11514 = vmatprep.subr.bf16.mxu0 %v17149_v44  ;;  %12675 = vmatprep.subr.bf16.mxu1 %v17152_v45  ;;  %v17231_v44 = vld [vmem:[%s19879_s22 + $0xe80] ss:$16 sps:$4 sm:$0xff]   ;;  %v17234_v45 = vld [vmem:[%s19879_s22 + $0xe88] ss:$16 sps:$4 sm:$0xff]  }
 0x2a9   : > { %11515 = vmatpush1.bf16.msra.mxu0 %v17147_v46  ;;  %12676 = vmatpush1.bf16.msra.mxu1 %v17150_v47  ;;  %v17239_v46 = vld [vmem:[%s19879_s22 + $0xea4] ss:$16 sps:$4 sm:$0xff]   ;;  %v17242_v47 = vld [vmem:[%s19879_s22 + $0xeac] ss:$16 sps:$4 sm:$0xff]  }
 0x2aa   : > { %11516 = vmatprep.subr.bf16.mxu0 %v17155_v48  ;;  %12677 = vmatprep.subr.bf16.mxu1 %v17158_v49  ;;  %v17237_v48 = vld [vmem:[%s19879_s22 + $0xea0] ss:$16 sps:$4 sm:$0xff]   ;;  %v17240_v49 = vld [vmem:[%s19879_s22 + $0xea8] ss:$16 sps:$4 sm:$0xff]  }
 0x2ad   : > { %11517 = vmatpush1.bf16.msra.mxu0 %v17153_v50  ;;  %12678 = vmatpush1.bf16.msra.mxu1 %v17156_v51  ;;  %v17245_v50 = vld [vmem:[%s19879_s22 + $0xec4] ss:$16 sps:$4 sm:$0xff]   ;;  %v17248_v51 = vld [vmem:[%s19879_s22 + $0xecc] ss:$16 sps:$4 sm:$0xff]  }
 0x2ae   : > { %11518 = vmatprep.subr.bf16.mxu0 %v17161_v52  ;;  %12679 = vmatprep.subr.bf16.mxu1 %v17164_v53  ;;  %v17243_v52 = vld [vmem:[%s19879_s22 + $0xec0] ss:$16 sps:$4 sm:$0xff]   ;;  %v17246_v53 = vld [vmem:[%s19879_s22 + $0xec8] ss:$16 sps:$4 sm:$0xff]  }
 0x2b1   : > { %11519 = vmatpush1.bf16.msra.mxu0 %v17159_v54  ;;  %12680 = vmatpush1.bf16.msra.mxu1 %v17162_v55  ;;  %v17251_v54 = vld [vmem:[%s19879_s22 + $0xee4] ss:$16 sps:$4 sm:$0xff]   ;;  %v17254_v55 = vld [vmem:[%s19879_s22 + $0xeec] ss:$16 sps:$4 sm:$0xff]  }
 0x2b2   : > { %11520 = vmatprep.subr.bf16.mxu0 %v17167_v56  ;;  %12681 = vmatprep.subr.bf16.mxu1 %v17170_v57  ;;  %v17249_v56 = vld [vmem:[%s19879_s22 + $0xee0] ss:$16 sps:$4 sm:$0xff]   ;;  %v17252_v57 = vld [vmem:[%s19879_s22 + $0xee8] ss:$16 sps:$4 sm:$0xff]  }
 0x2b5   : > { %11521 = vmatpush1.bf16.msra.mxu0 %v17165_v58  ;;  %12682 = vmatpush1.bf16.msra.mxu1 %v17168_v59  ;;  %v17257_v58 = vld [vmem:[%s19879_s22 + $0xf04] ss:$16 sps:$4 sm:$0xff]   ;;  %v17260_v59 = vld [vmem:[%s19879_s22 + $0xf0c] ss:$16 sps:$4 sm:$0xff]  }
 0x2b6   : > { %11522 = vmatprep.subr.bf16.mxu0 %v17173_v60  ;;  %12683 = vmatprep.subr.bf16.mxu1 %v17176_v61  ;;  %v17255_v60 = vld [vmem:[%s19879_s22 + $0xf00] ss:$16 sps:$4 sm:$0xff]   ;;  %v17258_v61 = vld [vmem:[%s19879_s22 + $0xf08] ss:$16 sps:$4 sm:$0xff]  }
 0x2b9   : > { %11523 = vmatpush1.bf16.msra.mxu0 %v17171_v62  ;;  %12684 = vmatpush1.bf16.msra.mxu1 %v17174_v63  ;;  %v17263_v62 = vld [vmem:[%s19879_s22 + $0xf24] ss:$16 sps:$4 sm:$0xff]   ;;  %v17266_v63 = vld [vmem:[%s19879_s22 + $0xf2c] ss:$16 sps:$4 sm:$0xff]  }
 0x2ba   : > { %11524 = vmatprep.subr.bf16.mxu0 %v17179_v0  ;;  %12685 = vmatprep.subr.bf16.mxu1 %v17182_v1  ;;  %v17261_v0 = vld [vmem:[%s19879_s22 + $0xf20] ss:$16 sps:$4 sm:$0xff]   ;;  %v17264_v1 = vld [vmem:[%s19879_s22 + $0xf28] ss:$16 sps:$4 sm:$0xff]  }
 0x2bd   : > { %11525 = vmatpush1.bf16.msra.mxu0 %v17177_v2  ;;  %12686 = vmatpush1.bf16.msra.mxu1 %v17180_v3  ;;  %v17269_v2 = vld [vmem:[%s19879_s22 + $0xf44] ss:$16 sps:$4 sm:$0xff]   ;;  %v17272_v3 = vld [vmem:[%s19879_s22 + $0xf4c] ss:$16 sps:$4 sm:$0xff]  }
 0x2be   : > { %11526 = vmatprep.subr.bf16.mxu0 %v17185_v4  ;;  %12687 = vmatprep.subr.bf16.mxu1 %v17188_v5  ;;  %v17267_v4 = vld [vmem:[%s19879_s22 + $0xf40] ss:$16 sps:$4 sm:$0xff]   ;;  %v17270_v5 = vld [vmem:[%s19879_s22 + $0xf48] ss:$16 sps:$4 sm:$0xff]  }
 0x2c1   : > { %11527 = vmatpush1.bf16.msra.mxu0 %v17183_v6  ;;  %12688 = vmatpush1.bf16.msra.mxu1 %v17186_v7  ;;  %v17275_v6 = vld [vmem:[%s19879_s22 + $0xf64] ss:$16 sps:$4 sm:$0xff]   ;;  %v17278_v7 = vld [vmem:[%s19879_s22 + $0xf6c] ss:$16 sps:$4 sm:$0xff]  }
 0x2c2   : > { %11528 = vmatprep.subr.bf16.mxu0 %v17191_v8  ;;  %12689 = vmatprep.subr.bf16.mxu1 %v17194_v9  ;;  %v17273_v8 = vld [vmem:[%s19879_s22 + $0xf60] ss:$16 sps:$4 sm:$0xff]   ;;  %v17276_v9 = vld [vmem:[%s19879_s22 + $0xf68] ss:$16 sps:$4 sm:$0xff]  }
 0x2c5   : > { %11529 = vmatpush1.bf16.msra.mxu0 %v17189_v10  ;;  %12690 = vmatpush1.bf16.msra.mxu1 %v17192_v11  ;;  %v17281_v10 = vld [vmem:[%s19879_s22 + $0xf84] ss:$16 sps:$4 sm:$0xff]   ;;  %v17284_v11 = vld [vmem:[%s19879_s22 + $0xf8c] ss:$16 sps:$4 sm:$0xff]  }
 0x2c6   : > { %11530 = vmatprep.subr.bf16.mxu0 %v17197_v12  ;;  %12691 = vmatprep.subr.bf16.mxu1 %v17200_v13  ;;  %v17279_v12 = vld [vmem:[%s19879_s22 + $0xf80] ss:$16 sps:$4 sm:$0xff]   ;;  %v17282_v13 = vld [vmem:[%s19879_s22 + $0xf88] ss:$16 sps:$4 sm:$0xff]  }
 0x2c9   : > { %11531 = vmatpush1.bf16.msra.mxu0 %v17195_v14  ;;  %12692 = vmatpush1.bf16.msra.mxu1 %v17198_v15  ;;  %v17287_v14 = vld [vmem:[%s19879_s22 + $0xfa4] ss:$16 sps:$4 sm:$0xff]   ;;  %v17290_v15 = vld [vmem:[%s19879_s22 + $0xfac] ss:$16 sps:$4 sm:$0xff]  }
 0x2ca   : > { %11532 = vmatprep.subr.bf16.mxu0 %v17203_v16  ;;  %12693 = vmatprep.subr.bf16.mxu1 %v17206_v17  ;;  %v17285_v16 = vld [vmem:[%s19879_s22 + $0xfa0] ss:$16 sps:$4 sm:$0xff]   ;;  %v17288_v17 = vld [vmem:[%s19879_s22 + $0xfa8] ss:$16 sps:$4 sm:$0xff]  }
 0x2cd   : > { %11533 = vmatpush1.bf16.msra.mxu0 %v17201_v18  ;;  %12694 = vmatpush1.bf16.msra.mxu1 %v17204_v19  ;;  %v17293_v18 = vld [vmem:[%s19879_s22 + $0xfc4] ss:$16 sps:$4 sm:$0xff]   ;;  %v17296_v19 = vld [vmem:[%s19879_s22 + $0xfcc] ss:$16 sps:$4 sm:$0xff]  }
 0x2ce   : > { %11545 = vmatprep.subr.bf16.mxu0 %v17209_v20  ;;  %12706 = vmatprep.subr.bf16.mxu1 %v17212_v21  ;;  %v17291_v20 = vld [vmem:[%s19879_s22 + $0xfc0] ss:$16 sps:$4 sm:$0xff]   ;;  %v17294_v21 = vld [vmem:[%s19879_s22 + $0xfc8] ss:$16 sps:$4 sm:$0xff]  }
 0x2d0   : > { %11535 = vmatmul.mubr.bf16.vlgmr.msra.gmra.mrb[0].mxu0 %v834_v26  ;;  %12696 = vmatmul.mubr.bf16.vlgmr.msra.gmra.mrb[0].mxu1 %v834_v26  ;;  %v17305_v26 = vld [vmem:[%s19879_s22 + $0x1004] ss:$16 sps:$4 sm:$0xff]  }
 0x2d1   : > { %11546 = vmatpush1.bf16.msra.mxu0 %v17207_v27  ;;  %12707 = vmatpush1.bf16.msra.mxu1 %v17210_v28  ;;  %v17308_v27 = vld [vmem:[%s19879_s22 + $0x100c] ss:$16 sps:$4 sm:$0xff]   ;;  %v728_v28 = vld [vmem:[%s19877_s4 + $0x70] sm:$0xff] }
 0x2d2   : > { %11547 = vmatprep.subr.bf16.mxu0 %v17215_v29  ;;  %12708 = vmatprep.subr.bf16.mxu1 %v17218_v30  ;;  %v782_v29 = vld [vmem:[%s19877_s4 + $0x220] sm:$0xff]  ;;  %v731_v30 = vld [vmem:[%s19877_s4 + $0x88] sm:$0xff] }
 0x2d3   : > { %11577 = vmatprep.mubr.bf16.mxu0 %v837_v31  ;;  %12738 = vmatprep.mubr.bf16.mxu1 %v837_v31  ;;  %v785_v31 = vld [vmem:[%s19877_s4 + $0x238] sm:$0xff] }
 0x2d5   : > { %11548 = vmatpush1.bf16.msra.mxu0 %v17213_v32  ;;  %12709 = vmatpush1.bf16.msra.mxu1 %v17216_v33  ;;  %v836_v32 = vpack.c.bf16 %v782_v29, %v728_v28  ;;  %v17303_v33 = vld [vmem:[%s19879_s22 + $0x1000] ss:$16 sps:$4 sm:$0xff]   ;;  %v17395_v28 = vld [vmem:[%s19879_s22 + $0x11e4] ss:$16 sps:$4 sm:$0xff]   ;;  %v17398_v29 = vld [vmem:[%s19879_s22 + $0x11ec] ss:$16 sps:$4 sm:$0xff]  }
 0x2d6   : > { %11549 = vmatprep.subr.bf16.mxu0 %v17221_v34  ;;  %12710 = vmatprep.subr.bf16.mxu1 %v17224_v35  ;;  %v17306_v34 = vld [vmem:[%s19879_s22 + $0x1008] ss:$16 sps:$4 sm:$0xff]   ;;  %v17311_v35 = vld [vmem:[%s19879_s22 + $0x1024] ss:$16 sps:$4 sm:$0xff]  }
 0x2d9   : > { %11550 = vmatpush1.bf16.msra.mxu0 %v17219_v36  ;;  %12711 = vmatpush1.bf16.msra.mxu1 %v17222_v37  ;;  %v17314_v36 = vld [vmem:[%s19879_s22 + $0x102c] ss:$16 sps:$4 sm:$0xff]   ;;  %v839_v37 = vpack.c.bf16 %v785_v31, %v731_v30  ;;  %v17393_v30 = vld [vmem:[%s19879_s22 + $0x11e0] ss:$16 sps:$4 sm:$0xff]   ;;  %v17396_v31 = vld [vmem:[%s19879_s22 + $0x11e8] ss:$16 sps:$4 sm:$0xff]  }
 0x2da   : > { %11551 = vmatprep.subr.bf16.mxu0 %v17227_v38  ;;  %12712 = vmatprep.subr.bf16.mxu1 %v17230_v39  ;;  %v17309_v38 = vld [vmem:[%s19879_s22 + $0x1020] ss:$16 sps:$4 sm:$0xff]   ;;  %v17312_v39 = vld [vmem:[%s19879_s22 + $0x1028] ss:$16 sps:$4 sm:$0xff]  }
 0x2dd   : > { %11552 = vmatpush1.bf16.msra.mxu0 %v17225_v40  ;;  %12713 = vmatpush1.bf16.msra.mxu1 %v17228_v41  ;;  %v17317_v40 = vld [vmem:[%s19879_s22 + $0x1044] ss:$16 sps:$4 sm:$0xff]   ;;  %v17320_v41 = vld [vmem:[%s19879_s22 + $0x104c] ss:$16 sps:$4 sm:$0xff]  }
 0x2de   : > { %11553 = vmatprep.subr.bf16.mxu0 %v17233_v42  ;;  %12714 = vmatprep.subr.bf16.mxu1 %v17236_v43  ;;  %v17315_v42 = vld [vmem:[%s19879_s22 + $0x1040] ss:$16 sps:$4 sm:$0xff]   ;;  %v17318_v43 = vld [vmem:[%s19879_s22 + $0x1048] ss:$16 sps:$4 sm:$0xff]  }
 0x2e1   : > { %11554 = vmatpush1.bf16.msra.mxu0 %v17231_v44  ;;  %12715 = vmatpush1.bf16.msra.mxu1 %v17234_v45  ;;  %v17323_v44 = vld [vmem:[%s19879_s22 + $0x1064] ss:$16 sps:$4 sm:$0xff]   ;;  %v17326_v45 = vld [vmem:[%s19879_s22 + $0x106c] ss:$16 sps:$4 sm:$0xff]  }
 0x2e2   : > { %11555 = vmatprep.subr.bf16.mxu0 %v17239_v46  ;;  %12716 = vmatprep.subr.bf16.mxu1 %v17242_v47  ;;  %v17321_v46 = vld [vmem:[%s19879_s22 + $0x1060] ss:$16 sps:$4 sm:$0xff]   ;;  %v17324_v47 = vld [vmem:[%s19879_s22 + $0x1068] ss:$16 sps:$4 sm:$0xff]  }
 0x2e5   : > { %11556 = vmatpush1.bf16.msra.mxu0 %v17237_v48  ;;  %12717 = vmatpush1.bf16.msra.mxu1 %v17240_v49  ;;  %v17329_v48 = vld [vmem:[%s19879_s22 + $0x1084] ss:$16 sps:$4 sm:$0xff]   ;;  %v17332_v49 = vld [vmem:[%s19879_s22 + $0x108c] ss:$16 sps:$4 sm:$0xff]  }
 0x2e6   : > { %11557 = vmatprep.subr.bf16.mxu0 %v17245_v50  ;;  %12718 = vmatprep.subr.bf16.mxu1 %v17248_v51  ;;  %v17327_v50 = vld [vmem:[%s19879_s22 + $0x1080] ss:$16 sps:$4 sm:$0xff]   ;;  %v17330_v51 = vld [vmem:[%s19879_s22 + $0x1088] ss:$16 sps:$4 sm:$0xff]  }
 0x2e9   : > { %11558 = vmatpush1.bf16.msra.mxu0 %v17243_v52  ;;  %12719 = vmatpush1.bf16.msra.mxu1 %v17246_v53  ;;  %v17335_v52 = vld [vmem:[%s19879_s22 + $0x10a4] ss:$16 sps:$4 sm:$0xff]   ;;  %v17338_v53 = vld [vmem:[%s19879_s22 + $0x10ac] ss:$16 sps:$4 sm:$0xff]  }
 0x2ea   : > { %11559 = vmatprep.subr.bf16.mxu0 %v17251_v54  ;;  %12720 = vmatprep.subr.bf16.mxu1 %v17254_v55  ;;  %v17333_v54 = vld [vmem:[%s19879_s22 + $0x10a0] ss:$16 sps:$4 sm:$0xff]   ;;  %v17336_v55 = vld [vmem:[%s19879_s22 + $0x10a8] ss:$16 sps:$4 sm:$0xff]  }
 0x2ed   : > { %11560 = vmatpush1.bf16.msra.mxu0 %v17249_v56  ;;  %12721 = vmatpush1.bf16.msra.mxu1 %v17252_v57  ;;  %v17341_v56 = vld [vmem:[%s19879_s22 + $0x10c4] ss:$16 sps:$4 sm:$0xff]   ;;  %v17344_v57 = vld [vmem:[%s19879_s22 + $0x10cc] ss:$16 sps:$4 sm:$0xff]  }
 0x2ee   : > { %11561 = vmatprep.subr.bf16.mxu0 %v17257_v58  ;;  %12722 = vmatprep.subr.bf16.mxu1 %v17260_v59  ;;  %v17339_v58 = vld [vmem:[%s19879_s22 + $0x10c0] ss:$16 sps:$4 sm:$0xff]   ;;  %v17342_v59 = vld [vmem:[%s19879_s22 + $0x10c8] ss:$16 sps:$4 sm:$0xff]  }
 0x2f1   : > { %11562 = vmatpush1.bf16.msra.mxu0 %v17255_v60  ;;  %12723 = vmatpush1.bf16.msra.mxu1 %v17258_v61  ;;  %v17347_v60 = vld [vmem:[%s19879_s22 + $0x10e4] ss:$16 sps:$4 sm:$0xff]   ;;  %v17350_v61 = vld [vmem:[%s19879_s22 + $0x10ec] ss:$16 sps:$4 sm:$0xff]  }
 0x2f2   : > { %11563 = vmatprep.subr.bf16.mxu0 %v17263_v62  ;;  %12724 = vmatprep.subr.bf16.mxu1 %v17266_v63  ;;  %v17345_v62 = vld [vmem:[%s19879_s22 + $0x10e0] ss:$16 sps:$4 sm:$0xff]   ;;  %v17348_v63 = vld [vmem:[%s19879_s22 + $0x10e8] ss:$16 sps:$4 sm:$0xff]  }
 0x2f5   : > { %11564 = vmatpush1.bf16.msra.mxu0 %v17261_v0  ;;  %12725 = vmatpush1.bf16.msra.mxu1 %v17264_v1  ;;  %v17353_v0 = vld [vmem:[%s19879_s22 + $0x1104] ss:$16 sps:$4 sm:$0xff]   ;;  %v17356_v1 = vld [vmem:[%s19879_s22 + $0x110c] ss:$16 sps:$4 sm:$0xff]  }
 0x2f6   : > { %11565 = vmatprep.subr.bf16.mxu0 %v17269_v2  ;;  %12726 = vmatprep.subr.bf16.mxu1 %v17272_v3  ;;  %v17351_v2 = vld [vmem:[%s19879_s22 + $0x1100] ss:$16 sps:$4 sm:$0xff]   ;;  %v17354_v3 = vld [vmem:[%s19879_s22 + $0x1108] ss:$16 sps:$4 sm:$0xff]  }
 0x2f9   : > { %11566 = vmatpush1.bf16.msra.mxu0 %v17267_v4  ;;  %12727 = vmatpush1.bf16.msra.mxu1 %v17270_v5  ;;  %v17359_v4 = vld [vmem:[%s19879_s22 + $0x1124] ss:$16 sps:$4 sm:$0xff]   ;;  %v17362_v5 = vld [vmem:[%s19879_s22 + $0x112c] ss:$16 sps:$4 sm:$0xff]  }
 0x2fa   : > { %11567 = vmatprep.subr.bf16.mxu0 %v17275_v6  ;;  %12728 = vmatprep.subr.bf16.mxu1 %v17278_v7  ;;  %v17357_v6 = vld [vmem:[%s19879_s22 + $0x1120] ss:$16 sps:$4 sm:$0xff]   ;;  %v17360_v7 = vld [vmem:[%s19879_s22 + $0x1128] ss:$16 sps:$4 sm:$0xff]  }
 0x2fd   : > { %11568 = vmatpush1.bf16.msra.mxu0 %v17273_v8  ;;  %12729 = vmatpush1.bf16.msra.mxu1 %v17276_v9  ;;  %v17365_v8 = vld [vmem:[%s19879_s22 + $0x1144] ss:$16 sps:$4 sm:$0xff]   ;;  %v17368_v9 = vld [vmem:[%s19879_s22 + $0x114c] ss:$16 sps:$4 sm:$0xff]  }
 0x2fe   : > { %11569 = vmatprep.subr.bf16.mxu0 %v17281_v10  ;;  %12730 = vmatprep.subr.bf16.mxu1 %v17284_v11  ;;  %v17363_v10 = vld [vmem:[%s19879_s22 + $0x1140] ss:$16 sps:$4 sm:$0xff]   ;;  %v17366_v11 = vld [vmem:[%s19879_s22 + $0x1148] ss:$16 sps:$4 sm:$0xff]  }
 0x301   : > { %11570 = vmatpush1.bf16.msra.mxu0 %v17279_v12  ;;  %12731 = vmatpush1.bf16.msra.mxu1 %v17282_v13  ;;  %v17371_v12 = vld [vmem:[%s19879_s22 + $0x1164] ss:$16 sps:$4 sm:$0xff]   ;;  %v17374_v13 = vld [vmem:[%s19879_s22 + $0x116c] ss:$16 sps:$4 sm:$0xff]  }
 0x302   : > { %11571 = vmatprep.subr.bf16.mxu0 %v17287_v14  ;;  %12732 = vmatprep.subr.bf16.mxu1 %v17290_v15  ;;  %v17369_v14 = vld [vmem:[%s19879_s22 + $0x1160] ss:$16 sps:$4 sm:$0xff]   ;;  %v17372_v15 = vld [vmem:[%s19879_s22 + $0x1168] ss:$16 sps:$4 sm:$0xff]  }
 0x305   : > { %11572 = vmatpush1.bf16.msra.mxu0 %v17285_v16  ;;  %12733 = vmatpush1.bf16.msra.mxu1 %v17288_v17  ;;  %v17377_v16 = vld [vmem:[%s19879_s22 + $0x1184] ss:$16 sps:$4 sm:$0xff]   ;;  %v17380_v17 = vld [vmem:[%s19879_s22 + $0x118c] ss:$16 sps:$4 sm:$0xff]  }
 0x306   : > { %11573 = vmatprep.subr.bf16.mxu0 %v17293_v18  ;;  %12734 = vmatprep.subr.bf16.mxu1 %v17296_v19  ;;  %v17375_v18 = vld [vmem:[%s19879_s22 + $0x1180] ss:$16 sps:$4 sm:$0xff]   ;;  %v17378_v19 = vld [vmem:[%s19879_s22 + $0x1188] ss:$16 sps:$4 sm:$0xff]  }
 0x309   : > { %11574 = vmatpush1.bf16.msra.mxu0 %v17291_v20  ;;  %12735 = vmatpush1.bf16.msra.mxu1 %v17294_v21  ;;  %v17383_v20 = vld [vmem:[%s19879_s22 + $0x11a4] ss:$16 sps:$4 sm:$0xff]   ;;  %v17386_v21 = vld [vmem:[%s19879_s22 + $0x11ac] ss:$16 sps:$4 sm:$0xff]  }
 0x30a   : > { %11575 = vmatprep.subr.bf16.mxu0 %v17299_v22  ;;  %12736 = vmatprep.subr.bf16.mxu1 %v17302_v23  ;;  %v17381_v22 = vld [vmem:[%s19879_s22 + $0x11a0] ss:$16 sps:$4 sm:$0xff]   ;;  %v17384_v23 = vld [vmem:[%s19879_s22 + $0x11a8] ss:$16 sps:$4 sm:$0xff]  }
 0x30d   : > { %11576 = vmatpush1.bf16.msra.mxu0 %v17297_v24  ;;  %12737 = vmatpush1.bf16.msra.mxu1 %v17300_v25  ;;  %v17389_v24 = vld [vmem:[%s19879_s22 + $0x11c4] ss:$16 sps:$4 sm:$0xff]   ;;  %v17392_v25 = vld [vmem:[%s19879_s22 + $0x11cc] ss:$16 sps:$4 sm:$0xff]  }
 0x30e   : > { %11588 = vmatprep.subr.bf16.mxu0 %v17305_v26  ;;  %12749 = vmatprep.subr.bf16.mxu1 %v17308_v27  ;;  %v17387_v26 = vld [vmem:[%s19879_s22 + $0x11c0] ss:$16 sps:$4 sm:$0xff]   ;;  %v17390_v27 = vld [vmem:[%s19879_s22 + $0x11c8] ss:$16 sps:$4 sm:$0xff]  }
 0x310   : > { %11578 = vmatmul.mubr.bf16.vlgmr.msra.gmra.mrb[0].mxu0 %v836_v32  ;;  %12739 = vmatmul.mubr.bf16.vlgmr.msra.gmra.mrb[0].mxu1 %v836_v32  ;;  %v17401_v32 = vld [vmem:[%s19879_s22 + $0x1204] ss:$16 sps:$4 sm:$0xff]  }
 0x311   : > { %11589 = vmatpush1.bf16.msra.mxu0 %v17303_v33  ;;  %12750 = vmatpush1.bf16.msra.mxu1 %v17306_v34  ;;  %v17404_v33 = vld [vmem:[%s19879_s22 + $0x120c] ss:$16 sps:$4 sm:$0xff]   ;;  %v730_v34 = vld [vmem:[%s19877_s4 + $0x80] sm:$0xff] }
 0x312   : > { %11590 = vmatprep.subr.bf16.mxu0 %v17311_v35  ;;  %12751 = vmatprep.subr.bf16.mxu1 %v17314_v36  ;;  %v784_v35 = vld [vmem:[%s19877_s4 + $0x230] sm:$0xff]  ;;  %v733_v36 = vld [vmem:[%s19877_s4 + $0x98] sm:$0xff] }
 0x313   : > { %11620 = vmatprep.mubr.bf16.mxu0 %v839_v37  ;;  %12781 = vmatprep.mubr.bf16.mxu1 %v839_v37  ;;  %v787_v37 = vld [vmem:[%s19877_s4 + $0x248] sm:$0xff] }
 0x315   : > { %11591 = vmatpush1.bf16.msra.mxu0 %v17309_v38  ;;  %12752 = vmatpush1.bf16.msra.mxu1 %v17312_v39  ;;  %v838_v38 = vpack.c.bf16 %v784_v35, %v730_v34  ;;  %v17399_v39 = vld [vmem:[%s19879_s22 + $0x1200] ss:$16 sps:$4 sm:$0xff]   ;;  %v17491_v34 = vld [vmem:[%s19879_s22 + $0x13e4] ss:$16 sps:$4 sm:$0xff]   ;;  %v17494_v35 = vld [vmem:[%s19879_s22 + $0x13ec] ss:$16 sps:$4 sm:$0xff]  }
 0x316   : > { %11592 = vmatprep.subr.bf16.mxu0 %v17317_v40  ;;  %12753 = vmatprep.subr.bf16.mxu1 %v17320_v41  ;;  %v17402_v40 = vld [vmem:[%s19879_s22 + $0x1208] ss:$16 sps:$4 sm:$0xff]   ;;  %v17407_v41 = vld [vmem:[%s19879_s22 + $0x1224] ss:$16 sps:$4 sm:$0xff]  }
 0x319   : > { %11593 = vmatpush1.bf16.msra.mxu0 %v17315_v42  ;;  %12754 = vmatpush1.bf16.msra.mxu1 %v17318_v43  ;;  %v17410_v42 = vld [vmem:[%s19879_s22 + $0x122c] ss:$16 sps:$4 sm:$0xff]   ;;  %v841_v43 = vpack.c.bf16 %v787_v37, %v733_v36  ;;  %v17489_v36 = vld [vmem:[%s19879_s22 + $0x13e0] ss:$16 sps:$4 sm:$0xff]   ;;  %v17492_v37 = vld [vmem:[%s19879_s22 + $0x13e8] ss:$16 sps:$4 sm:$0xff]  }
 0x31a   : > { %11594 = vmatprep.subr.bf16.mxu0 %v17323_v44  ;;  %12755 = vmatprep.subr.bf16.mxu1 %v17326_v45  ;;  %v17405_v44 = vld [vmem:[%s19879_s22 + $0x1220] ss:$16 sps:$4 sm:$0xff]   ;;  %v17408_v45 = vld [vmem:[%s19879_s22 + $0x1228] ss:$16 sps:$4 sm:$0xff]  }
 0x31d   : > { %11595 = vmatpush1.bf16.msra.mxu0 %v17321_v46  ;;  %12756 = vmatpush1.bf16.msra.mxu1 %v17324_v47  ;;  %v17413_v46 = vld [vmem:[%s19879_s22 + $0x1244] ss:$16 sps:$4 sm:$0xff]   ;;  %v17416_v47 = vld [vmem:[%s19879_s22 + $0x124c] ss:$16 sps:$4 sm:$0xff]  }
 0x31e   : > { %11596 = vmatprep.subr.bf16.mxu0 %v17329_v48  ;;  %12757 = vmatprep.subr.bf16.mxu1 %v17332_v49  ;;  %v17411_v48 = vld [vmem:[%s19879_s22 + $0x1240] ss:$16 sps:$4 sm:$0xff]   ;;  %v17414_v49 = vld [vmem:[%s19879_s22 + $0x1248] ss:$16 sps:$4 sm:$0xff]  }
 0x321   : > { %11597 = vmatpush1.bf16.msra.mxu0 %v17327_v50  ;;  %12758 = vmatpush1.bf16.msra.mxu1 %v17330_v51  ;;  %v17419_v50 = vld [vmem:[%s19879_s22 + $0x1264] ss:$16 sps:$4 sm:$0xff]   ;;  %v17422_v51 = vld [vmem:[%s19879_s22 + $0x126c] ss:$16 sps:$4 sm:$0xff]  }
 0x322   : > { %11598 = vmatprep.subr.bf16.mxu0 %v17335_v52  ;;  %12759 = vmatprep.subr.bf16.mxu1 %v17338_v53  ;;  %v17417_v52 = vld [vmem:[%s19879_s22 + $0x1260] ss:$16 sps:$4 sm:$0xff]   ;;  %v17420_v53 = vld [vmem:[%s19879_s22 + $0x1268] ss:$16 sps:$4 sm:$0xff]  }
 0x325   : > { %11599 = vmatpush1.bf16.msra.mxu0 %v17333_v54  ;;  %12760 = vmatpush1.bf16.msra.mxu1 %v17336_v55  ;;  %v17425_v54 = vld [vmem:[%s19879_s22 + $0x1284] ss:$16 sps:$4 sm:$0xff]   ;;  %v17428_v55 = vld [vmem:[%s19879_s22 + $0x128c] ss:$16 sps:$4 sm:$0xff]  }
 0x326   : > { %11600 = vmatprep.subr.bf16.mxu0 %v17341_v56  ;;  %12761 = vmatprep.subr.bf16.mxu1 %v17344_v57  ;;  %v17423_v56 = vld [vmem:[%s19879_s22 + $0x1280] ss:$16 sps:$4 sm:$0xff]   ;;  %v17426_v57 = vld [vmem:[%s19879_s22 + $0x1288] ss:$16 sps:$4 sm:$0xff]  }
 0x329   : > { %11601 = vmatpush1.bf16.msra.mxu0 %v17339_v58  ;;  %12762 = vmatpush1.bf16.msra.mxu1 %v17342_v59  ;;  %v17431_v58 = vld [vmem:[%s19879_s22 + $0x12a4] ss:$16 sps:$4 sm:$0xff]   ;;  %v17434_v59 = vld [vmem:[%s19879_s22 + $0x12ac] ss:$16 sps:$4 sm:$0xff]  }
 0x32a   : > { %11602 = vmatprep.subr.bf16.mxu0 %v17347_v60  ;;  %12763 = vmatprep.subr.bf16.mxu1 %v17350_v61  ;;  %v17429_v60 = vld [vmem:[%s19879_s22 + $0x12a0] ss:$16 sps:$4 sm:$0xff]   ;;  %v17432_v61 = vld [vmem:[%s19879_s22 + $0x12a8] ss:$16 sps:$4 sm:$0xff]  }
 0x32d   : > { %11603 = vmatpush1.bf16.msra.mxu0 %v17345_v62  ;;  %12764 = vmatpush1.bf16.msra.mxu1 %v17348_v63  ;;  %v17437_v62 = vld [vmem:[%s19879_s22 + $0x12c4] ss:$16 sps:$4 sm:$0xff]   ;;  %v17440_v63 = vld [vmem:[%s19879_s22 + $0x12cc] ss:$16 sps:$4 sm:$0xff]  }
 0x32e   : > { %11604 = vmatprep.subr.bf16.mxu0 %v17353_v0  ;;  %12765 = vmatprep.subr.bf16.mxu1 %v17356_v1  ;;  %v17435_v0 = vld [vmem:[%s19879_s22 + $0x12c0] ss:$16 sps:$4 sm:$0xff]   ;;  %v17438_v1 = vld [vmem:[%s19879_s22 + $0x12c8] ss:$16 sps:$4 sm:$0xff]  }
 0x331   : > { %11605 = vmatpush1.bf16.msra.mxu0 %v17351_v2  ;;  %12766 = vmatpush1.bf16.msra.mxu1 %v17354_v3  ;;  %v17443_v2 = vld [vmem:[%s19879_s22 + $0x12e4] ss:$16 sps:$4 sm:$0xff]   ;;  %v17446_v3 = vld [vmem:[%s19879_s22 + $0x12ec] ss:$16 sps:$4 sm:$0xff]  }
 0x332   : > { %11606 = vmatprep.subr.bf16.mxu0 %v17359_v4  ;;  %12767 = vmatprep.subr.bf16.mxu1 %v17362_v5  ;;  %v17441_v4 = vld [vmem:[%s19879_s22 + $0x12e0] ss:$16 sps:$4 sm:$0xff]   ;;  %v17444_v5 = vld [vmem:[%s19879_s22 + $0x12e8] ss:$16 sps:$4 sm:$0xff]  }
 0x335   : > { %11607 = vmatpush1.bf16.msra.mxu0 %v17357_v6  ;;  %12768 = vmatpush1.bf16.msra.mxu1 %v17360_v7  ;;  %v17449_v6 = vld [vmem:[%s19879_s22 + $0x1304] ss:$16 sps:$4 sm:$0xff]   ;;  %v17452_v7 = vld [vmem:[%s19879_s22 + $0x130c] ss:$16 sps:$4 sm:$0xff]  }
 0x336   : > { %11608 = vmatprep.subr.bf16.mxu0 %v17365_v8  ;;  %12769 = vmatprep.subr.bf16.mxu1 %v17368_v9  ;;  %v17447_v8 = vld [vmem:[%s19879_s22 + $0x1300] ss:$16 sps:$4 sm:$0xff]   ;;  %v17450_v9 = vld [vmem:[%s19879_s22 + $0x1308] ss:$16 sps:$4 sm:$0xff]  }
 0x339   : > { %11609 = vmatpush1.bf16.msra.mxu0 %v17363_v10  ;;  %12770 = vmatpush1.bf16.msra.mxu1 %v17366_v11  ;;  %v17455_v10 = vld [vmem:[%s19879_s22 + $0x1324] ss:$16 sps:$4 sm:$0xff]   ;;  %v17458_v11 = vld [vmem:[%s19879_s22 + $0x132c] ss:$16 sps:$4 sm:$0xff]  }
 0x33a   : > { %11610 = vmatprep.subr.bf16.mxu0 %v17371_v12  ;;  %12771 = vmatprep.subr.bf16.mxu1 %v17374_v13  ;;  %v17453_v12 = vld [vmem:[%s19879_s22 + $0x1320] ss:$16 sps:$4 sm:$0xff]   ;;  %v17456_v13 = vld [vmem:[%s19879_s22 + $0x1328] ss:$16 sps:$4 sm:$0xff]  }
 0x33d   : > { %11611 = vmatpush1.bf16.msra.mxu0 %v17369_v14  ;;  %12772 = vmatpush1.bf16.msra.mxu1 %v17372_v15  ;;  %v17461_v14 = vld [vmem:[%s19879_s22 + $0x1344] ss:$16 sps:$4 sm:$0xff]   ;;  %v17464_v15 = vld [vmem:[%s19879_s22 + $0x134c] ss:$16 sps:$4 sm:$0xff]  }
 0x33e   : > { %11612 = vmatprep.subr.bf16.mxu0 %v17377_v16  ;;  %12773 = vmatprep.subr.bf16.mxu1 %v17380_v17  ;;  %v17459_v16 = vld [vmem:[%s19879_s22 + $0x1340] ss:$16 sps:$4 sm:$0xff]   ;;  %v17462_v17 = vld [vmem:[%s19879_s22 + $0x1348] ss:$16 sps:$4 sm:$0xff]  }
 0x341   : > { %11613 = vmatpush1.bf16.msra.mxu0 %v17375_v18  ;;  %12774 = vmatpush1.bf16.msra.mxu1 %v17378_v19  ;;  %v17467_v18 = vld [vmem:[%s19879_s22 + $0x1364] ss:$16 sps:$4 sm:$0xff]   ;;  %v17470_v19 = vld [vmem:[%s19879_s22 + $0x136c] ss:$16 sps:$4 sm:$0xff]  }
 0x342   : > { %11614 = vmatprep.subr.bf16.mxu0 %v17383_v20  ;;  %12775 = vmatprep.subr.bf16.mxu1 %v17386_v21  ;;  %v17465_v20 = vld [vmem:[%s19879_s22 + $0x1360] ss:$16 sps:$4 sm:$0xff]   ;;  %v17468_v21 = vld [vmem:[%s19879_s22 + $0x1368] ss:$16 sps:$4 sm:$0xff]  }
 0x345   : > { %11615 = vmatpush1.bf16.msra.mxu0 %v17381_v22  ;;  %12776 = vmatpush1.bf16.msra.mxu1 %v17384_v23  ;;  %v17473_v22 = vld [vmem:[%s19879_s22 + $0x1384] ss:$16 sps:$4 sm:$0xff]   ;;  %v17476_v23 = vld [vmem:[%s19879_s22 + $0x138c] ss:$16 sps:$4 sm:$0xff]  }
 0x346   : > { %11616 = vmatprep.subr.bf16.mxu0 %v17389_v24  ;;  %12777 = vmatprep.subr.bf16.mxu1 %v17392_v25  ;;  %v17471_v24 = vld [vmem:[%s19879_s22 + $0x1380] ss:$16 sps:$4 sm:$0xff]   ;;  %v17474_v25 = vld [vmem:[%s19879_s22 + $0x1388] ss:$16 sps:$4 sm:$0xff]  }
 0x349   : > { %11617 = vmatpush1.bf16.msra.mxu0 %v17387_v26  ;;  %12778 = vmatpush1.bf16.msra.mxu1 %v17390_v27  ;;  %v17479_v26 = vld [vmem:[%s19879_s22 + $0x13a4] ss:$16 sps:$4 sm:$0xff]   ;;  %v17482_v27 = vld [vmem:[%s19879_s22 + $0x13ac] ss:$16 sps:$4 sm:$0xff]  }
 0x34a   : > { %11618 = vmatprep.subr.bf16.mxu0 %v17395_v28  ;;  %12779 = vmatprep.subr.bf16.mxu1 %v17398_v29  ;;  %v17477_v28 = vld [vmem:[%s19879_s22 + $0x13a0] ss:$16 sps:$4 sm:$0xff]   ;;  %v17480_v29 = vld [vmem:[%s19879_s22 + $0x13a8] ss:$16 sps:$4 sm:$0xff]  }
 0x34d   : > { %11619 = vmatpush1.bf16.msra.mxu0 %v17393_v30  ;;  %12780 = vmatpush1.bf16.msra.mxu1 %v17396_v31  ;;  %v17485_v30 = vld [vmem:[%s19879_s22 + $0x13c4] ss:$16 sps:$4 sm:$0xff]   ;;  %v17488_v31 = vld [vmem:[%s19879_s22 + $0x13cc] ss:$16 sps:$4 sm:$0xff]  }
 0x34e   : > { %11631 = vmatprep.subr.bf16.mxu0 %v17401_v32  ;;  %12792 = vmatprep.subr.bf16.mxu1 %v17404_v33  ;;  %v17483_v32 = vld [vmem:[%s19879_s22 + $0x13c0] ss:$16 sps:$4 sm:$0xff]   ;;  %v17486_v33 = vld [vmem:[%s19879_s22 + $0x13c8] ss:$16 sps:$4 sm:$0xff]  }
 0x350   : > { %11621 = vmatmul.mubr.bf16.vlgmr.msra.gmra.mrb[0].mxu0 %v838_v38  ;;  %12782 = vmatmul.mubr.bf16.vlgmr.msra.gmra.mrb[0].mxu1 %v838_v38  ;;  %v17497_v38 = vld [vmem:[%s19879_s22 + $0x1404] ss:$16 sps:$4 sm:$0xff]  }
 0x351   : > { %11632 = vmatpush1.bf16.msra.mxu0 %v17399_v39  ;;  %12793 = vmatpush1.bf16.msra.mxu1 %v17402_v40  ;;  %v17500_v39 = vld [vmem:[%s19879_s22 + $0x140c] ss:$16 sps:$4 sm:$0xff]   ;;  %v732_v40 = vld [vmem:[%s19877_s4 + $0x90] sm:$0xff] }
 0x352   : > { %11633 = vmatprep.subr.bf16.mxu0 %v17407_v41  ;;  %12794 = vmatprep.subr.bf16.mxu1 %v17410_v42  ;;  %v786_v41 = vld [vmem:[%s19877_s4 + $0x240] sm:$0xff]  ;;  %v735_v42 = vld [vmem:[%s19877_s4 + $0xa8] sm:$0xff] }
 0x353   : > { %11663 = vmatprep.mubr.bf16.mxu0 %v841_v43  ;;  %12824 = vmatprep.mubr.bf16.mxu1 %v841_v43  ;;  %v789_v43 = vld [vmem:[%s19877_s4 + $0x258] sm:$0xff] }
 0x355   : > { %11634 = vmatpush1.bf16.msra.mxu0 %v17405_v44  ;;  %12795 = vmatpush1.bf16.msra.mxu1 %v17408_v45  ;;  %v840_v44 = vpack.c.bf16 %v786_v41, %v732_v40  ;;  %v17495_v45 = vld [vmem:[%s19879_s22 + $0x1400] ss:$16 sps:$4 sm:$0xff]   ;;  %v17587_v40 = vld [vmem:[%s19879_s22 + $0x15e4] ss:$16 sps:$4 sm:$0xff]   ;;  %v17590_v41 = vld [vmem:[%s19879_s22 + $0x15ec] ss:$16 sps:$4 sm:$0xff]  }
 0x356   : > { %11635 = vmatprep.subr.bf16.mxu0 %v17413_v46  ;;  %12796 = vmatprep.subr.bf16.mxu1 %v17416_v47  ;;  %v17498_v46 = vld [vmem:[%s19879_s22 + $0x1408] ss:$16 sps:$4 sm:$0xff]   ;;  %v17503_v47 = vld [vmem:[%s19879_s22 + $0x1424] ss:$16 sps:$4 sm:$0xff]  }
 0x359   : > { %11636 = vmatpush1.bf16.msra.mxu0 %v17411_v48  ;;  %12797 = vmatpush1.bf16.msra.mxu1 %v17414_v49  ;;  %v17506_v48 = vld [vmem:[%s19879_s22 + $0x142c] ss:$16 sps:$4 sm:$0xff]   ;;  %v843_v49 = vpack.c.bf16 %v789_v43, %v735_v42  ;;  %v17585_v42 = vld [vmem:[%s19879_s22 + $0x15e0] ss:$16 sps:$4 sm:$0xff]   ;;  %v17588_v43 = vld [vmem:[%s19879_s22 + $0x15e8] ss:$16 sps:$4 sm:$0xff]  }
 0x35a   : > { %11637 = vmatprep.subr.bf16.mxu0 %v17419_v50  ;;  %12798 = vmatprep.subr.bf16.mxu1 %v17422_v51  ;;  %v17501_v50 = vld [vmem:[%s19879_s22 + $0x1420] ss:$16 sps:$4 sm:$0xff]   ;;  %v17504_v51 = vld [vmem:[%s19879_s22 + $0x1428] ss:$16 sps:$4 sm:$0xff]  }
 0x35d   : > { %11638 = vmatpush1.bf16.msra.mxu0 %v17417_v52  ;;  %12799 = vmatpush1.bf16.msra.mxu1 %v17420_v53  ;;  %v17509_v52 = vld [vmem:[%s19879_s22 + $0x1444] ss:$16 sps:$4 sm:$0xff]   ;;  %v17512_v53 = vld [vmem:[%s19879_s22 + $0x144c] ss:$16 sps:$4 sm:$0xff]  }
 0x35e   : > { %11639 = vmatprep.subr.bf16.mxu0 %v17425_v54  ;;  %12800 = vmatprep.subr.bf16.mxu1 %v17428_v55  ;;  %v17507_v54 = vld [vmem:[%s19879_s22 + $0x1440] ss:$16 sps:$4 sm:$0xff]   ;;  %v17510_v55 = vld [vmem:[%s19879_s22 + $0x1448] ss:$16 sps:$4 sm:$0xff]  }
 0x361   : > { %11640 = vmatpush1.bf16.msra.mxu0 %v17423_v56  ;;  %12801 = vmatpush1.bf16.msra.mxu1 %v17426_v57  ;;  %v17515_v56 = vld [vmem:[%s19879_s22 + $0x1464] ss:$16 sps:$4 sm:$0xff]   ;;  %v17518_v57 = vld [vmem:[%s19879_s22 + $0x146c] ss:$16 sps:$4 sm:$0xff]  }
 0x362   : > { %11641 = vmatprep.subr.bf16.mxu0 %v17431_v58  ;;  %12802 = vmatprep.subr.bf16.mxu1 %v17434_v59  ;;  %v17513_v58 = vld [vmem:[%s19879_s22 + $0x1460] ss:$16 sps:$4 sm:$0xff]   ;;  %v17516_v59 = vld [vmem:[%s19879_s22 + $0x1468] ss:$16 sps:$4 sm:$0xff]  }
 0x365   : > { %11642 = vmatpush1.bf16.msra.mxu0 %v17429_v60  ;;  %12803 = vmatpush1.bf16.msra.mxu1 %v17432_v61  ;;  %v17521_v60 = vld [vmem:[%s19879_s22 + $0x1484] ss:$16 sps:$4 sm:$0xff]   ;;  %v17524_v61 = vld [vmem:[%s19879_s22 + $0x148c] ss:$16 sps:$4 sm:$0xff]  }
 0x366   : > { %11643 = vmatprep.subr.bf16.mxu0 %v17437_v62  ;;  %12804 = vmatprep.subr.bf16.mxu1 %v17440_v63  ;;  %v17519_v62 = vld [vmem:[%s19879_s22 + $0x1480] ss:$16 sps:$4 sm:$0xff]   ;;  %v17522_v63 = vld [vmem:[%s19879_s22 + $0x1488] ss:$16 sps:$4 sm:$0xff]  }
 0x369   : > { %11644 = vmatpush1.bf16.msra.mxu0 %v17435_v0  ;;  %12805 = vmatpush1.bf16.msra.mxu1 %v17438_v1  ;;  %v17527_v0 = vld [vmem:[%s19879_s22 + $0x14a4] ss:$16 sps:$4 sm:$0xff]   ;;  %v17530_v1 = vld [vmem:[%s19879_s22 + $0x14ac] ss:$16 sps:$4 sm:$0xff]  }
 0x36a   : > { %11645 = vmatprep.subr.bf16.mxu0 %v17443_v2  ;;  %12806 = vmatprep.subr.bf16.mxu1 %v17446_v3  ;;  %v17525_v2 = vld [vmem:[%s19879_s22 + $0x14a0] ss:$16 sps:$4 sm:$0xff]   ;;  %v17528_v3 = vld [vmem:[%s19879_s22 + $0x14a8] ss:$16 sps:$4 sm:$0xff]  }
 0x36d   : > { %11646 = vmatpush1.bf16.msra.mxu0 %v17441_v4  ;;  %12807 = vmatpush1.bf16.msra.mxu1 %v17444_v5  ;;  %v17533_v4 = vld [vmem:[%s19879_s22 + $0x14c4] ss:$16 sps:$4 sm:$0xff]   ;;  %v17536_v5 = vld [vmem:[%s19879_s22 + $0x14cc] ss:$16 sps:$4 sm:$0xff]  }
 0x36e   : > { %11647 = vmatprep.subr.bf16.mxu0 %v17449_v6  ;;  %12808 = vmatprep.subr.bf16.mxu1 %v17452_v7  ;;  %v17531_v6 = vld [vmem:[%s19879_s22 + $0x14c0] ss:$16 sps:$4 sm:$0xff]   ;;  %v17534_v7 = vld [vmem:[%s19879_s22 + $0x14c8] ss:$16 sps:$4 sm:$0xff]  }
 0x371   : > { %11648 = vmatpush1.bf16.msra.mxu0 %v17447_v8  ;;  %12809 = vmatpush1.bf16.msra.mxu1 %v17450_v9  ;;  %v17539_v8 = vld [vmem:[%s19879_s22 + $0x14e4] ss:$16 sps:$4 sm:$0xff]   ;;  %v17542_v9 = vld [vmem:[%s19879_s22 + $0x14ec] ss:$16 sps:$4 sm:$0xff]  }
 0x372   : > { %11649 = vmatprep.subr.bf16.mxu0 %v17455_v10  ;;  %12810 = vmatprep.subr.bf16.mxu1 %v17458_v11  ;;  %v17537_v10 = vld [vmem:[%s19879_s22 + $0x14e0] ss:$16 sps:$4 sm:$0xff]   ;;  %v17540_v11 = vld [vmem:[%s19879_s22 + $0x14e8] ss:$16 sps:$4 sm:$0xff]  }
 0x375   : > { %11650 = vmatpush1.bf16.msra.mxu0 %v17453_v12  ;;  %12811 = vmatpush1.bf16.msra.mxu1 %v17456_v13  ;;  %v17545_v12 = vld [vmem:[%s19879_s22 + $0x1504] ss:$16 sps:$4 sm:$0xff]   ;;  %v17548_v13 = vld [vmem:[%s19879_s22 + $0x150c] ss:$16 sps:$4 sm:$0xff]  }
 0x376   : > { %11651 = vmatprep.subr.bf16.mxu0 %v17461_v14  ;;  %12812 = vmatprep.subr.bf16.mxu1 %v17464_v15  ;;  %v17543_v14 = vld [vmem:[%s19879_s22 + $0x1500] ss:$16 sps:$4 sm:$0xff]   ;;  %v17546_v15 = vld [vmem:[%s19879_s22 + $0x1508] ss:$16 sps:$4 sm:$0xff]  }
 0x379   : > { %11652 = vmatpush1.bf16.msra.mxu0 %v17459_v16  ;;  %12813 = vmatpush1.bf16.msra.mxu1 %v17462_v17  ;;  %v17551_v16 = vld [vmem:[%s19879_s22 + $0x1524] ss:$16 sps:$4 sm:$0xff]   ;;  %v17554_v17 = vld [vmem:[%s19879_s22 + $0x152c] ss:$16 sps:$4 sm:$0xff]  }
 0x37a   : > { %11653 = vmatprep.subr.bf16.mxu0 %v17467_v18  ;;  %12814 = vmatprep.subr.bf16.mxu1 %v17470_v19  ;;  %v17549_v18 = vld [vmem:[%s19879_s22 + $0x1520] ss:$16 sps:$4 sm:$0xff]   ;;  %v17552_v19 = vld [vmem:[%s19879_s22 + $0x1528] ss:$16 sps:$4 sm:$0xff]  }
 0x37d   : > { %11654 = vmatpush1.bf16.msra.mxu0 %v17465_v20  ;;  %12815 = vmatpush1.bf16.msra.mxu1 %v17468_v21  ;;  %v17557_v20 = vld [vmem:[%s19879_s22 + $0x1544] ss:$16 sps:$4 sm:$0xff]   ;;  %v17560_v21 = vld [vmem:[%s19879_s22 + $0x154c] ss:$16 sps:$4 sm:$0xff]  }
 0x37e   : > { %11655 = vmatprep.subr.bf16.mxu0 %v17473_v22  ;;  %12816 = vmatprep.subr.bf16.mxu1 %v17476_v23  ;;  %v17555_v22 = vld [vmem:[%s19879_s22 + $0x1540] ss:$16 sps:$4 sm:$0xff]   ;;  %v17558_v23 = vld [vmem:[%s19879_s22 + $0x1548] ss:$16 sps:$4 sm:$0xff]  }
 0x381   : > { %11656 = vmatpush1.bf16.msra.mxu0 %v17471_v24  ;;  %12817 = vmatpush1.bf16.msra.mxu1 %v17474_v25  ;;  %v17563_v24 = vld [vmem:[%s19879_s22 + $0x1564] ss:$16 sps:$4 sm:$0xff]   ;;  %v17566_v25 = vld [vmem:[%s19879_s22 + $0x156c] ss:$16 sps:$4 sm:$0xff]  }
 0x382   : > { %11657 = vmatprep.subr.bf16.mxu0 %v17479_v26  ;;  %12818 = vmatprep.subr.bf16.mxu1 %v17482_v27  ;;  %v17561_v26 = vld [vmem:[%s19879_s22 + $0x1560] ss:$16 sps:$4 sm:$0xff]   ;;  %v17564_v27 = vld [vmem:[%s19879_s22 + $0x1568] ss:$16 sps:$4 sm:$0xff]  }
 0x385   : > { %11658 = vmatpush1.bf16.msra.mxu0 %v17477_v28  ;;  %12819 = vmatpush1.bf16.msra.mxu1 %v17480_v29  ;;  %v17569_v28 = vld [vmem:[%s19879_s22 + $0x1584] ss:$16 sps:$4 sm:$0xff]   ;;  %v17572_v29 = vld [vmem:[%s19879_s22 + $0x158c] ss:$16 sps:$4 sm:$0xff]  }
 0x386   : > { %11659 = vmatprep.subr.bf16.mxu0 %v17485_v30  ;;  %12820 = vmatprep.subr.bf16.mxu1 %v17488_v31  ;;  %v17567_v30 = vld [vmem:[%s19879_s22 + $0x1580] ss:$16 sps:$4 sm:$0xff]   ;;  %v17570_v31 = vld [vmem:[%s19879_s22 + $0x1588] ss:$16 sps:$4 sm:$0xff]  }
 0x389   : > { %11660 = vmatpush1.bf16.msra.mxu0 %v17483_v32  ;;  %12821 = vmatpush1.bf16.msra.mxu1 %v17486_v33  ;;  %v17575_v32 = vld [vmem:[%s19879_s22 + $0x15a4] ss:$16 sps:$4 sm:$0xff]   ;;  %v17578_v33 = vld [vmem:[%s19879_s22 + $0x15ac] ss:$16 sps:$4 sm:$0xff]  }
 0x38a   : > { %11661 = vmatprep.subr.bf16.mxu0 %v17491_v34  ;;  %12822 = vmatprep.subr.bf16.mxu1 %v17494_v35  ;;  %v17573_v34 = vld [vmem:[%s19879_s22 + $0x15a0] ss:$16 sps:$4 sm:$0xff]   ;;  %v17576_v35 = vld [vmem:[%s19879_s22 + $0x15a8] ss:$16 sps:$4 sm:$0xff]  }
 0x38d   : > { %11662 = vmatpush1.bf16.msra.mxu0 %v17489_v36  ;;  %12823 = vmatpush1.bf16.msra.mxu1 %v17492_v37  ;;  %v17581_v36 = vld [vmem:[%s19879_s22 + $0x15c4] ss:$16 sps:$4 sm:$0xff]   ;;  %v17584_v37 = vld [vmem:[%s19879_s22 + $0x15cc] ss:$16 sps:$4 sm:$0xff]  }
 0x38e   : > { %11674 = vmatprep.subr.bf16.mxu0 %v17497_v38  ;;  %12835 = vmatprep.subr.bf16.mxu1 %v17500_v39  ;;  %v17579_v38 = vld [vmem:[%s19879_s22 + $0x15c0] ss:$16 sps:$4 sm:$0xff]   ;;  %v17582_v39 = vld [vmem:[%s19879_s22 + $0x15c8] ss:$16 sps:$4 sm:$0xff]  }
 0x390   : > { %11664 = vmatmul.mubr.bf16.vlgmr.msra.gmra.mrb[0].mxu0 %v840_v44  ;;  %12825 = vmatmul.mubr.bf16.vlgmr.msra.gmra.mrb[0].mxu1 %v840_v44  ;;  %v17593_v44 = vld [vmem:[%s19879_s22 + $0x1604] ss:$16 sps:$4 sm:$0xff]  }
 0x391   : > { %11675 = vmatpush1.bf16.msra.mxu0 %v17495_v45  ;;  %12836 = vmatpush1.bf16.msra.mxu1 %v17498_v46  ;;  %v17596_v45 = vld [vmem:[%s19879_s22 + $0x160c] ss:$16 sps:$4 sm:$0xff]   ;;  %v734_v46 = vld [vmem:[%s19877_s4 + $0xa0] sm:$0xff] }
 0x392   : > { %11676 = vmatprep.subr.bf16.mxu0 %v17503_v47  ;;  %12837 = vmatprep.subr.bf16.mxu1 %v17506_v48  ;;  %v788_v47 = vld [vmem:[%s19877_s4 + $0x250] sm:$0xff]  ;;  %v737_v48 = vld [vmem:[%s19877_s4 + $0xb8] sm:$0xff] }
 0x393   : > { %11706 = vmatprep.mubr.bf16.mxu0 %v843_v49  ;;  %12867 = vmatprep.mubr.bf16.mxu1 %v843_v49  ;;  %v791_v49 = vld [vmem:[%s19877_s4 + $0x268] sm:$0xff] }
 0x395   : > { %11677 = vmatpush1.bf16.msra.mxu0 %v17501_v50  ;;  %12838 = vmatpush1.bf16.msra.mxu1 %v17504_v51  ;;  %v842_v50 = vpack.c.bf16 %v788_v47, %v734_v46  ;;  %v17591_v51 = vld [vmem:[%s19879_s22 + $0x1600] ss:$16 sps:$4 sm:$0xff]   ;;  %v17683_v46 = vld [vmem:[%s19879_s22 + $0x17e4] ss:$16 sps:$4 sm:$0xff]   ;;  %v17686_v47 = vld [vmem:[%s19879_s22 + $0x17ec] ss:$16 sps:$4 sm:$0xff]  }
 0x396   : > { %11678 = vmatprep.subr.bf16.mxu0 %v17509_v52  ;;  %12839 = vmatprep.subr.bf16.mxu1 %v17512_v53  ;;  %v17594_v52 = vld [vmem:[%s19879_s22 + $0x1608] ss:$16 sps:$4 sm:$0xff]   ;;  %v17599_v53 = vld [vmem:[%s19879_s22 + $0x1624] ss:$16 sps:$4 sm:$0xff]  }
 0x399   : > { %11679 = vmatpush1.bf16.msra.mxu0 %v17507_v54  ;;  %12840 = vmatpush1.bf16.msra.mxu1 %v17510_v55  ;;  %v17602_v54 = vld [vmem:[%s19879_s22 + $0x162c] ss:$16 sps:$4 sm:$0xff]   ;;  %v845_v55 = vpack.c.bf16 %v791_v49, %v737_v48  ;;  %v17681_v48 = vld [vmem:[%s19879_s22 + $0x17e0] ss:$16 sps:$4 sm:$0xff]   ;;  %v17684_v49 = vld [vmem:[%s19879_s22 + $0x17e8] ss:$16 sps:$4 sm:$0xff]  }
 0x39a   : > { %11680 = vmatprep.subr.bf16.mxu0 %v17515_v56  ;;  %12841 = vmatprep.subr.bf16.mxu1 %v17518_v57  ;;  %v17597_v56 = vld [vmem:[%s19879_s22 + $0x1620] ss:$16 sps:$4 sm:$0xff]   ;;  %v17600_v57 = vld [vmem:[%s19879_s22 + $0x1628] ss:$16 sps:$4 sm:$0xff]  }
 0x39d   : > { %11681 = vmatpush1.bf16.msra.mxu0 %v17513_v58  ;;  %12842 = vmatpush1.bf16.msra.mxu1 %v17516_v59  ;;  %v17605_v58 = vld [vmem:[%s19879_s22 + $0x1644] ss:$16 sps:$4 sm:$0xff]   ;;  %v17608_v59 = vld [vmem:[%s19879_s22 + $0x164c] ss:$16 sps:$4 sm:$0xff]  }
 0x39e   : > { %11682 = vmatprep.subr.bf16.mxu0 %v17521_v60  ;;  %12843 = vmatprep.subr.bf16.mxu1 %v17524_v61  ;;  %v17603_v60 = vld [vmem:[%s19879_s22 + $0x1640] ss:$16 sps:$4 sm:$0xff]   ;;  %v17606_v61 = vld [vmem:[%s19879_s22 + $0x1648] ss:$16 sps:$4 sm:$0xff]  }
 0x3a1   : > { %11683 = vmatpush1.bf16.msra.mxu0 %v17519_v62  ;;  %12844 = vmatpush1.bf16.msra.mxu1 %v17522_v63  ;;  %v17611_v62 = vld [vmem:[%s19879_s22 + $0x1664] ss:$16 sps:$4 sm:$0xff]   ;;  %v17614_v63 = vld [vmem:[%s19879_s22 + $0x166c] ss:$16 sps:$4 sm:$0xff]  }
 0x3a2   : > { %11684 = vmatprep.subr.bf16.mxu0 %v17527_v0  ;;  %12845 = vmatprep.subr.bf16.mxu1 %v17530_v1  ;;  %v17609_v0 = vld [vmem:[%s19879_s22 + $0x1660] ss:$16 sps:$4 sm:$0xff]   ;;  %v17612_v1 = vld [vmem:[%s19879_s22 + $0x1668] ss:$16 sps:$4 sm:$0xff]  }
 0x3a5   : > { %11685 = vmatpush1.bf16.msra.mxu0 %v17525_v2  ;;  %12846 = vmatpush1.bf16.msra.mxu1 %v17528_v3  ;;  %v17617_v2 = vld [vmem:[%s19879_s22 + $0x1684] ss:$16 sps:$4 sm:$0xff]   ;;  %v17620_v3 = vld [vmem:[%s19879_s22 + $0x168c] ss:$16 sps:$4 sm:$0xff]  }
 0x3a6   : > { %11686 = vmatprep.subr.bf16.mxu0 %v17533_v4  ;;  %12847 = vmatprep.subr.bf16.mxu1 %v17536_v5  ;;  %v17615_v4 = vld [vmem:[%s19879_s22 + $0x1680] ss:$16 sps:$4 sm:$0xff]   ;;  %v17618_v5 = vld [vmem:[%s19879_s22 + $0x1688] ss:$16 sps:$4 sm:$0xff]  }
 0x3a9   : > { %11687 = vmatpush1.bf16.msra.mxu0 %v17531_v6  ;;  %12848 = vmatpush1.bf16.msra.mxu1 %v17534_v7  ;;  %v17623_v6 = vld [vmem:[%s19879_s22 + $0x16a4] ss:$16 sps:$4 sm:$0xff]   ;;  %v17626_v7 = vld [vmem:[%s19879_s22 + $0x16ac] ss:$16 sps:$4 sm:$0xff]  }
 0x3aa   : > { %11688 = vmatprep.subr.bf16.mxu0 %v17539_v8  ;;  %12849 = vmatprep.subr.bf16.mxu1 %v17542_v9  ;;  %v17621_v8 = vld [vmem:[%s19879_s22 + $0x16a0] ss:$16 sps:$4 sm:$0xff]   ;;  %v17624_v9 = vld [vmem:[%s19879_s22 + $0x16a8] ss:$16 sps:$4 sm:$0xff]  }
 0x3ad   : > { %11689 = vmatpush1.bf16.msra.mxu0 %v17537_v10  ;;  %12850 = vmatpush1.bf16.msra.mxu1 %v17540_v11  ;;  %v17629_v10 = vld [vmem:[%s19879_s22 + $0x16c4] ss:$16 sps:$4 sm:$0xff]   ;;  %v17632_v11 = vld [vmem:[%s19879_s22 + $0x16cc] ss:$16 sps:$4 sm:$0xff]  }
 0x3ae   : > { %11690 = vmatprep.subr.bf16.mxu0 %v17545_v12  ;;  %12851 = vmatprep.subr.bf16.mxu1 %v17548_v13  ;;  %v17627_v12 = vld [vmem:[%s19879_s22 + $0x16c0] ss:$16 sps:$4 sm:$0xff]   ;;  %v17630_v13 = vld [vmem:[%s19879_s22 + $0x16c8] ss:$16 sps:$4 sm:$0xff]  }
 0x3b1   : > { %11691 = vmatpush1.bf16.msra.mxu0 %v17543_v14  ;;  %12852 = vmatpush1.bf16.msra.mxu1 %v17546_v15  ;;  %v17635_v14 = vld [vmem:[%s19879_s22 + $0x16e4] ss:$16 sps:$4 sm:$0xff]   ;;  %v17638_v15 = vld [vmem:[%s19879_s22 + $0x16ec] ss:$16 sps:$4 sm:$0xff]  }
 0x3b2   : > { %11692 = vmatprep.subr.bf16.mxu0 %v17551_v16  ;;  %12853 = vmatprep.subr.bf16.mxu1 %v17554_v17  ;;  %v17633_v16 = vld [vmem:[%s19879_s22 + $0x16e0] ss:$16 sps:$4 sm:$0xff]   ;;  %v17636_v17 = vld [vmem:[%s19879_s22 + $0x16e8] ss:$16 sps:$4 sm:$0xff]  }
 0x3b5   : > { %11693 = vmatpush1.bf16.msra.mxu0 %v17549_v18  ;;  %12854 = vmatpush1.bf16.msra.mxu1 %v17552_v19  ;;  %v17641_v18 = vld [vmem:[%s19879_s22 + $0x1704] ss:$16 sps:$4 sm:$0xff]   ;;  %v17644_v19 = vld [vmem:[%s19879_s22 + $0x170c] ss:$16 sps:$4 sm:$0xff]  }
 0x3b6   : > { %11694 = vmatprep.subr.bf16.mxu0 %v17557_v20  ;;  %12855 = vmatprep.subr.bf16.mxu1 %v17560_v21  ;;  %v17639_v20 = vld [vmem:[%s19879_s22 + $0x1700] ss:$16 sps:$4 sm:$0xff]   ;;  %v17642_v21 = vld [vmem:[%s19879_s22 + $0x1708] ss:$16 sps:$4 sm:$0xff]  }
 0x3b9   : > { %11695 = vmatpush1.bf16.msra.mxu0 %v17555_v22  ;;  %12856 = vmatpush1.bf16.msra.mxu1 %v17558_v23  ;;  %v17647_v22 = vld [vmem:[%s19879_s22 + $0x1724] ss:$16 sps:$4 sm:$0xff]   ;;  %v17650_v23 = vld [vmem:[%s19879_s22 + $0x172c] ss:$16 sps:$4 sm:$0xff]  }
 0x3ba   : > { %11696 = vmatprep.subr.bf16.mxu0 %v17563_v24  ;;  %12857 = vmatprep.subr.bf16.mxu1 %v17566_v25  ;;  %v17645_v24 = vld [vmem:[%s19879_s22 + $0x1720] ss:$16 sps:$4 sm:$0xff]   ;;  %v17648_v25 = vld [vmem:[%s19879_s22 + $0x1728] ss:$16 sps:$4 sm:$0xff]  }
 0x3bd   : > { %11697 = vmatpush1.bf16.msra.mxu0 %v17561_v26  ;;  %12858 = vmatpush1.bf16.msra.mxu1 %v17564_v27  ;;  %v17653_v26 = vld [vmem:[%s19879_s22 + $0x1744] ss:$16 sps:$4 sm:$0xff]   ;;  %v17656_v27 = vld [vmem:[%s19879_s22 + $0x174c] ss:$16 sps:$4 sm:$0xff]  }
 0x3be   : > { %11698 = vmatprep.subr.bf16.mxu0 %v17569_v28  ;;  %12859 = vmatprep.subr.bf16.mxu1 %v17572_v29  ;;  %v17651_v28 = vld [vmem:[%s19879_s22 + $0x1740] ss:$16 sps:$4 sm:$0xff]   ;;  %v17654_v29 = vld [vmem:[%s19879_s22 + $0x1748] ss:$16 sps:$4 sm:$0xff]  }
 0x3c1   : > { %11699 = vmatpush1.bf16.msra.mxu0 %v17567_v30  ;;  %12860 = vmatpush1.bf16.msra.mxu1 %v17570_v31  ;;  %v17659_v30 = vld [vmem:[%s19879_s22 + $0x1764] ss:$16 sps:$4 sm:$0xff]   ;;  %v17662_v31 = vld [vmem:[%s19879_s22 + $0x176c] ss:$16 sps:$4 sm:$0xff]  }
 0x3c2   : > { %11700 = vmatprep.subr.bf16.mxu0 %v17575_v32  ;;  %12861 = vmatprep.subr.bf16.mxu1 %v17578_v33  ;;  %v17657_v32 = vld [vmem:[%s19879_s22 + $0x1760] ss:$16 sps:$4 sm:$0xff]   ;;  %v17660_v33 = vld [vmem:[%s19879_s22 + $0x1768] ss:$16 sps:$4 sm:$0xff]  }
 0x3c5   : > { %11701 = vmatpush1.bf16.msra.mxu0 %v17573_v34  ;;  %12862 = vmatpush1.bf16.msra.mxu1 %v17576_v35  ;;  %v17665_v34 = vld [vmem:[%s19879_s22 + $0x1784] ss:$16 sps:$4 sm:$0xff]   ;;  %v17668_v35 = vld [vmem:[%s19879_s22 + $0x178c] ss:$16 sps:$4 sm:$0xff]  }
 0x3c6   : > { %11702 = vmatprep.subr.bf16.mxu0 %v17581_v36  ;;  %12863 = vmatprep.subr.bf16.mxu1 %v17584_v37  ;;  %v17663_v36 = vld [vmem:[%s19879_s22 + $0x1780] ss:$16 sps:$4 sm:$0xff]   ;;  %v17666_v37 = vld [vmem:[%s19879_s22 + $0x1788] ss:$16 sps:$4 sm:$0xff]  }
 0x3c9   : > { %11703 = vmatpush1.bf16.msra.mxu0 %v17579_v38  ;;  %12864 = vmatpush1.bf16.msra.mxu1 %v17582_v39  ;;  %v17671_v38 = vld [vmem:[%s19879_s22 + $0x17a4] ss:$16 sps:$4 sm:$0xff]   ;;  %v17674_v39 = vld [vmem:[%s19879_s22 + $0x17ac] ss:$16 sps:$4 sm:$0xff]  }
 0x3ca   : > { %11704 = vmatprep.subr.bf16.mxu0 %v17587_v40  ;;  %12865 = vmatprep.subr.bf16.mxu1 %v17590_v41  ;;  %v17669_v40 = vld [vmem:[%s19879_s22 + $0x17a0] ss:$16 sps:$4 sm:$0xff]   ;;  %v17672_v41 = vld [vmem:[%s19879_s22 + $0x17a8] ss:$16 sps:$4 sm:$0xff]  }
 0x3cd   : > { %11705 = vmatpush1.bf16.msra.mxu0 %v17585_v42  ;;  %12866 = vmatpush1.bf16.msra.mxu1 %v17588_v43  ;;  %v17677_v42 = vld [vmem:[%s19879_s22 + $0x17c4] ss:$16 sps:$4 sm:$0xff]   ;;  %v17680_v43 = vld [vmem:[%s19879_s22 + $0x17cc] ss:$16 sps:$4 sm:$0xff]  }
 0x3ce   : > { %11717 = vmatprep.subr.bf16.mxu0 %v17593_v44  ;;  %12878 = vmatprep.subr.bf16.mxu1 %v17596_v45  ;;  %v17675_v44 = vld [vmem:[%s19879_s22 + $0x17c0] ss:$16 sps:$4 sm:$0xff]   ;;  %v17678_v45 = vld [vmem:[%s19879_s22 + $0x17c8] ss:$16 sps:$4 sm:$0xff]  }
 0x3d0   : > { %11707 = vmatmul.mubr.bf16.vlgmr.msra.gmra.mrb[0].mxu0 %v842_v50  ;;  %12868 = vmatmul.mubr.bf16.vlgmr.msra.gmra.mrb[0].mxu1 %v842_v50  ;;  %v17689_v50 = vld [vmem:[%s19879_s22 + $0x1804] ss:$16 sps:$4 sm:$0xff]  }
 0x3d1   : > { %11718 = vmatpush1.bf16.msra.mxu0 %v17591_v51  ;;  %12879 = vmatpush1.bf16.msra.mxu1 %v17594_v52  ;;  %v17692_v51 = vld [vmem:[%s19879_s22 + $0x180c] ss:$16 sps:$4 sm:$0xff]   ;;  %v736_v52 = vld [vmem:[%s19877_s4 + $0xb0] sm:$0xff] }
 0x3d2   : > { %11719 = vmatprep.subr.bf16.mxu0 %v17599_v53  ;;  %12880 = vmatprep.subr.bf16.mxu1 %v17602_v54  ;;  %v790_v53 = vld [vmem:[%s19877_s4 + $0x260] sm:$0xff]  ;;  %v739_v54 = vld [vmem:[%s19877_s4 + $0xc8] sm:$0xff] }
 0x3d3   : > { %11749 = vmatprep.mubr.bf16.mxu0 %v845_v55  ;;  %12910 = vmatprep.mubr.bf16.mxu1 %v845_v55  ;;  %v793_v55 = vld [vmem:[%s19877_s4 + $0x278] sm:$0xff] }
 0x3d5   : > { %11720 = vmatpush1.bf16.msra.mxu0 %v17597_v56  ;;  %12881 = vmatpush1.bf16.msra.mxu1 %v17600_v57  ;;  %v844_v56 = vpack.c.bf16 %v790_v53, %v736_v52  ;;  %v17687_v57 = vld [vmem:[%s19879_s22 + $0x1800] ss:$16 sps:$4 sm:$0xff]   ;;  %v17779_v52 = vld [vmem:[%s19879_s22 + $0x19e4] ss:$16 sps:$4 sm:$0xff]   ;;  %v17782_v53 = vld [vmem:[%s19879_s22 + $0x19ec] ss:$16 sps:$4 sm:$0xff]  }
 0x3d6   : > { %11721 = vmatprep.subr.bf16.mxu0 %v17605_v58  ;;  %12882 = vmatprep.subr.bf16.mxu1 %v17608_v59  ;;  %v17690_v58 = vld [vmem:[%s19879_s22 + $0x1808] ss:$16 sps:$4 sm:$0xff]   ;;  %v17695_v59 = vld [vmem:[%s19879_s22 + $0x1824] ss:$16 sps:$4 sm:$0xff]  }
 0x3d9   : > { %11722 = vmatpush1.bf16.msra.mxu0 %v17603_v60  ;;  %12883 = vmatpush1.bf16.msra.mxu1 %v17606_v61  ;;  %v17698_v60 = vld [vmem:[%s19879_s22 + $0x182c] ss:$16 sps:$4 sm:$0xff]   ;;  %v847_v61 = vpack.c.bf16 %v793_v55, %v739_v54  ;;  %v17777_v54 = vld [vmem:[%s19879_s22 + $0x19e0] ss:$16 sps:$4 sm:$0xff]   ;;  %v17780_v55 = vld [vmem:[%s19879_s22 + $0x19e8] ss:$16 sps:$4 sm:$0xff]  }
 0x3da   : > { %11723 = vmatprep.subr.bf16.mxu0 %v17611_v62  ;;  %12884 = vmatprep.subr.bf16.mxu1 %v17614_v63  ;;  %v17693_v62 = vld [vmem:[%s19879_s22 + $0x1820] ss:$16 sps:$4 sm:$0xff]   ;;  %v17696_v63 = vld [vmem:[%s19879_s22 + $0x1828] ss:$16 sps:$4 sm:$0xff]  }
 0x3dd   : > { %11724 = vmatpush1.bf16.msra.mxu0 %v17609_v0  ;;  %12885 = vmatpush1.bf16.msra.mxu1 %v17612_v1  ;;  %v17701_v0 = vld [vmem:[%s19879_s22 + $0x1844] ss:$16 sps:$4 sm:$0xff]   ;;  %v17704_v1 = vld [vmem:[%s19879_s22 + $0x184c] ss:$16 sps:$4 sm:$0xff]  }
 0x3de   : > { %11725 = vmatprep.subr.bf16.mxu0 %v17617_v2  ;;  %12886 = vmatprep.subr.bf16.mxu1 %v17620_v3  ;;  %v17699_v2 = vld [vmem:[%s19879_s22 + $0x1840] ss:$16 sps:$4 sm:$0xff]   ;;  %v17702_v3 = vld [vmem:[%s19879_s22 + $0x1848] ss:$16 sps:$4 sm:$0xff]  }
 0x3e1   : > { %11726 = vmatpush1.bf16.msra.mxu0 %v17615_v4  ;;  %12887 = vmatpush1.bf16.msra.mxu1 %v17618_v5  ;;  %v17707_v4 = vld [vmem:[%s19879_s22 + $0x1864] ss:$16 sps:$4 sm:$0xff]   ;;  %v17710_v5 = vld [vmem:[%s19879_s22 + $0x186c] ss:$16 sps:$4 sm:$0xff]  }
 0x3e2   : > { %11727 = vmatprep.subr.bf16.mxu0 %v17623_v6  ;;  %12888 = vmatprep.subr.bf16.mxu1 %v17626_v7  ;;  %v17705_v6 = vld [vmem:[%s19879_s22 + $0x1860] ss:$16 sps:$4 sm:$0xff]   ;;  %v17708_v7 = vld [vmem:[%s19879_s22 + $0x1868] ss:$16 sps:$4 sm:$0xff]  }
 0x3e5   : > { %11728 = vmatpush1.bf16.msra.mxu0 %v17621_v8  ;;  %12889 = vmatpush1.bf16.msra.mxu1 %v17624_v9  ;;  %v17713_v8 = vld [vmem:[%s19879_s22 + $0x1884] ss:$16 sps:$4 sm:$0xff]   ;;  %v17716_v9 = vld [vmem:[%s19879_s22 + $0x188c] ss:$16 sps:$4 sm:$0xff]  }
 0x3e6   : > { %11729 = vmatprep.subr.bf16.mxu0 %v17629_v10  ;;  %12890 = vmatprep.subr.bf16.mxu1 %v17632_v11  ;;  %v17711_v10 = vld [vmem:[%s19879_s22 + $0x1880] ss:$16 sps:$4 sm:$0xff]   ;;  %v17714_v11 = vld [vmem:[%s19879_s22 + $0x1888] ss:$16 sps:$4 sm:$0xff]  }
 0x3e9   : > { %11730 = vmatpush1.bf16.msra.mxu0 %v17627_v12  ;;  %12891 = vmatpush1.bf16.msra.mxu1 %v17630_v13  ;;  %v17719_v12 = vld [vmem:[%s19879_s22 + $0x18a4] ss:$16 sps:$4 sm:$0xff]   ;;  %v17722_v13 = vld [vmem:[%s19879_s22 + $0x18ac] ss:$16 sps:$4 sm:$0xff]  }
 0x3ea   : > { %11731 = vmatprep.subr.bf16.mxu0 %v17635_v14  ;;  %12892 = vmatprep.subr.bf16.mxu1 %v17638_v15  ;;  %v17717_v14 = vld [vmem:[%s19879_s22 + $0x18a0] ss:$16 sps:$4 sm:$0xff]   ;;  %v17720_v15 = vld [vmem:[%s19879_s22 + $0x18a8] ss:$16 sps:$4 sm:$0xff]  }
 0x3ed   : > { %11732 = vmatpush1.bf16.msra.mxu0 %v17633_v16  ;;  %12893 = vmatpush1.bf16.msra.mxu1 %v17636_v17  ;;  %v17725_v16 = vld [vmem:[%s19879_s22 + $0x18c4] ss:$16 sps:$4 sm:$0xff]   ;;  %v17728_v17 = vld [vmem:[%s19879_s22 + $0x18cc] ss:$16 sps:$4 sm:$0xff]  }
 0x3ee   : > { %11733 = vmatprep.subr.bf16.mxu0 %v17641_v18  ;;  %12894 = vmatprep.subr.bf16.mxu1 %v17644_v19  ;;  %v17723_v18 = vld [vmem:[%s19879_s22 + $0x18c0] ss:$16 sps:$4 sm:$0xff]   ;;  %v17726_v19 = vld [vmem:[%s19879_s22 + $0x18c8] ss:$16 sps:$4 sm:$0xff]  }
 0x3f1   : > { %11734 = vmatpush1.bf16.msra.mxu0 %v17639_v20  ;;  %12895 = vmatpush1.bf16.msra.mxu1 %v17642_v21  ;;  %v17731_v20 = vld [vmem:[%s19879_s22 + $0x18e4] ss:$16 sps:$4 sm:$0xff]   ;;  %v17734_v21 = vld [vmem:[%s19879_s22 + $0x18ec] ss:$16 sps:$4 sm:$0xff]  }
 0x3f2   : > { %11735 = vmatprep.subr.bf16.mxu0 %v17647_v22  ;;  %12896 = vmatprep.subr.bf16.mxu1 %v17650_v23  ;;  %v17729_v22 = vld [vmem:[%s19879_s22 + $0x18e0] ss:$16 sps:$4 sm:$0xff]   ;;  %v17732_v23 = vld [vmem:[%s19879_s22 + $0x18e8] ss:$16 sps:$4 sm:$0xff]  }
 0x3f5   : > { %11736 = vmatpush1.bf16.msra.mxu0 %v17645_v24  ;;  %12897 = vmatpush1.bf16.msra.mxu1 %v17648_v25  ;;  %v17737_v24 = vld [vmem:[%s19879_s22 + $0x1904] ss:$16 sps:$4 sm:$0xff]   ;;  %v17740_v25 = vld [vmem:[%s19879_s22 + $0x190c] ss:$16 sps:$4 sm:$0xff]  }
 0x3f6   : > { %11737 = vmatprep.subr.bf16.mxu0 %v17653_v26  ;;  %12898 = vmatprep.subr.bf16.mxu1 %v17656_v27  ;;  %v17735_v26 = vld [vmem:[%s19879_s22 + $0x1900] ss:$16 sps:$4 sm:$0xff]   ;;  %v17738_v27 = vld [vmem:[%s19879_s22 + $0x1908] ss:$16 sps:$4 sm:$0xff]  }
 0x3f9   : > { %11738 = vmatpush1.bf16.msra.mxu0 %v17651_v28  ;;  %12899 = vmatpush1.bf16.msra.mxu1 %v17654_v29  ;;  %v17743_v28 = vld [vmem:[%s19879_s22 + $0x1924] ss:$16 sps:$4 sm:$0xff]   ;;  %v17746_v29 = vld [vmem:[%s19879_s22 + $0x192c] ss:$16 sps:$4 sm:$0xff]  }
 0x3fa   : > { %11739 = vmatprep.subr.bf16.mxu0 %v17659_v30  ;;  %12900 = vmatprep.subr.bf16.mxu1 %v17662_v31  ;;  %v17741_v30 = vld [vmem:[%s19879_s22 + $0x1920] ss:$16 sps:$4 sm:$0xff]   ;;  %v17744_v31 = vld [vmem:[%s19879_s22 + $0x1928] ss:$16 sps:$4 sm:$0xff]  }
 0x3fd   : > { %11740 = vmatpush1.bf16.msra.mxu0 %v17657_v32  ;;  %12901 = vmatpush1.bf16.msra.mxu1 %v17660_v33  ;;  %v17749_v32 = vld [vmem:[%s19879_s22 + $0x1944] ss:$16 sps:$4 sm:$0xff]   ;;  %v17752_v33 = vld [vmem:[%s19879_s22 + $0x194c] ss:$16 sps:$4 sm:$0xff]  }
 0x3fe   : > { %11741 = vmatprep.subr.bf16.mxu0 %v17665_v34  ;;  %12902 = vmatprep.subr.bf16.mxu1 %v17668_v35  ;;  %v17747_v34 = vld [vmem:[%s19879_s22 + $0x1940] ss:$16 sps:$4 sm:$0xff]   ;;  %v17750_v35 = vld [vmem:[%s19879_s22 + $0x1948] ss:$16 sps:$4 sm:$0xff]  }
 0x401   : > { %11742 = vmatpush1.bf16.msra.mxu0 %v17663_v36  ;;  %12903 = vmatpush1.bf16.msra.mxu1 %v17666_v37  ;;  %v17755_v36 = vld [vmem:[%s19879_s22 + $0x1964] ss:$16 sps:$4 sm:$0xff]   ;;  %v17758_v37 = vld [vmem:[%s19879_s22 + $0x196c] ss:$16 sps:$4 sm:$0xff]  }
 0x402   : > { %11743 = vmatprep.subr.bf16.mxu0 %v17671_v38  ;;  %12904 = vmatprep.subr.bf16.mxu1 %v17674_v39  ;;  %v17753_v38 = vld [vmem:[%s19879_s22 + $0x1960] ss:$16 sps:$4 sm:$0xff]   ;;  %v17756_v39 = vld [vmem:[%s19879_s22 + $0x1968] ss:$16 sps:$4 sm:$0xff]  }
 0x405   : > { %11744 = vmatpush1.bf16.msra.mxu0 %v17669_v40  ;;  %12905 = vmatpush1.bf16.msra.mxu1 %v17672_v41  ;;  %v17761_v40 = vld [vmem:[%s19879_s22 + $0x1984] ss:$16 sps:$4 sm:$0xff]   ;;  %v17764_v41 = vld [vmem:[%s19879_s22 + $0x198c] ss:$16 sps:$4 sm:$0xff]  }
 0x406   : > { %11745 = vmatprep.subr.bf16.mxu0 %v17677_v42  ;;  %12906 = vmatprep.subr.bf16.mxu1 %v17680_v43  ;;  %v17759_v42 = vld [vmem:[%s19879_s22 + $0x1980] ss:$16 sps:$4 sm:$0xff]   ;;  %v17762_v43 = vld [vmem:[%s19879_s22 + $0x1988] ss:$16 sps:$4 sm:$0xff]  }
 0x409   : > { %11746 = vmatpush1.bf16.msra.mxu0 %v17675_v44  ;;  %12907 = vmatpush1.bf16.msra.mxu1 %v17678_v45  ;;  %v17767_v44 = vld [vmem:[%s19879_s22 + $0x19a4] ss:$16 sps:$4 sm:$0xff]   ;;  %v17770_v45 = vld [vmem:[%s19879_s22 + $0x19ac] ss:$16 sps:$4 sm:$0xff]  }
 0x40a   : > { %11747 = vmatprep.subr.bf16.mxu0 %v17683_v46  ;;  %12908 = vmatprep.subr.bf16.mxu1 %v17686_v47  ;;  %v17765_v46 = vld [vmem:[%s19879_s22 + $0x19a0] ss:$16 sps:$4 sm:$0xff]   ;;  %v17768_v47 = vld [vmem:[%s19879_s22 + $0x19a8] ss:$16 sps:$4 sm:$0xff]  }
 0x40d   : > { %11748 = vmatpush1.bf16.msra.mxu0 %v17681_v48  ;;  %12909 = vmatpush1.bf16.msra.mxu1 %v17684_v49  ;;  %v17773_v48 = vld [vmem:[%s19879_s22 + $0x19c4] ss:$16 sps:$4 sm:$0xff]   ;;  %v17776_v49 = vld [vmem:[%s19879_s22 + $0x19cc] ss:$16 sps:$4 sm:$0xff]  }
 0x40e   : > { %11760 = vmatprep.subr.bf16.mxu0 %v17689_v50  ;;  %12921 = vmatprep.subr.bf16.mxu1 %v17692_v51  ;;  %v17771_v50 = vld [vmem:[%s19879_s22 + $0x19c0] ss:$16 sps:$4 sm:$0xff]   ;;  %v17774_v51 = vld [vmem:[%s19879_s22 + $0x19c8] ss:$16 sps:$4 sm:$0xff]  }
 0x410   : > { %11750 = vmatmul.mubr.bf16.vlgmr.msra.gmra.mrb[0].mxu0 %v844_v56  ;;  %12911 = vmatmul.mubr.bf16.vlgmr.msra.gmra.mrb[0].mxu1 %v844_v56  ;;  %v17785_v56 = vld [vmem:[%s19879_s22 + $0x1a04] ss:$16 sps:$4 sm:$0xff]  }
 0x411   : > { %11761 = vmatpush1.bf16.msra.mxu0 %v17687_v57  ;;  %12922 = vmatpush1.bf16.msra.mxu1 %v17690_v58  ;;  %v17788_v57 = vld [vmem:[%s19879_s22 + $0x1a0c] ss:$16 sps:$4 sm:$0xff]   ;;  %v738_v58 = vld [vmem:[%s19877_s4 + $0xc0] sm:$0xff] }
 0x412   : > { %11762 = vmatprep.subr.bf16.mxu0 %v17695_v59  ;;  %12923 = vmatprep.subr.bf16.mxu1 %v17698_v60  ;;  %v792_v59 = vld [vmem:[%s19877_s4 + $0x270] sm:$0xff]  ;;  %v741_v60 = vld [vmem:[%s19877_s4 + $0xd8] sm:$0xff] }
 0x413   : > { %11792 = vmatprep.mubr.bf16.mxu0 %v847_v61  ;;  %12953 = vmatprep.mubr.bf16.mxu1 %v847_v61  ;;  %v795_v61 = vld [vmem:[%s19877_s4 + $0x288] sm:$0xff] }
 0x415   : > { %11763 = vmatpush1.bf16.msra.mxu0 %v17693_v62  ;;  %12924 = vmatpush1.bf16.msra.mxu1 %v17696_v63  ;;  %v846_v62 = vpack.c.bf16 %v792_v59, %v738_v58  ;;  %v17783_v63 = vld [vmem:[%s19879_s22 + $0x1a00] ss:$16 sps:$4 sm:$0xff]   ;;  %v17875_v58 = vld [vmem:[%s19879_s22 + $0x1be4] ss:$16 sps:$4 sm:$0xff]   ;;  %v17878_v59 = vld [vmem:[%s19879_s22 + $0x1bec] ss:$16 sps:$4 sm:$0xff]  }
 0x416   : > { %11764 = vmatprep.subr.bf16.mxu0 %v17701_v0  ;;  %12925 = vmatprep.subr.bf16.mxu1 %v17704_v1  ;;  %v17786_v0 = vld [vmem:[%s19879_s22 + $0x1a08] ss:$16 sps:$4 sm:$0xff]   ;;  %v17791_v1 = vld [vmem:[%s19879_s22 + $0x1a24] ss:$16 sps:$4 sm:$0xff]  }
 0x419   : > { %11765 = vmatpush1.bf16.msra.mxu0 %v17699_v2  ;;  %12926 = vmatpush1.bf16.msra.mxu1 %v17702_v3  ;;  %v17794_v2 = vld [vmem:[%s19879_s22 + $0x1a2c] ss:$16 sps:$4 sm:$0xff]   ;;  %v849_v3 = vpack.c.bf16 %v795_v61, %v741_v60  ;;  %v17873_v60 = vld [vmem:[%s19879_s22 + $0x1be0] ss:$16 sps:$4 sm:$0xff]   ;;  %v17876_v61 = vld [vmem:[%s19879_s22 + $0x1be8] ss:$16 sps:$4 sm:$0xff]  }
 0x41a   : > { %11766 = vmatprep.subr.bf16.mxu0 %v17707_v4  ;;  %12927 = vmatprep.subr.bf16.mxu1 %v17710_v5  ;;  %v17789_v4 = vld [vmem:[%s19879_s22 + $0x1a20] ss:$16 sps:$4 sm:$0xff]   ;;  %v17792_v5 = vld [vmem:[%s19879_s22 + $0x1a28] ss:$16 sps:$4 sm:$0xff]  }
 0x41d   : > { %11767 = vmatpush1.bf16.msra.mxu0 %v17705_v6  ;;  %12928 = vmatpush1.bf16.msra.mxu1 %v17708_v7  ;;  %v17797_v6 = vld [vmem:[%s19879_s22 + $0x1a44] ss:$16 sps:$4 sm:$0xff]   ;;  %v17800_v7 = vld [vmem:[%s19879_s22 + $0x1a4c] ss:$16 sps:$4 sm:$0xff]  }
 0x41e   : > { %11768 = vmatprep.subr.bf16.mxu0 %v17713_v8  ;;  %12929 = vmatprep.subr.bf16.mxu1 %v17716_v9  ;;  %v17795_v8 = vld [vmem:[%s19879_s22 + $0x1a40] ss:$16 sps:$4 sm:$0xff]   ;;  %v17798_v9 = vld [vmem:[%s19879_s22 + $0x1a48] ss:$16 sps:$4 sm:$0xff]  }
 0x421   : > { %11769 = vmatpush1.bf16.msra.mxu0 %v17711_v10  ;;  %12930 = vmatpush1.bf16.msra.mxu1 %v17714_v11  ;;  %v17803_v10 = vld [vmem:[%s19879_s22 + $0x1a64] ss:$16 sps:$4 sm:$0xff]   ;;  %v17806_v11 = vld [vmem:[%s19879_s22 + $0x1a6c] ss:$16 sps:$4 sm:$0xff]  }
 0x422   : > { %11770 = vmatprep.subr.bf16.mxu0 %v17719_v12  ;;  %12931 = vmatprep.subr.bf16.mxu1 %v17722_v13  ;;  %v17801_v12 = vld [vmem:[%s19879_s22 + $0x1a60] ss:$16 sps:$4 sm:$0xff]   ;;  %v17804_v13 = vld [vmem:[%s19879_s22 + $0x1a68] ss:$16 sps:$4 sm:$0xff]  }
 0x425   : > { %11771 = vmatpush1.bf16.msra.mxu0 %v17717_v14  ;;  %12932 = vmatpush1.bf16.msra.mxu1 %v17720_v15  ;;  %v17809_v14 = vld [vmem:[%s19879_s22 + $0x1a84] ss:$16 sps:$4 sm:$0xff]   ;;  %v17812_v15 = vld [vmem:[%s19879_s22 + $0x1a8c] ss:$16 sps:$4 sm:$0xff]  }
 0x426   : > { %11772 = vmatprep.subr.bf16.mxu0 %v17725_v16  ;;  %12933 = vmatprep.subr.bf16.mxu1 %v17728_v17  ;;  %v17807_v16 = vld [vmem:[%s19879_s22 + $0x1a80] ss:$16 sps:$4 sm:$0xff]   ;;  %v17810_v17 = vld [vmem:[%s19879_s22 + $0x1a88] ss:$16 sps:$4 sm:$0xff]  }
 0x429   : > { %11773 = vmatpush1.bf16.msra.mxu0 %v17723_v18  ;;  %12934 = vmatpush1.bf16.msra.mxu1 %v17726_v19  ;;  %v17815_v18 = vld [vmem:[%s19879_s22 + $0x1aa4] ss:$16 sps:$4 sm:$0xff]   ;;  %v17818_v19 = vld [vmem:[%s19879_s22 + $0x1aac] ss:$16 sps:$4 sm:$0xff]  }
 0x42a   : > { %11774 = vmatprep.subr.bf16.mxu0 %v17731_v20  ;;  %12935 = vmatprep.subr.bf16.mxu1 %v17734_v21  ;;  %v17813_v20 = vld [vmem:[%s19879_s22 + $0x1aa0] ss:$16 sps:$4 sm:$0xff]   ;;  %v17816_v21 = vld [vmem:[%s19879_s22 + $0x1aa8] ss:$16 sps:$4 sm:$0xff]  }
 0x42d   : > { %11775 = vmatpush1.bf16.msra.mxu0 %v17729_v22  ;;  %12936 = vmatpush1.bf16.msra.mxu1 %v17732_v23  ;;  %v17821_v22 = vld [vmem:[%s19879_s22 + $0x1ac4] ss:$16 sps:$4 sm:$0xff]   ;;  %v17824_v23 = vld [vmem:[%s19879_s22 + $0x1acc] ss:$16 sps:$4 sm:$0xff]  }
 0x42e   : > { %11776 = vmatprep.subr.bf16.mxu0 %v17737_v24  ;;  %12937 = vmatprep.subr.bf16.mxu1 %v17740_v25  ;;  %v17819_v24 = vld [vmem:[%s19879_s22 + $0x1ac0] ss:$16 sps:$4 sm:$0xff]   ;;  %v17822_v25 = vld [vmem:[%s19879_s22 + $0x1ac8] ss:$16 sps:$4 sm:$0xff]  }
 0x431   : > { %11777 = vmatpush1.bf16.msra.mxu0 %v17735_v26  ;;  %12938 = vmatpush1.bf16.msra.mxu1 %v17738_v27  ;;  %v17827_v26 = vld [vmem:[%s19879_s22 + $0x1ae4] ss:$16 sps:$4 sm:$0xff]   ;;  %v17830_v27 = vld [vmem:[%s19879_s22 + $0x1aec] ss:$16 sps:$4 sm:$0xff]  }
 0x432   : > { %11778 = vmatprep.subr.bf16.mxu0 %v17743_v28  ;;  %12939 = vmatprep.subr.bf16.mxu1 %v17746_v29  ;;  %v17825_v28 = vld [vmem:[%s19879_s22 + $0x1ae0] ss:$16 sps:$4 sm:$0xff]   ;;  %v17828_v29 = vld [vmem:[%s19879_s22 + $0x1ae8] ss:$16 sps:$4 sm:$0xff]  }
 0x435   : > { %11779 = vmatpush1.bf16.msra.mxu0 %v17741_v30  ;;  %12940 = vmatpush1.bf16.msra.mxu1 %v17744_v31  ;;  %v17833_v30 = vld [vmem:[%s19879_s22 + $0x1b04] ss:$16 sps:$4 sm:$0xff]   ;;  %v17836_v31 = vld [vmem:[%s19879_s22 + $0x1b0c] ss:$16 sps:$4 sm:$0xff]  }
 0x436   : > { %11780 = vmatprep.subr.bf16.mxu0 %v17749_v32  ;;  %12941 = vmatprep.subr.bf16.mxu1 %v17752_v33  ;;  %v17831_v32 = vld [vmem:[%s19879_s22 + $0x1b00] ss:$16 sps:$4 sm:$0xff]   ;;  %v17834_v33 = vld [vmem:[%s19879_s22 + $0x1b08] ss:$16 sps:$4 sm:$0xff]  }
 0x439   : > { %11781 = vmatpush1.bf16.msra.mxu0 %v17747_v34  ;;  %12942 = vmatpush1.bf16.msra.mxu1 %v17750_v35  ;;  %v17839_v34 = vld [vmem:[%s19879_s22 + $0x1b24] ss:$16 sps:$4 sm:$0xff]   ;;  %v17842_v35 = vld [vmem:[%s19879_s22 + $0x1b2c] ss:$16 sps:$4 sm:$0xff]  }
 0x43a   : > { %11782 = vmatprep.subr.bf16.mxu0 %v17755_v36  ;;  %12943 = vmatprep.subr.bf16.mxu1 %v17758_v37  ;;  %v17837_v36 = vld [vmem:[%s19879_s22 + $0x1b20] ss:$16 sps:$4 sm:$0xff]   ;;  %v17840_v37 = vld [vmem:[%s19879_s22 + $0x1b28] ss:$16 sps:$4 sm:$0xff]  }
 0x43d   : > { %11783 = vmatpush1.bf16.msra.mxu0 %v17753_v38  ;;  %12944 = vmatpush1.bf16.msra.mxu1 %v17756_v39  ;;  %v17845_v38 = vld [vmem:[%s19879_s22 + $0x1b44] ss:$16 sps:$4 sm:$0xff]   ;;  %v17848_v39 = vld [vmem:[%s19879_s22 + $0x1b4c] ss:$16 sps:$4 sm:$0xff]  }
 0x43e   : > { %11784 = vmatprep.subr.bf16.mxu0 %v17761_v40  ;;  %12945 = vmatprep.subr.bf16.mxu1 %v17764_v41  ;;  %v17843_v40 = vld [vmem:[%s19879_s22 + $0x1b40] ss:$16 sps:$4 sm:$0xff]   ;;  %v17846_v41 = vld [vmem:[%s19879_s22 + $0x1b48] ss:$16 sps:$4 sm:$0xff]  }
 0x441   : > { %11785 = vmatpush1.bf16.msra.mxu0 %v17759_v42  ;;  %12946 = vmatpush1.bf16.msra.mxu1 %v17762_v43  ;;  %v17851_v42 = vld [vmem:[%s19879_s22 + $0x1b64] ss:$16 sps:$4 sm:$0xff]   ;;  %v17854_v43 = vld [vmem:[%s19879_s22 + $0x1b6c] ss:$16 sps:$4 sm:$0xff]  }
 0x442   : > { %11786 = vmatprep.subr.bf16.mxu0 %v17767_v44  ;;  %12947 = vmatprep.subr.bf16.mxu1 %v17770_v45  ;;  %v17849_v44 = vld [vmem:[%s19879_s22 + $0x1b60] ss:$16 sps:$4 sm:$0xff]   ;;  %v17852_v45 = vld [vmem:[%s19879_s22 + $0x1b68] ss:$16 sps:$4 sm:$0xff]  }
 0x445   : > { %11787 = vmatpush1.bf16.msra.mxu0 %v17765_v46  ;;  %12948 = vmatpush1.bf16.msra.mxu1 %v17768_v47  ;;  %v17857_v46 = vld [vmem:[%s19879_s22 + $0x1b84] ss:$16 sps:$4 sm:$0xff]   ;;  %v17860_v47 = vld [vmem:[%s19879_s22 + $0x1b8c] ss:$16 sps:$4 sm:$0xff]  }
 0x446   : > { %11788 = vmatprep.subr.bf16.mxu0 %v17773_v48  ;;  %12949 = vmatprep.subr.bf16.mxu1 %v17776_v49  ;;  %v17855_v48 = vld [vmem:[%s19879_s22 + $0x1b80] ss:$16 sps:$4 sm:$0xff]   ;;  %v17858_v49 = vld [vmem:[%s19879_s22 + $0x1b88] ss:$16 sps:$4 sm:$0xff]  }
 0x449   : > { %11789 = vmatpush1.bf16.msra.mxu0 %v17771_v50  ;;  %12950 = vmatpush1.bf16.msra.mxu1 %v17774_v51  ;;  %v17863_v50 = vld [vmem:[%s19879_s22 + $0x1ba4] ss:$16 sps:$4 sm:$0xff]   ;;  %v17866_v51 = vld [vmem:[%s19879_s22 + $0x1bac] ss:$16 sps:$4 sm:$0xff]  }
 0x44a   : > { %11790 = vmatprep.subr.bf16.mxu0 %v17779_v52  ;;  %12951 = vmatprep.subr.bf16.mxu1 %v17782_v53  ;;  %v17861_v52 = vld [vmem:[%s19879_s22 + $0x1ba0] ss:$16 sps:$4 sm:$0xff]   ;;  %v17864_v53 = vld [vmem:[%s19879_s22 + $0x1ba8] ss:$16 sps:$4 sm:$0xff]  }
 0x44d   : > { %11791 = vmatpush1.bf16.msra.mxu0 %v17777_v54  ;;  %12952 = vmatpush1.bf16.msra.mxu1 %v17780_v55  ;;  %v17869_v54 = vld [vmem:[%s19879_s22 + $0x1bc4] ss:$16 sps:$4 sm:$0xff]   ;;  %v17872_v55 = vld [vmem:[%s19879_s22 + $0x1bcc] ss:$16 sps:$4 sm:$0xff]  }
 0x44e   : > { %11803 = vmatprep.subr.bf16.mxu0 %v17785_v56  ;;  %12964 = vmatprep.subr.bf16.mxu1 %v17788_v57  ;;  %v17867_v56 = vld [vmem:[%s19879_s22 + $0x1bc0] ss:$16 sps:$4 sm:$0xff]   ;;  %v17870_v57 = vld [vmem:[%s19879_s22 + $0x1bc8] ss:$16 sps:$4 sm:$0xff]  }
 0x450   : > { %11793 = vmatmul.mubr.bf16.vlgmr.msra.gmra.mrb[0].mxu0 %v846_v62  ;;  %12954 = vmatmul.mubr.bf16.vlgmr.msra.gmra.mrb[0].mxu1 %v846_v62  ;;  %v17881_v62 = vld [vmem:[%s19879_s22 + $0x1c04] ss:$16 sps:$4 sm:$0xff]  }
 0x451   : > { %11804 = vmatpush1.bf16.msra.mxu0 %v17783_v63  ;;  %12965 = vmatpush1.bf16.msra.mxu1 %v17786_v0  ;;  %v17884_v63 = vld [vmem:[%s19879_s22 + $0x1c0c] ss:$16 sps:$4 sm:$0xff]   ;;  %v740_v0 = vld [vmem:[%s19877_s4 + $0xd0] sm:$0xff] }
 0x452   : > { %11805 = vmatprep.subr.bf16.mxu0 %v17791_v1  ;;  %12966 = vmatprep.subr.bf16.mxu1 %v17794_v2  ;;  %v794_v1 = vld [vmem:[%s19877_s4 + $0x280] sm:$0xff]  ;;  %v743_v2 = vld [vmem:[%s19877_s4 + $0xe8] sm:$0xff] }
 0x453   : > { %11835 = vmatprep.mubr.bf16.mxu0 %v849_v3  ;;  %12996 = vmatprep.mubr.bf16.mxu1 %v849_v3  ;;  %v797_v3 = vld [vmem:[%s19877_s4 + $0x298] sm:$0xff] }
 0x455   : > { %11806 = vmatpush1.bf16.msra.mxu0 %v17789_v4  ;;  %12967 = vmatpush1.bf16.msra.mxu1 %v17792_v5  ;;  %v848_v4 = vpack.c.bf16 %v794_v1, %v740_v0  ;;  %v17879_v5 = vld [vmem:[%s19879_s22 + $0x1c00] ss:$16 sps:$4 sm:$0xff]   ;;  %v17971_v0 = vld [vmem:[%s19879_s22 + $0x1de4] ss:$16 sps:$4 sm:$0xff]   ;;  %v17974_v1 = vld [vmem:[%s19879_s22 + $0x1dec] ss:$16 sps:$4 sm:$0xff]  }
 0x456   : > { %11807 = vmatprep.subr.bf16.mxu0 %v17797_v6  ;;  %12968 = vmatprep.subr.bf16.mxu1 %v17800_v7  ;;  %v17882_v6 = vld [vmem:[%s19879_s22 + $0x1c08] ss:$16 sps:$4 sm:$0xff]   ;;  %v17887_v7 = vld [vmem:[%s19879_s22 + $0x1c24] ss:$16 sps:$4 sm:$0xff]  }
 0x459   : > { %11808 = vmatpush1.bf16.msra.mxu0 %v17795_v8  ;;  %12969 = vmatpush1.bf16.msra.mxu1 %v17798_v9  ;;  %v17890_v8 = vld [vmem:[%s19879_s22 + $0x1c2c] ss:$16 sps:$4 sm:$0xff]   ;;  %v851_v9 = vpack.c.bf16 %v797_v3, %v743_v2  ;;  %v17969_v2 = vld [vmem:[%s19879_s22 + $0x1de0] ss:$16 sps:$4 sm:$0xff]   ;;  %v17972_v3 = vld [vmem:[%s19879_s22 + $0x1de8] ss:$16 sps:$4 sm:$0xff]  }
 0x45a   : > { %11809 = vmatprep.subr.bf16.mxu0 %v17803_v10  ;;  %12970 = vmatprep.subr.bf16.mxu1 %v17806_v11  ;;  %v17885_v10 = vld [vmem:[%s19879_s22 + $0x1c20] ss:$16 sps:$4 sm:$0xff]   ;;  %v17888_v11 = vld [vmem:[%s19879_s22 + $0x1c28] ss:$16 sps:$4 sm:$0xff]  }
 0x45d   : > { %11810 = vmatpush1.bf16.msra.mxu0 %v17801_v12  ;;  %12971 = vmatpush1.bf16.msra.mxu1 %v17804_v13  ;;  %v17893_v12 = vld [vmem:[%s19879_s22 + $0x1c44] ss:$16 sps:$4 sm:$0xff]   ;;  %v17896_v13 = vld [vmem:[%s19879_s22 + $0x1c4c] ss:$16 sps:$4 sm:$0xff]  }
 0x45e   : > { %11811 = vmatprep.subr.bf16.mxu0 %v17809_v14  ;;  %12972 = vmatprep.subr.bf16.mxu1 %v17812_v15  ;;  %v17891_v14 = vld [vmem:[%s19879_s22 + $0x1c40] ss:$16 sps:$4 sm:$0xff]   ;;  %v17894_v15 = vld [vmem:[%s19879_s22 + $0x1c48] ss:$16 sps:$4 sm:$0xff]  }
 0x461   : > { %11812 = vmatpush1.bf16.msra.mxu0 %v17807_v16  ;;  %12973 = vmatpush1.bf16.msra.mxu1 %v17810_v17  ;;  %v17899_v16 = vld [vmem:[%s19879_s22 + $0x1c64] ss:$16 sps:$4 sm:$0xff]   ;;  %v17902_v17 = vld [vmem:[%s19879_s22 + $0x1c6c] ss:$16 sps:$4 sm:$0xff]  }
 0x462   : > { %11813 = vmatprep.subr.bf16.mxu0 %v17815_v18  ;;  %12974 = vmatprep.subr.bf16.mxu1 %v17818_v19  ;;  %v17897_v18 = vld [vmem:[%s19879_s22 + $0x1c60] ss:$16 sps:$4 sm:$0xff]   ;;  %v17900_v19 = vld [vmem:[%s19879_s22 + $0x1c68] ss:$16 sps:$4 sm:$0xff]  }
 0x465   : > { %11814 = vmatpush1.bf16.msra.mxu0 %v17813_v20  ;;  %12975 = vmatpush1.bf16.msra.mxu1 %v17816_v21  ;;  %v17905_v20 = vld [vmem:[%s19879_s22 + $0x1c84] ss:$16 sps:$4 sm:$0xff]   ;;  %v17908_v21 = vld [vmem:[%s19879_s22 + $0x1c8c] ss:$16 sps:$4 sm:$0xff]  }
 0x466   : > { %11815 = vmatprep.subr.bf16.mxu0 %v17821_v22  ;;  %12976 = vmatprep.subr.bf16.mxu1 %v17824_v23  ;;  %v17903_v22 = vld [vmem:[%s19879_s22 + $0x1c80] ss:$16 sps:$4 sm:$0xff]   ;;  %v17906_v23 = vld [vmem:[%s19879_s22 + $0x1c88] ss:$16 sps:$4 sm:$0xff]  }
 0x469   : > { %11816 = vmatpush1.bf16.msra.mxu0 %v17819_v24  ;;  %12977 = vmatpush1.bf16.msra.mxu1 %v17822_v25  ;;  %v17911_v24 = vld [vmem:[%s19879_s22 + $0x1ca4] ss:$16 sps:$4 sm:$0xff]   ;;  %v17914_v25 = vld [vmem:[%s19879_s22 + $0x1cac] ss:$16 sps:$4 sm:$0xff]  }
 0x46a   : > { %11817 = vmatprep.subr.bf16.mxu0 %v17827_v26  ;;  %12978 = vmatprep.subr.bf16.mxu1 %v17830_v27  ;;  %v17909_v26 = vld [vmem:[%s19879_s22 + $0x1ca0] ss:$16 sps:$4 sm:$0xff]   ;;  %v17912_v27 = vld [vmem:[%s19879_s22 + $0x1ca8] ss:$16 sps:$4 sm:$0xff]  }
 0x46d   : > { %11818 = vmatpush1.bf16.msra.mxu0 %v17825_v28  ;;  %12979 = vmatpush1.bf16.msra.mxu1 %v17828_v29  ;;  %v17917_v28 = vld [vmem:[%s19879_s22 + $0x1cc4] ss:$16 sps:$4 sm:$0xff]   ;;  %v17920_v29 = vld [vmem:[%s19879_s22 + $0x1ccc] ss:$16 sps:$4 sm:$0xff]  }
 0x46e   : > { %11819 = vmatprep.subr.bf16.mxu0 %v17833_v30  ;;  %12980 = vmatprep.subr.bf16.mxu1 %v17836_v31  ;;  %v17915_v30 = vld [vmem:[%s19879_s22 + $0x1cc0] ss:$16 sps:$4 sm:$0xff]   ;;  %v17918_v31 = vld [vmem:[%s19879_s22 + $0x1cc8] ss:$16 sps:$4 sm:$0xff]  }
 0x471   : > { %11820 = vmatpush1.bf16.msra.mxu0 %v17831_v32  ;;  %12981 = vmatpush1.bf16.msra.mxu1 %v17834_v33  ;;  %v17923_v32 = vld [vmem:[%s19879_s22 + $0x1ce4] ss:$16 sps:$4 sm:$0xff]   ;;  %v17926_v33 = vld [vmem:[%s19879_s22 + $0x1cec] ss:$16 sps:$4 sm:$0xff]  }
 0x472   : > { %11821 = vmatprep.subr.bf16.mxu0 %v17839_v34  ;;  %12982 = vmatprep.subr.bf16.mxu1 %v17842_v35  ;;  %v17921_v34 = vld [vmem:[%s19879_s22 + $0x1ce0] ss:$16 sps:$4 sm:$0xff]   ;;  %v17924_v35 = vld [vmem:[%s19879_s22 + $0x1ce8] ss:$16 sps:$4 sm:$0xff]  }
 0x475   : > { %11822 = vmatpush1.bf16.msra.mxu0 %v17837_v36  ;;  %12983 = vmatpush1.bf16.msra.mxu1 %v17840_v37  ;;  %v17929_v36 = vld [vmem:[%s19879_s22 + $0x1d04] ss:$16 sps:$4 sm:$0xff]   ;;  %v17932_v37 = vld [vmem:[%s19879_s22 + $0x1d0c] ss:$16 sps:$4 sm:$0xff]  }
 0x476   : > { %11823 = vmatprep.subr.bf16.mxu0 %v17845_v38  ;;  %12984 = vmatprep.subr.bf16.mxu1 %v17848_v39  ;;  %v17927_v38 = vld [vmem:[%s19879_s22 + $0x1d00] ss:$16 sps:$4 sm:$0xff]   ;;  %v17930_v39 = vld [vmem:[%s19879_s22 + $0x1d08] ss:$16 sps:$4 sm:$0xff]  }
 0x479   : > { %11824 = vmatpush1.bf16.msra.mxu0 %v17843_v40  ;;  %12985 = vmatpush1.bf16.msra.mxu1 %v17846_v41  ;;  %v17935_v40 = vld [vmem:[%s19879_s22 + $0x1d24] ss:$16 sps:$4 sm:$0xff]   ;;  %v17938_v41 = vld [vmem:[%s19879_s22 + $0x1d2c] ss:$16 sps:$4 sm:$0xff]  }
 0x47a   : > { %11825 = vmatprep.subr.bf16.mxu0 %v17851_v42  ;;  %12986 = vmatprep.subr.bf16.mxu1 %v17854_v43  ;;  %v17933_v42 = vld [vmem:[%s19879_s22 + $0x1d20] ss:$16 sps:$4 sm:$0xff]   ;;  %v17936_v43 = vld [vmem:[%s19879_s22 + $0x1d28] ss:$16 sps:$4 sm:$0xff]  }
 0x47d   : > { %11826 = vmatpush1.bf16.msra.mxu0 %v17849_v44  ;;  %12987 = vmatpush1.bf16.msra.mxu1 %v17852_v45  ;;  %v17941_v44 = vld [vmem:[%s19879_s22 + $0x1d44] ss:$16 sps:$4 sm:$0xff]   ;;  %v17944_v45 = vld [vmem:[%s19879_s22 + $0x1d4c] ss:$16 sps:$4 sm:$0xff]  }
 0x47e   : > { %11827 = vmatprep.subr.bf16.mxu0 %v17857_v46  ;;  %12988 = vmatprep.subr.bf16.mxu1 %v17860_v47  ;;  %v17939_v46 = vld [vmem:[%s19879_s22 + $0x1d40] ss:$16 sps:$4 sm:$0xff]   ;;  %v17942_v47 = vld [vmem:[%s19879_s22 + $0x1d48] ss:$16 sps:$4 sm:$0xff]  }
 0x481   : > { %11828 = vmatpush1.bf16.msra.mxu0 %v17855_v48  ;;  %12989 = vmatpush1.bf16.msra.mxu1 %v17858_v49  ;;  %v17947_v48 = vld [vmem:[%s19879_s22 + $0x1d64] ss:$16 sps:$4 sm:$0xff]   ;;  %v17950_v49 = vld [vmem:[%s19879_s22 + $0x1d6c] ss:$16 sps:$4 sm:$0xff]  }
 0x482   : > { %11829 = vmatprep.subr.bf16.mxu0 %v17863_v50  ;;  %12990 = vmatprep.subr.bf16.mxu1 %v17866_v51  ;;  %v17945_v50 = vld [vmem:[%s19879_s22 + $0x1d60] ss:$16 sps:$4 sm:$0xff]   ;;  %v17948_v51 = vld [vmem:[%s19879_s22 + $0x1d68] ss:$16 sps:$4 sm:$0xff]  }
 0x485   : > { %11830 = vmatpush1.bf16.msra.mxu0 %v17861_v52  ;;  %12991 = vmatpush1.bf16.msra.mxu1 %v17864_v53  ;;  %v17953_v52 = vld [vmem:[%s19879_s22 + $0x1d84] ss:$16 sps:$4 sm:$0xff]   ;;  %v17956_v53 = vld [vmem:[%s19879_s22 + $0x1d8c] ss:$16 sps:$4 sm:$0xff]  }
 0x486   : > { %11831 = vmatprep.subr.bf16.mxu0 %v17869_v54  ;;  %12992 = vmatprep.subr.bf16.mxu1 %v17872_v55  ;;  %v17951_v54 = vld [vmem:[%s19879_s22 + $0x1d80] ss:$16 sps:$4 sm:$0xff]   ;;  %v17954_v55 = vld [vmem:[%s19879_s22 + $0x1d88] ss:$16 sps:$4 sm:$0xff]  }
 0x489   : > { %11832 = vmatpush1.bf16.msra.mxu0 %v17867_v56  ;;  %12993 = vmatpush1.bf16.msra.mxu1 %v17870_v57  ;;  %v17959_v56 = vld [vmem:[%s19879_s22 + $0x1da4] ss:$16 sps:$4 sm:$0xff]   ;;  %v17962_v57 = vld [vmem:[%s19879_s22 + $0x1dac] ss:$16 sps:$4 sm:$0xff]  }
 0x48a   : > { %11833 = vmatprep.subr.bf16.mxu0 %v17875_v58  ;;  %12994 = vmatprep.subr.bf16.mxu1 %v17878_v59  ;;  %v17957_v58 = vld [vmem:[%s19879_s22 + $0x1da0] ss:$16 sps:$4 sm:$0xff]   ;;  %v17960_v59 = vld [vmem:[%s19879_s22 + $0x1da8] ss:$16 sps:$4 sm:$0xff]  }
 0x48d   : > { %11834 = vmatpush1.bf16.msra.mxu0 %v17873_v60  ;;  %12995 = vmatpush1.bf16.msra.mxu1 %v17876_v61  ;;  %v17965_v60 = vld [vmem:[%s19879_s22 + $0x1dc4] ss:$16 sps:$4 sm:$0xff]   ;;  %v17968_v61 = vld [vmem:[%s19879_s22 + $0x1dcc] ss:$16 sps:$4 sm:$0xff]  }
 0x48e   : > { %11846 = vmatprep.subr.bf16.mxu0 %v17881_v62  ;;  %13007 = vmatprep.subr.bf16.mxu1 %v17884_v63  ;;  %v17963_v62 = vld [vmem:[%s19879_s22 + $0x1dc0] ss:$16 sps:$4 sm:$0xff]   ;;  %v17966_v63 = vld [vmem:[%s19879_s22 + $0x1dc8] ss:$16 sps:$4 sm:$0xff]  }
 0x490   : > { %11836 = vmatmul.mubr.bf16.vlgmr.msra.gmra.mrb[0].mxu0 %v848_v4  ;;  %12997 = vmatmul.mubr.bf16.vlgmr.msra.gmra.mrb[0].mxu1 %v848_v4  ;;  %v17977_v4 = vld [vmem:[%s19879_s22 + $0x1e04] ss:$16 sps:$4 sm:$0xff]  }
 0x491   : > { %11847 = vmatpush1.bf16.msra.mxu0 %v17879_v5  ;;  %13008 = vmatpush1.bf16.msra.mxu1 %v17882_v6  ;;  %v17980_v5 = vld [vmem:[%s19879_s22 + $0x1e0c] ss:$16 sps:$4 sm:$0xff]   ;;  %v742_v6 = vld [vmem:[%s19877_s4 + $0xe0] sm:$0xff] }
 0x492   : > { %11848 = vmatprep.subr.bf16.mxu0 %v17887_v7  ;;  %13009 = vmatprep.subr.bf16.mxu1 %v17890_v8  ;;  %v796_v7 = vld [vmem:[%s19877_s4 + $0x290] sm:$0xff]  ;;  %v745_v8 = vld [vmem:[%s19877_s4 + $0xf8] sm:$0xff] }
 0x493   : > { %11878 = vmatprep.mubr.bf16.mxu0 %v851_v9  ;;  %13039 = vmatprep.mubr.bf16.mxu1 %v851_v9  ;;  %v799_v9 = vld [vmem:[%s19877_s4 + $0x2a8] sm:$0xff] }
 0x495   : > { %11849 = vmatpush1.bf16.msra.mxu0 %v17885_v10  ;;  %13010 = vmatpush1.bf16.msra.mxu1 %v17888_v11  ;;  %v850_v10 = vpack.c.bf16 %v796_v7, %v742_v6  ;;  %v17975_v11 = vld [vmem:[%s19879_s22 + $0x1e00] ss:$16 sps:$4 sm:$0xff]   ;;  %v18067_v6 = vld [vmem:[%s19879_s22 + $0x1fe4] ss:$16 sps:$4 sm:$0xff]   ;;  %v18070_v7 = vld [vmem:[%s19879_s22 + $0x1fec] ss:$16 sps:$4 sm:$0xff]  }
 0x496   : > { %11850 = vmatprep.subr.bf16.mxu0 %v17893_v12  ;;  %13011 = vmatprep.subr.bf16.mxu1 %v17896_v13  ;;  %v17978_v12 = vld [vmem:[%s19879_s22 + $0x1e08] ss:$16 sps:$4 sm:$0xff]   ;;  %v17983_v13 = vld [vmem:[%s19879_s22 + $0x1e24] ss:$16 sps:$4 sm:$0xff]  }
 0x499   : > { %11851 = vmatpush1.bf16.msra.mxu0 %v17891_v14  ;;  %13012 = vmatpush1.bf16.msra.mxu1 %v17894_v15  ;;  %v17986_v14 = vld [vmem:[%s19879_s22 + $0x1e2c] ss:$16 sps:$4 sm:$0xff]   ;;  %v853_v15 = vpack.c.bf16 %v799_v9, %v745_v8  ;;  %v18065_v8 = vld [vmem:[%s19879_s22 + $0x1fe0] ss:$16 sps:$4 sm:$0xff]   ;;  %v18068_v9 = vld [vmem:[%s19879_s22 + $0x1fe8] ss:$16 sps:$4 sm:$0xff]  }
 0x49a   : > { %11852 = vmatprep.subr.bf16.mxu0 %v17899_v16  ;;  %13013 = vmatprep.subr.bf16.mxu1 %v17902_v17  ;;  %v17981_v16 = vld [vmem:[%s19879_s22 + $0x1e20] ss:$16 sps:$4 sm:$0xff]   ;;  %v17984_v17 = vld [vmem:[%s19879_s22 + $0x1e28] ss:$16 sps:$4 sm:$0xff]  }
 0x49d   : > { %11853 = vmatpush1.bf16.msra.mxu0 %v17897_v18  ;;  %13014 = vmatpush1.bf16.msra.mxu1 %v17900_v19  ;;  %v17989_v18 = vld [vmem:[%s19879_s22 + $0x1e44] ss:$16 sps:$4 sm:$0xff]   ;;  %v17992_v19 = vld [vmem:[%s19879_s22 + $0x1e4c] ss:$16 sps:$4 sm:$0xff]  }
 0x49e   : > { %11854 = vmatprep.subr.bf16.mxu0 %v17905_v20  ;;  %13015 = vmatprep.subr.bf16.mxu1 %v17908_v21  ;;  %v17987_v20 = vld [vmem:[%s19879_s22 + $0x1e40] ss:$16 sps:$4 sm:$0xff]   ;;  %v17990_v21 = vld [vmem:[%s19879_s22 + $0x1e48] ss:$16 sps:$4 sm:$0xff]  }
 0x4a1   : > { %11855 = vmatpush1.bf16.msra.mxu0 %v17903_v22  ;;  %13016 = vmatpush1.bf16.msra.mxu1 %v17906_v23  ;;  %v17995_v22 = vld [vmem:[%s19879_s22 + $0x1e64] ss:$16 sps:$4 sm:$0xff]   ;;  %v17998_v23 = vld [vmem:[%s19879_s22 + $0x1e6c] ss:$16 sps:$4 sm:$0xff]  }
 0x4a2   : > { %11856 = vmatprep.subr.bf16.mxu0 %v17911_v24  ;;  %13017 = vmatprep.subr.bf16.mxu1 %v17914_v25  ;;  %v17993_v24 = vld [vmem:[%s19879_s22 + $0x1e60] ss:$16 sps:$4 sm:$0xff]   ;;  %v17996_v25 = vld [vmem:[%s19879_s22 + $0x1e68] ss:$16 sps:$4 sm:$0xff]  }
 0x4a5   : > { %11857 = vmatpush1.bf16.msra.mxu0 %v17909_v26  ;;  %13018 = vmatpush1.bf16.msra.mxu1 %v17912_v27  ;;  %v18001_v26 = vld [vmem:[%s19879_s22 + $0x1e84] ss:$16 sps:$4 sm:$0xff]   ;;  %v18004_v27 = vld [vmem:[%s19879_s22 + $0x1e8c] ss:$16 sps:$4 sm:$0xff]  }
 0x4a6   : > { %11858 = vmatprep.subr.bf16.mxu0 %v17917_v28  ;;  %13019 = vmatprep.subr.bf16.mxu1 %v17920_v29  ;;  %v17999_v28 = vld [vmem:[%s19879_s22 + $0x1e80] ss:$16 sps:$4 sm:$0xff]   ;;  %v18002_v29 = vld [vmem:[%s19879_s22 + $0x1e88] ss:$16 sps:$4 sm:$0xff]  }
 0x4a9   : > { %11859 = vmatpush1.bf16.msra.mxu0 %v17915_v30  ;;  %13020 = vmatpush1.bf16.msra.mxu1 %v17918_v31  ;;  %v18007_v30 = vld [vmem:[%s19879_s22 + $0x1ea4] ss:$16 sps:$4 sm:$0xff]   ;;  %v18010_v31 = vld [vmem:[%s19879_s22 + $0x1eac] ss:$16 sps:$4 sm:$0xff]  }
 0x4aa   : > { %11860 = vmatprep.subr.bf16.mxu0 %v17923_v32  ;;  %13021 = vmatprep.subr.bf16.mxu1 %v17926_v33  ;;  %v18005_v32 = vld [vmem:[%s19879_s22 + $0x1ea0] ss:$16 sps:$4 sm:$0xff]   ;;  %v18008_v33 = vld [vmem:[%s19879_s22 + $0x1ea8] ss:$16 sps:$4 sm:$0xff]  }
 0x4ad   : > { %11861 = vmatpush1.bf16.msra.mxu0 %v17921_v34  ;;  %13022 = vmatpush1.bf16.msra.mxu1 %v17924_v35  ;;  %v18013_v34 = vld [vmem:[%s19879_s22 + $0x1ec4] ss:$16 sps:$4 sm:$0xff]   ;;  %v18016_v35 = vld [vmem:[%s19879_s22 + $0x1ecc] ss:$16 sps:$4 sm:$0xff]  }
 0x4ae   : > { %11862 = vmatprep.subr.bf16.mxu0 %v17929_v36  ;;  %13023 = vmatprep.subr.bf16.mxu1 %v17932_v37  ;;  %v18011_v36 = vld [vmem:[%s19879_s22 + $0x1ec0] ss:$16 sps:$4 sm:$0xff]   ;;  %v18014_v37 = vld [vmem:[%s19879_s22 + $0x1ec8] ss:$16 sps:$4 sm:$0xff]  }
 0x4b1   : > { %11863 = vmatpush1.bf16.msra.mxu0 %v17927_v38  ;;  %13024 = vmatpush1.bf16.msra.mxu1 %v17930_v39  ;;  %v18019_v38 = vld [vmem:[%s19879_s22 + $0x1ee4] ss:$16 sps:$4 sm:$0xff]   ;;  %v18022_v39 = vld [vmem:[%s19879_s22 + $0x1eec] ss:$16 sps:$4 sm:$0xff]  }
 0x4b2   : > { %11864 = vmatprep.subr.bf16.mxu0 %v17935_v40  ;;  %13025 = vmatprep.subr.bf16.mxu1 %v17938_v41  ;;  %v18017_v40 = vld [vmem:[%s19879_s22 + $0x1ee0] ss:$16 sps:$4 sm:$0xff]   ;;  %v18020_v41 = vld [vmem:[%s19879_s22 + $0x1ee8] ss:$16 sps:$4 sm:$0xff]  }
 0x4b5   : > { %11865 = vmatpush1.bf16.msra.mxu0 %v17933_v42  ;;  %13026 = vmatpush1.bf16.msra.mxu1 %v17936_v43  ;;  %v18025_v42 = vld [vmem:[%s19879_s22 + $0x1f04] ss:$16 sps:$4 sm:$0xff]   ;;  %v18028_v43 = vld [vmem:[%s19879_s22 + $0x1f0c] ss:$16 sps:$4 sm:$0xff]  }
 0x4b6   : > { %11866 = vmatprep.subr.bf16.mxu0 %v17941_v44  ;;  %13027 = vmatprep.subr.bf16.mxu1 %v17944_v45  ;;  %v18023_v44 = vld [vmem:[%s19879_s22 + $0x1f00] ss:$16 sps:$4 sm:$0xff]   ;;  %v18026_v45 = vld [vmem:[%s19879_s22 + $0x1f08] ss:$16 sps:$4 sm:$0xff]  }
 0x4b9   : > { %11867 = vmatpush1.bf16.msra.mxu0 %v17939_v46  ;;  %13028 = vmatpush1.bf16.msra.mxu1 %v17942_v47  ;;  %v18031_v46 = vld [vmem:[%s19879_s22 + $0x1f24] ss:$16 sps:$4 sm:$0xff]   ;;  %v18034_v47 = vld [vmem:[%s19879_s22 + $0x1f2c] ss:$16 sps:$4 sm:$0xff]  }
 0x4ba   : > { %11868 = vmatprep.subr.bf16.mxu0 %v17947_v48  ;;  %13029 = vmatprep.subr.bf16.mxu1 %v17950_v49  ;;  %v18029_v48 = vld [vmem:[%s19879_s22 + $0x1f20] ss:$16 sps:$4 sm:$0xff]   ;;  %v18032_v49 = vld [vmem:[%s19879_s22 + $0x1f28] ss:$16 sps:$4 sm:$0xff]  }
 0x4bd   : > { %11869 = vmatpush1.bf16.msra.mxu0 %v17945_v50  ;;  %13030 = vmatpush1.bf16.msra.mxu1 %v17948_v51  ;;  %v18037_v50 = vld [vmem:[%s19879_s22 + $0x1f44] ss:$16 sps:$4 sm:$0xff]   ;;  %v18040_v51 = vld [vmem:[%s19879_s22 + $0x1f4c] ss:$16 sps:$4 sm:$0xff]  }
 0x4be   : > { %11870 = vmatprep.subr.bf16.mxu0 %v17953_v52  ;;  %13031 = vmatprep.subr.bf16.mxu1 %v17956_v53  ;;  %v18035_v52 = vld [vmem:[%s19879_s22 + $0x1f40] ss:$16 sps:$4 sm:$0xff]   ;;  %v18038_v53 = vld [vmem:[%s19879_s22 + $0x1f48] ss:$16 sps:$4 sm:$0xff]  }
 0x4c1   : > { %11871 = vmatpush1.bf16.msra.mxu0 %v17951_v54  ;;  %13032 = vmatpush1.bf16.msra.mxu1 %v17954_v55  ;;  %v18043_v54 = vld [vmem:[%s19879_s22 + $0x1f64] ss:$16 sps:$4 sm:$0xff]   ;;  %v18046_v55 = vld [vmem:[%s19879_s22 + $0x1f6c] ss:$16 sps:$4 sm:$0xff]  }
 0x4c2   : > { %11872 = vmatprep.subr.bf16.mxu0 %v17959_v56  ;;  %13033 = vmatprep.subr.bf16.mxu1 %v17962_v57  ;;  %v18041_v56 = vld [vmem:[%s19879_s22 + $0x1f60] ss:$16 sps:$4 sm:$0xff]   ;;  %v18044_v57 = vld [vmem:[%s19879_s22 + $0x1f68] ss:$16 sps:$4 sm:$0xff]  }
 0x4c5   : > { %11873 = vmatpush1.bf16.msra.mxu0 %v17957_v58  ;;  %13034 = vmatpush1.bf16.msra.mxu1 %v17960_v59  ;;  %v18049_v58 = vld [vmem:[%s19879_s22 + $0x1f84] ss:$16 sps:$4 sm:$0xff]   ;;  %v18052_v59 = vld [vmem:[%s19879_s22 + $0x1f8c] ss:$16 sps:$4 sm:$0xff]  }
 0x4c6   : > { %11874 = vmatprep.subr.bf16.mxu0 %v17965_v60  ;;  %13035 = vmatprep.subr.bf16.mxu1 %v17968_v61  ;;  %v18047_v60 = vld [vmem:[%s19879_s22 + $0x1f80] ss:$16 sps:$4 sm:$0xff]   ;;  %v18050_v61 = vld [vmem:[%s19879_s22 + $0x1f88] ss:$16 sps:$4 sm:$0xff]  }
 0x4c9   : > { %11875 = vmatpush1.bf16.msra.mxu0 %v17963_v62  ;;  %13036 = vmatpush1.bf16.msra.mxu1 %v17966_v63  ;;  %v18055_v62 = vld [vmem:[%s19879_s22 + $0x1fa4] ss:$16 sps:$4 sm:$0xff]   ;;  %v18058_v63 = vld [vmem:[%s19879_s22 + $0x1fac] ss:$16 sps:$4 sm:$0xff]  }
 0x4ca   : > { %11876 = vmatprep.subr.bf16.mxu0 %v17971_v0  ;;  %13037 = vmatprep.subr.bf16.mxu1 %v17974_v1  ;;  %v18053_v0 = vld [vmem:[%s19879_s22 + $0x1fa0] ss:$16 sps:$4 sm:$0xff]   ;;  %v18056_v1 = vld [vmem:[%s19879_s22 + $0x1fa8] ss:$16 sps:$4 sm:$0xff]  }
 0x4cd   : > { %11877 = vmatpush1.bf16.msra.mxu0 %v17969_v2  ;;  %13038 = vmatpush1.bf16.msra.mxu1 %v17972_v3  ;;  %v18061_v2 = vld [vmem:[%s19879_s22 + $0x1fc4] ss:$16 sps:$4 sm:$0xff]   ;;  %v18064_v3 = vld [vmem:[%s19879_s22 + $0x1fcc] ss:$16 sps:$4 sm:$0xff]  }
 0x4ce   : > { %11889 = vmatprep.subr.bf16.mxu0 %v17977_v4  ;;  %13050 = vmatprep.subr.bf16.mxu1 %v17980_v5  ;;  %v18059_v4 = vld [vmem:[%s19879_s22 + $0x1fc0] ss:$16 sps:$4 sm:$0xff]   ;;  %v18062_v5 = vld [vmem:[%s19879_s22 + $0x1fc8] ss:$16 sps:$4 sm:$0xff]  }
 0x4d0   : > { %11879 = vmatmul.mubr.bf16.vlgmr.msra.gmra.mrb[0].mxu0 %v850_v10  ;;  %13040 = vmatmul.mubr.bf16.vlgmr.msra.gmra.mrb[0].mxu1 %v850_v10  ;;  %v744_v10 = vld [vmem:[%s19877_s4 + $0xf0] sm:$0xff] }
 0x4d1   : > { %11890 = vmatpush1.bf16.msra.mxu0 %v17975_v11  ;;  %13051 = vmatpush1.bf16.msra.mxu1 %v17978_v12  ;;  %v798_v11 = vld [vmem:[%s19877_s4 + $0x2a0] sm:$0xff] }
 0x4d2   : > { %11891 = vmatprep.subr.bf16.mxu0 %v17983_v13  ;;  %13052 = vmatprep.subr.bf16.mxu1 %v17986_v14  ;;  %v18073_v12 = vld [vmem:[%s19879_s22 + $0x2004] ss:$16 sps:$4 sm:$0xff]   ;;  %v18076_v13 = vld [vmem:[%s19879_s22 + $0x200c] ss:$16 sps:$4 sm:$0xff]   ;;  %v852_v14 = vpack.c.bf16 %v798_v11, %v744_v10  ;;  %v18155_v10 = vld [vmem:[%s19879_s22 + $0x21c0] ss:$16 sps:$4 sm:$0xff]  }
 0x4d3   : > { %11921 = vmatprep.mubr.bf16.mxu0 %v853_v15  ;;  %13082 = vmatprep.mubr.bf16.mxu1 %v853_v15  ;;  %v747_v15 = vld [vmem:[%s19877_s4 + $0x108] sm:$0xff] }
 0x4d4   : > { %v18158_v11 = vld [vmem:[%s19879_s22 + $0x21c8] ss:$16 sps:$4 sm:$0xff]  }
 0x4d5   : > { %11892 = vmatpush1.bf16.msra.mxu0 %v17981_v16  ;;  %13053 = vmatpush1.bf16.msra.mxu1 %v17984_v17  ;;  %v801_v16 = vld [vmem:[%s19877_s4 + $0x2b8] sm:$0xff]  ;;  %v18071_v17 = vld [vmem:[%s19879_s22 + $0x2000] ss:$16 sps:$4 sm:$0xff]  }
 0x4d6   : > { %11893 = vmatprep.subr.bf16.mxu0 %v17989_v18  ;;  %13054 = vmatprep.subr.bf16.mxu1 %v17992_v19  ;;  %v18074_v18 = vld [vmem:[%s19879_s22 + $0x2008] ss:$16 sps:$4 sm:$0xff]   ;;  %v18079_v19 = vld [vmem:[%s19879_s22 + $0x2024] ss:$16 sps:$4 sm:$0xff]  }
 0x4d9   : > { %11894 = vmatpush1.bf16.msra.mxu0 %v17987_v20  ;;  %13055 = vmatpush1.bf16.msra.mxu1 %v17990_v21  ;;  %v18082_v20 = vld [vmem:[%s19879_s22 + $0x202c] ss:$16 sps:$4 sm:$0xff]   ;;  %v855_v21 = vpack.c.bf16 %v801_v16, %v747_v15  ;;  %v18164_v15 = vld [vmem:[%s19879_s22 + $0x21e8] ss:$16 sps:$4 sm:$0xff]   ;;  %v746_v16 = vld [vmem:[%s19877_s4 + $0x100] sm:$0xff] }
 0x4da   : > { %11895 = vmatprep.subr.bf16.mxu0 %v17995_v22  ;;  %13056 = vmatprep.subr.bf16.mxu1 %v17998_v23  ;;  %v18077_v22 = vld [vmem:[%s19879_s22 + $0x2020] ss:$16 sps:$4 sm:$0xff]   ;;  %v18080_v23 = vld [vmem:[%s19879_s22 + $0x2028] ss:$16 sps:$4 sm:$0xff]  }
 0x4dd   : > { %11896 = vmatpush1.bf16.msra.mxu0 %v17993_v24  ;;  %13057 = vmatpush1.bf16.msra.mxu1 %v17996_v25  ;;  %v18085_v24 = vld [vmem:[%s19879_s22 + $0x2044] ss:$16 sps:$4 sm:$0xff]   ;;  %v18088_v25 = vld [vmem:[%s19879_s22 + $0x204c] ss:$16 sps:$4 sm:$0xff]  }
 0x4de   : > { %11897 = vmatprep.subr.bf16.mxu0 %v18001_v26  ;;  %13058 = vmatprep.subr.bf16.mxu1 %v18004_v27  ;;  %v18083_v26 = vld [vmem:[%s19879_s22 + $0x2040] ss:$16 sps:$4 sm:$0xff]   ;;  %v18086_v27 = vld [vmem:[%s19879_s22 + $0x2048] ss:$16 sps:$4 sm:$0xff]  }
 0x4e1   : > { %11898 = vmatpush1.bf16.msra.mxu0 %v17999_v28  ;;  %13059 = vmatpush1.bf16.msra.mxu1 %v18002_v29  ;;  %v18091_v28 = vld [vmem:[%s19879_s22 + $0x2064] ss:$16 sps:$4 sm:$0xff]   ;;  %v18094_v29 = vld [vmem:[%s19879_s22 + $0x206c] ss:$16 sps:$4 sm:$0xff]  }
 0x4e2   : > { %11899 = vmatprep.subr.bf16.mxu0 %v18007_v30  ;;  %13060 = vmatprep.subr.bf16.mxu1 %v18010_v31  ;;  %v18089_v30 = vld [vmem:[%s19879_s22 + $0x2060] ss:$16 sps:$4 sm:$0xff]   ;;  %v18092_v31 = vld [vmem:[%s19879_s22 + $0x2068] ss:$16 sps:$4 sm:$0xff]  }
 0x4e5   : > { %11900 = vmatpush1.bf16.msra.mxu0 %v18005_v32  ;;  %13061 = vmatpush1.bf16.msra.mxu1 %v18008_v33  ;;  %v18097_v32 = vld [vmem:[%s19879_s22 + $0x2084] ss:$16 sps:$4 sm:$0xff]   ;;  %v18100_v33 = vld [vmem:[%s19879_s22 + $0x208c] ss:$16 sps:$4 sm:$0xff]  }
 0x4e6   : > { %11901 = vmatprep.subr.bf16.mxu0 %v18013_v34  ;;  %13062 = vmatprep.subr.bf16.mxu1 %v18016_v35  ;;  %v18095_v34 = vld [vmem:[%s19879_s22 + $0x2080] ss:$16 sps:$4 sm:$0xff]   ;;  %v18098_v35 = vld [vmem:[%s19879_s22 + $0x2088] ss:$16 sps:$4 sm:$0xff]  }
 0x4e9   : > { %11902 = vmatpush1.bf16.msra.mxu0 %v18011_v36  ;;  %13063 = vmatpush1.bf16.msra.mxu1 %v18014_v37  ;;  %v18103_v36 = vld [vmem:[%s19879_s22 + $0x20a4] ss:$16 sps:$4 sm:$0xff]   ;;  %v18106_v37 = vld [vmem:[%s19879_s22 + $0x20ac] ss:$16 sps:$4 sm:$0xff]  }
 0x4ea   : > { %11903 = vmatprep.subr.bf16.mxu0 %v18019_v38  ;;  %13064 = vmatprep.subr.bf16.mxu1 %v18022_v39  ;;  %v18101_v38 = vld [vmem:[%s19879_s22 + $0x20a0] ss:$16 sps:$4 sm:$0xff]   ;;  %v18104_v39 = vld [vmem:[%s19879_s22 + $0x20a8] ss:$16 sps:$4 sm:$0xff]  }
 0x4ed   : > { %11904 = vmatpush1.bf16.msra.mxu0 %v18017_v40  ;;  %13065 = vmatpush1.bf16.msra.mxu1 %v18020_v41  ;;  %v18109_v40 = vld [vmem:[%s19879_s22 + $0x20c4] ss:$16 sps:$4 sm:$0xff]   ;;  %v18112_v41 = vld [vmem:[%s19879_s22 + $0x20cc] ss:$16 sps:$4 sm:$0xff]  }
 0x4ee   : > { %11905 = vmatprep.subr.bf16.mxu0 %v18025_v42  ;;  %13066 = vmatprep.subr.bf16.mxu1 %v18028_v43  ;;  %v18107_v42 = vld [vmem:[%s19879_s22 + $0x20c0] ss:$16 sps:$4 sm:$0xff]   ;;  %v18110_v43 = vld [vmem:[%s19879_s22 + $0x20c8] ss:$16 sps:$4 sm:$0xff]  }
 0x4f1   : > { %11906 = vmatpush1.bf16.msra.mxu0 %v18023_v44  ;;  %13067 = vmatpush1.bf16.msra.mxu1 %v18026_v45  ;;  %v18115_v44 = vld [vmem:[%s19879_s22 + $0x20e4] ss:$16 sps:$4 sm:$0xff]   ;;  %v18118_v45 = vld [vmem:[%s19879_s22 + $0x20ec] ss:$16 sps:$4 sm:$0xff]  }
 0x4f2   : > { %11907 = vmatprep.subr.bf16.mxu0 %v18031_v46  ;;  %13068 = vmatprep.subr.bf16.mxu1 %v18034_v47  ;;  %v18113_v46 = vld [vmem:[%s19879_s22 + $0x20e0] ss:$16 sps:$4 sm:$0xff]   ;;  %v18116_v47 = vld [vmem:[%s19879_s22 + $0x20e8] ss:$16 sps:$4 sm:$0xff]  }
 0x4f5   : > { %11908 = vmatpush1.bf16.msra.mxu0 %v18029_v48  ;;  %13069 = vmatpush1.bf16.msra.mxu1 %v18032_v49  ;;  %v18121_v48 = vld [vmem:[%s19879_s22 + $0x2104] ss:$16 sps:$4 sm:$0xff]   ;;  %v18124_v49 = vld [vmem:[%s19879_s22 + $0x210c] ss:$16 sps:$4 sm:$0xff]  }
 0x4f6   : > { %11909 = vmatprep.subr.bf16.mxu0 %v18037_v50  ;;  %13070 = vmatprep.subr.bf16.mxu1 %v18040_v51  ;;  %v18119_v50 = vld [vmem:[%s19879_s22 + $0x2100] ss:$16 sps:$4 sm:$0xff]   ;;  %v18122_v51 = vld [vmem:[%s19879_s22 + $0x2108] ss:$16 sps:$4 sm:$0xff]  }
 0x4f9   : > { %11910 = vmatpush1.bf16.msra.mxu0 %v18035_v52  ;;  %13071 = vmatpush1.bf16.msra.mxu1 %v18038_v53  ;;  %v18127_v52 = vld [vmem:[%s19879_s22 + $0x2124] ss:$16 sps:$4 sm:$0xff]   ;;  %v18130_v53 = vld [vmem:[%s19879_s22 + $0x212c] ss:$16 sps:$4 sm:$0xff]  }
 0x4fa   : > { %11911 = vmatprep.subr.bf16.mxu0 %v18043_v54  ;;  %13072 = vmatprep.subr.bf16.mxu1 %v18046_v55  ;;  %v18125_v54 = vld [vmem:[%s19879_s22 + $0x2120] ss:$16 sps:$4 sm:$0xff]   ;;  %v18128_v55 = vld [vmem:[%s19879_s22 + $0x2128] ss:$16 sps:$4 sm:$0xff]  }
 0x4fd   : > { %11912 = vmatpush1.bf16.msra.mxu0 %v18041_v56  ;;  %13073 = vmatpush1.bf16.msra.mxu1 %v18044_v57  ;;  %v18133_v56 = vld [vmem:[%s19879_s22 + $0x2144] ss:$16 sps:$4 sm:$0xff]   ;;  %v18136_v57 = vld [vmem:[%s19879_s22 + $0x214c] ss:$16 sps:$4 sm:$0xff]  }
 0x4fe   : > { %11913 = vmatprep.subr.bf16.mxu0 %v18049_v58  ;;  %13074 = vmatprep.subr.bf16.mxu1 %v18052_v59  ;;  %v18131_v58 = vld [vmem:[%s19879_s22 + $0x2140] ss:$16 sps:$4 sm:$0xff]   ;;  %v18134_v59 = vld [vmem:[%s19879_s22 + $0x2148] ss:$16 sps:$4 sm:$0xff]  }
 0x501   : > { %11914 = vmatpush1.bf16.msra.mxu0 %v18047_v60  ;;  %13075 = vmatpush1.bf16.msra.mxu1 %v18050_v61  ;;  %v18139_v60 = vld [vmem:[%s19879_s22 + $0x2164] ss:$16 sps:$4 sm:$0xff]   ;;  %v18142_v61 = vld [vmem:[%s19879_s22 + $0x216c] ss:$16 sps:$4 sm:$0xff]  }
 0x502   : > { %11915 = vmatprep.subr.bf16.mxu0 %v18055_v62  ;;  %13076 = vmatprep.subr.bf16.mxu1 %v18058_v63  ;;  %v18137_v62 = vld [vmem:[%s19879_s22 + $0x2160] ss:$16 sps:$4 sm:$0xff]   ;;  %v18140_v63 = vld [vmem:[%s19879_s22 + $0x2168] ss:$16 sps:$4 sm:$0xff]  }
 0x505   : > { %11916 = vmatpush1.bf16.msra.mxu0 %v18053_v0  ;;  %13077 = vmatpush1.bf16.msra.mxu1 %v18056_v1  ;;  %v18145_v0 = vld [vmem:[%s19879_s22 + $0x2184] ss:$16 sps:$4 sm:$0xff]   ;;  %v18148_v1 = vld [vmem:[%s19879_s22 + $0x218c] ss:$16 sps:$4 sm:$0xff]  }
 0x506   : > { %11917 = vmatprep.subr.bf16.mxu0 %v18061_v2  ;;  %13078 = vmatprep.subr.bf16.mxu1 %v18064_v3  ;;  %v18143_v2 = vld [vmem:[%s19879_s22 + $0x2180] ss:$16 sps:$4 sm:$0xff]   ;;  %v18146_v3 = vld [vmem:[%s19879_s22 + $0x2188] ss:$16 sps:$4 sm:$0xff]  }
 0x509   : > { %11918 = vmatpush1.bf16.msra.mxu0 %v18059_v4  ;;  %13079 = vmatpush1.bf16.msra.mxu1 %v18062_v5  ;;  %v18151_v4 = vld [vmem:[%s19879_s22 + $0x21a4] ss:$16 sps:$4 sm:$0xff]   ;;  %v18154_v5 = vld [vmem:[%s19879_s22 + $0x21ac] ss:$16 sps:$4 sm:$0xff]  }
 0x50a   : > { %11919 = vmatprep.subr.bf16.mxu0 %v18067_v6  ;;  %13080 = vmatprep.subr.bf16.mxu1 %v18070_v7  ;;  %v18149_v6 = vld [vmem:[%s19879_s22 + $0x21a0] ss:$16 sps:$4 sm:$0xff]   ;;  %v18152_v7 = vld [vmem:[%s19879_s22 + $0x21a8] ss:$16 sps:$4 sm:$0xff]  }
 0x50d   : > { %11920 = vmatpush1.bf16.msra.mxu0 %v18065_v8  ;;  %13081 = vmatpush1.bf16.msra.mxu1 %v18068_v9  ;;  %v18157_v8 = vld [vmem:[%s19879_s22 + $0x21c4] ss:$16 sps:$4 sm:$0xff]   ;;  %v18160_v9 = vld [vmem:[%s19879_s22 + $0x21cc] ss:$16 sps:$4 sm:$0xff]  }
 0x50e   : > { %11932 = vmatprep.subr.bf16.mxu0 %v18073_v12  ;;  %13093 = vmatprep.subr.bf16.mxu1 %v18076_v13  ;;  %v18163_v12 = vld [vmem:[%s19879_s22 + $0x21e4] ss:$16 sps:$4 sm:$0xff]   ;;  %v18166_v13 = vld [vmem:[%s19879_s22 + $0x21ec] ss:$16 sps:$4 sm:$0xff]  }
 0x510   : > { %11922 = vmatmul.mubr.bf16.vlgmr.msra.gmra.mrb[0].mxu0 %v852_v14  ;;  %13083 = vmatmul.mubr.bf16.vlgmr.msra.gmra.mrb[0].mxu1 %v852_v14  ;;  %v18161_v14 = vld [vmem:[%s19879_s22 + $0x21e0] ss:$16 sps:$4 sm:$0xff]  }
 0x511   : > { %11933 = vmatpush1.bf16.msra.mxu0 %v18071_v17  ;;  %13094 = vmatpush1.bf16.msra.mxu1 %v18074_v18  ;;  %v800_v17 = vld [vmem:[%s19877_s4 + $0x2b0] sm:$0xff] }
 0x512   : > { %11934 = vmatprep.subr.bf16.mxu0 %v18079_v19  ;;  %13095 = vmatprep.subr.bf16.mxu1 %v18082_v20  ;;  %v18169_v18 = vld [vmem:[%s19879_s22 + $0x2204] ss:$16 sps:$4 sm:$0xff]   ;;  %v18172_v19 = vld [vmem:[%s19879_s22 + $0x220c] ss:$16 sps:$4 sm:$0xff]   ;;  %v854_v20 = vpack.c.bf16 %v800_v17, %v746_v16  ;;  %v18251_v16 = vld [vmem:[%s19879_s22 + $0x23c0] ss:$16 sps:$4 sm:$0xff]  }
 0x513   : > { %11964 = vmatprep.mubr.bf16.mxu0 %v855_v21  ;;  %13125 = vmatprep.mubr.bf16.mxu1 %v855_v21  ;;  %v749_v21 = vld [vmem:[%s19877_s4 + $0x118] sm:$0xff] }
 0x514   : > { %v18254_v17 = vld [vmem:[%s19879_s22 + $0x23c8] ss:$16 sps:$4 sm:$0xff]  }
 0x515   : > { %11935 = vmatpush1.bf16.msra.mxu0 %v18077_v22  ;;  %13096 = vmatpush1.bf16.msra.mxu1 %v18080_v23  ;;  %v803_v22 = vld [vmem:[%s19877_s4 + $0x2c8] sm:$0xff]  ;;  %v18167_v23 = vld [vmem:[%s19879_s22 + $0x2200] ss:$16 sps:$4 sm:$0xff]  }
 0x516   : > { %11936 = vmatprep.subr.bf16.mxu0 %v18085_v24  ;;  %13097 = vmatprep.subr.bf16.mxu1 %v18088_v25  ;;  %v18170_v24 = vld [vmem:[%s19879_s22 + $0x2208] ss:$16 sps:$4 sm:$0xff]   ;;  %v18175_v25 = vld [vmem:[%s19879_s22 + $0x2224] ss:$16 sps:$4 sm:$0xff]  }
 0x519   : > { %11937 = vmatpush1.bf16.msra.mxu0 %v18083_v26  ;;  %13098 = vmatpush1.bf16.msra.mxu1 %v18086_v27  ;;  %v18178_v26 = vld [vmem:[%s19879_s22 + $0x222c] ss:$16 sps:$4 sm:$0xff]   ;;  %v857_v27 = vpack.c.bf16 %v803_v22, %v749_v21  ;;  %v18260_v21 = vld [vmem:[%s19879_s22 + $0x23e8] ss:$16 sps:$4 sm:$0xff]   ;;  %v748_v22 = vld [vmem:[%s19877_s4 + $0x110] sm:$0xff] }
 0x51a   : > { %11938 = vmatprep.subr.bf16.mxu0 %v18091_v28  ;;  %13099 = vmatprep.subr.bf16.mxu1 %v18094_v29  ;;  %v18173_v28 = vld [vmem:[%s19879_s22 + $0x2220] ss:$16 sps:$4 sm:$0xff]   ;;  %v18176_v29 = vld [vmem:[%s19879_s22 + $0x2228] ss:$16 sps:$4 sm:$0xff]  }
 0x51d   : > { %11939 = vmatpush1.bf16.msra.mxu0 %v18089_v30  ;;  %13100 = vmatpush1.bf16.msra.mxu1 %v18092_v31  ;;  %v18181_v30 = vld [vmem:[%s19879_s22 + $0x2244] ss:$16 sps:$4 sm:$0xff]   ;;  %v18184_v31 = vld [vmem:[%s19879_s22 + $0x224c] ss:$16 sps:$4 sm:$0xff]  }
 0x51e   : > { %11940 = vmatprep.subr.bf16.mxu0 %v18097_v32  ;;  %13101 = vmatprep.subr.bf16.mxu1 %v18100_v33  ;;  %v18179_v32 = vld [vmem:[%s19879_s22 + $0x2240] ss:$16 sps:$4 sm:$0xff]   ;;  %v18182_v33 = vld [vmem:[%s19879_s22 + $0x2248] ss:$16 sps:$4 sm:$0xff]  }
 0x521   : > { %11941 = vmatpush1.bf16.msra.mxu0 %v18095_v34  ;;  %13102 = vmatpush1.bf16.msra.mxu1 %v18098_v35  ;;  %v18187_v34 = vld [vmem:[%s19879_s22 + $0x2264] ss:$16 sps:$4 sm:$0xff]   ;;  %v18190_v35 = vld [vmem:[%s19879_s22 + $0x226c] ss:$16 sps:$4 sm:$0xff]  }
 0x522   : > { %11942 = vmatprep.subr.bf16.mxu0 %v18103_v36  ;;  %13103 = vmatprep.subr.bf16.mxu1 %v18106_v37  ;;  %v18185_v36 = vld [vmem:[%s19879_s22 + $0x2260] ss:$16 sps:$4 sm:$0xff]   ;;  %v18188_v37 = vld [vmem:[%s19879_s22 + $0x2268] ss:$16 sps:$4 sm:$0xff]  }
 0x525   : > { %11943 = vmatpush1.bf16.msra.mxu0 %v18101_v38  ;;  %13104 = vmatpush1.bf16.msra.mxu1 %v18104_v39  ;;  %v18193_v38 = vld [vmem:[%s19879_s22 + $0x2284] ss:$16 sps:$4 sm:$0xff]   ;;  %v18196_v39 = vld [vmem:[%s19879_s22 + $0x228c] ss:$16 sps:$4 sm:$0xff]  }
 0x526   : > { %11944 = vmatprep.subr.bf16.mxu0 %v18109_v40  ;;  %13105 = vmatprep.subr.bf16.mxu1 %v18112_v41  ;;  %v18191_v40 = vld [vmem:[%s19879_s22 + $0x2280] ss:$16 sps:$4 sm:$0xff]   ;;  %v18194_v41 = vld [vmem:[%s19879_s22 + $0x2288] ss:$16 sps:$4 sm:$0xff]  }
 0x529   : > { %11945 = vmatpush1.bf16.msra.mxu0 %v18107_v42  ;;  %13106 = vmatpush1.bf16.msra.mxu1 %v18110_v43  ;;  %v18199_v42 = vld [vmem:[%s19879_s22 + $0x22a4] ss:$16 sps:$4 sm:$0xff]   ;;  %v18202_v43 = vld [vmem:[%s19879_s22 + $0x22ac] ss:$16 sps:$4 sm:$0xff]  }
 0x52a   : > { %11946 = vmatprep.subr.bf16.mxu0 %v18115_v44  ;;  %13107 = vmatprep.subr.bf16.mxu1 %v18118_v45  ;;  %v18197_v44 = vld [vmem:[%s19879_s22 + $0x22a0] ss:$16 sps:$4 sm:$0xff]   ;;  %v18200_v45 = vld [vmem:[%s19879_s22 + $0x22a8] ss:$16 sps:$4 sm:$0xff]  }
 0x52d   : > { %11947 = vmatpush1.bf16.msra.mxu0 %v18113_v46  ;;  %13108 = vmatpush1.bf16.msra.mxu1 %v18116_v47  ;;  %v18205_v46 = vld [vmem:[%s19879_s22 + $0x22c4] ss:$16 sps:$4 sm:$0xff]   ;;  %v18208_v47 = vld [vmem:[%s19879_s22 + $0x22cc] ss:$16 sps:$4 sm:$0xff]  }
 0x52e   : > { %11948 = vmatprep.subr.bf16.mxu0 %v18121_v48  ;;  %13109 = vmatprep.subr.bf16.mxu1 %v18124_v49  ;;  %v18203_v48 = vld [vmem:[%s19879_s22 + $0x22c0] ss:$16 sps:$4 sm:$0xff]   ;;  %v18206_v49 = vld [vmem:[%s19879_s22 + $0x22c8] ss:$16 sps:$4 sm:$0xff]  }
 0x531   : > { %11949 = vmatpush1.bf16.msra.mxu0 %v18119_v50  ;;  %13110 = vmatpush1.bf16.msra.mxu1 %v18122_v51  ;;  %v18211_v50 = vld [vmem:[%s19879_s22 + $0x22e4] ss:$16 sps:$4 sm:$0xff]   ;;  %v18214_v51 = vld [vmem:[%s19879_s22 + $0x22ec] ss:$16 sps:$4 sm:$0xff]  }
 0x532   : > { %11950 = vmatprep.subr.bf16.mxu0 %v18127_v52  ;;  %13111 = vmatprep.subr.bf16.mxu1 %v18130_v53  ;;  %v18209_v52 = vld [vmem:[%s19879_s22 + $0x22e0] ss:$16 sps:$4 sm:$0xff]   ;;  %v18212_v53 = vld [vmem:[%s19879_s22 + $0x22e8] ss:$16 sps:$4 sm:$0xff]  }
 0x535   : > { %11951 = vmatpush1.bf16.msra.mxu0 %v18125_v54  ;;  %13112 = vmatpush1.bf16.msra.mxu1 %v18128_v55  ;;  %v18217_v54 = vld [vmem:[%s19879_s22 + $0x2304] ss:$16 sps:$4 sm:$0xff]   ;;  %v18220_v55 = vld [vmem:[%s19879_s22 + $0x230c] ss:$16 sps:$4 sm:$0xff]  }
 0x536   : > { %11952 = vmatprep.subr.bf16.mxu0 %v18133_v56  ;;  %13113 = vmatprep.subr.bf16.mxu1 %v18136_v57  ;;  %v18215_v56 = vld [vmem:[%s19879_s22 + $0x2300] ss:$16 sps:$4 sm:$0xff]   ;;  %v18218_v57 = vld [vmem:[%s19879_s22 + $0x2308] ss:$16 sps:$4 sm:$0xff]  }
 0x539   : > { %11953 = vmatpush1.bf16.msra.mxu0 %v18131_v58  ;;  %13114 = vmatpush1.bf16.msra.mxu1 %v18134_v59  ;;  %v18223_v58 = vld [vmem:[%s19879_s22 + $0x2324] ss:$16 sps:$4 sm:$0xff]   ;;  %v18226_v59 = vld [vmem:[%s19879_s22 + $0x232c] ss:$16 sps:$4 sm:$0xff]  }
 0x53a   : > { %11954 = vmatprep.subr.bf16.mxu0 %v18139_v60  ;;  %13115 = vmatprep.subr.bf16.mxu1 %v18142_v61  ;;  %v18221_v60 = vld [vmem:[%s19879_s22 + $0x2320] ss:$16 sps:$4 sm:$0xff]   ;;  %v18224_v61 = vld [vmem:[%s19879_s22 + $0x2328] ss:$16 sps:$4 sm:$0xff]  }
 0x53d   : > { %11955 = vmatpush1.bf16.msra.mxu0 %v18137_v62  ;;  %13116 = vmatpush1.bf16.msra.mxu1 %v18140_v63  ;;  %v18229_v62 = vld [vmem:[%s19879_s22 + $0x2344] ss:$16 sps:$4 sm:$0xff]   ;;  %v18232_v63 = vld [vmem:[%s19879_s22 + $0x234c] ss:$16 sps:$4 sm:$0xff]  }
 0x53e   : > { %11956 = vmatprep.subr.bf16.mxu0 %v18145_v0  ;;  %13117 = vmatprep.subr.bf16.mxu1 %v18148_v1  ;;  %v18227_v0 = vld [vmem:[%s19879_s22 + $0x2340] ss:$16 sps:$4 sm:$0xff]   ;;  %v18230_v1 = vld [vmem:[%s19879_s22 + $0x2348] ss:$16 sps:$4 sm:$0xff]  }
 0x541   : > { %11957 = vmatpush1.bf16.msra.mxu0 %v18143_v2  ;;  %13118 = vmatpush1.bf16.msra.mxu1 %v18146_v3  ;;  %v18235_v2 = vld [vmem:[%s19879_s22 + $0x2364] ss:$16 sps:$4 sm:$0xff]   ;;  %v18238_v3 = vld [vmem:[%s19879_s22 + $0x236c] ss:$16 sps:$4 sm:$0xff]  }
 0x542   : > { %11958 = vmatprep.subr.bf16.mxu0 %v18151_v4  ;;  %13119 = vmatprep.subr.bf16.mxu1 %v18154_v5  ;;  %v18233_v4 = vld [vmem:[%s19879_s22 + $0x2360] ss:$16 sps:$4 sm:$0xff]   ;;  %v18236_v5 = vld [vmem:[%s19879_s22 + $0x2368] ss:$16 sps:$4 sm:$0xff]  }
 0x545   : > { %11959 = vmatpush1.bf16.msra.mxu0 %v18149_v6  ;;  %13120 = vmatpush1.bf16.msra.mxu1 %v18152_v7  ;;  %v18241_v6 = vld [vmem:[%s19879_s22 + $0x2384] ss:$16 sps:$4 sm:$0xff]   ;;  %v18244_v7 = vld [vmem:[%s19879_s22 + $0x238c] ss:$16 sps:$4 sm:$0xff]  }
 0x546   : > { %11960 = vmatprep.subr.bf16.mxu0 %v18157_v8  ;;  %13121 = vmatprep.subr.bf16.mxu1 %v18160_v9  ;;  %v18239_v8 = vld [vmem:[%s19879_s22 + $0x2380] ss:$16 sps:$4 sm:$0xff]   ;;  %v18242_v9 = vld [vmem:[%s19879_s22 + $0x2388] ss:$16 sps:$4 sm:$0xff]  }
 0x549   : > { %11961 = vmatpush1.bf16.msra.mxu0 %v18155_v10  ;;  %13122 = vmatpush1.bf16.msra.mxu1 %v18158_v11  ;;  %v18247_v10 = vld [vmem:[%s19879_s22 + $0x23a4] ss:$16 sps:$4 sm:$0xff]   ;;  %v18250_v11 = vld [vmem:[%s19879_s22 + $0x23ac] ss:$16 sps:$4 sm:$0xff]  }
 0x54a   : > { %11962 = vmatprep.subr.bf16.mxu0 %v18163_v12  ;;  %13123 = vmatprep.subr.bf16.mxu1 %v18166_v13  ;;  %v18245_v12 = vld [vmem:[%s19879_s22 + $0x23a0] ss:$16 sps:$4 sm:$0xff]   ;;  %v18248_v13 = vld [vmem:[%s19879_s22 + $0x23a8] ss:$16 sps:$4 sm:$0xff]  }
 0x54d   : > { %11963 = vmatpush1.bf16.msra.mxu0 %v18161_v14  ;;  %13124 = vmatpush1.bf16.msra.mxu1 %v18164_v15  ;;  %v18253_v14 = vld [vmem:[%s19879_s22 + $0x23c4] ss:$16 sps:$4 sm:$0xff]   ;;  %v18256_v15 = vld [vmem:[%s19879_s22 + $0x23cc] ss:$16 sps:$4 sm:$0xff]  }
 0x54e   : > { %11975 = vmatprep.subr.bf16.mxu0 %v18169_v18  ;;  %13136 = vmatprep.subr.bf16.mxu1 %v18172_v19  ;;  %v18259_v18 = vld [vmem:[%s19879_s22 + $0x23e4] ss:$16 sps:$4 sm:$0xff]   ;;  %v18262_v19 = vld [vmem:[%s19879_s22 + $0x23ec] ss:$16 sps:$4 sm:$0xff]  }
 0x550   : > { %11965 = vmatmul.mubr.bf16.vlgmr.msra.gmra.mrb[0].mxu0 %v854_v20  ;;  %13126 = vmatmul.mubr.bf16.vlgmr.msra.gmra.mrb[0].mxu1 %v854_v20  ;;  %v18257_v20 = vld [vmem:[%s19879_s22 + $0x23e0] ss:$16 sps:$4 sm:$0xff]  }
 0x551   : > { %11976 = vmatpush1.bf16.msra.mxu0 %v18167_v23  ;;  %13137 = vmatpush1.bf16.msra.mxu1 %v18170_v24  ;;  %v802_v23 = vld [vmem:[%s19877_s4 + $0x2c0] sm:$0xff] }
 0x552   : > { %11977 = vmatprep.subr.bf16.mxu0 %v18175_v25  ;;  %13138 = vmatprep.subr.bf16.mxu1 %v18178_v26  ;;  %v18265_v24 = vld [vmem:[%s19879_s22 + $0x2404] ss:$16 sps:$4 sm:$0xff]   ;;  %v18268_v25 = vld [vmem:[%s19879_s22 + $0x240c] ss:$16 sps:$4 sm:$0xff]   ;;  %v856_v26 = vpack.c.bf16 %v802_v23, %v748_v22  ;;  %v18347_v22 = vld [vmem:[%s19879_s22 + $0x25c0] ss:$16 sps:$4 sm:$0xff]  }
 0x553   : > { %12007 = vmatprep.mubr.bf16.mxu0 %v857_v27  ;;  %13168 = vmatprep.mubr.bf16.mxu1 %v857_v27  ;;  %v751_v27 = vld [vmem:[%s19877_s4 + $0x128] sm:$0xff] }
 0x554   : > { %v18350_v23 = vld [vmem:[%s19879_s22 + $0x25c8] ss:$16 sps:$4 sm:$0xff]  }
 0x555   : > { %11978 = vmatpush1.bf16.msra.mxu0 %v18173_v28  ;;  %13139 = vmatpush1.bf16.msra.mxu1 %v18176_v29  ;;  %v805_v28 = vld [vmem:[%s19877_s4 + $0x2d8] sm:$0xff]  ;;  %v18263_v29 = vld [vmem:[%s19879_s22 + $0x2400] ss:$16 sps:$4 sm:$0xff]  }
 0x556   : > { %11979 = vmatprep.subr.bf16.mxu0 %v18181_v30  ;;  %13140 = vmatprep.subr.bf16.mxu1 %v18184_v31  ;;  %v18266_v30 = vld [vmem:[%s19879_s22 + $0x2408] ss:$16 sps:$4 sm:$0xff]   ;;  %v18271_v31 = vld [vmem:[%s19879_s22 + $0x2424] ss:$16 sps:$4 sm:$0xff]  }
 0x559   : > { %11980 = vmatpush1.bf16.msra.mxu0 %v18179_v32  ;;  %13141 = vmatpush1.bf16.msra.mxu1 %v18182_v33  ;;  %v18274_v32 = vld [vmem:[%s19879_s22 + $0x242c] ss:$16 sps:$4 sm:$0xff]   ;;  %v859_v33 = vpack.c.bf16 %v805_v28, %v751_v27  ;;  %v18356_v27 = vld [vmem:[%s19879_s22 + $0x25e8] ss:$16 sps:$4 sm:$0xff]   ;;  %v750_v28 = vld [vmem:[%s19877_s4 + $0x120] sm:$0xff] }
 0x55a   : > { %11981 = vmatprep.subr.bf16.mxu0 %v18187_v34  ;;  %13142 = vmatprep.subr.bf16.mxu1 %v18190_v35  ;;  %v18269_v34 = vld [vmem:[%s19879_s22 + $0x2420] ss:$16 sps:$4 sm:$0xff]   ;;  %v18272_v35 = vld [vmem:[%s19879_s22 + $0x2428] ss:$16 sps:$4 sm:$0xff]  }
 0x55d   : > { %11982 = vmatpush1.bf16.msra.mxu0 %v18185_v36  ;;  %13143 = vmatpush1.bf16.msra.mxu1 %v18188_v37  ;;  %v18277_v36 = vld [vmem:[%s19879_s22 + $0x2444] ss:$16 sps:$4 sm:$0xff]   ;;  %v18280_v37 = vld [vmem:[%s19879_s22 + $0x244c] ss:$16 sps:$4 sm:$0xff]  }
 0x55e   : > { %11983 = vmatprep.subr.bf16.mxu0 %v18193_v38  ;;  %13144 = vmatprep.subr.bf16.mxu1 %v18196_v39  ;;  %v18275_v38 = vld [vmem:[%s19879_s22 + $0x2440] ss:$16 sps:$4 sm:$0xff]   ;;  %v18278_v39 = vld [vmem:[%s19879_s22 + $0x2448] ss:$16 sps:$4 sm:$0xff]  }
 0x561   : > { %11984 = vmatpush1.bf16.msra.mxu0 %v18191_v40  ;;  %13145 = vmatpush1.bf16.msra.mxu1 %v18194_v41  ;;  %v18283_v40 = vld [vmem:[%s19879_s22 + $0x2464] ss:$16 sps:$4 sm:$0xff]   ;;  %v18286_v41 = vld [vmem:[%s19879_s22 + $0x246c] ss:$16 sps:$4 sm:$0xff]  }
 0x562   : > { %11985 = vmatprep.subr.bf16.mxu0 %v18199_v42  ;;  %13146 = vmatprep.subr.bf16.mxu1 %v18202_v43  ;;  %v18281_v42 = vld [vmem:[%s19879_s22 + $0x2460] ss:$16 sps:$4 sm:$0xff]   ;;  %v18284_v43 = vld [vmem:[%s19879_s22 + $0x2468] ss:$16 sps:$4 sm:$0xff]  }
 0x565   : > { %11986 = vmatpush1.bf16.msra.mxu0 %v18197_v44  ;;  %13147 = vmatpush1.bf16.msra.mxu1 %v18200_v45  ;;  %v18289_v44 = vld [vmem:[%s19879_s22 + $0x2484] ss:$16 sps:$4 sm:$0xff]   ;;  %v18292_v45 = vld [vmem:[%s19879_s22 + $0x248c] ss:$16 sps:$4 sm:$0xff]  }
 0x566   : > { %11987 = vmatprep.subr.bf16.mxu0 %v18205_v46  ;;  %13148 = vmatprep.subr.bf16.mxu1 %v18208_v47  ;;  %v18287_v46 = vld [vmem:[%s19879_s22 + $0x2480] ss:$16 sps:$4 sm:$0xff]   ;;  %v18290_v47 = vld [vmem:[%s19879_s22 + $0x2488] ss:$16 sps:$4 sm:$0xff]  }
 0x569   : > { %11988 = vmatpush1.bf16.msra.mxu0 %v18203_v48  ;;  %13149 = vmatpush1.bf16.msra.mxu1 %v18206_v49  ;;  %v18295_v48 = vld [vmem:[%s19879_s22 + $0x24a4] ss:$16 sps:$4 sm:$0xff]   ;;  %v18298_v49 = vld [vmem:[%s19879_s22 + $0x24ac] ss:$16 sps:$4 sm:$0xff]  }
 0x56a   : > { %11989 = vmatprep.subr.bf16.mxu0 %v18211_v50  ;;  %13150 = vmatprep.subr.bf16.mxu1 %v18214_v51  ;;  %v18293_v50 = vld [vmem:[%s19879_s22 + $0x24a0] ss:$16 sps:$4 sm:$0xff]   ;;  %v18296_v51 = vld [vmem:[%s19879_s22 + $0x24a8] ss:$16 sps:$4 sm:$0xff]  }
 0x56d   : > { %11990 = vmatpush1.bf16.msra.mxu0 %v18209_v52  ;;  %13151 = vmatpush1.bf16.msra.mxu1 %v18212_v53  ;;  %v18301_v52 = vld [vmem:[%s19879_s22 + $0x24c4] ss:$16 sps:$4 sm:$0xff]   ;;  %v18304_v53 = vld [vmem:[%s19879_s22 + $0x24cc] ss:$16 sps:$4 sm:$0xff]  }
 0x56e   : > { %11991 = vmatprep.subr.bf16.mxu0 %v18217_v54  ;;  %13152 = vmatprep.subr.bf16.mxu1 %v18220_v55  ;;  %v18299_v54 = vld [vmem:[%s19879_s22 + $0x24c0] ss:$16 sps:$4 sm:$0xff]   ;;  %v18302_v55 = vld [vmem:[%s19879_s22 + $0x24c8] ss:$16 sps:$4 sm:$0xff]  }
 0x571   : > { %11992 = vmatpush1.bf16.msra.mxu0 %v18215_v56  ;;  %13153 = vmatpush1.bf16.msra.mxu1 %v18218_v57  ;;  %v18307_v56 = vld [vmem:[%s19879_s22 + $0x24e4] ss:$16 sps:$4 sm:$0xff]   ;;  %v18310_v57 = vld [vmem:[%s19879_s22 + $0x24ec] ss:$16 sps:$4 sm:$0xff]  }
 0x572   : > { %11993 = vmatprep.subr.bf16.mxu0 %v18223_v58  ;;  %13154 = vmatprep.subr.bf16.mxu1 %v18226_v59  ;;  %v18305_v58 = vld [vmem:[%s19879_s22 + $0x24e0] ss:$16 sps:$4 sm:$0xff]   ;;  %v18308_v59 = vld [vmem:[%s19879_s22 + $0x24e8] ss:$16 sps:$4 sm:$0xff]  }
 0x575   : > { %11994 = vmatpush1.bf16.msra.mxu0 %v18221_v60  ;;  %13155 = vmatpush1.bf16.msra.mxu1 %v18224_v61  ;;  %v18313_v60 = vld [vmem:[%s19879_s22 + $0x2504] ss:$16 sps:$4 sm:$0xff]   ;;  %v18316_v61 = vld [vmem:[%s19879_s22 + $0x250c] ss:$16 sps:$4 sm:$0xff]  }
 0x576   : > { %11995 = vmatprep.subr.bf16.mxu0 %v18229_v62  ;;  %13156 = vmatprep.subr.bf16.mxu1 %v18232_v63  ;;  %v18311_v62 = vld [vmem:[%s19879_s22 + $0x2500] ss:$16 sps:$4 sm:$0xff]   ;;  %v18314_v63 = vld [vmem:[%s19879_s22 + $0x2508] ss:$16 sps:$4 sm:$0xff]  }
 0x579   : > { %11996 = vmatpush1.bf16.msra.mxu0 %v18227_v0  ;;  %13157 = vmatpush1.bf16.msra.mxu1 %v18230_v1  ;;  %v18319_v0 = vld [vmem:[%s19879_s22 + $0x2524] ss:$16 sps:$4 sm:$0xff]   ;;  %v18322_v1 = vld [vmem:[%s19879_s22 + $0x252c] ss:$16 sps:$4 sm:$0xff]  }
 0x57a   : > { %11997 = vmatprep.subr.bf16.mxu0 %v18235_v2  ;;  %13158 = vmatprep.subr.bf16.mxu1 %v18238_v3  ;;  %v18317_v2 = vld [vmem:[%s19879_s22 + $0x2520] ss:$16 sps:$4 sm:$0xff]   ;;  %v18320_v3 = vld [vmem:[%s19879_s22 + $0x2528] ss:$16 sps:$4 sm:$0xff]  }
 0x57d   : > { %11998 = vmatpush1.bf16.msra.mxu0 %v18233_v4  ;;  %13159 = vmatpush1.bf16.msra.mxu1 %v18236_v5  ;;  %v18325_v4 = vld [vmem:[%s19879_s22 + $0x2544] ss:$16 sps:$4 sm:$0xff]   ;;  %v18328_v5 = vld [vmem:[%s19879_s22 + $0x254c] ss:$16 sps:$4 sm:$0xff]  }
 0x57e   : > { %11999 = vmatprep.subr.bf16.mxu0 %v18241_v6  ;;  %13160 = vmatprep.subr.bf16.mxu1 %v18244_v7  ;;  %v18323_v6 = vld [vmem:[%s19879_s22 + $0x2540] ss:$16 sps:$4 sm:$0xff]   ;;  %v18326_v7 = vld [vmem:[%s19879_s22 + $0x2548] ss:$16 sps:$4 sm:$0xff]  }
 0x581   : > { %12000 = vmatpush1.bf16.msra.mxu0 %v18239_v8  ;;  %13161 = vmatpush1.bf16.msra.mxu1 %v18242_v9  ;;  %v18331_v8 = vld [vmem:[%s19879_s22 + $0x2564] ss:$16 sps:$4 sm:$0xff]   ;;  %v18334_v9 = vld [vmem:[%s19879_s22 + $0x256c] ss:$16 sps:$4 sm:$0xff]  }
 0x582   : > { %12001 = vmatprep.subr.bf16.mxu0 %v18247_v10  ;;  %13162 = vmatprep.subr.bf16.mxu1 %v18250_v11  ;;  %v18329_v10 = vld [vmem:[%s19879_s22 + $0x2560] ss:$16 sps:$4 sm:$0xff]   ;;  %v18332_v11 = vld [vmem:[%s19879_s22 + $0x2568] ss:$16 sps:$4 sm:$0xff]  }
 0x585   : > { %12002 = vmatpush1.bf16.msra.mxu0 %v18245_v12  ;;  %13163 = vmatpush1.bf16.msra.mxu1 %v18248_v13  ;;  %v18337_v12 = vld [vmem:[%s19879_s22 + $0x2584] ss:$16 sps:$4 sm:$0xff]   ;;  %v18340_v13 = vld [vmem:[%s19879_s22 + $0x258c] ss:$16 sps:$4 sm:$0xff]  }
 0x586   : > { %12003 = vmatprep.subr.bf16.mxu0 %v18253_v14  ;;  %13164 = vmatprep.subr.bf16.mxu1 %v18256_v15  ;;  %v18335_v14 = vld [vmem:[%s19879_s22 + $0x2580] ss:$16 sps:$4 sm:$0xff]   ;;  %v18338_v15 = vld [vmem:[%s19879_s22 + $0x2588] ss:$16 sps:$4 sm:$0xff]  }
 0x589   : > { %12004 = vmatpush1.bf16.msra.mxu0 %v18251_v16  ;;  %13165 = vmatpush1.bf16.msra.mxu1 %v18254_v17  ;;  %v18343_v16 = vld [vmem:[%s19879_s22 + $0x25a4] ss:$16 sps:$4 sm:$0xff]   ;;  %v18346_v17 = vld [vmem:[%s19879_s22 + $0x25ac] ss:$16 sps:$4 sm:$0xff]  }
 0x58a   : > { %12005 = vmatprep.subr.bf16.mxu0 %v18259_v18  ;;  %13166 = vmatprep.subr.bf16.mxu1 %v18262_v19  ;;  %v18341_v18 = vld [vmem:[%s19879_s22 + $0x25a0] ss:$16 sps:$4 sm:$0xff]   ;;  %v18344_v19 = vld [vmem:[%s19879_s22 + $0x25a8] ss:$16 sps:$4 sm:$0xff]  }
 0x58d   : > { %12006 = vmatpush1.bf16.msra.mxu0 %v18257_v20  ;;  %13167 = vmatpush1.bf16.msra.mxu1 %v18260_v21  ;;  %v18349_v20 = vld [vmem:[%s19879_s22 + $0x25c4] ss:$16 sps:$4 sm:$0xff]   ;;  %v18352_v21 = vld [vmem:[%s19879_s22 + $0x25cc] ss:$16 sps:$4 sm:$0xff]  }
 0x58e   : > { %12018 = vmatprep.subr.bf16.mxu0 %v18265_v24  ;;  %13179 = vmatprep.subr.bf16.mxu1 %v18268_v25  ;;  %v18355_v24 = vld [vmem:[%s19879_s22 + $0x25e4] ss:$16 sps:$4 sm:$0xff]   ;;  %v18358_v25 = vld [vmem:[%s19879_s22 + $0x25ec] ss:$16 sps:$4 sm:$0xff]  }
 0x590   : > { %12008 = vmatmul.mubr.bf16.vlgmr.msra.gmra.mrb[0].mxu0 %v856_v26  ;;  %13169 = vmatmul.mubr.bf16.vlgmr.msra.gmra.mrb[0].mxu1 %v856_v26  ;;  %v18353_v26 = vld [vmem:[%s19879_s22 + $0x25e0] ss:$16 sps:$4 sm:$0xff]  }
 0x591   : > { %12019 = vmatpush1.bf16.msra.mxu0 %v18263_v29  ;;  %13180 = vmatpush1.bf16.msra.mxu1 %v18266_v30  ;;  %v804_v29 = vld [vmem:[%s19877_s4 + $0x2d0] sm:$0xff] }
 0x592   : > { %12020 = vmatprep.subr.bf16.mxu0 %v18271_v31  ;;  %13181 = vmatprep.subr.bf16.mxu1 %v18274_v32  ;;  %v18361_v30 = vld [vmem:[%s19879_s22 + $0x2604] ss:$16 sps:$4 sm:$0xff]   ;;  %v18364_v31 = vld [vmem:[%s19879_s22 + $0x260c] ss:$16 sps:$4 sm:$0xff]   ;;  %v858_v32 = vpack.c.bf16 %v804_v29, %v750_v28  ;;  %v18443_v28 = vld [vmem:[%s19879_s22 + $0x27c0] ss:$16 sps:$4 sm:$0xff]  }
 0x593   : > { %12050 = vmatprep.mubr.bf16.mxu0 %v859_v33  ;;  %13211 = vmatprep.mubr.bf16.mxu1 %v859_v33  ;;  %v753_v33 = vld [vmem:[%s19877_s4 + $0x138] sm:$0xff] }
 0x594   : > { %v18446_v29 = vld [vmem:[%s19879_s22 + $0x27c8] ss:$16 sps:$4 sm:$0xff]  }
 0x595   : > { %12021 = vmatpush1.bf16.msra.mxu0 %v18269_v34  ;;  %13182 = vmatpush1.bf16.msra.mxu1 %v18272_v35  ;;  %v807_v34 = vld [vmem:[%s19877_s4 + $0x2e8] sm:$0xff]  ;;  %v18359_v35 = vld [vmem:[%s19879_s22 + $0x2600] ss:$16 sps:$4 sm:$0xff]  }
 0x596   : > { %12022 = vmatprep.subr.bf16.mxu0 %v18277_v36  ;;  %13183 = vmatprep.subr.bf16.mxu1 %v18280_v37  ;;  %v18362_v36 = vld [vmem:[%s19879_s22 + $0x2608] ss:$16 sps:$4 sm:$0xff]   ;;  %v18367_v37 = vld [vmem:[%s19879_s22 + $0x2624] ss:$16 sps:$4 sm:$0xff]  }
 0x599   : > { %12023 = vmatpush1.bf16.msra.mxu0 %v18275_v38  ;;  %13184 = vmatpush1.bf16.msra.mxu1 %v18278_v39  ;;  %v18370_v38 = vld [vmem:[%s19879_s22 + $0x262c] ss:$16 sps:$4 sm:$0xff]   ;;  %v861_v39 = vpack.c.bf16 %v807_v34, %v753_v33  ;;  %v18452_v33 = vld [vmem:[%s19879_s22 + $0x27e8] ss:$16 sps:$4 sm:$0xff]   ;;  %v752_v34 = vld [vmem:[%s19877_s4 + $0x130] sm:$0xff] }
 0x59a   : > { %12024 = vmatprep.subr.bf16.mxu0 %v18283_v40  ;;  %13185 = vmatprep.subr.bf16.mxu1 %v18286_v41  ;;  %v18365_v40 = vld [vmem:[%s19879_s22 + $0x2620] ss:$16 sps:$4 sm:$0xff]   ;;  %v18368_v41 = vld [vmem:[%s19879_s22 + $0x2628] ss:$16 sps:$4 sm:$0xff]  }
 0x59d   : > { %12025 = vmatpush1.bf16.msra.mxu0 %v18281_v42  ;;  %13186 = vmatpush1.bf16.msra.mxu1 %v18284_v43  ;;  %v18373_v42 = vld [vmem:[%s19879_s22 + $0x2644] ss:$16 sps:$4 sm:$0xff]   ;;  %v18376_v43 = vld [vmem:[%s19879_s22 + $0x264c] ss:$16 sps:$4 sm:$0xff]  }
 0x59e   : > { %12026 = vmatprep.subr.bf16.mxu0 %v18289_v44  ;;  %13187 = vmatprep.subr.bf16.mxu1 %v18292_v45  ;;  %v18371_v44 = vld [vmem:[%s19879_s22 + $0x2640] ss:$16 sps:$4 sm:$0xff]   ;;  %v18374_v45 = vld [vmem:[%s19879_s22 + $0x2648] ss:$16 sps:$4 sm:$0xff]  }
 0x5a1   : > { %12027 = vmatpush1.bf16.msra.mxu0 %v18287_v46  ;;  %13188 = vmatpush1.bf16.msra.mxu1 %v18290_v47  ;;  %v18379_v46 = vld [vmem:[%s19879_s22 + $0x2664] ss:$16 sps:$4 sm:$0xff]   ;;  %v18382_v47 = vld [vmem:[%s19879_s22 + $0x266c] ss:$16 sps:$4 sm:$0xff]  }
 0x5a2   : > { %12028 = vmatprep.subr.bf16.mxu0 %v18295_v48  ;;  %13189 = vmatprep.subr.bf16.mxu1 %v18298_v49  ;;  %v18377_v48 = vld [vmem:[%s19879_s22 + $0x2660] ss:$16 sps:$4 sm:$0xff]   ;;  %v18380_v49 = vld [vmem:[%s19879_s22 + $0x2668] ss:$16 sps:$4 sm:$0xff]  }
 0x5a5   : > { %12029 = vmatpush1.bf16.msra.mxu0 %v18293_v50  ;;  %13190 = vmatpush1.bf16.msra.mxu1 %v18296_v51  ;;  %v18385_v50 = vld [vmem:[%s19879_s22 + $0x2684] ss:$16 sps:$4 sm:$0xff]   ;;  %v18388_v51 = vld [vmem:[%s19879_s22 + $0x268c] ss:$16 sps:$4 sm:$0xff]  }
 0x5a6   : > { %12030 = vmatprep.subr.bf16.mxu0 %v18301_v52  ;;  %13191 = vmatprep.subr.bf16.mxu1 %v18304_v53  ;;  %v18383_v52 = vld [vmem:[%s19879_s22 + $0x2680] ss:$16 sps:$4 sm:$0xff]   ;;  %v18386_v53 = vld [vmem:[%s19879_s22 + $0x2688] ss:$16 sps:$4 sm:$0xff]  }
 0x5a9   : > { %12031 = vmatpush1.bf16.msra.mxu0 %v18299_v54  ;;  %13192 = vmatpush1.bf16.msra.mxu1 %v18302_v55  ;;  %v18391_v54 = vld [vmem:[%s19879_s22 + $0x26a4] ss:$16 sps:$4 sm:$0xff]   ;;  %v18394_v55 = vld [vmem:[%s19879_s22 + $0x26ac] ss:$16 sps:$4 sm:$0xff]  }
 0x5aa   : > { %12032 = vmatprep.subr.bf16.mxu0 %v18307_v56  ;;  %13193 = vmatprep.subr.bf16.mxu1 %v18310_v57  ;;  %v18389_v56 = vld [vmem:[%s19879_s22 + $0x26a0] ss:$16 sps:$4 sm:$0xff]   ;;  %v18392_v57 = vld [vmem:[%s19879_s22 + $0x26a8] ss:$16 sps:$4 sm:$0xff]  }
 0x5ad   : > { %12033 = vmatpush1.bf16.msra.mxu0 %v18305_v58  ;;  %13194 = vmatpush1.bf16.msra.mxu1 %v18308_v59  ;;  %v18397_v58 = vld [vmem:[%s19879_s22 + $0x26c4] ss:$16 sps:$4 sm:$0xff]   ;;  %v18400_v59 = vld [vmem:[%s19879_s22 + $0x26cc] ss:$16 sps:$4 sm:$0xff]  }
 0x5ae   : > { %12034 = vmatprep.subr.bf16.mxu0 %v18313_v60  ;;  %13195 = vmatprep.subr.bf16.mxu1 %v18316_v61  ;;  %v18395_v60 = vld [vmem:[%s19879_s22 + $0x26c0] ss:$16 sps:$4 sm:$0xff]   ;;  %v18398_v61 = vld [vmem:[%s19879_s22 + $0x26c8] ss:$16 sps:$4 sm:$0xff]  }
 0x5b1   : > { %12035 = vmatpush1.bf16.msra.mxu0 %v18311_v62  ;;  %13196 = vmatpush1.bf16.msra.mxu1 %v18314_v63  ;;  %v18403_v62 = vld [vmem:[%s19879_s22 + $0x26e4] ss:$16 sps:$4 sm:$0xff]   ;;  %v18406_v63 = vld [vmem:[%s19879_s22 + $0x26ec] ss:$16 sps:$4 sm:$0xff]  }
 0x5b2   : > { %12036 = vmatprep.subr.bf16.mxu0 %v18319_v0  ;;  %13197 = vmatprep.subr.bf16.mxu1 %v18322_v1  ;;  %v18401_v0 = vld [vmem:[%s19879_s22 + $0x26e0] ss:$16 sps:$4 sm:$0xff]   ;;  %v18404_v1 = vld [vmem:[%s19879_s22 + $0x26e8] ss:$16 sps:$4 sm:$0xff]  }
 0x5b5   : > { %12037 = vmatpush1.bf16.msra.mxu0 %v18317_v2  ;;  %13198 = vmatpush1.bf16.msra.mxu1 %v18320_v3  ;;  %v18409_v2 = vld [vmem:[%s19879_s22 + $0x2704] ss:$16 sps:$4 sm:$0xff]   ;;  %v18412_v3 = vld [vmem:[%s19879_s22 + $0x270c] ss:$16 sps:$4 sm:$0xff]  }
 0x5b6   : > { %12038 = vmatprep.subr.bf16.mxu0 %v18325_v4  ;;  %13199 = vmatprep.subr.bf16.mxu1 %v18328_v5  ;;  %v18407_v4 = vld [vmem:[%s19879_s22 + $0x2700] ss:$16 sps:$4 sm:$0xff]   ;;  %v18410_v5 = vld [vmem:[%s19879_s22 + $0x2708] ss:$16 sps:$4 sm:$0xff]  }
 0x5b9   : > { %12039 = vmatpush1.bf16.msra.mxu0 %v18323_v6  ;;  %13200 = vmatpush1.bf16.msra.mxu1 %v18326_v7  ;;  %v18415_v6 = vld [vmem:[%s19879_s22 + $0x2724] ss:$16 sps:$4 sm:$0xff]   ;;  %v18418_v7 = vld [vmem:[%s19879_s22 + $0x272c] ss:$16 sps:$4 sm:$0xff]  }
 0x5ba   : > { %12040 = vmatprep.subr.bf16.mxu0 %v18331_v8  ;;  %13201 = vmatprep.subr.bf16.mxu1 %v18334_v9  ;;  %v18413_v8 = vld [vmem:[%s19879_s22 + $0x2720] ss:$16 sps:$4 sm:$0xff]   ;;  %v18416_v9 = vld [vmem:[%s19879_s22 + $0x2728] ss:$16 sps:$4 sm:$0xff]  }
 0x5bd   : > { %12041 = vmatpush1.bf16.msra.mxu0 %v18329_v10  ;;  %13202 = vmatpush1.bf16.msra.mxu1 %v18332_v11  ;;  %v18421_v10 = vld [vmem:[%s19879_s22 + $0x2744] ss:$16 sps:$4 sm:$0xff]   ;;  %v18424_v11 = vld [vmem:[%s19879_s22 + $0x274c] ss:$16 sps:$4 sm:$0xff]  }
 0x5be   : > { %12042 = vmatprep.subr.bf16.mxu0 %v18337_v12  ;;  %13203 = vmatprep.subr.bf16.mxu1 %v18340_v13  ;;  %v18419_v12 = vld [vmem:[%s19879_s22 + $0x2740] ss:$16 sps:$4 sm:$0xff]   ;;  %v18422_v13 = vld [vmem:[%s19879_s22 + $0x2748] ss:$16 sps:$4 sm:$0xff]  }
 0x5c1   : > { %12043 = vmatpush1.bf16.msra.mxu0 %v18335_v14  ;;  %13204 = vmatpush1.bf16.msra.mxu1 %v18338_v15  ;;  %v18427_v14 = vld [vmem:[%s19879_s22 + $0x2764] ss:$16 sps:$4 sm:$0xff]   ;;  %v18430_v15 = vld [vmem:[%s19879_s22 + $0x276c] ss:$16 sps:$4 sm:$0xff]  }
 0x5c2   : > { %12044 = vmatprep.subr.bf16.mxu0 %v18343_v16  ;;  %13205 = vmatprep.subr.bf16.mxu1 %v18346_v17  ;;  %v18425_v16 = vld [vmem:[%s19879_s22 + $0x2760] ss:$16 sps:$4 sm:$0xff]   ;;  %v18428_v17 = vld [vmem:[%s19879_s22 + $0x2768] ss:$16 sps:$4 sm:$0xff]  }
 0x5c5   : > { %12045 = vmatpush1.bf16.msra.mxu0 %v18341_v18  ;;  %13206 = vmatpush1.bf16.msra.mxu1 %v18344_v19  ;;  %v18433_v18 = vld [vmem:[%s19879_s22 + $0x2784] ss:$16 sps:$4 sm:$0xff]   ;;  %v18436_v19 = vld [vmem:[%s19879_s22 + $0x278c] ss:$16 sps:$4 sm:$0xff]  }
 0x5c6   : > { %12046 = vmatprep.subr.bf16.mxu0 %v18349_v20  ;;  %13207 = vmatprep.subr.bf16.mxu1 %v18352_v21  ;;  %v18431_v20 = vld [vmem:[%s19879_s22 + $0x2780] ss:$16 sps:$4 sm:$0xff]   ;;  %v18434_v21 = vld [vmem:[%s19879_s22 + $0x2788] ss:$16 sps:$4 sm:$0xff]  }
 0x5c9   : > { %12047 = vmatpush1.bf16.msra.mxu0 %v18347_v22  ;;  %13208 = vmatpush1.bf16.msra.mxu1 %v18350_v23  ;;  %v18439_v22 = vld [vmem:[%s19879_s22 + $0x27a4] ss:$16 sps:$4 sm:$0xff]   ;;  %v18442_v23 = vld [vmem:[%s19879_s22 + $0x27ac] ss:$16 sps:$4 sm:$0xff]  }
 0x5ca   : > { %12048 = vmatprep.subr.bf16.mxu0 %v18355_v24  ;;  %13209 = vmatprep.subr.bf16.mxu1 %v18358_v25  ;;  %v18437_v24 = vld [vmem:[%s19879_s22 + $0x27a0] ss:$16 sps:$4 sm:$0xff]   ;;  %v18440_v25 = vld [vmem:[%s19879_s22 + $0x27a8] ss:$16 sps:$4 sm:$0xff]  }
 0x5cd   : > { %12049 = vmatpush1.bf16.msra.mxu0 %v18353_v26  ;;  %13210 = vmatpush1.bf16.msra.mxu1 %v18356_v27  ;;  %v18445_v26 = vld [vmem:[%s19879_s22 + $0x27c4] ss:$16 sps:$4 sm:$0xff]   ;;  %v18448_v27 = vld [vmem:[%s19879_s22 + $0x27cc] ss:$16 sps:$4 sm:$0xff]  }
 0x5ce   : > { %12061 = vmatprep.subr.bf16.mxu0 %v18361_v30  ;;  %13222 = vmatprep.subr.bf16.mxu1 %v18364_v31  ;;  %v18451_v30 = vld [vmem:[%s19879_s22 + $0x27e4] ss:$16 sps:$4 sm:$0xff]   ;;  %v18454_v31 = vld [vmem:[%s19879_s22 + $0x27ec] ss:$16 sps:$4 sm:$0xff]  }
 0x5d0   : > { %12051 = vmatmul.mubr.bf16.vlgmr.msra.gmra.mrb[0].mxu0 %v858_v32  ;;  %13212 = vmatmul.mubr.bf16.vlgmr.msra.gmra.mrb[0].mxu1 %v858_v32  ;;  %v18449_v32 = vld [vmem:[%s19879_s22 + $0x27e0] ss:$16 sps:$4 sm:$0xff]  }
 0x5d1   : > { %12062 = vmatpush1.bf16.msra.mxu0 %v18359_v35  ;;  %13223 = vmatpush1.bf16.msra.mxu1 %v18362_v36  ;;  %v806_v35 = vld [vmem:[%s19877_s4 + $0x2e0] sm:$0xff] }
 0x5d2   : > { %12063 = vmatprep.subr.bf16.mxu0 %v18367_v37  ;;  %13224 = vmatprep.subr.bf16.mxu1 %v18370_v38  ;;  %v18457_v36 = vld [vmem:[%s19879_s22 + $0x2804] ss:$16 sps:$4 sm:$0xff]   ;;  %v18460_v37 = vld [vmem:[%s19879_s22 + $0x280c] ss:$16 sps:$4 sm:$0xff]   ;;  %v860_v38 = vpack.c.bf16 %v806_v35, %v752_v34  ;;  %v18539_v34 = vld [vmem:[%s19879_s22 + $0x29c0] ss:$16 sps:$4 sm:$0xff]  }
 0x5d3   : > { %12093 = vmatprep.mubr.bf16.mxu0 %v861_v39  ;;  %13254 = vmatprep.mubr.bf16.mxu1 %v861_v39  ;;  %v755_v39 = vld [vmem:[%s19877_s4 + $0x148] sm:$0xff] }
 0x5d4   : > { %v18542_v35 = vld [vmem:[%s19879_s22 + $0x29c8] ss:$16 sps:$4 sm:$0xff]  }
 0x5d5   : > { %12064 = vmatpush1.bf16.msra.mxu0 %v18365_v40  ;;  %13225 = vmatpush1.bf16.msra.mxu1 %v18368_v41  ;;  %v809_v40 = vld [vmem:[%s19877_s4 + $0x2f8] sm:$0xff]  ;;  %v18455_v41 = vld [vmem:[%s19879_s22 + $0x2800] ss:$16 sps:$4 sm:$0xff]  }
 0x5d6   : > { %12065 = vmatprep.subr.bf16.mxu0 %v18373_v42  ;;  %13226 = vmatprep.subr.bf16.mxu1 %v18376_v43  ;;  %v18458_v42 = vld [vmem:[%s19879_s22 + $0x2808] ss:$16 sps:$4 sm:$0xff]   ;;  %v18463_v43 = vld [vmem:[%s19879_s22 + $0x2824] ss:$16 sps:$4 sm:$0xff]  }
 0x5d9   : > { %12066 = vmatpush1.bf16.msra.mxu0 %v18371_v44  ;;  %13227 = vmatpush1.bf16.msra.mxu1 %v18374_v45  ;;  %v18466_v44 = vld [vmem:[%s19879_s22 + $0x282c] ss:$16 sps:$4 sm:$0xff]   ;;  %v863_v45 = vpack.c.bf16 %v809_v40, %v755_v39  ;;  %v18548_v39 = vld [vmem:[%s19879_s22 + $0x29e8] ss:$16 sps:$4 sm:$0xff]   ;;  %v754_v40 = vld [vmem:[%s19877_s4 + $0x140] sm:$0xff] }
 0x5da   : > { %12067 = vmatprep.subr.bf16.mxu0 %v18379_v46  ;;  %13228 = vmatprep.subr.bf16.mxu1 %v18382_v47  ;;  %v18461_v46 = vld [vmem:[%s19879_s22 + $0x2820] ss:$16 sps:$4 sm:$0xff]   ;;  %v18464_v47 = vld [vmem:[%s19879_s22 + $0x2828] ss:$16 sps:$4 sm:$0xff]  }
 0x5dd   : > { %12068 = vmatpush1.bf16.msra.mxu0 %v18377_v48  ;;  %13229 = vmatpush1.bf16.msra.mxu1 %v18380_v49  ;;  %v18469_v48 = vld [vmem:[%s19879_s22 + $0x2844] ss:$16 sps:$4 sm:$0xff]   ;;  %v18472_v49 = vld [vmem:[%s19879_s22 + $0x284c] ss:$16 sps:$4 sm:$0xff]  }
 0x5de   : > { %12069 = vmatprep.subr.bf16.mxu0 %v18385_v50  ;;  %13230 = vmatprep.subr.bf16.mxu1 %v18388_v51  ;;  %v18467_v50 = vld [vmem:[%s19879_s22 + $0x2840] ss:$16 sps:$4 sm:$0xff]   ;;  %v18470_v51 = vld [vmem:[%s19879_s22 + $0x2848] ss:$16 sps:$4 sm:$0xff]  }
 0x5e1   : > { %12070 = vmatpush1.bf16.msra.mxu0 %v18383_v52  ;;  %13231 = vmatpush1.bf16.msra.mxu1 %v18386_v53  ;;  %v18475_v52 = vld [vmem:[%s19879_s22 + $0x2864] ss:$16 sps:$4 sm:$0xff]   ;;  %v18478_v53 = vld [vmem:[%s19879_s22 + $0x286c] ss:$16 sps:$4 sm:$0xff]  }
 0x5e2   : > { %12071 = vmatprep.subr.bf16.mxu0 %v18391_v54  ;;  %13232 = vmatprep.subr.bf16.mxu1 %v18394_v55  ;;  %v18473_v54 = vld [vmem:[%s19879_s22 + $0x2860] ss:$16 sps:$4 sm:$0xff]   ;;  %v18476_v55 = vld [vmem:[%s19879_s22 + $0x2868] ss:$16 sps:$4 sm:$0xff]  }
 0x5e5   : > { %12072 = vmatpush1.bf16.msra.mxu0 %v18389_v56  ;;  %13233 = vmatpush1.bf16.msra.mxu1 %v18392_v57  ;;  %v18481_v56 = vld [vmem:[%s19879_s22 + $0x2884] ss:$16 sps:$4 sm:$0xff]   ;;  %v18484_v57 = vld [vmem:[%s19879_s22 + $0x288c] ss:$16 sps:$4 sm:$0xff]  }
 0x5e6   : > { %12073 = vmatprep.subr.bf16.mxu0 %v18397_v58  ;;  %13234 = vmatprep.subr.bf16.mxu1 %v18400_v59  ;;  %v18479_v58 = vld [vmem:[%s19879_s22 + $0x2880] ss:$16 sps:$4 sm:$0xff]   ;;  %v18482_v59 = vld [vmem:[%s19879_s22 + $0x2888] ss:$16 sps:$4 sm:$0xff]  }
 0x5e9   : > { %12074 = vmatpush1.bf16.msra.mxu0 %v18395_v60  ;;  %13235 = vmatpush1.bf16.msra.mxu1 %v18398_v61  ;;  %v18487_v60 = vld [vmem:[%s19879_s22 + $0x28a4] ss:$16 sps:$4 sm:$0xff]   ;;  %v18490_v61 = vld [vmem:[%s19879_s22 + $0x28ac] ss:$16 sps:$4 sm:$0xff]  }
 0x5ea   : > { %12075 = vmatprep.subr.bf16.mxu0 %v18403_v62  ;;  %13236 = vmatprep.subr.bf16.mxu1 %v18406_v63  ;;  %v18485_v62 = vld [vmem:[%s19879_s22 + $0x28a0] ss:$16 sps:$4 sm:$0xff]   ;;  %v18488_v63 = vld [vmem:[%s19879_s22 + $0x28a8] ss:$16 sps:$4 sm:$0xff]  }
 0x5ed   : > { %12076 = vmatpush1.bf16.msra.mxu0 %v18401_v0  ;;  %13237 = vmatpush1.bf16.msra.mxu1 %v18404_v1  ;;  %v18493_v0 = vld [vmem:[%s19879_s22 + $0x28c4] ss:$16 sps:$4 sm:$0xff]   ;;  %v18496_v1 = vld [vmem:[%s19879_s22 + $0x28cc] ss:$16 sps:$4 sm:$0xff]  }
 0x5ee   : > { %12077 = vmatprep.subr.bf16.mxu0 %v18409_v2  ;;  %13238 = vmatprep.subr.bf16.mxu1 %v18412_v3  ;;  %v18491_v2 = vld [vmem:[%s19879_s22 + $0x28c0] ss:$16 sps:$4 sm:$0xff]   ;;  %v18494_v3 = vld [vmem:[%s19879_s22 + $0x28c8] ss:$16 sps:$4 sm:$0xff]  }
 0x5f1   : > { %12078 = vmatpush1.bf16.msra.mxu0 %v18407_v4  ;;  %13239 = vmatpush1.bf16.msra.mxu1 %v18410_v5  ;;  %v18499_v4 = vld [vmem:[%s19879_s22 + $0x28e4] ss:$16 sps:$4 sm:$0xff]   ;;  %v18502_v5 = vld [vmem:[%s19879_s22 + $0x28ec] ss:$16 sps:$4 sm:$0xff]  }
 0x5f2   : > { %12079 = vmatprep.subr.bf16.mxu0 %v18415_v6  ;;  %13240 = vmatprep.subr.bf16.mxu1 %v18418_v7  ;;  %v18497_v6 = vld [vmem:[%s19879_s22 + $0x28e0] ss:$16 sps:$4 sm:$0xff]   ;;  %v18500_v7 = vld [vmem:[%s19879_s22 + $0x28e8] ss:$16 sps:$4 sm:$0xff]  }
 0x5f5   : > { %12080 = vmatpush1.bf16.msra.mxu0 %v18413_v8  ;;  %13241 = vmatpush1.bf16.msra.mxu1 %v18416_v9  ;;  %v18505_v8 = vld [vmem:[%s19879_s22 + $0x2904] ss:$16 sps:$4 sm:$0xff]   ;;  %v18508_v9 = vld [vmem:[%s19879_s22 + $0x290c] ss:$16 sps:$4 sm:$0xff]  }
 0x5f6   : > { %12081 = vmatprep.subr.bf16.mxu0 %v18421_v10  ;;  %13242 = vmatprep.subr.bf16.mxu1 %v18424_v11  ;;  %v18503_v10 = vld [vmem:[%s19879_s22 + $0x2900] ss:$16 sps:$4 sm:$0xff]   ;;  %v18506_v11 = vld [vmem:[%s19879_s22 + $0x2908] ss:$16 sps:$4 sm:$0xff]  }
 0x5f9   : > { %12082 = vmatpush1.bf16.msra.mxu0 %v18419_v12  ;;  %13243 = vmatpush1.bf16.msra.mxu1 %v18422_v13  ;;  %v18511_v12 = vld [vmem:[%s19879_s22 + $0x2924] ss:$16 sps:$4 sm:$0xff]   ;;  %v18514_v13 = vld [vmem:[%s19879_s22 + $0x292c] ss:$16 sps:$4 sm:$0xff]  }
 0x5fa   : > { %12083 = vmatprep.subr.bf16.mxu0 %v18427_v14  ;;  %13244 = vmatprep.subr.bf16.mxu1 %v18430_v15  ;;  %v18509_v14 = vld [vmem:[%s19879_s22 + $0x2920] ss:$16 sps:$4 sm:$0xff]   ;;  %v18512_v15 = vld [vmem:[%s19879_s22 + $0x2928] ss:$16 sps:$4 sm:$0xff]  }
 0x5fd   : > { %12084 = vmatpush1.bf16.msra.mxu0 %v18425_v16  ;;  %13245 = vmatpush1.bf16.msra.mxu1 %v18428_v17  ;;  %v18517_v16 = vld [vmem:[%s19879_s22 + $0x2944] ss:$16 sps:$4 sm:$0xff]   ;;  %v18520_v17 = vld [vmem:[%s19879_s22 + $0x294c] ss:$16 sps:$4 sm:$0xff]  }
 0x5fe   : > { %12085 = vmatprep.subr.bf16.mxu0 %v18433_v18  ;;  %13246 = vmatprep.subr.bf16.mxu1 %v18436_v19  ;;  %v18515_v18 = vld [vmem:[%s19879_s22 + $0x2940] ss:$16 sps:$4 sm:$0xff]   ;;  %v18518_v19 = vld [vmem:[%s19879_s22 + $0x2948] ss:$16 sps:$4 sm:$0xff]  }
 0x601   : > { %12086 = vmatpush1.bf16.msra.mxu0 %v18431_v20  ;;  %13247 = vmatpush1.bf16.msra.mxu1 %v18434_v21  ;;  %v18523_v20 = vld [vmem:[%s19879_s22 + $0x2964] ss:$16 sps:$4 sm:$0xff]   ;;  %v18526_v21 = vld [vmem:[%s19879_s22 + $0x296c] ss:$16 sps:$4 sm:$0xff]  }
 0x602   : > { %12087 = vmatprep.subr.bf16.mxu0 %v18439_v22  ;;  %13248 = vmatprep.subr.bf16.mxu1 %v18442_v23  ;;  %v18521_v22 = vld [vmem:[%s19879_s22 + $0x2960] ss:$16 sps:$4 sm:$0xff]   ;;  %v18524_v23 = vld [vmem:[%s19879_s22 + $0x2968] ss:$16 sps:$4 sm:$0xff]  }
 0x605   : > { %12088 = vmatpush1.bf16.msra.mxu0 %v18437_v24  ;;  %13249 = vmatpush1.bf16.msra.mxu1 %v18440_v25  ;;  %v18529_v24 = vld [vmem:[%s19879_s22 + $0x2984] ss:$16 sps:$4 sm:$0xff]   ;;  %v18532_v25 = vld [vmem:[%s19879_s22 + $0x298c] ss:$16 sps:$4 sm:$0xff]  }
 0x606   : > { %12089 = vmatprep.subr.bf16.mxu0 %v18445_v26  ;;  %13250 = vmatprep.subr.bf16.mxu1 %v18448_v27  ;;  %v18527_v26 = vld [vmem:[%s19879_s22 + $0x2980] ss:$16 sps:$4 sm:$0xff]   ;;  %v18530_v27 = vld [vmem:[%s19879_s22 + $0x2988] ss:$16 sps:$4 sm:$0xff]  }
 0x609   : > { %12090 = vmatpush1.bf16.msra.mxu0 %v18443_v28  ;;  %13251 = vmatpush1.bf16.msra.mxu1 %v18446_v29  ;;  %v18535_v28 = vld [vmem:[%s19879_s22 + $0x29a4] ss:$16 sps:$4 sm:$0xff]   ;;  %v18538_v29 = vld [vmem:[%s19879_s22 + $0x29ac] ss:$16 sps:$4 sm:$0xff]  }
 0x60a   : > { %12091 = vmatprep.subr.bf16.mxu0 %v18451_v30  ;;  %13252 = vmatprep.subr.bf16.mxu1 %v18454_v31  ;;  %v18533_v30 = vld [vmem:[%s19879_s22 + $0x29a0] ss:$16 sps:$4 sm:$0xff]   ;;  %v18536_v31 = vld [vmem:[%s19879_s22 + $0x29a8] ss:$16 sps:$4 sm:$0xff]  }
 0x60d   : > { %12092 = vmatpush1.bf16.msra.mxu0 %v18449_v32  ;;  %13253 = vmatpush1.bf16.msra.mxu1 %v18452_v33  ;;  %v18541_v32 = vld [vmem:[%s19879_s22 + $0x29c4] ss:$16 sps:$4 sm:$0xff]   ;;  %v18544_v33 = vld [vmem:[%s19879_s22 + $0x29cc] ss:$16 sps:$4 sm:$0xff]  }
 0x60e   : > { %12104 = vmatprep.subr.bf16.mxu0 %v18457_v36  ;;  %13265 = vmatprep.subr.bf16.mxu1 %v18460_v37  ;;  %v18547_v36 = vld [vmem:[%s19879_s22 + $0x29e4] ss:$16 sps:$4 sm:$0xff]   ;;  %v18550_v37 = vld [vmem:[%s19879_s22 + $0x29ec] ss:$16 sps:$4 sm:$0xff]  }
 0x610   : > { %12094 = vmatmul.mubr.bf16.vlgmr.msra.gmra.mrb[0].mxu0 %v860_v38  ;;  %13255 = vmatmul.mubr.bf16.vlgmr.msra.gmra.mrb[0].mxu1 %v860_v38  ;;  %v18545_v38 = vld [vmem:[%s19879_s22 + $0x29e0] ss:$16 sps:$4 sm:$0xff]  }
 0x611   : > { %12105 = vmatpush1.bf16.msra.mxu0 %v18455_v41  ;;  %13266 = vmatpush1.bf16.msra.mxu1 %v18458_v42  ;;  %v808_v41 = vld [vmem:[%s19877_s4 + $0x2f0] sm:$0xff] }
 0x612   : > { %12106 = vmatprep.subr.bf16.mxu0 %v18463_v43  ;;  %13267 = vmatprep.subr.bf16.mxu1 %v18466_v44  ;;  %v18553_v42 = vld [vmem:[%s19879_s22 + $0x2a04] ss:$16 sps:$4 sm:$0xff]   ;;  %v18556_v43 = vld [vmem:[%s19879_s22 + $0x2a0c] ss:$16 sps:$4 sm:$0xff]   ;;  %v862_v44 = vpack.c.bf16 %v808_v41, %v754_v40  ;;  %v18635_v40 = vld [vmem:[%s19879_s22 + $0x2bc0] ss:$16 sps:$4 sm:$0xff]  }
 0x613   : > { %12136 = vmatprep.mubr.bf16.mxu0 %v863_v45  ;;  %13297 = vmatprep.mubr.bf16.mxu1 %v863_v45  ;;  %v757_v45 = vld [vmem:[%s19877_s4 + $0x158] sm:$0xff] }
 0x614   : > { %v18638_v41 = vld [vmem:[%s19879_s22 + $0x2bc8] ss:$16 sps:$4 sm:$0xff]  }
 0x615   : > { %12107 = vmatpush1.bf16.msra.mxu0 %v18461_v46  ;;  %13268 = vmatpush1.bf16.msra.mxu1 %v18464_v47  ;;  %v811_v46 = vld [vmem:[%s19877_s4 + $0x308] sm:$0xff]  ;;  %v18551_v47 = vld [vmem:[%s19879_s22 + $0x2a00] ss:$16 sps:$4 sm:$0xff]  }
 0x616   : > { %12108 = vmatprep.subr.bf16.mxu0 %v18469_v48  ;;  %13269 = vmatprep.subr.bf16.mxu1 %v18472_v49  ;;  %v18554_v48 = vld [vmem:[%s19879_s22 + $0x2a08] ss:$16 sps:$4 sm:$0xff]   ;;  %v18559_v49 = vld [vmem:[%s19879_s22 + $0x2a24] ss:$16 sps:$4 sm:$0xff]  }
 0x619   : > { %12109 = vmatpush1.bf16.msra.mxu0 %v18467_v50  ;;  %13270 = vmatpush1.bf16.msra.mxu1 %v18470_v51  ;;  %v18562_v50 = vld [vmem:[%s19879_s22 + $0x2a2c] ss:$16 sps:$4 sm:$0xff]   ;;  %v865_v51 = vpack.c.bf16 %v811_v46, %v757_v45  ;;  %v18644_v45 = vld [vmem:[%s19879_s22 + $0x2be8] ss:$16 sps:$4 sm:$0xff]   ;;  %v756_v46 = vld [vmem:[%s19877_s4 + $0x150] sm:$0xff] }
 0x61a   : > { %12110 = vmatprep.subr.bf16.mxu0 %v18475_v52  ;;  %13271 = vmatprep.subr.bf16.mxu1 %v18478_v53  ;;  %v18557_v52 = vld [vmem:[%s19879_s22 + $0x2a20] ss:$16 sps:$4 sm:$0xff]   ;;  %v18560_v53 = vld [vmem:[%s19879_s22 + $0x2a28] ss:$16 sps:$4 sm:$0xff]  }
 0x61d   : > { %12111 = vmatpush1.bf16.msra.mxu0 %v18473_v54  ;;  %13272 = vmatpush1.bf16.msra.mxu1 %v18476_v55  ;;  %v18565_v54 = vld [vmem:[%s19879_s22 + $0x2a44] ss:$16 sps:$4 sm:$0xff]   ;;  %v18568_v55 = vld [vmem:[%s19879_s22 + $0x2a4c] ss:$16 sps:$4 sm:$0xff]  }
 0x61e   : > { %12112 = vmatprep.subr.bf16.mxu0 %v18481_v56  ;;  %13273 = vmatprep.subr.bf16.mxu1 %v18484_v57  ;;  %v18563_v56 = vld [vmem:[%s19879_s22 + $0x2a40] ss:$16 sps:$4 sm:$0xff]   ;;  %v18566_v57 = vld [vmem:[%s19879_s22 + $0x2a48] ss:$16 sps:$4 sm:$0xff]  }
 0x621   : > { %12113 = vmatpush1.bf16.msra.mxu0 %v18479_v58  ;;  %13274 = vmatpush1.bf16.msra.mxu1 %v18482_v59  ;;  %v18571_v58 = vld [vmem:[%s19879_s22 + $0x2a64] ss:$16 sps:$4 sm:$0xff]   ;;  %v18574_v59 = vld [vmem:[%s19879_s22 + $0x2a6c] ss:$16 sps:$4 sm:$0xff]  }
 0x622   : > { %12114 = vmatprep.subr.bf16.mxu0 %v18487_v60  ;;  %13275 = vmatprep.subr.bf16.mxu1 %v18490_v61  ;;  %v18569_v60 = vld [vmem:[%s19879_s22 + $0x2a60] ss:$16 sps:$4 sm:$0xff]   ;;  %v18572_v61 = vld [vmem:[%s19879_s22 + $0x2a68] ss:$16 sps:$4 sm:$0xff]  }
 0x625   : > { %12115 = vmatpush1.bf16.msra.mxu0 %v18485_v62  ;;  %13276 = vmatpush1.bf16.msra.mxu1 %v18488_v63  ;;  %v18577_v62 = vld [vmem:[%s19879_s22 + $0x2a84] ss:$16 sps:$4 sm:$0xff]   ;;  %v18580_v63 = vld [vmem:[%s19879_s22 + $0x2a8c] ss:$16 sps:$4 sm:$0xff]  }
 0x626   : > { %12116 = vmatprep.subr.bf16.mxu0 %v18493_v0  ;;  %13277 = vmatprep.subr.bf16.mxu1 %v18496_v1  ;;  %v18575_v0 = vld [vmem:[%s19879_s22 + $0x2a80] ss:$16 sps:$4 sm:$0xff]   ;;  %v18578_v1 = vld [vmem:[%s19879_s22 + $0x2a88] ss:$16 sps:$4 sm:$0xff]  }
 0x629   : > { %12117 = vmatpush1.bf16.msra.mxu0 %v18491_v2  ;;  %13278 = vmatpush1.bf16.msra.mxu1 %v18494_v3  ;;  %v18583_v2 = vld [vmem:[%s19879_s22 + $0x2aa4] ss:$16 sps:$4 sm:$0xff]   ;;  %v18586_v3 = vld [vmem:[%s19879_s22 + $0x2aac] ss:$16 sps:$4 sm:$0xff]  }
 0x62a   : > { %12118 = vmatprep.subr.bf16.mxu0 %v18499_v4  ;;  %13279 = vmatprep.subr.bf16.mxu1 %v18502_v5  ;;  %v18581_v4 = vld [vmem:[%s19879_s22 + $0x2aa0] ss:$16 sps:$4 sm:$0xff]   ;;  %v18584_v5 = vld [vmem:[%s19879_s22 + $0x2aa8] ss:$16 sps:$4 sm:$0xff]  }
 0x62d   : > { %12119 = vmatpush1.bf16.msra.mxu0 %v18497_v6  ;;  %13280 = vmatpush1.bf16.msra.mxu1 %v18500_v7  ;;  %v18589_v6 = vld [vmem:[%s19879_s22 + $0x2ac4] ss:$16 sps:$4 sm:$0xff]   ;;  %v18592_v7 = vld [vmem:[%s19879_s22 + $0x2acc] ss:$16 sps:$4 sm:$0xff]  }
 0x62e   : > { %12120 = vmatprep.subr.bf16.mxu0 %v18505_v8  ;;  %13281 = vmatprep.subr.bf16.mxu1 %v18508_v9  ;;  %v18587_v8 = vld [vmem:[%s19879_s22 + $0x2ac0] ss:$16 sps:$4 sm:$0xff]   ;;  %v18590_v9 = vld [vmem:[%s19879_s22 + $0x2ac8] ss:$16 sps:$4 sm:$0xff]  }
 0x631   : > { %12121 = vmatpush1.bf16.msra.mxu0 %v18503_v10  ;;  %13282 = vmatpush1.bf16.msra.mxu1 %v18506_v11  ;;  %v18595_v10 = vld [vmem:[%s19879_s22 + $0x2ae4] ss:$16 sps:$4 sm:$0xff]   ;;  %v18598_v11 = vld [vmem:[%s19879_s22 + $0x2aec] ss:$16 sps:$4 sm:$0xff]  }
 0x632   : > { %12122 = vmatprep.subr.bf16.mxu0 %v18511_v12  ;;  %13283 = vmatprep.subr.bf16.mxu1 %v18514_v13  ;;  %v18593_v12 = vld [vmem:[%s19879_s22 + $0x2ae0] ss:$16 sps:$4 sm:$0xff]   ;;  %v18596_v13 = vld [vmem:[%s19879_s22 + $0x2ae8] ss:$16 sps:$4 sm:$0xff]  }
 0x635   : > { %12123 = vmatpush1.bf16.msra.mxu0 %v18509_v14  ;;  %13284 = vmatpush1.bf16.msra.mxu1 %v18512_v15  ;;  %v18601_v14 = vld [vmem:[%s19879_s22 + $0x2b04] ss:$16 sps:$4 sm:$0xff]   ;;  %v18604_v15 = vld [vmem:[%s19879_s22 + $0x2b0c] ss:$16 sps:$4 sm:$0xff]  }
 0x636   : > { %12124 = vmatprep.subr.bf16.mxu0 %v18517_v16  ;;  %13285 = vmatprep.subr.bf16.mxu1 %v18520_v17  ;;  %v18599_v16 = vld [vmem:[%s19879_s22 + $0x2b00] ss:$16 sps:$4 sm:$0xff]   ;;  %v18602_v17 = vld [vmem:[%s19879_s22 + $0x2b08] ss:$16 sps:$4 sm:$0xff]  }
 0x639   : > { %12125 = vmatpush1.bf16.msra.mxu0 %v18515_v18  ;;  %13286 = vmatpush1.bf16.msra.mxu1 %v18518_v19  ;;  %v18607_v18 = vld [vmem:[%s19879_s22 + $0x2b24] ss:$16 sps:$4 sm:$0xff]   ;;  %v18610_v19 = vld [vmem:[%s19879_s22 + $0x2b2c] ss:$16 sps:$4 sm:$0xff]  }
 0x63a   : > { %12126 = vmatprep.subr.bf16.mxu0 %v18523_v20  ;;  %13287 = vmatprep.subr.bf16.mxu1 %v18526_v21  ;;  %v18605_v20 = vld [vmem:[%s19879_s22 + $0x2b20] ss:$16 sps:$4 sm:$0xff]   ;;  %v18608_v21 = vld [vmem:[%s19879_s22 + $0x2b28] ss:$16 sps:$4 sm:$0xff]  }
 0x63d   : > { %12127 = vmatpush1.bf16.msra.mxu0 %v18521_v22  ;;  %13288 = vmatpush1.bf16.msra.mxu1 %v18524_v23  ;;  %v18613_v22 = vld [vmem:[%s19879_s22 + $0x2b44] ss:$16 sps:$4 sm:$0xff]   ;;  %v18616_v23 = vld [vmem:[%s19879_s22 + $0x2b4c] ss:$16 sps:$4 sm:$0xff]  }
 0x63e   : > { %12128 = vmatprep.subr.bf16.mxu0 %v18529_v24  ;;  %13289 = vmatprep.subr.bf16.mxu1 %v18532_v25  ;;  %v18611_v24 = vld [vmem:[%s19879_s22 + $0x2b40] ss:$16 sps:$4 sm:$0xff]   ;;  %v18614_v25 = vld [vmem:[%s19879_s22 + $0x2b48] ss:$16 sps:$4 sm:$0xff]  }
 0x641   : > { %12129 = vmatpush1.bf16.msra.mxu0 %v18527_v26  ;;  %13290 = vmatpush1.bf16.msra.mxu1 %v18530_v27  ;;  %v18619_v26 = vld [vmem:[%s19879_s22 + $0x2b64] ss:$16 sps:$4 sm:$0xff]   ;;  %v18622_v27 = vld [vmem:[%s19879_s22 + $0x2b6c] ss:$16 sps:$4 sm:$0xff]  }
 0x642   : > { %12130 = vmatprep.subr.bf16.mxu0 %v18535_v28  ;;  %13291 = vmatprep.subr.bf16.mxu1 %v18538_v29  ;;  %v18617_v28 = vld [vmem:[%s19879_s22 + $0x2b60] ss:$16 sps:$4 sm:$0xff]   ;;  %v18620_v29 = vld [vmem:[%s19879_s22 + $0x2b68] ss:$16 sps:$4 sm:$0xff]  }
 0x645   : > { %12131 = vmatpush1.bf16.msra.mxu0 %v18533_v30  ;;  %13292 = vmatpush1.bf16.msra.mxu1 %v18536_v31  ;;  %v18625_v30 = vld [vmem:[%s19879_s22 + $0x2b84] ss:$16 sps:$4 sm:$0xff]   ;;  %v18628_v31 = vld [vmem:[%s19879_s22 + $0x2b8c] ss:$16 sps:$4 sm:$0xff]  }
 0x646   : > { %12132 = vmatprep.subr.bf16.mxu0 %v18541_v32  ;;  %13293 = vmatprep.subr.bf16.mxu1 %v18544_v33  ;;  %v18623_v32 = vld [vmem:[%s19879_s22 + $0x2b80] ss:$16 sps:$4 sm:$0xff]   ;;  %v18626_v33 = vld [vmem:[%s19879_s22 + $0x2b88] ss:$16 sps:$4 sm:$0xff]  }
 0x649   : > { %12133 = vmatpush1.bf16.msra.mxu0 %v18539_v34  ;;  %13294 = vmatpush1.bf16.msra.mxu1 %v18542_v35  ;;  %v18631_v34 = vld [vmem:[%s19879_s22 + $0x2ba4] ss:$16 sps:$4 sm:$0xff]   ;;  %v18634_v35 = vld [vmem:[%s19879_s22 + $0x2bac] ss:$16 sps:$4 sm:$0xff]  }
 0x64a   : > { %12134 = vmatprep.subr.bf16.mxu0 %v18547_v36  ;;  %13295 = vmatprep.subr.bf16.mxu1 %v18550_v37  ;;  %v18629_v36 = vld [vmem:[%s19879_s22 + $0x2ba0] ss:$16 sps:$4 sm:$0xff]   ;;  %v18632_v37 = vld [vmem:[%s19879_s22 + $0x2ba8] ss:$16 sps:$4 sm:$0xff]  }
 0x64d   : > { %12135 = vmatpush1.bf16.msra.mxu0 %v18545_v38  ;;  %13296 = vmatpush1.bf16.msra.mxu1 %v18548_v39  ;;  %v18637_v38 = vld [vmem:[%s19879_s22 + $0x2bc4] ss:$16 sps:$4 sm:$0xff]   ;;  %v18640_v39 = vld [vmem:[%s19879_s22 + $0x2bcc] ss:$16 sps:$4 sm:$0xff]  }
 0x64e   : > { %12147 = vmatprep.subr.bf16.mxu0 %v18553_v42  ;;  %13308 = vmatprep.subr.bf16.mxu1 %v18556_v43  ;;  %v18643_v42 = vld [vmem:[%s19879_s22 + $0x2be4] ss:$16 sps:$4 sm:$0xff]   ;;  %v18646_v43 = vld [vmem:[%s19879_s22 + $0x2bec] ss:$16 sps:$4 sm:$0xff]  }
 0x650   : > { %12137 = vmatmul.mubr.bf16.vlgmr.msra.gmra.mrb[0].mxu0 %v862_v44  ;;  %13298 = vmatmul.mubr.bf16.vlgmr.msra.gmra.mrb[0].mxu1 %v862_v44  ;;  %v18641_v44 = vld [vmem:[%s19879_s22 + $0x2be0] ss:$16 sps:$4 sm:$0xff]  }
 0x651   : > { %12148 = vmatpush1.bf16.msra.mxu0 %v18551_v47  ;;  %13309 = vmatpush1.bf16.msra.mxu1 %v18554_v48  ;;  %v810_v47 = vld [vmem:[%s19877_s4 + $0x300] sm:$0xff] }
 0x652   : > { %12149 = vmatprep.subr.bf16.mxu0 %v18559_v49  ;;  %13310 = vmatprep.subr.bf16.mxu1 %v18562_v50  ;;  %v18649_v48 = vld [vmem:[%s19879_s22 + $0x2c04] ss:$16 sps:$4 sm:$0xff]   ;;  %v18652_v49 = vld [vmem:[%s19879_s22 + $0x2c0c] ss:$16 sps:$4 sm:$0xff]   ;;  %v864_v50 = vpack.c.bf16 %v810_v47, %v756_v46  ;;  %v18731_v46 = vld [vmem:[%s19879_s22 + $0x2dc0] ss:$16 sps:$4 sm:$0xff]  }
 0x653   : > { %12179 = vmatprep.mubr.bf16.mxu0 %v865_v51  ;;  %13340 = vmatprep.mubr.bf16.mxu1 %v865_v51  ;;  %v759_v51 = vld [vmem:[%s19877_s4 + $0x168] sm:$0xff] }
 0x654   : > { %v18734_v47 = vld [vmem:[%s19879_s22 + $0x2dc8] ss:$16 sps:$4 sm:$0xff]  }
 0x655   : > { %12150 = vmatpush1.bf16.msra.mxu0 %v18557_v52  ;;  %13311 = vmatpush1.bf16.msra.mxu1 %v18560_v53  ;;  %v813_v52 = vld [vmem:[%s19877_s4 + $0x318] sm:$0xff]  ;;  %v18647_v53 = vld [vmem:[%s19879_s22 + $0x2c00] ss:$16 sps:$4 sm:$0xff]  }
 0x656   : > { %12151 = vmatprep.subr.bf16.mxu0 %v18565_v54  ;;  %13312 = vmatprep.subr.bf16.mxu1 %v18568_v55  ;;  %v18650_v54 = vld [vmem:[%s19879_s22 + $0x2c08] ss:$16 sps:$4 sm:$0xff]   ;;  %v18655_v55 = vld [vmem:[%s19879_s22 + $0x2c24] ss:$16 sps:$4 sm:$0xff]  }
 0x659   : > { %12152 = vmatpush1.bf16.msra.mxu0 %v18563_v56  ;;  %13313 = vmatpush1.bf16.msra.mxu1 %v18566_v57  ;;  %v18658_v56 = vld [vmem:[%s19879_s22 + $0x2c2c] ss:$16 sps:$4 sm:$0xff]   ;;  %v867_v57 = vpack.c.bf16 %v813_v52, %v759_v51  ;;  %v18740_v51 = vld [vmem:[%s19879_s22 + $0x2de8] ss:$16 sps:$4 sm:$0xff]   ;;  %v758_v52 = vld [vmem:[%s19877_s4 + $0x160] sm:$0xff] }
 0x65a   : > { %12153 = vmatprep.subr.bf16.mxu0 %v18571_v58  ;;  %13314 = vmatprep.subr.bf16.mxu1 %v18574_v59  ;;  %v18653_v58 = vld [vmem:[%s19879_s22 + $0x2c20] ss:$16 sps:$4 sm:$0xff]   ;;  %v18656_v59 = vld [vmem:[%s19879_s22 + $0x2c28] ss:$16 sps:$4 sm:$0xff]  }
 0x65d   : > { %12154 = vmatpush1.bf16.msra.mxu0 %v18569_v60  ;;  %13315 = vmatpush1.bf16.msra.mxu1 %v18572_v61  ;;  %v18661_v60 = vld [vmem:[%s19879_s22 + $0x2c44] ss:$16 sps:$4 sm:$0xff]   ;;  %v18664_v61 = vld [vmem:[%s19879_s22 + $0x2c4c] ss:$16 sps:$4 sm:$0xff]  }
 0x65e   : > { %12155 = vmatprep.subr.bf16.mxu0 %v18577_v62  ;;  %13316 = vmatprep.subr.bf16.mxu1 %v18580_v63  ;;  %v18659_v62 = vld [vmem:[%s19879_s22 + $0x2c40] ss:$16 sps:$4 sm:$0xff]   ;;  %v18662_v63 = vld [vmem:[%s19879_s22 + $0x2c48] ss:$16 sps:$4 sm:$0xff]  }
 0x661   : > { %12156 = vmatpush1.bf16.msra.mxu0 %v18575_v0  ;;  %13317 = vmatpush1.bf16.msra.mxu1 %v18578_v1  ;;  %v18667_v0 = vld [vmem:[%s19879_s22 + $0x2c64] ss:$16 sps:$4 sm:$0xff]   ;;  %v18670_v1 = vld [vmem:[%s19879_s22 + $0x2c6c] ss:$16 sps:$4 sm:$0xff]  }
 0x662   : > { %12157 = vmatprep.subr.bf16.mxu0 %v18583_v2  ;;  %13318 = vmatprep.subr.bf16.mxu1 %v18586_v3  ;;  %v18665_v2 = vld [vmem:[%s19879_s22 + $0x2c60] ss:$16 sps:$4 sm:$0xff]   ;;  %v18668_v3 = vld [vmem:[%s19879_s22 + $0x2c68] ss:$16 sps:$4 sm:$0xff]  }
 0x665   : > { %12158 = vmatpush1.bf16.msra.mxu0 %v18581_v4  ;;  %13319 = vmatpush1.bf16.msra.mxu1 %v18584_v5  ;;  %v18673_v4 = vld [vmem:[%s19879_s22 + $0x2c84] ss:$16 sps:$4 sm:$0xff]   ;;  %v18676_v5 = vld [vmem:[%s19879_s22 + $0x2c8c] ss:$16 sps:$4 sm:$0xff]  }
 0x666   : > { %12159 = vmatprep.subr.bf16.mxu0 %v18589_v6  ;;  %13320 = vmatprep.subr.bf16.mxu1 %v18592_v7  ;;  %v18671_v6 = vld [vmem:[%s19879_s22 + $0x2c80] ss:$16 sps:$4 sm:$0xff]   ;;  %v18674_v7 = vld [vmem:[%s19879_s22 + $0x2c88] ss:$16 sps:$4 sm:$0xff]  }
 0x669   : > { %12160 = vmatpush1.bf16.msra.mxu0 %v18587_v8  ;;  %13321 = vmatpush1.bf16.msra.mxu1 %v18590_v9  ;;  %v18679_v8 = vld [vmem:[%s19879_s22 + $0x2ca4] ss:$16 sps:$4 sm:$0xff]   ;;  %v18682_v9 = vld [vmem:[%s19879_s22 + $0x2cac] ss:$16 sps:$4 sm:$0xff]  }
 0x66a   : > { %12161 = vmatprep.subr.bf16.mxu0 %v18595_v10  ;;  %13322 = vmatprep.subr.bf16.mxu1 %v18598_v11  ;;  %v18677_v10 = vld [vmem:[%s19879_s22 + $0x2ca0] ss:$16 sps:$4 sm:$0xff]   ;;  %v18680_v11 = vld [vmem:[%s19879_s22 + $0x2ca8] ss:$16 sps:$4 sm:$0xff]  }
 0x66d   : > { %12162 = vmatpush1.bf16.msra.mxu0 %v18593_v12  ;;  %13323 = vmatpush1.bf16.msra.mxu1 %v18596_v13  ;;  %v18685_v12 = vld [vmem:[%s19879_s22 + $0x2cc4] ss:$16 sps:$4 sm:$0xff]   ;;  %v18688_v13 = vld [vmem:[%s19879_s22 + $0x2ccc] ss:$16 sps:$4 sm:$0xff]  }
 0x66e   : > { %12163 = vmatprep.subr.bf16.mxu0 %v18601_v14  ;;  %13324 = vmatprep.subr.bf16.mxu1 %v18604_v15  ;;  %v18683_v14 = vld [vmem:[%s19879_s22 + $0x2cc0] ss:$16 sps:$4 sm:$0xff]   ;;  %v18686_v15 = vld [vmem:[%s19879_s22 + $0x2cc8] ss:$16 sps:$4 sm:$0xff]  }
 0x671   : > { %12164 = vmatpush1.bf16.msra.mxu0 %v18599_v16  ;;  %13325 = vmatpush1.bf16.msra.mxu1 %v18602_v17  ;;  %v18691_v16 = vld [vmem:[%s19879_s22 + $0x2ce4] ss:$16 sps:$4 sm:$0xff]   ;;  %v18694_v17 = vld [vmem:[%s19879_s22 + $0x2cec] ss:$16 sps:$4 sm:$0xff]  }
 0x672   : > { %12165 = vmatprep.subr.bf16.mxu0 %v18607_v18  ;;  %13326 = vmatprep.subr.bf16.mxu1 %v18610_v19  ;;  %v18689_v18 = vld [vmem:[%s19879_s22 + $0x2ce0] ss:$16 sps:$4 sm:$0xff]   ;;  %v18692_v19 = vld [vmem:[%s19879_s22 + $0x2ce8] ss:$16 sps:$4 sm:$0xff]  }
 0x675   : > { %12166 = vmatpush1.bf16.msra.mxu0 %v18605_v20  ;;  %13327 = vmatpush1.bf16.msra.mxu1 %v18608_v21  ;;  %v18697_v20 = vld [vmem:[%s19879_s22 + $0x2d04] ss:$16 sps:$4 sm:$0xff]   ;;  %v18700_v21 = vld [vmem:[%s19879_s22 + $0x2d0c] ss:$16 sps:$4 sm:$0xff]  }
 0x676   : > { %12167 = vmatprep.subr.bf16.mxu0 %v18613_v22  ;;  %13328 = vmatprep.subr.bf16.mxu1 %v18616_v23  ;;  %v18695_v22 = vld [vmem:[%s19879_s22 + $0x2d00] ss:$16 sps:$4 sm:$0xff]   ;;  %v18698_v23 = vld [vmem:[%s19879_s22 + $0x2d08] ss:$16 sps:$4 sm:$0xff]  }
 0x679   : > { %12168 = vmatpush1.bf16.msra.mxu0 %v18611_v24  ;;  %13329 = vmatpush1.bf16.msra.mxu1 %v18614_v25  ;;  %v18703_v24 = vld [vmem:[%s19879_s22 + $0x2d24] ss:$16 sps:$4 sm:$0xff]   ;;  %v18706_v25 = vld [vmem:[%s19879_s22 + $0x2d2c] ss:$16 sps:$4 sm:$0xff]  }
 0x67a   : > { %12169 = vmatprep.subr.bf16.mxu0 %v18619_v26  ;;  %13330 = vmatprep.subr.bf16.mxu1 %v18622_v27  ;;  %v18701_v26 = vld [vmem:[%s19879_s22 + $0x2d20] ss:$16 sps:$4 sm:$0xff]   ;;  %v18704_v27 = vld [vmem:[%s19879_s22 + $0x2d28] ss:$16 sps:$4 sm:$0xff]  }
 0x67d   : > { %12170 = vmatpush1.bf16.msra.mxu0 %v18617_v28  ;;  %13331 = vmatpush1.bf16.msra.mxu1 %v18620_v29  ;;  %v18709_v28 = vld [vmem:[%s19879_s22 + $0x2d44] ss:$16 sps:$4 sm:$0xff]   ;;  %v18712_v29 = vld [vmem:[%s19879_s22 + $0x2d4c] ss:$16 sps:$4 sm:$0xff]  }
 0x67e   : > { %12171 = vmatprep.subr.bf16.mxu0 %v18625_v30  ;;  %13332 = vmatprep.subr.bf16.mxu1 %v18628_v31  ;;  %v18707_v30 = vld [vmem:[%s19879_s22 + $0x2d40] ss:$16 sps:$4 sm:$0xff]   ;;  %v18710_v31 = vld [vmem:[%s19879_s22 + $0x2d48] ss:$16 sps:$4 sm:$0xff]  }
 0x681   : > { %12172 = vmatpush1.bf16.msra.mxu0 %v18623_v32  ;;  %13333 = vmatpush1.bf16.msra.mxu1 %v18626_v33  ;;  %v18715_v32 = vld [vmem:[%s19879_s22 + $0x2d64] ss:$16 sps:$4 sm:$0xff]   ;;  %v18718_v33 = vld [vmem:[%s19879_s22 + $0x2d6c] ss:$16 sps:$4 sm:$0xff]  }
 0x682   : > { %12173 = vmatprep.subr.bf16.mxu0 %v18631_v34  ;;  %13334 = vmatprep.subr.bf16.mxu1 %v18634_v35  ;;  %v18713_v34 = vld [vmem:[%s19879_s22 + $0x2d60] ss:$16 sps:$4 sm:$0xff]   ;;  %v18716_v35 = vld [vmem:[%s19879_s22 + $0x2d68] ss:$16 sps:$4 sm:$0xff]  }
 0x685   : > { %12174 = vmatpush1.bf16.msra.mxu0 %v18629_v36  ;;  %13335 = vmatpush1.bf16.msra.mxu1 %v18632_v37  ;;  %v18721_v36 = vld [vmem:[%s19879_s22 + $0x2d84] ss:$16 sps:$4 sm:$0xff]   ;;  %v18724_v37 = vld [vmem:[%s19879_s22 + $0x2d8c] ss:$16 sps:$4 sm:$0xff]  }
 0x686   : > { %12175 = vmatprep.subr.bf16.mxu0 %v18637_v38  ;;  %13336 = vmatprep.subr.bf16.mxu1 %v18640_v39  ;;  %v18719_v38 = vld [vmem:[%s19879_s22 + $0x2d80] ss:$16 sps:$4 sm:$0xff]   ;;  %v18722_v39 = vld [vmem:[%s19879_s22 + $0x2d88] ss:$16 sps:$4 sm:$0xff]  }
 0x689   : > { %12176 = vmatpush1.bf16.msra.mxu0 %v18635_v40  ;;  %13337 = vmatpush1.bf16.msra.mxu1 %v18638_v41  ;;  %v18727_v40 = vld [vmem:[%s19879_s22 + $0x2da4] ss:$16 sps:$4 sm:$0xff]   ;;  %v18730_v41 = vld [vmem:[%s19879_s22 + $0x2dac] ss:$16 sps:$4 sm:$0xff]  }
 0x68a   : > { %12177 = vmatprep.subr.bf16.mxu0 %v18643_v42  ;;  %13338 = vmatprep.subr.bf16.mxu1 %v18646_v43  ;;  %v18725_v42 = vld [vmem:[%s19879_s22 + $0x2da0] ss:$16 sps:$4 sm:$0xff]   ;;  %v18728_v43 = vld [vmem:[%s19879_s22 + $0x2da8] ss:$16 sps:$4 sm:$0xff]  }
 0x68d   : > { %12178 = vmatpush1.bf16.msra.mxu0 %v18641_v44  ;;  %13339 = vmatpush1.bf16.msra.mxu1 %v18644_v45  ;;  %v18733_v44 = vld [vmem:[%s19879_s22 + $0x2dc4] ss:$16 sps:$4 sm:$0xff]   ;;  %v18736_v45 = vld [vmem:[%s19879_s22 + $0x2dcc] ss:$16 sps:$4 sm:$0xff]  }
 0x68e   : > { %12190 = vmatprep.subr.bf16.mxu0 %v18649_v48  ;;  %13351 = vmatprep.subr.bf16.mxu1 %v18652_v49  ;;  %v18739_v48 = vld [vmem:[%s19879_s22 + $0x2de4] ss:$16 sps:$4 sm:$0xff]   ;;  %v18742_v49 = vld [vmem:[%s19879_s22 + $0x2dec] ss:$16 sps:$4 sm:$0xff]  }
 0x690   : > { %12180 = vmatmul.mubr.bf16.vlgmr.msra.gmra.mrb[0].mxu0 %v864_v50  ;;  %13341 = vmatmul.mubr.bf16.vlgmr.msra.gmra.mrb[0].mxu1 %v864_v50  ;;  %v18737_v50 = vld [vmem:[%s19879_s22 + $0x2de0] ss:$16 sps:$4 sm:$0xff]  }
 0x691   : > { %12191 = vmatpush1.bf16.msra.mxu0 %v18647_v53  ;;  %13352 = vmatpush1.bf16.msra.mxu1 %v18650_v54  ;;  %v812_v53 = vld [vmem:[%s19877_s4 + $0x310] sm:$0xff] }
 0x692   : > { %12192 = vmatprep.subr.bf16.mxu0 %v18655_v55  ;;  %13353 = vmatprep.subr.bf16.mxu1 %v18658_v56  ;;  %v18745_v54 = vld [vmem:[%s19879_s22 + $0x2e04] ss:$16 sps:$4 sm:$0xff]   ;;  %v18748_v55 = vld [vmem:[%s19879_s22 + $0x2e0c] ss:$16 sps:$4 sm:$0xff]   ;;  %v866_v56 = vpack.c.bf16 %v812_v53, %v758_v52  ;;  %v18827_v52 = vld [vmem:[%s19879_s22 + $0x2fc0] ss:$16 sps:$4 sm:$0xff]  }
 0x693   : > { %12222 = vmatprep.mubr.bf16.mxu0 %v867_v57  ;;  %13383 = vmatprep.mubr.bf16.mxu1 %v867_v57  ;;  %v761_v57 = vld [vmem:[%s19877_s4 + $0x178] sm:$0xff] }
 0x694   : > { %v18830_v53 = vld [vmem:[%s19879_s22 + $0x2fc8] ss:$16 sps:$4 sm:$0xff]  }
 0x695   : > { %12193 = vmatpush1.bf16.msra.mxu0 %v18653_v58  ;;  %13354 = vmatpush1.bf16.msra.mxu1 %v18656_v59  ;;  %v815_v58 = vld [vmem:[%s19877_s4 + $0x328] sm:$0xff]  ;;  %v18743_v59 = vld [vmem:[%s19879_s22 + $0x2e00] ss:$16 sps:$4 sm:$0xff]  }
 0x696   : > { %12194 = vmatprep.subr.bf16.mxu0 %v18661_v60  ;;  %13355 = vmatprep.subr.bf16.mxu1 %v18664_v61  ;;  %v18746_v60 = vld [vmem:[%s19879_s22 + $0x2e08] ss:$16 sps:$4 sm:$0xff]   ;;  %v18751_v61 = vld [vmem:[%s19879_s22 + $0x2e24] ss:$16 sps:$4 sm:$0xff]  }
 0x699   : > { %12195 = vmatpush1.bf16.msra.mxu0 %v18659_v62  ;;  %13356 = vmatpush1.bf16.msra.mxu1 %v18662_v63  ;;  %v18754_v62 = vld [vmem:[%s19879_s22 + $0x2e2c] ss:$16 sps:$4 sm:$0xff]   ;;  %v869_v63 = vpack.c.bf16 %v815_v58, %v761_v57  ;;  %v18836_v57 = vld [vmem:[%s19879_s22 + $0x2fe8] ss:$16 sps:$4 sm:$0xff]   ;;  %v760_v58 = vld [vmem:[%s19877_s4 + $0x170] sm:$0xff] }
 0x69a   : > { %12196 = vmatprep.subr.bf16.mxu0 %v18667_v0  ;;  %13357 = vmatprep.subr.bf16.mxu1 %v18670_v1  ;;  %v18749_v0 = vld [vmem:[%s19879_s22 + $0x2e20] ss:$16 sps:$4 sm:$0xff]   ;;  %v18752_v1 = vld [vmem:[%s19879_s22 + $0x2e28] ss:$16 sps:$4 sm:$0xff]  }
 0x69d   : > { %12197 = vmatpush1.bf16.msra.mxu0 %v18665_v2  ;;  %13358 = vmatpush1.bf16.msra.mxu1 %v18668_v3  ;;  %v18757_v2 = vld [vmem:[%s19879_s22 + $0x2e44] ss:$16 sps:$4 sm:$0xff]   ;;  %v18760_v3 = vld [vmem:[%s19879_s22 + $0x2e4c] ss:$16 sps:$4 sm:$0xff]  }
 0x69e   : > { %12198 = vmatprep.subr.bf16.mxu0 %v18673_v4  ;;  %13359 = vmatprep.subr.bf16.mxu1 %v18676_v5  ;;  %v18755_v4 = vld [vmem:[%s19879_s22 + $0x2e40] ss:$16 sps:$4 sm:$0xff]   ;;  %v18758_v5 = vld [vmem:[%s19879_s22 + $0x2e48] ss:$16 sps:$4 sm:$0xff]  }
 0x6a1   : > { %12199 = vmatpush1.bf16.msra.mxu0 %v18671_v6  ;;  %13360 = vmatpush1.bf16.msra.mxu1 %v18674_v7  ;;  %v18763_v6 = vld [vmem:[%s19879_s22 + $0x2e64] ss:$16 sps:$4 sm:$0xff]   ;;  %v18766_v7 = vld [vmem:[%s19879_s22 + $0x2e6c] ss:$16 sps:$4 sm:$0xff]  }
 0x6a2   : > { %12200 = vmatprep.subr.bf16.mxu0 %v18679_v8  ;;  %13361 = vmatprep.subr.bf16.mxu1 %v18682_v9  ;;  %v18761_v8 = vld [vmem:[%s19879_s22 + $0x2e60] ss:$16 sps:$4 sm:$0xff]   ;;  %v18764_v9 = vld [vmem:[%s19879_s22 + $0x2e68] ss:$16 sps:$4 sm:$0xff]  }
 0x6a5   : > { %12201 = vmatpush1.bf16.msra.mxu0 %v18677_v10  ;;  %13362 = vmatpush1.bf16.msra.mxu1 %v18680_v11  ;;  %v18769_v10 = vld [vmem:[%s19879_s22 + $0x2e84] ss:$16 sps:$4 sm:$0xff]   ;;  %v18772_v11 = vld [vmem:[%s19879_s22 + $0x2e8c] ss:$16 sps:$4 sm:$0xff]  }
 0x6a6   : > { %12202 = vmatprep.subr.bf16.mxu0 %v18685_v12  ;;  %13363 = vmatprep.subr.bf16.mxu1 %v18688_v13  ;;  %v18767_v12 = vld [vmem:[%s19879_s22 + $0x2e80] ss:$16 sps:$4 sm:$0xff]   ;;  %v18770_v13 = vld [vmem:[%s19879_s22 + $0x2e88] ss:$16 sps:$4 sm:$0xff]  }
 0x6a9   : > { %12203 = vmatpush1.bf16.msra.mxu0 %v18683_v14  ;;  %13364 = vmatpush1.bf16.msra.mxu1 %v18686_v15  ;;  %v18775_v14 = vld [vmem:[%s19879_s22 + $0x2ea4] ss:$16 sps:$4 sm:$0xff]   ;;  %v18778_v15 = vld [vmem:[%s19879_s22 + $0x2eac] ss:$16 sps:$4 sm:$0xff]  }
 0x6aa   : > { %12204 = vmatprep.subr.bf16.mxu0 %v18691_v16  ;;  %13365 = vmatprep.subr.bf16.mxu1 %v18694_v17  ;;  %v18773_v16 = vld [vmem:[%s19879_s22 + $0x2ea0] ss:$16 sps:$4 sm:$0xff]   ;;  %v18776_v17 = vld [vmem:[%s19879_s22 + $0x2ea8] ss:$16 sps:$4 sm:$0xff]  }
 0x6ad   : > { %12205 = vmatpush1.bf16.msra.mxu0 %v18689_v18  ;;  %13366 = vmatpush1.bf16.msra.mxu1 %v18692_v19  ;;  %v18781_v18 = vld [vmem:[%s19879_s22 + $0x2ec4] ss:$16 sps:$4 sm:$0xff]   ;;  %v18784_v19 = vld [vmem:[%s19879_s22 + $0x2ecc] ss:$16 sps:$4 sm:$0xff]  }
 0x6ae   : > { %12206 = vmatprep.subr.bf16.mxu0 %v18697_v20  ;;  %13367 = vmatprep.subr.bf16.mxu1 %v18700_v21  ;;  %v18779_v20 = vld [vmem:[%s19879_s22 + $0x2ec0] ss:$16 sps:$4 sm:$0xff]   ;;  %v18782_v21 = vld [vmem:[%s19879_s22 + $0x2ec8] ss:$16 sps:$4 sm:$0xff]  }
 0x6b1   : > { %12207 = vmatpush1.bf16.msra.mxu0 %v18695_v22  ;;  %13368 = vmatpush1.bf16.msra.mxu1 %v18698_v23  ;;  %v18787_v22 = vld [vmem:[%s19879_s22 + $0x2ee4] ss:$16 sps:$4 sm:$0xff]   ;;  %v18790_v23 = vld [vmem:[%s19879_s22 + $0x2eec] ss:$16 sps:$4 sm:$0xff]  }
 0x6b2   : > { %12208 = vmatprep.subr.bf16.mxu0 %v18703_v24  ;;  %13369 = vmatprep.subr.bf16.mxu1 %v18706_v25  ;;  %v18785_v24 = vld [vmem:[%s19879_s22 + $0x2ee0] ss:$16 sps:$4 sm:$0xff]   ;;  %v18788_v25 = vld [vmem:[%s19879_s22 + $0x2ee8] ss:$16 sps:$4 sm:$0xff]  }
 0x6b5   : > { %12209 = vmatpush1.bf16.msra.mxu0 %v18701_v26  ;;  %13370 = vmatpush1.bf16.msra.mxu1 %v18704_v27  ;;  %v18793_v26 = vld [vmem:[%s19879_s22 + $0x2f04] ss:$16 sps:$4 sm:$0xff]   ;;  %v18796_v27 = vld [vmem:[%s19879_s22 + $0x2f0c] ss:$16 sps:$4 sm:$0xff]  }
 0x6b6   : > { %12210 = vmatprep.subr.bf16.mxu0 %v18709_v28  ;;  %13371 = vmatprep.subr.bf16.mxu1 %v18712_v29  ;;  %v18791_v28 = vld [vmem:[%s19879_s22 + $0x2f00] ss:$16 sps:$4 sm:$0xff]   ;;  %v18794_v29 = vld [vmem:[%s19879_s22 + $0x2f08] ss:$16 sps:$4 sm:$0xff]  }
 0x6b9   : > { %12211 = vmatpush1.bf16.msra.mxu0 %v18707_v30  ;;  %13372 = vmatpush1.bf16.msra.mxu1 %v18710_v31  ;;  %v18799_v30 = vld [vmem:[%s19879_s22 + $0x2f24] ss:$16 sps:$4 sm:$0xff]   ;;  %v18802_v31 = vld [vmem:[%s19879_s22 + $0x2f2c] ss:$16 sps:$4 sm:$0xff]  }
 0x6ba   : > { %12212 = vmatprep.subr.bf16.mxu0 %v18715_v32  ;;  %13373 = vmatprep.subr.bf16.mxu1 %v18718_v33  ;;  %v18797_v32 = vld [vmem:[%s19879_s22 + $0x2f20] ss:$16 sps:$4 sm:$0xff]   ;;  %v18800_v33 = vld [vmem:[%s19879_s22 + $0x2f28] ss:$16 sps:$4 sm:$0xff]  }
 0x6bd   : > { %12213 = vmatpush1.bf16.msra.mxu0 %v18713_v34  ;;  %13374 = vmatpush1.bf16.msra.mxu1 %v18716_v35  ;;  %v18805_v34 = vld [vmem:[%s19879_s22 + $0x2f44] ss:$16 sps:$4 sm:$0xff]   ;;  %v18808_v35 = vld [vmem:[%s19879_s22 + $0x2f4c] ss:$16 sps:$4 sm:$0xff]  }
 0x6be   : > { %12214 = vmatprep.subr.bf16.mxu0 %v18721_v36  ;;  %13375 = vmatprep.subr.bf16.mxu1 %v18724_v37  ;;  %v18803_v36 = vld [vmem:[%s19879_s22 + $0x2f40] ss:$16 sps:$4 sm:$0xff]   ;;  %v18806_v37 = vld [vmem:[%s19879_s22 + $0x2f48] ss:$16 sps:$4 sm:$0xff]  }
 0x6c1   : > { %12215 = vmatpush1.bf16.msra.mxu0 %v18719_v38  ;;  %13376 = vmatpush1.bf16.msra.mxu1 %v18722_v39  ;;  %v18811_v38 = vld [vmem:[%s19879_s22 + $0x2f64] ss:$16 sps:$4 sm:$0xff]   ;;  %v18814_v39 = vld [vmem:[%s19879_s22 + $0x2f6c] ss:$16 sps:$4 sm:$0xff]  }
 0x6c2   : > { %12216 = vmatprep.subr.bf16.mxu0 %v18727_v40  ;;  %13377 = vmatprep.subr.bf16.mxu1 %v18730_v41  ;;  %v18809_v40 = vld [vmem:[%s19879_s22 + $0x2f60] ss:$16 sps:$4 sm:$0xff]   ;;  %v18812_v41 = vld [vmem:[%s19879_s22 + $0x2f68] ss:$16 sps:$4 sm:$0xff]  }
 0x6c5   : > { %12217 = vmatpush1.bf16.msra.mxu0 %v18725_v42  ;;  %13378 = vmatpush1.bf16.msra.mxu1 %v18728_v43  ;;  %v18817_v42 = vld [vmem:[%s19879_s22 + $0x2f84] ss:$16 sps:$4 sm:$0xff]   ;;  %v18820_v43 = vld [vmem:[%s19879_s22 + $0x2f8c] ss:$16 sps:$4 sm:$0xff]  }
 0x6c6   : > { %12218 = vmatprep.subr.bf16.mxu0 %v18733_v44  ;;  %13379 = vmatprep.subr.bf16.mxu1 %v18736_v45  ;;  %v18815_v44 = vld [vmem:[%s19879_s22 + $0x2f80] ss:$16 sps:$4 sm:$0xff]   ;;  %v18818_v45 = vld [vmem:[%s19879_s22 + $0x2f88] ss:$16 sps:$4 sm:$0xff]  }
 0x6c9   : > { %12219 = vmatpush1.bf16.msra.mxu0 %v18731_v46  ;;  %13380 = vmatpush1.bf16.msra.mxu1 %v18734_v47  ;;  %v18823_v46 = vld [vmem:[%s19879_s22 + $0x2fa4] ss:$16 sps:$4 sm:$0xff]   ;;  %v18826_v47 = vld [vmem:[%s19879_s22 + $0x2fac] ss:$16 sps:$4 sm:$0xff]  }
 0x6ca   : > { %12220 = vmatprep.subr.bf16.mxu0 %v18739_v48  ;;  %13381 = vmatprep.subr.bf16.mxu1 %v18742_v49  ;;  %v18821_v48 = vld [vmem:[%s19879_s22 + $0x2fa0] ss:$16 sps:$4 sm:$0xff]   ;;  %v18824_v49 = vld [vmem:[%s19879_s22 + $0x2fa8] ss:$16 sps:$4 sm:$0xff]  }
 0x6cd   : > { %12221 = vmatpush1.bf16.msra.mxu0 %v18737_v50  ;;  %13382 = vmatpush1.bf16.msra.mxu1 %v18740_v51  ;;  %v18829_v50 = vld [vmem:[%s19879_s22 + $0x2fc4] ss:$16 sps:$4 sm:$0xff]   ;;  %v18832_v51 = vld [vmem:[%s19879_s22 + $0x2fcc] ss:$16 sps:$4 sm:$0xff]  }
 0x6ce   : > { %12233 = vmatprep.subr.bf16.mxu0 %v18745_v54  ;;  %13394 = vmatprep.subr.bf16.mxu1 %v18748_v55  ;;  %v18835_v54 = vld [vmem:[%s19879_s22 + $0x2fe4] ss:$16 sps:$4 sm:$0xff]   ;;  %v18838_v55 = vld [vmem:[%s19879_s22 + $0x2fec] ss:$16 sps:$4 sm:$0xff]  }
 0x6d0   : > { %12223 = vmatmul.mubr.bf16.vlgmr.msra.gmra.mrb[0].mxu0 %v866_v56  ;;  %13384 = vmatmul.mubr.bf16.vlgmr.msra.gmra.mrb[0].mxu1 %v866_v56  ;;  %v18833_v56 = vld [vmem:[%s19879_s22 + $0x2fe0] ss:$16 sps:$4 sm:$0xff]  }
 0x6d1   : > { %12234 = vmatpush1.bf16.msra.mxu0 %v18743_v59  ;;  %13395 = vmatpush1.bf16.msra.mxu1 %v18746_v60  ;;  %v814_v59 = vld [vmem:[%s19877_s4 + $0x320] sm:$0xff] }
 0x6d2   : > { %12235 = vmatprep.subr.bf16.mxu0 %v18751_v61  ;;  %13396 = vmatprep.subr.bf16.mxu1 %v18754_v62  ;;  %v18841_v60 = vld [vmem:[%s19879_s22 + $0x3004] ss:$16 sps:$4 sm:$0xff]   ;;  %v18844_v61 = vld [vmem:[%s19879_s22 + $0x300c] ss:$16 sps:$4 sm:$0xff]   ;;  %v868_v62 = vpack.c.bf16 %v814_v59, %v760_v58  ;;  %v18923_v58 = vld [vmem:[%s19879_s22 + $0x31c0] ss:$16 sps:$4 sm:$0xff]  }
 0x6d3   : > { %12265 = vmatprep.mubr.bf16.mxu0 %v869_v63  ;;  %13426 = vmatprep.mubr.bf16.mxu1 %v869_v63  ;;  %v763_v63 = vld [vmem:[%s19877_s4 + $0x188] sm:$0xff] }
 0x6d4   : > { %v18926_v59 = vld [vmem:[%s19879_s22 + $0x31c8] ss:$16 sps:$4 sm:$0xff]  }
 0x6d5   : > { %12236 = vmatpush1.bf16.msra.mxu0 %v18749_v0  ;;  %13397 = vmatpush1.bf16.msra.mxu1 %v18752_v1  ;;  %v817_v0 = vld [vmem:[%s19877_s4 + $0x338] sm:$0xff]  ;;  %v18839_v1 = vld [vmem:[%s19879_s22 + $0x3000] ss:$16 sps:$4 sm:$0xff]  }
 0x6d6   : > { %12237 = vmatprep.subr.bf16.mxu0 %v18757_v2  ;;  %13398 = vmatprep.subr.bf16.mxu1 %v18760_v3  ;;  %v18842_v2 = vld [vmem:[%s19879_s22 + $0x3008] ss:$16 sps:$4 sm:$0xff]   ;;  %v18847_v3 = vld [vmem:[%s19879_s22 + $0x3024] ss:$16 sps:$4 sm:$0xff]  }
 0x6d9   : > { %12238 = vmatpush1.bf16.msra.mxu0 %v18755_v4  ;;  %13399 = vmatpush1.bf16.msra.mxu1 %v18758_v5  ;;  %v18850_v4 = vld [vmem:[%s19879_s22 + $0x302c] ss:$16 sps:$4 sm:$0xff]   ;;  %v871_v5 = vpack.c.bf16 %v817_v0, %v763_v63  ;;  %v18932_v63 = vld [vmem:[%s19879_s22 + $0x31e8] ss:$16 sps:$4 sm:$0xff]   ;;  %v762_v0 = vld [vmem:[%s19877_s4 + $0x180] sm:$0xff] }
 0x6da   : > { %12239 = vmatprep.subr.bf16.mxu0 %v18763_v6  ;;  %13400 = vmatprep.subr.bf16.mxu1 %v18766_v7  ;;  %v18845_v6 = vld [vmem:[%s19879_s22 + $0x3020] ss:$16 sps:$4 sm:$0xff]   ;;  %v18848_v7 = vld [vmem:[%s19879_s22 + $0x3028] ss:$16 sps:$4 sm:$0xff]  }
 0x6dd   : > { %12240 = vmatpush1.bf16.msra.mxu0 %v18761_v8  ;;  %13401 = vmatpush1.bf16.msra.mxu1 %v18764_v9  ;;  %v18853_v8 = vld [vmem:[%s19879_s22 + $0x3044] ss:$16 sps:$4 sm:$0xff]   ;;  %v18856_v9 = vld [vmem:[%s19879_s22 + $0x304c] ss:$16 sps:$4 sm:$0xff]  }
 0x6de   : > { %12241 = vmatprep.subr.bf16.mxu0 %v18769_v10  ;;  %13402 = vmatprep.subr.bf16.mxu1 %v18772_v11  ;;  %v18851_v10 = vld [vmem:[%s19879_s22 + $0x3040] ss:$16 sps:$4 sm:$0xff]   ;;  %v18854_v11 = vld [vmem:[%s19879_s22 + $0x3048] ss:$16 sps:$4 sm:$0xff]  }
 0x6e1   : > { %12242 = vmatpush1.bf16.msra.mxu0 %v18767_v12  ;;  %13403 = vmatpush1.bf16.msra.mxu1 %v18770_v13  ;;  %v18859_v12 = vld [vmem:[%s19879_s22 + $0x3064] ss:$16 sps:$4 sm:$0xff]   ;;  %v18862_v13 = vld [vmem:[%s19879_s22 + $0x306c] ss:$16 sps:$4 sm:$0xff]  }
 0x6e2   : > { %12243 = vmatprep.subr.bf16.mxu0 %v18775_v14  ;;  %13404 = vmatprep.subr.bf16.mxu1 %v18778_v15  ;;  %v18857_v14 = vld [vmem:[%s19879_s22 + $0x3060] ss:$16 sps:$4 sm:$0xff]   ;;  %v18860_v15 = vld [vmem:[%s19879_s22 + $0x3068] ss:$16 sps:$4 sm:$0xff]  }
 0x6e5   : > { %12244 = vmatpush1.bf16.msra.mxu0 %v18773_v16  ;;  %13405 = vmatpush1.bf16.msra.mxu1 %v18776_v17  ;;  %v18865_v16 = vld [vmem:[%s19879_s22 + $0x3084] ss:$16 sps:$4 sm:$0xff]   ;;  %v18868_v17 = vld [vmem:[%s19879_s22 + $0x308c] ss:$16 sps:$4 sm:$0xff]  }
 0x6e6   : > { %12245 = vmatprep.subr.bf16.mxu0 %v18781_v18  ;;  %13406 = vmatprep.subr.bf16.mxu1 %v18784_v19  ;;  %v18863_v18 = vld [vmem:[%s19879_s22 + $0x3080] ss:$16 sps:$4 sm:$0xff]   ;;  %v18866_v19 = vld [vmem:[%s19879_s22 + $0x3088] ss:$16 sps:$4 sm:$0xff]  }
 0x6e9   : > { %12246 = vmatpush1.bf16.msra.mxu0 %v18779_v20  ;;  %13407 = vmatpush1.bf16.msra.mxu1 %v18782_v21  ;;  %v18871_v20 = vld [vmem:[%s19879_s22 + $0x30a4] ss:$16 sps:$4 sm:$0xff]   ;;  %v18874_v21 = vld [vmem:[%s19879_s22 + $0x30ac] ss:$16 sps:$4 sm:$0xff]  }
 0x6ea   : > { %12247 = vmatprep.subr.bf16.mxu0 %v18787_v22  ;;  %13408 = vmatprep.subr.bf16.mxu1 %v18790_v23  ;;  %v18869_v22 = vld [vmem:[%s19879_s22 + $0x30a0] ss:$16 sps:$4 sm:$0xff]   ;;  %v18872_v23 = vld [vmem:[%s19879_s22 + $0x30a8] ss:$16 sps:$4 sm:$0xff]  }
 0x6ed   : > { %12248 = vmatpush1.bf16.msra.mxu0 %v18785_v24  ;;  %13409 = vmatpush1.bf16.msra.mxu1 %v18788_v25  ;;  %v18877_v24 = vld [vmem:[%s19879_s22 + $0x30c4] ss:$16 sps:$4 sm:$0xff]   ;;  %v18880_v25 = vld [vmem:[%s19879_s22 + $0x30cc] ss:$16 sps:$4 sm:$0xff]  }
 0x6ee   : > { %12249 = vmatprep.subr.bf16.mxu0 %v18793_v26  ;;  %13410 = vmatprep.subr.bf16.mxu1 %v18796_v27  ;;  %v18875_v26 = vld [vmem:[%s19879_s22 + $0x30c0] ss:$16 sps:$4 sm:$0xff]   ;;  %v18878_v27 = vld [vmem:[%s19879_s22 + $0x30c8] ss:$16 sps:$4 sm:$0xff]  }
 0x6f1   : > { %12250 = vmatpush1.bf16.msra.mxu0 %v18791_v28  ;;  %13411 = vmatpush1.bf16.msra.mxu1 %v18794_v29  ;;  %v18883_v28 = vld [vmem:[%s19879_s22 + $0x30e4] ss:$16 sps:$4 sm:$0xff]   ;;  %v18886_v29 = vld [vmem:[%s19879_s22 + $0x30ec] ss:$16 sps:$4 sm:$0xff]  }
 0x6f2   : > { %12251 = vmatprep.subr.bf16.mxu0 %v18799_v30  ;;  %13412 = vmatprep.subr.bf16.mxu1 %v18802_v31  ;;  %v18881_v30 = vld [vmem:[%s19879_s22 + $0x30e0] ss:$16 sps:$4 sm:$0xff]   ;;  %v18884_v31 = vld [vmem:[%s19879_s22 + $0x30e8] ss:$16 sps:$4 sm:$0xff]  }
 0x6f5   : > { %12252 = vmatpush1.bf16.msra.mxu0 %v18797_v32  ;;  %13413 = vmatpush1.bf16.msra.mxu1 %v18800_v33  ;;  %v18889_v32 = vld [vmem:[%s19879_s22 + $0x3104] ss:$16 sps:$4 sm:$0xff]   ;;  %v18892_v33 = vld [vmem:[%s19879_s22 + $0x310c] ss:$16 sps:$4 sm:$0xff]  }
 0x6f6   : > { %12253 = vmatprep.subr.bf16.mxu0 %v18805_v34  ;;  %13414 = vmatprep.subr.bf16.mxu1 %v18808_v35  ;;  %v18887_v34 = vld [vmem:[%s19879_s22 + $0x3100] ss:$16 sps:$4 sm:$0xff]   ;;  %v18890_v35 = vld [vmem:[%s19879_s22 + $0x3108] ss:$16 sps:$4 sm:$0xff]  }
 0x6f9   : > { %12254 = vmatpush1.bf16.msra.mxu0 %v18803_v36  ;;  %13415 = vmatpush1.bf16.msra.mxu1 %v18806_v37  ;;  %v18895_v36 = vld [vmem:[%s19879_s22 + $0x3124] ss:$16 sps:$4 sm:$0xff]   ;;  %v18898_v37 = vld [vmem:[%s19879_s22 + $0x312c] ss:$16 sps:$4 sm:$0xff]  }
 0x6fa   : > { %12255 = vmatprep.subr.bf16.mxu0 %v18811_v38  ;;  %13416 = vmatprep.subr.bf16.mxu1 %v18814_v39  ;;  %v18893_v38 = vld [vmem:[%s19879_s22 + $0x3120] ss:$16 sps:$4 sm:$0xff]   ;;  %v18896_v39 = vld [vmem:[%s19879_s22 + $0x3128] ss:$16 sps:$4 sm:$0xff]  }
 0x6fd   : > { %12256 = vmatpush1.bf16.msra.mxu0 %v18809_v40  ;;  %13417 = vmatpush1.bf16.msra.mxu1 %v18812_v41  ;;  %v18901_v40 = vld [vmem:[%s19879_s22 + $0x3144] ss:$16 sps:$4 sm:$0xff]   ;;  %v18904_v41 = vld [vmem:[%s19879_s22 + $0x314c] ss:$16 sps:$4 sm:$0xff]  }
 0x6fe   : > { %12257 = vmatprep.subr.bf16.mxu0 %v18817_v42  ;;  %13418 = vmatprep.subr.bf16.mxu1 %v18820_v43  ;;  %v18899_v42 = vld [vmem:[%s19879_s22 + $0x3140] ss:$16 sps:$4 sm:$0xff]   ;;  %v18902_v43 = vld [vmem:[%s19879_s22 + $0x3148] ss:$16 sps:$4 sm:$0xff]  }
 0x701   : > { %12258 = vmatpush1.bf16.msra.mxu0 %v18815_v44  ;;  %13419 = vmatpush1.bf16.msra.mxu1 %v18818_v45  ;;  %v18907_v44 = vld [vmem:[%s19879_s22 + $0x3164] ss:$16 sps:$4 sm:$0xff]   ;;  %v18910_v45 = vld [vmem:[%s19879_s22 + $0x316c] ss:$16 sps:$4 sm:$0xff]  }
 0x702   : > { %12259 = vmatprep.subr.bf16.mxu0 %v18823_v46  ;;  %13420 = vmatprep.subr.bf16.mxu1 %v18826_v47  ;;  %v18905_v46 = vld [vmem:[%s19879_s22 + $0x3160] ss:$16 sps:$4 sm:$0xff]   ;;  %v18908_v47 = vld [vmem:[%s19879_s22 + $0x3168] ss:$16 sps:$4 sm:$0xff]  }
 0x705   : > { %12260 = vmatpush1.bf16.msra.mxu0 %v18821_v48  ;;  %13421 = vmatpush1.bf16.msra.mxu1 %v18824_v49  ;;  %v18913_v48 = vld [vmem:[%s19879_s22 + $0x3184] ss:$16 sps:$4 sm:$0xff]   ;;  %v18916_v49 = vld [vmem:[%s19879_s22 + $0x318c] ss:$16 sps:$4 sm:$0xff]  }
 0x706   : > { %12261 = vmatprep.subr.bf16.mxu0 %v18829_v50  ;;  %13422 = vmatprep.subr.bf16.mxu1 %v18832_v51  ;;  %v18911_v50 = vld [vmem:[%s19879_s22 + $0x3180] ss:$16 sps:$4 sm:$0xff]   ;;  %v18914_v51 = vld [vmem:[%s19879_s22 + $0x3188] ss:$16 sps:$4 sm:$0xff]  }
 0x709   : > { %12262 = vmatpush1.bf16.msra.mxu0 %v18827_v52  ;;  %13423 = vmatpush1.bf16.msra.mxu1 %v18830_v53  ;;  %v18919_v52 = vld [vmem:[%s19879_s22 + $0x31a4] ss:$16 sps:$4 sm:$0xff]   ;;  %v18922_v53 = vld [vmem:[%s19879_s22 + $0x31ac] ss:$16 sps:$4 sm:$0xff]  }
 0x70a   : > { %12263 = vmatprep.subr.bf16.mxu0 %v18835_v54  ;;  %13424 = vmatprep.subr.bf16.mxu1 %v18838_v55  ;;  %v18917_v54 = vld [vmem:[%s19879_s22 + $0x31a0] ss:$16 sps:$4 sm:$0xff]   ;;  %v18920_v55 = vld [vmem:[%s19879_s22 + $0x31a8] ss:$16 sps:$4 sm:$0xff]  }
 0x70d   : > { %12264 = vmatpush1.bf16.msra.mxu0 %v18833_v56  ;;  %13425 = vmatpush1.bf16.msra.mxu1 %v18836_v57  ;;  %v18925_v56 = vld [vmem:[%s19879_s22 + $0x31c4] ss:$16 sps:$4 sm:$0xff]   ;;  %v18928_v57 = vld [vmem:[%s19879_s22 + $0x31cc] ss:$16 sps:$4 sm:$0xff]  }
 0x70e   : > { %12276 = vmatprep.subr.bf16.mxu0 %v18841_v60  ;;  %13437 = vmatprep.subr.bf16.mxu1 %v18844_v61  ;;  %v18931_v60 = vld [vmem:[%s19879_s22 + $0x31e4] ss:$16 sps:$4 sm:$0xff]   ;;  %v18934_v61 = vld [vmem:[%s19879_s22 + $0x31ec] ss:$16 sps:$4 sm:$0xff]  }
 0x710   : > { %12266 = vmatmul.mubr.bf16.vlgmr.msra.gmra.mrb[0].mxu0 %v868_v62  ;;  %13427 = vmatmul.mubr.bf16.vlgmr.msra.gmra.mrb[0].mxu1 %v868_v62  ;;  %v18929_v62 = vld [vmem:[%s19879_s22 + $0x31e0] ss:$16 sps:$4 sm:$0xff]  }
 0x711   : > { %12277 = vmatpush1.bf16.msra.mxu0 %v18839_v1  ;;  %13438 = vmatpush1.bf16.msra.mxu1 %v18842_v2  ;;  %v816_v1 = vld [vmem:[%s19877_s4 + $0x330] sm:$0xff] }
 0x712   : > { %12278 = vmatprep.subr.bf16.mxu0 %v18847_v3  ;;  %13439 = vmatprep.subr.bf16.mxu1 %v18850_v4  ;;  %v18937_v2 = vld [vmem:[%s19879_s22 + $0x3204] ss:$16 sps:$4 sm:$0xff]   ;;  %v18940_v3 = vld [vmem:[%s19879_s22 + $0x320c] ss:$16 sps:$4 sm:$0xff]   ;;  %v870_v4 = vpack.c.bf16 %v816_v1, %v762_v0  ;;  %v19019_v0 = vld [vmem:[%s19879_s22 + $0x33c0] ss:$16 sps:$4 sm:$0xff]  }
 0x713   : > { %12308 = vmatprep.mubr.bf16.mxu0 %v871_v5  ;;  %13469 = vmatprep.mubr.bf16.mxu1 %v871_v5  ;;  %v765_v5 = vld [vmem:[%s19877_s4 + $0x198] sm:$0xff] }
 0x714   : > { %v19022_v1 = vld [vmem:[%s19879_s22 + $0x33c8] ss:$16 sps:$4 sm:$0xff]  }
 0x715   : > { %12279 = vmatpush1.bf16.msra.mxu0 %v18845_v6  ;;  %13440 = vmatpush1.bf16.msra.mxu1 %v18848_v7  ;;  %v819_v6 = vld [vmem:[%s19877_s4 + $0x348] sm:$0xff]  ;;  %v18935_v7 = vld [vmem:[%s19879_s22 + $0x3200] ss:$16 sps:$4 sm:$0xff]  }
 0x716   : > { %12280 = vmatprep.subr.bf16.mxu0 %v18853_v8  ;;  %13441 = vmatprep.subr.bf16.mxu1 %v18856_v9  ;;  %v18938_v8 = vld [vmem:[%s19879_s22 + $0x3208] ss:$16 sps:$4 sm:$0xff]   ;;  %v18943_v9 = vld [vmem:[%s19879_s22 + $0x3224] ss:$16 sps:$4 sm:$0xff]  }
 0x719   : > { %12281 = vmatpush1.bf16.msra.mxu0 %v18851_v10  ;;  %13442 = vmatpush1.bf16.msra.mxu1 %v18854_v11  ;;  %v18946_v10 = vld [vmem:[%s19879_s22 + $0x322c] ss:$16 sps:$4 sm:$0xff]   ;;  %v873_v11 = vpack.c.bf16 %v819_v6, %v765_v5  ;;  %v19028_v5 = vld [vmem:[%s19879_s22 + $0x33e8] ss:$16 sps:$4 sm:$0xff]   ;;  %v764_v6 = vld [vmem:[%s19877_s4 + $0x190] sm:$0xff] }
 0x71a   : > { %12282 = vmatprep.subr.bf16.mxu0 %v18859_v12  ;;  %13443 = vmatprep.subr.bf16.mxu1 %v18862_v13  ;;  %v18941_v12 = vld [vmem:[%s19879_s22 + $0x3220] ss:$16 sps:$4 sm:$0xff]   ;;  %v18944_v13 = vld [vmem:[%s19879_s22 + $0x3228] ss:$16 sps:$4 sm:$0xff]  }
 0x71d   : > { %12283 = vmatpush1.bf16.msra.mxu0 %v18857_v14  ;;  %13444 = vmatpush1.bf16.msra.mxu1 %v18860_v15  ;;  %v18949_v14 = vld [vmem:[%s19879_s22 + $0x3244] ss:$16 sps:$4 sm:$0xff]   ;;  %v18952_v15 = vld [vmem:[%s19879_s22 + $0x324c] ss:$16 sps:$4 sm:$0xff]  }
 0x71e   : > { %12284 = vmatprep.subr.bf16.mxu0 %v18865_v16  ;;  %13445 = vmatprep.subr.bf16.mxu1 %v18868_v17  ;;  %v18947_v16 = vld [vmem:[%s19879_s22 + $0x3240] ss:$16 sps:$4 sm:$0xff]   ;;  %v18950_v17 = vld [vmem:[%s19879_s22 + $0x3248] ss:$16 sps:$4 sm:$0xff]  }
 0x721   : > { %12285 = vmatpush1.bf16.msra.mxu0 %v18863_v18  ;;  %13446 = vmatpush1.bf16.msra.mxu1 %v18866_v19  ;;  %v18955_v18 = vld [vmem:[%s19879_s22 + $0x3264] ss:$16 sps:$4 sm:$0xff]   ;;  %v18958_v19 = vld [vmem:[%s19879_s22 + $0x326c] ss:$16 sps:$4 sm:$0xff]  }
 0x722   : > { %12286 = vmatprep.subr.bf16.mxu0 %v18871_v20  ;;  %13447 = vmatprep.subr.bf16.mxu1 %v18874_v21  ;;  %v18953_v20 = vld [vmem:[%s19879_s22 + $0x3260] ss:$16 sps:$4 sm:$0xff]   ;;  %v18956_v21 = vld [vmem:[%s19879_s22 + $0x3268] ss:$16 sps:$4 sm:$0xff]  }
 0x725   : > { %12287 = vmatpush1.bf16.msra.mxu0 %v18869_v22  ;;  %13448 = vmatpush1.bf16.msra.mxu1 %v18872_v23  ;;  %v18961_v22 = vld [vmem:[%s19879_s22 + $0x3284] ss:$16 sps:$4 sm:$0xff]   ;;  %v18964_v23 = vld [vmem:[%s19879_s22 + $0x328c] ss:$16 sps:$4 sm:$0xff]  }
 0x726   : > { %12288 = vmatprep.subr.bf16.mxu0 %v18877_v24  ;;  %13449 = vmatprep.subr.bf16.mxu1 %v18880_v25  ;;  %v18959_v24 = vld [vmem:[%s19879_s22 + $0x3280] ss:$16 sps:$4 sm:$0xff]   ;;  %v18962_v25 = vld [vmem:[%s19879_s22 + $0x3288] ss:$16 sps:$4 sm:$0xff]  }
 0x729   : > { %12289 = vmatpush1.bf16.msra.mxu0 %v18875_v26  ;;  %13450 = vmatpush1.bf16.msra.mxu1 %v18878_v27  ;;  %v18967_v26 = vld [vmem:[%s19879_s22 + $0x32a4] ss:$16 sps:$4 sm:$0xff]   ;;  %v18970_v27 = vld [vmem:[%s19879_s22 + $0x32ac] ss:$16 sps:$4 sm:$0xff]  }
 0x72a   : > { %12290 = vmatprep.subr.bf16.mxu0 %v18883_v28  ;;  %13451 = vmatprep.subr.bf16.mxu1 %v18886_v29  ;;  %v18965_v28 = vld [vmem:[%s19879_s22 + $0x32a0] ss:$16 sps:$4 sm:$0xff]   ;;  %v18968_v29 = vld [vmem:[%s19879_s22 + $0x32a8] ss:$16 sps:$4 sm:$0xff]  }
 0x72d   : > { %12291 = vmatpush1.bf16.msra.mxu0 %v18881_v30  ;;  %13452 = vmatpush1.bf16.msra.mxu1 %v18884_v31  ;;  %v18973_v30 = vld [vmem:[%s19879_s22 + $0x32c4] ss:$16 sps:$4 sm:$0xff]   ;;  %v18976_v31 = vld [vmem:[%s19879_s22 + $0x32cc] ss:$16 sps:$4 sm:$0xff]  }
 0x72e   : > { %12292 = vmatprep.subr.bf16.mxu0 %v18889_v32  ;;  %13453 = vmatprep.subr.bf16.mxu1 %v18892_v33  ;;  %v18971_v32 = vld [vmem:[%s19879_s22 + $0x32c0] ss:$16 sps:$4 sm:$0xff]   ;;  %v18974_v33 = vld [vmem:[%s19879_s22 + $0x32c8] ss:$16 sps:$4 sm:$0xff]  }
 0x731   : > { %12293 = vmatpush1.bf16.msra.mxu0 %v18887_v34  ;;  %13454 = vmatpush1.bf16.msra.mxu1 %v18890_v35  ;;  %v18979_v34 = vld [vmem:[%s19879_s22 + $0x32e4] ss:$16 sps:$4 sm:$0xff]   ;;  %v18982_v35 = vld [vmem:[%s19879_s22 + $0x32ec] ss:$16 sps:$4 sm:$0xff]  }
 0x732   : > { %12294 = vmatprep.subr.bf16.mxu0 %v18895_v36  ;;  %13455 = vmatprep.subr.bf16.mxu1 %v18898_v37  ;;  %v18977_v36 = vld [vmem:[%s19879_s22 + $0x32e0] ss:$16 sps:$4 sm:$0xff]   ;;  %v18980_v37 = vld [vmem:[%s19879_s22 + $0x32e8] ss:$16 sps:$4 sm:$0xff]  }
 0x735   : > { %12295 = vmatpush1.bf16.msra.mxu0 %v18893_v38  ;;  %13456 = vmatpush1.bf16.msra.mxu1 %v18896_v39  ;;  %v18985_v38 = vld [vmem:[%s19879_s22 + $0x3304] ss:$16 sps:$4 sm:$0xff]   ;;  %v18988_v39 = vld [vmem:[%s19879_s22 + $0x330c] ss:$16 sps:$4 sm:$0xff]  }
 0x736   : > { %12296 = vmatprep.subr.bf16.mxu0 %v18901_v40  ;;  %13457 = vmatprep.subr.bf16.mxu1 %v18904_v41  ;;  %v18983_v40 = vld [vmem:[%s19879_s22 + $0x3300] ss:$16 sps:$4 sm:$0xff]   ;;  %v18986_v41 = vld [vmem:[%s19879_s22 + $0x3308] ss:$16 sps:$4 sm:$0xff]  }
 0x739   : > { %12297 = vmatpush1.bf16.msra.mxu0 %v18899_v42  ;;  %13458 = vmatpush1.bf16.msra.mxu1 %v18902_v43  ;;  %v18991_v42 = vld [vmem:[%s19879_s22 + $0x3324] ss:$16 sps:$4 sm:$0xff]   ;;  %v18994_v43 = vld [vmem:[%s19879_s22 + $0x332c] ss:$16 sps:$4 sm:$0xff]  }
 0x73a   : > { %12298 = vmatprep.subr.bf16.mxu0 %v18907_v44  ;;  %13459 = vmatprep.subr.bf16.mxu1 %v18910_v45  ;;  %v18989_v44 = vld [vmem:[%s19879_s22 + $0x3320] ss:$16 sps:$4 sm:$0xff]   ;;  %v18992_v45 = vld [vmem:[%s19879_s22 + $0x3328] ss:$16 sps:$4 sm:$0xff]  }
 0x73d   : > { %12299 = vmatpush1.bf16.msra.mxu0 %v18905_v46  ;;  %13460 = vmatpush1.bf16.msra.mxu1 %v18908_v47  ;;  %v18997_v46 = vld [vmem:[%s19879_s22 + $0x3344] ss:$16 sps:$4 sm:$0xff]   ;;  %v19000_v47 = vld [vmem:[%s19879_s22 + $0x334c] ss:$16 sps:$4 sm:$0xff]  }
 0x73e   : > { %12300 = vmatprep.subr.bf16.mxu0 %v18913_v48  ;;  %13461 = vmatprep.subr.bf16.mxu1 %v18916_v49  ;;  %v18995_v48 = vld [vmem:[%s19879_s22 + $0x3340] ss:$16 sps:$4 sm:$0xff]   ;;  %v18998_v49 = vld [vmem:[%s19879_s22 + $0x3348] ss:$16 sps:$4 sm:$0xff]  }
 0x741   : > { %12301 = vmatpush1.bf16.msra.mxu0 %v18911_v50  ;;  %13462 = vmatpush1.bf16.msra.mxu1 %v18914_v51  ;;  %v19003_v50 = vld [vmem:[%s19879_s22 + $0x3364] ss:$16 sps:$4 sm:$0xff]   ;;  %v19006_v51 = vld [vmem:[%s19879_s22 + $0x336c] ss:$16 sps:$4 sm:$0xff]  }
 0x742   : > { %12302 = vmatprep.subr.bf16.mxu0 %v18919_v52  ;;  %13463 = vmatprep.subr.bf16.mxu1 %v18922_v53  ;;  %v19001_v52 = vld [vmem:[%s19879_s22 + $0x3360] ss:$16 sps:$4 sm:$0xff]   ;;  %v19004_v53 = vld [vmem:[%s19879_s22 + $0x3368] ss:$16 sps:$4 sm:$0xff]  }
 0x745   : > { %12303 = vmatpush1.bf16.msra.mxu0 %v18917_v54  ;;  %13464 = vmatpush1.bf16.msra.mxu1 %v18920_v55  ;;  %v19009_v54 = vld [vmem:[%s19879_s22 + $0x3384] ss:$16 sps:$4 sm:$0xff]   ;;  %v19012_v55 = vld [vmem:[%s19879_s22 + $0x338c] ss:$16 sps:$4 sm:$0xff]  }
 0x746   : > { %12304 = vmatprep.subr.bf16.mxu0 %v18925_v56  ;;  %13465 = vmatprep.subr.bf16.mxu1 %v18928_v57  ;;  %v19007_v56 = vld [vmem:[%s19879_s22 + $0x3380] ss:$16 sps:$4 sm:$0xff]   ;;  %v19010_v57 = vld [vmem:[%s19879_s22 + $0x3388] ss:$16 sps:$4 sm:$0xff]  }
 0x749   : > { %12305 = vmatpush1.bf16.msra.mxu0 %v18923_v58  ;;  %13466 = vmatpush1.bf16.msra.mxu1 %v18926_v59  ;;  %v19015_v58 = vld [vmem:[%s19879_s22 + $0x33a4] ss:$16 sps:$4 sm:$0xff]   ;;  %v19018_v59 = vld [vmem:[%s19879_s22 + $0x33ac] ss:$16 sps:$4 sm:$0xff]  }
 0x74a   : > { %12306 = vmatprep.subr.bf16.mxu0 %v18931_v60  ;;  %13467 = vmatprep.subr.bf16.mxu1 %v18934_v61  ;;  %v19013_v60 = vld [vmem:[%s19879_s22 + $0x33a0] ss:$16 sps:$4 sm:$0xff]   ;;  %v19016_v61 = vld [vmem:[%s19879_s22 + $0x33a8] ss:$16 sps:$4 sm:$0xff]  }
 0x74d   : > { %12307 = vmatpush1.bf16.msra.mxu0 %v18929_v62  ;;  %13468 = vmatpush1.bf16.msra.mxu1 %v18932_v63  ;;  %v19021_v62 = vld [vmem:[%s19879_s22 + $0x33c4] ss:$16 sps:$4 sm:$0xff]   ;;  %v19024_v63 = vld [vmem:[%s19879_s22 + $0x33cc] ss:$16 sps:$4 sm:$0xff]  }
 0x74e   : > { %12319 = vmatprep.subr.bf16.mxu0 %v18937_v2  ;;  %13480 = vmatprep.subr.bf16.mxu1 %v18940_v3  ;;  %v19027_v2 = vld [vmem:[%s19879_s22 + $0x33e4] ss:$16 sps:$4 sm:$0xff]   ;;  %v19030_v3 = vld [vmem:[%s19879_s22 + $0x33ec] ss:$16 sps:$4 sm:$0xff]  }
 0x750   : > { %12309 = vmatmul.mubr.bf16.vlgmr.msra.gmra.mrb[0].mxu0 %v870_v4  ;;  %13470 = vmatmul.mubr.bf16.vlgmr.msra.gmra.mrb[0].mxu1 %v870_v4  ;;  %v19025_v4 = vld [vmem:[%s19879_s22 + $0x33e0] ss:$16 sps:$4 sm:$0xff]  }
 0x751   : > { %12320 = vmatpush1.bf16.msra.mxu0 %v18935_v7  ;;  %13481 = vmatpush1.bf16.msra.mxu1 %v18938_v8  ;;  %v818_v7 = vld [vmem:[%s19877_s4 + $0x340] sm:$0xff] }
 0x752   : > { %12321 = vmatprep.subr.bf16.mxu0 %v18943_v9  ;;  %13482 = vmatprep.subr.bf16.mxu1 %v18946_v10  ;;  %v19033_v8 = vld [vmem:[%s19879_s22 + $0x3404] ss:$16 sps:$4 sm:$0xff]   ;;  %v19036_v9 = vld [vmem:[%s19879_s22 + $0x340c] ss:$16 sps:$4 sm:$0xff]   ;;  %v872_v10 = vpack.c.bf16 %v818_v7, %v764_v6  ;;  %v19115_v6 = vld [vmem:[%s19879_s22 + $0x35c0] ss:$16 sps:$4 sm:$0xff]  }
 0x753   : > { %12351 = vmatprep.mubr.bf16.mxu0 %v873_v11  ;;  %13512 = vmatprep.mubr.bf16.mxu1 %v873_v11  ;;  %v767_v11 = vld [vmem:[%s19877_s4 + $0x1a8] sm:$0xff] }
 0x754   : > { %v19118_v7 = vld [vmem:[%s19879_s22 + $0x35c8] ss:$16 sps:$4 sm:$0xff]  }
 0x755   : > { %12322 = vmatpush1.bf16.msra.mxu0 %v18941_v12  ;;  %13483 = vmatpush1.bf16.msra.mxu1 %v18944_v13  ;;  %v821_v12 = vld [vmem:[%s19877_s4 + $0x358] sm:$0xff]  ;;  %v19031_v13 = vld [vmem:[%s19879_s22 + $0x3400] ss:$16 sps:$4 sm:$0xff]  }
 0x756   : > { %12323 = vmatprep.subr.bf16.mxu0 %v18949_v14  ;;  %13484 = vmatprep.subr.bf16.mxu1 %v18952_v15  ;;  %v19034_v14 = vld [vmem:[%s19879_s22 + $0x3408] ss:$16 sps:$4 sm:$0xff]   ;;  %v19039_v15 = vld [vmem:[%s19879_s22 + $0x3424] ss:$16 sps:$4 sm:$0xff]  }
 0x759   : > { %12324 = vmatpush1.bf16.msra.mxu0 %v18947_v16  ;;  %13485 = vmatpush1.bf16.msra.mxu1 %v18950_v17  ;;  %v19042_v16 = vld [vmem:[%s19879_s22 + $0x342c] ss:$16 sps:$4 sm:$0xff]   ;;  %v875_v17 = vpack.c.bf16 %v821_v12, %v767_v11  ;;  %v19124_v11 = vld [vmem:[%s19879_s22 + $0x35e8] ss:$16 sps:$4 sm:$0xff]   ;;  %v766_v12 = vld [vmem:[%s19877_s4 + $0x1a0] sm:$0xff] }
 0x75a   : > { %12325 = vmatprep.subr.bf16.mxu0 %v18955_v18  ;;  %13486 = vmatprep.subr.bf16.mxu1 %v18958_v19  ;;  %v19037_v18 = vld [vmem:[%s19879_s22 + $0x3420] ss:$16 sps:$4 sm:$0xff]   ;;  %v19040_v19 = vld [vmem:[%s19879_s22 + $0x3428] ss:$16 sps:$4 sm:$0xff]  }
 0x75d   : > { %12326 = vmatpush1.bf16.msra.mxu0 %v18953_v20  ;;  %13487 = vmatpush1.bf16.msra.mxu1 %v18956_v21  ;;  %v19045_v20 = vld [vmem:[%s19879_s22 + $0x3444] ss:$16 sps:$4 sm:$0xff]   ;;  %v19048_v21 = vld [vmem:[%s19879_s22 + $0x344c] ss:$16 sps:$4 sm:$0xff]  }
 0x75e   : > { %12327 = vmatprep.subr.bf16.mxu0 %v18961_v22  ;;  %13488 = vmatprep.subr.bf16.mxu1 %v18964_v23  ;;  %v19043_v22 = vld [vmem:[%s19879_s22 + $0x3440] ss:$16 sps:$4 sm:$0xff]   ;;  %v19046_v23 = vld [vmem:[%s19879_s22 + $0x3448] ss:$16 sps:$4 sm:$0xff]  }
 0x761   : > { %12328 = vmatpush1.bf16.msra.mxu0 %v18959_v24  ;;  %13489 = vmatpush1.bf16.msra.mxu1 %v18962_v25  ;;  %v19051_v24 = vld [vmem:[%s19879_s22 + $0x3464] ss:$16 sps:$4 sm:$0xff]   ;;  %v19054_v25 = vld [vmem:[%s19879_s22 + $0x346c] ss:$16 sps:$4 sm:$0xff]  }
 0x762   : > { %12329 = vmatprep.subr.bf16.mxu0 %v18967_v26  ;;  %13490 = vmatprep.subr.bf16.mxu1 %v18970_v27  ;;  %v19049_v26 = vld [vmem:[%s19879_s22 + $0x3460] ss:$16 sps:$4 sm:$0xff]   ;;  %v19052_v27 = vld [vmem:[%s19879_s22 + $0x3468] ss:$16 sps:$4 sm:$0xff]  }
 0x765   : > { %12330 = vmatpush1.bf16.msra.mxu0 %v18965_v28  ;;  %13491 = vmatpush1.bf16.msra.mxu1 %v18968_v29  ;;  %v19057_v28 = vld [vmem:[%s19879_s22 + $0x3484] ss:$16 sps:$4 sm:$0xff]   ;;  %v19060_v29 = vld [vmem:[%s19879_s22 + $0x348c] ss:$16 sps:$4 sm:$0xff]  }
 0x766   : > { %12331 = vmatprep.subr.bf16.mxu0 %v18973_v30  ;;  %13492 = vmatprep.subr.bf16.mxu1 %v18976_v31  ;;  %v19055_v30 = vld [vmem:[%s19879_s22 + $0x3480] ss:$16 sps:$4 sm:$0xff]   ;;  %v19058_v31 = vld [vmem:[%s19879_s22 + $0x3488] ss:$16 sps:$4 sm:$0xff]  }
 0x769   : > { %12332 = vmatpush1.bf16.msra.mxu0 %v18971_v32  ;;  %13493 = vmatpush1.bf16.msra.mxu1 %v18974_v33  ;;  %v19063_v32 = vld [vmem:[%s19879_s22 + $0x34a4] ss:$16 sps:$4 sm:$0xff]   ;;  %v19066_v33 = vld [vmem:[%s19879_s22 + $0x34ac] ss:$16 sps:$4 sm:$0xff]  }
 0x76a   : > { %12333 = vmatprep.subr.bf16.mxu0 %v18979_v34  ;;  %13494 = vmatprep.subr.bf16.mxu1 %v18982_v35  ;;  %v19061_v34 = vld [vmem:[%s19879_s22 + $0x34a0] ss:$16 sps:$4 sm:$0xff]   ;;  %v19064_v35 = vld [vmem:[%s19879_s22 + $0x34a8] ss:$16 sps:$4 sm:$0xff]  }
 0x76d   : > { %12334 = vmatpush1.bf16.msra.mxu0 %v18977_v36  ;;  %13495 = vmatpush1.bf16.msra.mxu1 %v18980_v37  ;;  %v19069_v36 = vld [vmem:[%s19879_s22 + $0x34c4] ss:$16 sps:$4 sm:$0xff]   ;;  %v19072_v37 = vld [vmem:[%s19879_s22 + $0x34cc] ss:$16 sps:$4 sm:$0xff]  }
 0x76e   : > { %12335 = vmatprep.subr.bf16.mxu0 %v18985_v38  ;;  %13496 = vmatprep.subr.bf16.mxu1 %v18988_v39  ;;  %v19067_v38 = vld [vmem:[%s19879_s22 + $0x34c0] ss:$16 sps:$4 sm:$0xff]   ;;  %v19070_v39 = vld [vmem:[%s19879_s22 + $0x34c8] ss:$16 sps:$4 sm:$0xff]  }
 0x771   : > { %12336 = vmatpush1.bf16.msra.mxu0 %v18983_v40  ;;  %13497 = vmatpush1.bf16.msra.mxu1 %v18986_v41  ;;  %v19075_v40 = vld [vmem:[%s19879_s22 + $0x34e4] ss:$16 sps:$4 sm:$0xff]   ;;  %v19078_v41 = vld [vmem:[%s19879_s22 + $0x34ec] ss:$16 sps:$4 sm:$0xff]  }
 0x772   : > { %12337 = vmatprep.subr.bf16.mxu0 %v18991_v42  ;;  %13498 = vmatprep.subr.bf16.mxu1 %v18994_v43  ;;  %v19073_v42 = vld [vmem:[%s19879_s22 + $0x34e0] ss:$16 sps:$4 sm:$0xff]   ;;  %v19076_v43 = vld [vmem:[%s19879_s22 + $0x34e8] ss:$16 sps:$4 sm:$0xff]  }
 0x775   : > { %12338 = vmatpush1.bf16.msra.mxu0 %v18989_v44  ;;  %13499 = vmatpush1.bf16.msra.mxu1 %v18992_v45  ;;  %v19081_v44 = vld [vmem:[%s19879_s22 + $0x3504] ss:$16 sps:$4 sm:$0xff]   ;;  %v19084_v45 = vld [vmem:[%s19879_s22 + $0x350c] ss:$16 sps:$4 sm:$0xff]  }
 0x776   : > { %12339 = vmatprep.subr.bf16.mxu0 %v18997_v46  ;;  %13500 = vmatprep.subr.bf16.mxu1 %v19000_v47  ;;  %v19079_v46 = vld [vmem:[%s19879_s22 + $0x3500] ss:$16 sps:$4 sm:$0xff]   ;;  %v19082_v47 = vld [vmem:[%s19879_s22 + $0x3508] ss:$16 sps:$4 sm:$0xff]  }
 0x779   : > { %12340 = vmatpush1.bf16.msra.mxu0 %v18995_v48  ;;  %13501 = vmatpush1.bf16.msra.mxu1 %v18998_v49  ;;  %v19087_v48 = vld [vmem:[%s19879_s22 + $0x3524] ss:$16 sps:$4 sm:$0xff]   ;;  %v19090_v49 = vld [vmem:[%s19879_s22 + $0x352c] ss:$16 sps:$4 sm:$0xff]  }
 0x77a   : > { %12341 = vmatprep.subr.bf16.mxu0 %v19003_v50  ;;  %13502 = vmatprep.subr.bf16.mxu1 %v19006_v51  ;;  %v19085_v50 = vld [vmem:[%s19879_s22 + $0x3520] ss:$16 sps:$4 sm:$0xff]   ;;  %v19088_v51 = vld [vmem:[%s19879_s22 + $0x3528] ss:$16 sps:$4 sm:$0xff]  }
 0x77d   : > { %12342 = vmatpush1.bf16.msra.mxu0 %v19001_v52  ;;  %13503 = vmatpush1.bf16.msra.mxu1 %v19004_v53  ;;  %v19093_v52 = vld [vmem:[%s19879_s22 + $0x3544] ss:$16 sps:$4 sm:$0xff]   ;;  %v19096_v53 = vld [vmem:[%s19879_s22 + $0x354c] ss:$16 sps:$4 sm:$0xff]  }
 0x77e   : > { %12343 = vmatprep.subr.bf16.mxu0 %v19009_v54  ;;  %13504 = vmatprep.subr.bf16.mxu1 %v19012_v55  ;;  %v19091_v54 = vld [vmem:[%s19879_s22 + $0x3540] ss:$16 sps:$4 sm:$0xff]   ;;  %v19094_v55 = vld [vmem:[%s19879_s22 + $0x3548] ss:$16 sps:$4 sm:$0xff]  }
 0x781   : > { %12344 = vmatpush1.bf16.msra.mxu0 %v19007_v56  ;;  %13505 = vmatpush1.bf16.msra.mxu1 %v19010_v57  ;;  %v19099_v56 = vld [vmem:[%s19879_s22 + $0x3564] ss:$16 sps:$4 sm:$0xff]   ;;  %v19102_v57 = vld [vmem:[%s19879_s22 + $0x356c] ss:$16 sps:$4 sm:$0xff]  }
 0x782   : > { %12345 = vmatprep.subr.bf16.mxu0 %v19015_v58  ;;  %13506 = vmatprep.subr.bf16.mxu1 %v19018_v59  ;;  %v19097_v58 = vld [vmem:[%s19879_s22 + $0x3560] ss:$16 sps:$4 sm:$0xff]   ;;  %v19100_v59 = vld [vmem:[%s19879_s22 + $0x3568] ss:$16 sps:$4 sm:$0xff]  }
 0x785   : > { %12346 = vmatpush1.bf16.msra.mxu0 %v19013_v60  ;;  %13507 = vmatpush1.bf16.msra.mxu1 %v19016_v61  ;;  %v19105_v60 = vld [vmem:[%s19879_s22 + $0x3584] ss:$16 sps:$4 sm:$0xff]   ;;  %v19108_v61 = vld [vmem:[%s19879_s22 + $0x358c] ss:$16 sps:$4 sm:$0xff]  }
 0x786   : > { %12347 = vmatprep.subr.bf16.mxu0 %v19021_v62  ;;  %13508 = vmatprep.subr.bf16.mxu1 %v19024_v63  ;;  %v19103_v62 = vld [vmem:[%s19879_s22 + $0x3580] ss:$16 sps:$4 sm:$0xff]   ;;  %v19106_v63 = vld [vmem:[%s19879_s22 + $0x3588] ss:$16 sps:$4 sm:$0xff]  }
 0x789   : > { %12348 = vmatpush1.bf16.msra.mxu0 %v19019_v0  ;;  %13509 = vmatpush1.bf16.msra.mxu1 %v19022_v1  ;;  %v19111_v0 = vld [vmem:[%s19879_s22 + $0x35a4] ss:$16 sps:$4 sm:$0xff]   ;;  %v19114_v1 = vld [vmem:[%s19879_s22 + $0x35ac] ss:$16 sps:$4 sm:$0xff]  }
 0x78a   : > { %12349 = vmatprep.subr.bf16.mxu0 %v19027_v2  ;;  %13510 = vmatprep.subr.bf16.mxu1 %v19030_v3  ;;  %v19109_v2 = vld [vmem:[%s19879_s22 + $0x35a0] ss:$16 sps:$4 sm:$0xff]   ;;  %v19112_v3 = vld [vmem:[%s19879_s22 + $0x35a8] ss:$16 sps:$4 sm:$0xff]  }
 0x78d   : > { %12350 = vmatpush1.bf16.msra.mxu0 %v19025_v4  ;;  %13511 = vmatpush1.bf16.msra.mxu1 %v19028_v5  ;;  %v19117_v4 = vld [vmem:[%s19879_s22 + $0x35c4] ss:$16 sps:$4 sm:$0xff]   ;;  %v19120_v5 = vld [vmem:[%s19879_s22 + $0x35cc] ss:$16 sps:$4 sm:$0xff]  }
 0x78e   : > { %12362 = vmatprep.subr.bf16.mxu0 %v19033_v8  ;;  %13523 = vmatprep.subr.bf16.mxu1 %v19036_v9  ;;  %v19123_v8 = vld [vmem:[%s19879_s22 + $0x35e4] ss:$16 sps:$4 sm:$0xff]   ;;  %v19126_v9 = vld [vmem:[%s19879_s22 + $0x35ec] ss:$16 sps:$4 sm:$0xff]  }
 0x790   : > { %12352 = vmatmul.mubr.bf16.vlgmr.msra.gmra.mrb[0].mxu0 %v872_v10  ;;  %13513 = vmatmul.mubr.bf16.vlgmr.msra.gmra.mrb[0].mxu1 %v872_v10  ;;  %v19121_v10 = vld [vmem:[%s19879_s22 + $0x35e0] ss:$16 sps:$4 sm:$0xff]  }
 0x791   : > { %12363 = vmatpush1.bf16.msra.mxu0 %v19031_v13  ;;  %13524 = vmatpush1.bf16.msra.mxu1 %v19034_v14  ;;  %v820_v13 = vld [vmem:[%s19877_s4 + $0x350] sm:$0xff] }
 0x792   : > { %12364 = vmatprep.subr.bf16.mxu0 %v19039_v15  ;;  %13525 = vmatprep.subr.bf16.mxu1 %v19042_v16  ;;  %v874_v14 = vpack.c.bf16 %v820_v13, %v766_v12  ;;  %v706_v15 = vld [vmem:[#allocation2] sm:$0xff]  ;;  %v708_v16 = vld [vmem:[#allocation2 + $0x10] sm:$0xff] }
 0x793   : > { %12394 = vmatprep.mubr.bf16.mxu0 %v875_v17  ;;  %13555 = vmatprep.mubr.bf16.mxu1 %v875_v17  ;;  %v707_v17 = vld [vmem:[#allocation2 + $0x8] sm:$0xff]  ;;  %v13638_v12 = vld [vmem:[#allocation8 + $0x30] sm:$0xff] (!%p15951_p4) }
 0x795   : > { %12365 = vmatpush1.bf16.msra.mxu0 %v19037_v18  ;;  %13526 = vmatpush1.bf16.msra.mxu1 %v19040_v19  ;;  %v709_v18 = vld [vmem:[#allocation2 + $0x18] sm:$0xff] }
 0x796   : > { %12366 = vmatprep.subr.bf16.mxu0 %v19045_v20  ;;  %13527 = vmatprep.subr.bf16.mxu1 %v19048_v21  ;;  %v710_v21 = vld [vmem:[#allocation2 + $0x20] sm:$0xff] }
 0x799   : > { %12367 = vmatpush1.bf16.msra.mxu0 %v19043_v22  ;;  %13528 = vmatpush1.bf16.msra.mxu1 %v19046_v23  ;;  %v712_v22 = vld [vmem:[#allocation2 + $0x30] sm:$0xff] }
 0x79a   : > { %12368 = vmatprep.subr.bf16.mxu0 %v19051_v24  ;;  %13529 = vmatprep.subr.bf16.mxu1 %v19054_v25 }
 0x79d   : > { %12369 = vmatpush1.bf16.msra.mxu0 %v19049_v26  ;;  %13530 = vmatpush1.bf16.msra.mxu1 %v19052_v27  ;;  %v711_v27 = vld [vmem:[#allocation2 + $0x28] sm:$0xff] }
 0x79e   : > { %12370 = vmatprep.subr.bf16.mxu0 %v19057_v28  ;;  %13531 = vmatprep.subr.bf16.mxu1 %v19060_v29  ;;  %v713_v28 = vld [vmem:[#allocation2 + $0x38] sm:$0xff] }
 0x7a1   : > { %12371 = vmatpush1.bf16.msra.mxu0 %v19055_v30  ;;  %13532 = vmatpush1.bf16.msra.mxu1 %v19058_v31 }
 0x7a2   : > { %12372 = vmatprep.subr.bf16.mxu0 %v19063_v32  ;;  %13533 = vmatprep.subr.bf16.mxu1 %v19066_v33 }
 0x7a5   : > { %12373 = vmatpush1.bf16.msra.mxu0 %v19061_v34  ;;  %13534 = vmatpush1.bf16.msra.mxu1 %v19064_v35 }
 0x7a6   : > { %12374 = vmatprep.subr.bf16.mxu0 %v19069_v36  ;;  %13535 = vmatprep.subr.bf16.mxu1 %v19072_v37 }
 0x7a9   : > { %12375 = vmatpush1.bf16.msra.mxu0 %v19067_v38  ;;  %13536 = vmatpush1.bf16.msra.mxu1 %v19070_v39  ;;  %v13648_v39 = vld [vmem:[#allocation8 + $0x80] sm:$0xff] (!%p15951_p4) }
 0x7aa   : > { %12376 = vmatprep.subr.bf16.mxu0 %v19075_v40  ;;  %13537 = vmatprep.subr.bf16.mxu1 %v19078_v41  ;;  %v13649_v40 = vld [vmem:[#allocation8 + $0x88] sm:$0xff] (!%p15951_p4)  ;;  %v13632_v41 = vld [vmem:[#allocation8] sm:$0xff] (!%p15951_p4) }
 0x7ad   : > { %12377 = vmatpush1.bf16.msra.mxu0 %v19073_v42  ;;  %13538 = vmatpush1.bf16.msra.mxu1 %v19076_v43  ;;  %v16113_v42 = vpack.c.bf16 (!%p15951_p4), %v13649_v40, %v13648_v39  ;;  %v13633_v43 = vld [vmem:[#allocation8 + $0x8] sm:$0xff] (!%p15951_p4) }
 0x7ae   : > { %12378 = vmatprep.subr.bf16.mxu0 %v19081_v44  ;;  %13539 = vmatprep.subr.bf16.mxu1 %v19084_v45  ;;  %v13680_v44 = vld [vmem:[#allocation8 + $0x180] sm:$0xff] (!%p15951_p4)  ;;  %v13681_v45 = vld [vmem:[#allocation8 + $0x188] sm:$0xff] (!%p15951_p4) }
 0x7b1   : > { %12379 = vmatpush1.bf16.msra.mxu0 %v19079_v46  ;;  %13540 = vmatpush1.bf16.msra.mxu1 %v19082_v47  ;;  %v16115_v46 = vpack.c.bf16 (!%p15951_p4), %v13633_v43, %v13632_v41  ;;  %v16145_v47 = vpack.c.bf16 (!%p15951_p4), %v13681_v45, %v13680_v44  ;;  %v13643_v43 = vld [vmem:[#allocation8 + $0x58] sm:$0xff] (!%p15951_p4)  ;;  %v13674_v44 = vld [vmem:[#allocation8 + $0x150] sm:$0xff] (!%p15951_p4) }
 0x7b2   : > { %12380 = vmatprep.subr.bf16.mxu0 %v19087_v48  ;;  %13541 = vmatprep.subr.bf16.mxu1 %v19090_v49  ;;  %v13664_v48 = vld [vmem:[#allocation8 + $0x100] sm:$0xff] (!%p15951_p4)  ;;  %v13665_v49 = vld [vmem:[#allocation8 + $0x108] sm:$0xff] (!%p15951_p4) }
 0x7b5   : > { %12381 = vmatpush1.bf16.msra.mxu0 %v19085_v50  ;;  %13542 = vmatpush1.bf16.msra.mxu1 %v19088_v51  ;;  %v13650_v50 = vld [vmem:[#allocation8 + $0x90] sm:$0xff] (!%p15951_p4)  ;;  %v16147_v51 = vpack.c.bf16 (!%p15951_p4), %v13665_v49, %v13664_v48  ;;  %v13661_v48 = vld [vmem:[#allocation8 + $0xe8] sm:$0xff] (!%p15951_p4) }
 0x7b6   : > { %12382 = vmatprep.subr.bf16.mxu0 %v19093_v52  ;;  %13543 = vmatprep.subr.bf16.mxu1 %v19096_v53  ;;  %v13651_v52 = vld [vmem:[#allocation8 + $0x98] sm:$0xff] (!%p15951_p4)  ;;  %v13634_v53 = vld [vmem:[#allocation8 + $0x10] sm:$0xff] (!%p15951_p4) }
 0x7b9   : > { %12383 = vmatpush1.bf16.msra.mxu0 %v19091_v54  ;;  %13544 = vmatpush1.bf16.msra.mxu1 %v19094_v55  ;;  %v13635_v54 = vld [vmem:[#allocation8 + $0x18] sm:$0xff] (!%p15951_p4)  ;;  %v16117_v55 = vpack.c.bf16 (!%p15951_p4), %v13651_v52, %v13650_v50  ;;  %v13693_v52 = vld [vmem:[#allocation8 + $0x1e8] sm:$0xff] (!%p15951_p4) }
 0x7ba   : > { %12384 = vmatprep.subr.bf16.mxu0 %v19099_v56  ;;  %13545 = vmatprep.subr.bf16.mxu1 %v19102_v57  ;;  %v16119_v56 = vpack.c.bf16 (!%p15951_p4), %v13635_v54, %v13634_v53  ;;  %v13682_v57 = vld [vmem:[#allocation8 + $0x190] sm:$0xff] (!%p15951_p4) }
 0x7bd   : > { %12385 = vmatpush1.bf16.msra.mxu0 %v19097_v58  ;;  %13546 = vmatpush1.bf16.msra.mxu1 %v19100_v59  ;;  %v13683_v58 = vld [vmem:[#allocation8 + $0x198] sm:$0xff] (!%p15951_p4)  ;;  %v13666_v59 = vld [vmem:[#allocation8 + $0x110] sm:$0xff] (!%p15951_p4) }
 0x7be   : > { %12386 = vmatprep.subr.bf16.mxu0 %v19105_v60  ;;  %13547 = vmatprep.subr.bf16.mxu1 %v19108_v61  ;;  %v16149_v60 = vpack.c.bf16 (!%p15951_p4), %v13683_v58, %v13682_v57  ;;  %v13667_v61 = vld [vmem:[#allocation8 + $0x118] sm:$0xff] (!%p15951_p4)  ;;  %v13676_v57 = vld [vmem:[#allocation8 + $0x160] sm:$0xff] (!%p15951_p4) }
 0x7c1   : > { %12387 = vmatpush1.bf16.msra.mxu0 %v19103_v62  ;;  %13548 = vmatpush1.bf16.msra.mxu1 %v19106_v63  ;;  %v13652_v62 = vld [vmem:[#allocation8 + $0xa0] sm:$0xff] (!%p15951_p4)  ;;  %v13653_v63 = vld [vmem:[#allocation8 + $0xa8] sm:$0xff] (!%p15951_p4) }
 0x7c2   : > { %12388 = vmatprep.subr.bf16.mxu0 %v19111_v0  ;;  %13549 = vmatprep.subr.bf16.mxu1 %v19114_v1  ;;  %v16151_v0 = vpack.c.bf16 (!%p15951_p4), %v13667_v61, %v13666_v59  ;;  %v16121_v1 = vpack.c.bf16 (!%p15951_p4), %v13653_v63, %v13652_v62  ;;  %v13677_v61 = vld [vmem:[#allocation8 + $0x168] sm:$0xff] (!%p15951_p4)  ;;  %v13594_v63 = vld [vmem:[#allocation6] sm:$0xf] (!%p15951_p4) }
 0x7c5   : > { %12389 = vmatpush1.bf16.msra.mxu0 %v19109_v2  ;;  %13550 = vmatpush1.bf16.msra.mxu1 %v19112_v3  ;;  %v13636_v2 = vld [vmem:[#allocation8 + $0x20] sm:$0xff] (!%p15951_p4)  ;;  %v13637_v3 = vld [vmem:[#allocation8 + $0x28] sm:$0xff] (!%p15951_p4) }
 0x7c6   : > { %12390 = vmatprep.subr.bf16.mxu0 %v19117_v4  ;;  %13551 = vmatprep.subr.bf16.mxu1 %v19120_v5  ;;  %v13684_v4 = vld [vmem:[#allocation8 + $0x1a0] sm:$0xff] (!%p15951_p4)  ;;  %v13685_v5 = vld [vmem:[#allocation8 + $0x1a8] sm:$0xff] (!%p15951_p4) }
 0x7c9   : > { %12391 = vmatpush1.bf16.msra.mxu0 %v19115_v6  ;;  %13552 = vmatpush1.bf16.msra.mxu1 %v19118_v7  ;;  %v13668_v6 = vld [vmem:[#allocation8 + $0x120] sm:$0xff] (!%p15951_p4)  ;;  %v13669_v7 = vld [vmem:[#allocation8 + $0x128] sm:$0xff] (!%p15951_p4) }
 0x7ca   : > { %12392 = vmatprep.subr.bf16.mxu0 %v19123_v8  ;;  %13553 = vmatprep.subr.bf16.mxu1 %v19126_v9  ;;  %v16123_v8 = vpack.c.bf16 (!%p15951_p4), %v13637_v3, %v13636_v2  ;;  %v16153_v9 = vpack.c.bf16 (!%p15951_p4), %v13685_v5, %v13684_v4  ;;  %v16155_v13 = vpack.c.bf16 (!%p15951_p4), %v13669_v7, %v13668_v6  ;;  %v13663_v2 = vld [vmem:[#allocation8 + $0xf8] sm:$0xff] (!%p15951_p4)  ;;  %v13646_v6 = vld [vmem:[#allocation8 + $0x70] sm:$0xff] (!%p15951_p4) }
 0x7cb   : > { %v13694_v7 = vld [vmem:[#allocation8 + $0x1f0] sm:$0xff] (!%p15951_p4) }
 0x7cd   : > { %12393 = vmatpush1.bf16.msra.mxu0 %v19121_v10  ;;  %13554 = vmatpush1.bf16.msra.mxu1 %v19124_v11  ;;  %v13654_v10 = vld [vmem:[#allocation8 + $0xb0] sm:$0xff] (!%p15951_p4)  ;;  %v13655_v11 = vld [vmem:[#allocation8 + $0xb8] sm:$0xff] (!%p15951_p4) }
 0x7ce   : > { %16114 = vmatprep.subr.bf16.mxu0 (!%p15951_p4), %v16113_v42  ;;  %16146 = vmatprep.subr.bf16.mxu1 (!%p15951_p4), %v16145_v47  ;;  %v13642_v42 = vld [vmem:[#allocation8 + $0x50] sm:$0xff] (!%p15951_p4)  ;;  %v13660_v47 = vld [vmem:[#allocation8 + $0xe0] sm:$0xff] (!%p15951_p4) }
 0x7cf   : > { %v16135_v54 = vpack.c.bf16 (!%p15951_p4), %v13643_v43, %v13642_v42 }
 0x7d0   : > { %12395 = vmatmul.mubr.bf16.vlgmr.msra.gmra.mrb[0].mxu0 %v874_v14  ;;  %13556 = vmatmul.mubr.bf16.vlgmr.msra.gmra.mrb[0].mxu1 %v874_v14  ;;  %v16125_v14 = vpack.c.bf16 (!%p15951_p4), %v13655_v11, %v13654_v10  ;;  %v13647_v11 = vld [vmem:[#allocation8 + $0x78] sm:$0xff] (!%p15951_p4) }
 0x7d1   : > { %16116 = vmatpush3.bf16.msra.mxu0 (!%p15951_p4), %v16115_v46  ;;  %16148 = vmatpush3.bf16.msra.mxu1 (!%p15951_p4), %v16147_v51  ;;  %v13675_v46 = vld [vmem:[#allocation8 + $0x158] sm:$0xff] (!%p15951_p4)  ;;  %v13692_v51 = vld [vmem:[#allocation8 + $0x1e0] sm:$0xff] (!%p15951_p4) }
 0x7d2   : > { %16118 = vmatprep.subr.bf16.mxu0 (!%p15951_p4), %v16117_v55  ;;  %16150 = vmatprep.subr.bf16.mxu1 (!%p15951_p4), %v16149_v60  ;;  %v13644_v55 = vld [vmem:[#allocation8 + $0x60] sm:$0xff] (!%p15951_p4)  ;;  %v16167_v59 = vpack.c.bf16 (!%p15951_p4), %v13675_v46, %v13674_v44  ;;  %v16137_v60 = vpack.c.bf16 (!%p15951_p4), %v13661_v48, %v13660_v47 }
 0x7d3   : > { %v13859_v47 = vld [vmem:[%s21824_s5 + $0x20] sm:$0xff] (!%p15951_p4)  ;;  %v13860_v48 = vld [vmem:[%s21824_s5 + $0x28] sm:$0xff] (!%p15951_p4) }
 0x7d5   : > { %16120 = vmatpush3.bf16.msra.mxu0 (!%p15951_p4), %v16119_v56  ;;  %16152 = vmatpush3.bf16.msra.mxu1 (!%p15951_p4), %v16151_v0  ;;  %v13645_v56 = vld [vmem:[#allocation8 + $0x68] sm:$0xff] (!%p15951_p4)  ;;  %v16169_v0 = vpack.c.bf16 (!%p15951_p4), %v13693_v52, %v13692_v51  ;;  %v13862_v52 = vld [vmem:[%s21824_s5 + $0x38] sm:$0xff] (!%p15951_p4) }
 0x7d6   : > { %16122 = vmatprep.subr.bf16.mxu0 (!%p15951_p4), %v16121_v1  ;;  %16154 = vmatprep.subr.bf16.mxu1 (!%p15951_p4), %v16153_v9  ;;  %v13662_v1 = vld [vmem:[#allocation8 + $0xf0] sm:$0xff] (!%p15951_p4)  ;;  %v16139_v10 = vpack.c.bf16 (!%p15951_p4), %v13645_v56, %v13644_v55  ;;  %v13864_v55 = vld [vmem:[%s21824_s5 + $0x48] sm:$0xff] (!%p15951_p4) }
 0x7d7   : > { %v13861_v51 = vld [vmem:[%s21824_s5 + $0x30] sm:$0xff] (!%p15951_p4) }
 0x7d9   : > { %16124 = vmatpush3.bf16.msra.mxu0 (!%p15951_p4), %v16123_v8  ;;  %16156 = vmatpush3.bf16.msra.mxu1 (!%p15951_p4), %v16155_v13  ;;  %v13695_v8 = vld [vmem:[#allocation8 + $0x1f8] sm:$0xff] (!%p15951_p4) }
 0x7da   : > { %16126 = vmatprep.subr.bf16.mxu0 (!%p15951_p4), %v16125_v14 }
 0x8a3   : > { %v12396_v19 = vpop.f32.mrb[0].mxu0  ;;  %v13557_v20 = vpop.f32.mrb[0].mxu1  ;;  %13585 = sbr.rel (%p15951_p4) target bundleno = 2921 (0xb69), region = 111 }
 0x8a4   : > { %v13566_v23 = vadd.f32 %v12396_v19, %v706_v15  ;;  %v13568_v24 = vadd.f32 %v13557_v20, %v708_v16  ;;  %v12398_v25 = vpop.f32.mrb[1].mxu0  ;;  %v13559_v26 = vpop.f32.mrb[1].mxu1  ;;  %v13639_v15 = vld [vmem:[#allocation8 + $0x38] sm:$0xff] (!%p15951_p4)  ;;  %v13686_v16 = vld [vmem:[#allocation8 + $0x1b0] sm:$0xff] (!%p15951_p4) }
 0x8a5   : > { %v13567_v29 = vadd.f32 %v12398_v25, %v707_v17  ;;  %v13569_v30 = vadd.f32 %v13559_v26, %v709_v18  ;;  %v12400_v31 = vpop.f32.mrb[2].mxu0  ;;  %v13561_v32 = vpop.f32.mrb[2].mxu1  ;;  %v13687_v17 = vld [vmem:[#allocation8 + $0x1b8] sm:$0xff] (!%p15951_p4)  ;;  %v13670_v19 = vld [vmem:[#allocation8 + $0x130] sm:$0xff] (!%p15951_p4)  ;;  %v13688_v25 = vld [vmem:[#allocation8 + $0x1c0] sm:$0xff] (!%p15951_p4) }
 0x8a6   : > { %13574 = vst [vmem:[#allocation2] sm:$0xff] %v13566_v23  ;;  %13576 = vst [vmem:[#allocation2 + $0x10] sm:$0xff] %v13568_v24  ;;  %v13570_v33 = vadd.f32 %v12400_v31, %v710_v21  ;;  %v13572_v34 = vadd.f32 %v13561_v32, %v712_v22  ;;  %v12402_v35 = vpop.f32.mrb[3].mxu0  ;;  %v13563_v36 = vpop.f32.mrb[3].mxu1  ;;  %v16157_v18 = vpack.c.bf16 (!%p15951_p4), %v13687_v17, %v13686_v16  ;;  %v13671_v20 = vld [vmem:[#allocation8 + $0x138] sm:$0xff] (!%p15951_p4)  ;;  %v13656_v21 = vld [vmem:[#allocation8 + $0xc0] sm:$0xff] (!%p15951_p4)  ;;  %v13596_v22 = vlaneseq (!%p15951_p4) }
 0x8a7   : > { %13575 = vst [vmem:[#allocation2 + $0x8] sm:$0xff] %v13567_v29  ;;  %13577 = vst [vmem:[#allocation2 + $0x18] sm:$0xff] %v13569_v30  ;;  %v13571_v37 = vadd.f32 %v12402_v35, %v711_v27  ;;  %v13573_v38 = vadd.f32 %v13563_v36, %v713_v28  ;;  %v13657_v23 = vld [vmem:[#allocation8 + $0xc8] sm:$0xff] (!%p15951_p4)  ;;  %v16127_v24 = vpack.c.bf16 (!%p15951_p4), %v13639_v15, %v13638_v12  ;;  %v13640_v29 = vld [vmem:[#allocation8 + $0x40] sm:$0xff] (!%p15951_p4) }
 0x8a8   : > { %13578 = vst [vmem:[#allocation2 + $0x20] sm:$0xff] %v13570_v33  ;;  %13580 = vst [vmem:[#allocation2 + $0x30] sm:$0xff] %v13572_v34  ;;  %v13689_v26 = vld [vmem:[#allocation8 + $0x1c8] sm:$0xff] (!%p15951_p4)  ;;  %v16159_v27 = vpack.c.bf16 (!%p15951_p4), %v13671_v20, %v13670_v19  ;;  %v16129_v28 = vpack.c.bf16 (!%p15951_p4), %v13657_v23, %v13656_v21  ;;  %v13672_v31 = vld [vmem:[#allocation8 + $0x140] sm:$0xff] (!%p15951_p4)  ;;  %16158 = vmatprep.subr.bf16.mxu1 (!%p15951_p4), %v16157_v18  ;;  %v13597_v36 = vshrl.u32 (!%p15951_p4), %v13596_v22, 7 }
 0x8a9   : > { %13579 = vst [vmem:[#allocation2 + $0x28] sm:$0xff] %v13571_v37  ;;  %13581 = vst [vmem:[#allocation2 + $0x38] sm:$0xff] %v13573_v38  ;;  %v13641_v30 = vld [vmem:[#allocation8 + $0x48] sm:$0xff] (!%p15951_p4)  ;;  %v16161_v32 = vpack.c.bf16 (!%p15951_p4), %v13689_v26, %v13688_v25  ;;  %v13658_v34 = vld [vmem:[#allocation8 + $0xd0] sm:$0xff] (!%p15951_p4)  ;;  %16128 = vmatpush3.bf16.msra.mxu0 (!%p15951_p4), %v16127_v24  ;;  %v16171_v17 = vpack.c.bf16 (!%p15951_p4), %v13677_v61, %v13676_v57  ;;  %v16141_v18 = vpack.c.bf16 (!%p15951_p4), %v13663_v2, %v13662_v1 }
 0x8aa   : > { %v13673_v33 = vld [vmem:[#allocation8 + $0x148] sm:$0xff]  ;;  %v13659_v35 = vld [vmem:[#allocation8 + $0xd8] sm:$0xff]  ;;  %v13690_v37 = vld [vmem:[#allocation8 + $0x1d0] sm:$0xff]  ;;  %v16131_v39 = vpack.c.bf16 %v13641_v30, %v13640_v29  ;;  %16160 = vmatpush3.bf16.msra.mxu1 %v16159_v27  ;;  %16130 = vmatprep.subr.bf16.mxu0 %v16129_v28  ;;  %v13602_v49 = vsub.s32 1, %v13597_v36  ;;  %v13610_v50 = vsub.s32 3, %v13597_v36  ;;  %v13598_v53 = vsub.s32 0, %v13597_v36 }
 0x8ab   : > { %v13691_v38 = vld [vmem:[#allocation8 + $0x1d8] sm:$0xff]  ;;  %v16163_v40 = vpack.c.bf16 %v13673_v33, %v13672_v31  ;;  %v16133_v41 = vpack.c.bf16 %v13659_v35, %v13658_v34  ;;  %16162 = vmatprep.subr.bf16.mxu1 %v16161_v32  ;;  %v13606_v58 = vsub.s32 2, %v13597_v36  ;;  %v13678_v12 = vld [vmem:[#allocation8 + $0x170] sm:$0xff]  ;;  %v16173_v22 = vpack.c.bf16 %v13695_v8, %v13694_v7  ;;  %v13856_v27 = vld [vmem:[%s21824_s5 + $0x8] sm:$0xff] }
 0x8ac   : > { %v16165_v45 = vpack.c.bf16 %v13691_v38, %v13690_v37  ;;  %v13603_v3 = vrot.slane %v13594_v63, %v13602_v49  ;;  %v13611_v5 = vrot.slane %v13594_v63, %v13610_v50  ;;  %v13599_v9 = vrot.slane %v13594_v63, %v13598_v53  ;;  %v13679_v19 = vld [vmem:[#allocation8 + $0x178] sm:$0xff]  ;;  %v13865_v57 = vld [vmem:[%s21824_s5 + $0x50] sm:$0xff]  ;;  %v13868_v61 = vld [vmem:[%s21824_s5 + $0x68] sm:$0xff] }
 0x8ad   : > { %16132 = vmatpush3.bf16.msra.mxu0 %v16131_v39  ;;  %v13586_v14 = vld [vmem:[#allocation2] sm:$0xff]  ;;  %v13607_v16 = vrot.slane %v13594_v63, %v13606_v58  ;;  %v13588_v20 = vld [vmem:[#allocation2 + $0x10] sm:$0xff]  ;;  %v16143_v29 = vpack.c.bf16 %v13647_v11, %v13646_v6  ;;  %v16175_v33 = vpack.c.bf16 %v13679_v19, %v13678_v12  ;;  %v16185_v50 = vpack.c.bf16 %v13860_v48, %v13859_v47  ;;  %v13866_v58 = vld [vmem:[%s21824_s5 + $0x58] sm:$0xff] }
 0x8ae   : > { %16164 = vmatpush3.bf16.msra.mxu1 %v16163_v40  ;;  %16134 = vmatprep.subr.bf16.mxu0 %v16133_v41  ;;  %v13587_v62 = vld [vmem:[#allocation2 + $0x8] sm:$0xff]  ;;  %v13589_v4 = vld [vmem:[#allocation2 + $0x18] sm:$0xff]  ;;  %v13855_v26 = vld [vmem:[%s21824_s5] sm:$0xff]  ;;  %v13616_v28 = vadd.f32 %v13599_v9, %v13586_v14  ;;  %v16189_v53 = vpack.c.bf16 %v13862_v52, %v13861_v51 }
 0x8af   : > { %16166 = vmatprep.subr.bf16.mxu1 %v16165_v45  ;;  %v13617_v13 = vadd.f32 %v13603_v3, %v13587_v62  ;;  %v13619_v15 = vadd.f32 %v13611_v5, %v13589_v4  ;;  %v13618_v30 = vadd.f32 %v13607_v16, %v13588_v20  ;;  %v13590_v32 = vld [vmem:[#allocation2 + $0x20] sm:$0xff]  ;;  %v13592_v35 = vld [vmem:[#allocation2 + $0x30] sm:$0xff]  ;;  %v16177_v36 = vpack.c.bf16 %v13856_v27, %v13855_v26  ;;  %v13858_v40 = vld [vmem:[%s21824_s5 + $0x18] sm:$0xff] }
 0x8b0   : > { %v13591_v21 = vld [vmem:[#allocation2 + $0x28] sm:$0xff]  ;;  %v13593_v25 = vld [vmem:[#allocation2 + $0x38] sm:$0xff]  ;;  %v13624_v37 = vmax.f32 %v13616_v28, 0.0  ;;  %v13620_v38 = vadd.f32 %v13599_v9, %v13590_v32  ;;  %v13857_v39 = vld [vmem:[%s21824_s5 + $0x10] sm:$0xff]  ;;  %v13622_v43 = vadd.f32 %v13607_v16, %v13592_v35 }
 0x8b1   : > { %16136 = vmatpush3.bf16.msra.mxu0 %v16135_v54  ;;  %v13625_v23 = vmax.f32 %v13617_v13, 0.0  ;;  %v13627_v24 = vmax.f32 %v13619_v15, 0.0  ;;  %v13621_v31 = vadd.f32 %v13603_v3, %v13591_v21  ;;  %v13623_v34 = vadd.f32 %v13611_v5, %v13593_v25  ;;  %v13863_v54 = vld [vmem:[%s21824_s5 + $0x40] sm:$0xff]  ;;  %v13869_v63 = vld [vmem:[%s21824_s5 + $0x70] sm:$0xff]  ;;  %v13956_v3 = vld [vmem:[%s21856_s9 + $0x8] sm:$0xff] }
 0x8b2   : > { %16168 = vmatpush3.bf16.msra.mxu1 %v16167_v59  ;;  %16138 = vmatprep.subr.bf16.mxu0 %v16137_v60  ;;  %v13626_v41 = vmax.f32 %v13618_v30, 0.0  ;;  %v16181_v45 = vpack.c.bf16 %v13858_v40, %v13857_v39  ;;  %v13628_v46 = vmax.f32 %v13620_v38, 0.0  ;;  %v13630_v49 = vmax.f32 %v13622_v43, 0.0  ;;  %v13867_v60 = vld [vmem:[%s21824_s5 + $0x60] sm:$0xff]  ;;  %v13958_v25 = vld [vmem:[%s21856_s9 + $0x18] sm:$0xff] }
 0x8b3   : > { %16170 = vmatprep.subr.bf16.mxu1 %v16169_v0  ;;  %13767 = vmatprep.mubr.f32.mxu0 %v13625_v23  ;;  %v13629_v42 = vmax.f32 %v13621_v31, 0.0  ;;  %v13631_v44 = vmax.f32 %v13623_v34, 0.0  ;;  %v16193_v56 = vpack.c.bf16 %v13864_v55, %v13863_v54  ;;  %v16197_v59 = vpack.c.bf16 %v13866_v58, %v13865_v57  ;;  %v13870_v0 = vld [vmem:[%s21824_s5 + $0x78] sm:$0xff]  ;;  %v13955_v2 = vld [vmem:[%s21856_s9] sm:$0xff]  ;;  %v15954_v34 = vld [vmem:[#allocation12] ss:$0 sm:$0xff] }
 0x8b4   : > { %13842 = vmatprep.mubr.f32.mxu1 %v13627_v24  ;;  %v16201_v62 = vpack.c.bf16 %v13868_v61, %v13867_v60  ;;  %v16205_v1 = vpack.c.bf16 %v13870_v0, %v13869_v63  ;;  %v16209_v4 = vpack.c.bf16 %v13956_v3, %v13955_v2  ;;  %v15952_v6 = vld [vmem:[#allocation9] ss:$0 sm:$0xff]  ;;  %v13957_v24 = vld [vmem:[%s21856_s9 + $0x10] sm:$0xff]  ;;  %v15953_v27 = vld [vmem:[#allocation11] ss:$0 sm:$0xff] }
 0x8b5   : > { %16140 = vmatpush3.bf16.msra.mxu0 %v16139_v10  ;;  %v16213_v26 = vpack.c.bf16 %v13958_v25, %v13957_v24 }
 0x8b6   : > { %16172 = vmatpush3.bf16.msra.mxu1 %v16171_v17  ;;  %16142 = vmatprep.subr.bf16.mxu0 %v16141_v18 }
 0x8b7   : > { %16174 = vmatprep.subr.bf16.mxu1 %v16173_v22 }
 0x8b9   : > { %16144 = vmatpush3.bf16.msra.mxu0 %v16143_v29 }
 0x8ba   : > { %16176 = vmatpush3.bf16.msra.mxu1 %v16175_v33  ;;  %16178 = vmatprep.subr.bf16.mxu0 %v16177_v36 }
 0x8bb   : > { %16210 = vmatprep.subr.bf16.mxu1 %v16209_v4 }
 0x8bc   : > { %13768 = vmatmul.mubr.f32.vlgmr.msra.gmra.mrb[0].mxu0 %v13624_v37 }
 0x8bd   : > { %13843 = vmatmul.mubr.f32.vlgmr.msra.gmra.mrb[0].mxu1 %v13626_v41  ;;  %13772 = vmatprep.mubr.f32.mxu0 %v13629_v42 }
 0x8be   : > { %13847 = vmatprep.mubr.f32.mxu1 %v13631_v44  ;;  %16180 = vmatpush3.bf16.msra.mxu0 %v16177_v36 }
 0x8bf   : > { %16182 = vmatprep.subr.bf16.mxu0 %v16181_v45  ;;  %16212 = vmatpush3.bf16.msra.mxu1 %v16209_v4 }
 0x8c0   : > { %13773 = vmatmul.mubr.f32.gmra.mrb[2].mxu0 %v13628_v46  ;;  %16214 = vmatprep.subr.bf16.mxu1 %v16213_v26 }
 0x8c1   : > { %13848 = vmatmul.mubr.f32.gmra.mrb[2].mxu1 %v13630_v49 }
 0x8c2   : > { %16184 = vmatpush3.bf16.msra.mxu0 %v16181_v45 }
 0x8c3   : > { %16186 = vmatprep.subr.bf16.mxu0 %v16185_v50  ;;  %16216 = vmatpush3.bf16.msra.mxu1 %v16213_v26 }
 0x8c6   : > { %16188 = vmatpush3.bf16.msra.mxu0 %v16185_v50 }
 0x8c7   : > { %16190 = vmatprep.subr.bf16.mxu0 %v16189_v53 }
 0x8ca   : > { %16192 = vmatpush3.bf16.msra.mxu0 %v16189_v53 }
 0x8cb   : > { %16194 = vmatprep.subr.bf16.mxu0 %v16193_v56 }
 0x8ce   : > { %16196 = vmatpush3.bf16.msra.mxu0 %v16193_v56 }
 0x8cf   : > { %16198 = vmatprep.subr.bf16.mxu0 %v16197_v59 }
 0x8d2   : > { %16200 = vmatpush3.bf16.msra.mxu0 %v16197_v59 }
 0x8d3   : > { %16202 = vmatprep.subr.bf16.mxu0 %v16201_v62 }
 0x8d6   : > { %16204 = vmatpush3.bf16.msra.mxu0 %v16201_v62 }
 0x8d7   : > { %16206 = vmatprep.subr.bf16.mxu0 %v16205_v1 }
 0x8da   : > { %16208 = vmatpush3.bf16.msra.mxu0 %v16205_v1 }
 0x98f   : > { %v15999_v5 = vpop.f32.mrb[0].mxu0 }
 0x990   : > { %v16000_v7 = vpop.f32.mrb[1].mxu0  ;;  %v16037_v8 = vpop.f32.mrb[0].mxu1 }
 0x991   : > { %v16001_v9 = vadd.f32 %v16000_v7, %v15999_v5  ;;  %v16038_v10 = vpop.f32.mrb[1].mxu1 }
 0x992   : > { %v16039_v11 = vadd.f32 %v16038_v10, %v16037_v8 }
 0x993   : > { %v13770_v12 = vadd.f32 %v16001_v9, %v15952_v6  ;;  %v16002_v13 = vpop.f32.mrb[2].mxu0 }
 0x994   : > { %v16003_v14 = vpop.f32.mrb[3].mxu0  ;;  %v16040_v15 = vpop.f32.mrb[2].mxu1 }
 0x995   : > { %v13845_v16 = vadd.f32 %v16039_v11, %v13770_v12  ;;  %v16004_v17 = vadd.f32 %v16003_v14, %v16002_v13  ;;  %v16041_v18 = vpop.f32.mrb[3].mxu1 }
 0x996   : > { %v16042_v19 = vadd.f32 %v16041_v18, %v16040_v15 }
 0x997   : > { %v13853_v20 = vmax.f32 %v13845_v16, 0.0  ;;  %v13775_v21 = vadd.f32 %v16004_v17, %v15952_v6 }
 0x999   : > { %v13850_v22 = vadd.f32 %v16042_v19, %v13775_v21  ;;  %16099 = vmatprep.mubr.f32.mxu0 %v13853_v20 }
 0x99b   : > { %v13854_v23 = vmax.f32 %v13850_v22, 0.0 }
 0x99d   : > { %16100 = vmatmul.mubr.f32.vlgmr.msra.gmra.mrb[4].mxu0 %v13854_v23 }
 0xa70   : > { %v16101_v28 = vpop.f32.mrb[4].mxu0 }
 0xa71   : > { %v13950_v29 = vadd.f32 %v16101_v28, %v15953_v27  ;;  %v13944_v30 = vpop.f32.mrb[5].mxu0 }
 0xa72   : > { %v13945_v31 = vadd.f32 %v15953_v27, %v13944_v30 }
 0xa73   : > { %v13954_v33 = vmax.f32 %v13950_v29, 0.0 }
 0xa74   : > { %v13953_v32 = vmax.f32 %v13945_v31, 0.0 }
 0xa76   : > { %16110 = vmatprep.mubr.msk.f32.mxu1 %vm13966_vm0, %v13953_v32 }
 0xa77   : > { %16111 = vmatmul.mubr.msk.f32.vlgmr.msra.gmra.mrb[4].mxu1 %vm13966_vm0, %v13954_v33 }
 0xb4a   : > { %v16112_v35 = vpop.f32.mrb[4].mxu1 }
 0xb4b   : > { %v14045_v36 = vadd.f32 %v16112_v35, %v15954_v34  ;;  %v14039_v37 = vpop.f32.mrb[5].mxu1 }
 0xb4c   : > { %v14040_v38 = vadd.f32 %v15954_v34, %v14039_v37 }
 0xb4d   : > { %v15958_v39 = vmul.f32 -1.442695, %v14045_v36 }
 0xb4e   : > { %v15957_v40 = vmul.f32 -1.442695, %v14040_v38 }
 0xb4f   : > { %19127 = vpow2.f32 %v15958_v39 }
 0xb50   : > { %19129 = vpow2.f32 %v15957_v40 }
 0xb59   : > { %v19128_v41 = vpop.eup %19127 }
 0xb5a   : > { %v19130_v42 = vpop.eup %19129  ;;  %v14055_v43 = vadd.f32 1.0, %v19128_v41 }
 0xb5b   : > { %v14054_v44 = vadd.f32 1.0, %v19130_v42 }
 0xb5c   : > { %19131 = vrcp.f32 %v14055_v43 }
 0xb5d   : > { %19133 = vrcp.f32 %v14054_v44 }
 0xb66   : > { %v19132_v45 = vpop.eup %19131 }
 0xb67   : > { %v19134_v46 = vpop.eup %19133  ;;  %14062 = vst.msk [vmem:[%s21857_s18 + $0x8] sm:$0xff] %vm14060_vm1, %v19132_v45 }
 0xb68   : > { %14061 = vst.msk [vmem:[%s21857_s18] sm:$0xff] %vm14060_vm1, %v19134_v46 }
 0xb69 PF: > { %s25_s14 = sadd.s32 1, %s19365_s14   ;;  %s21858_s23 = sld [smem:[#allocation19_spill]] }
 0xb6a   : > { %p22_p6 = scmp.ge.s32.totalorder %s25_s14, 6   ;;  %s21859_s19 = sld [smem:[#allocation18_spill]] }
 0xb6b   : > { %s21860_s30 = smov %s19349_s10  ;;  %s21861_s10 = smov %s19353_s11 }
 0xb6c   : > { %s21863_s12 = smov %s19361_s13  ;;  %24 = sbr.rel (!%p22_p6) target bundleno = 12 (0xc), region = 155 }
 0xb6f   : > { %s21862_s11 = smov %s21858_s23 }
 0xb70   : > { %s21864_s13 = smov %s21859_s19 }
 0xb73   :  { %14085 = vsyncpa [#allocation5], 1 }
 0xb74   :  { %14087 = vsyncpa [#allocation5 + $0x1], 1 }
 0xb75   :  { %14088 = vsyncpa [#allocation7], 1 }
 0xb76   :  { %14089 = vsyncpa [#allocation10], 1 }
 0xb77   :  { %14090 = vsyncpa [#allocation13], 1 }

</bundles_post_ra>
